<compile_context>
chip_gen: v7x
topology: tpu7x:2x2x1
jax: 0.10.0
libtpu: 0.0.40
codegen_flags: <defaults>
</compile_context>

<pallas_src>
import functools

import jax
import jax.numpy as jnp
from jax import lax
from jax.experimental import pallas as pl
from jax.experimental.pallas import tpu as pltpu


P1 = 13   # spatial size after pool1
O2 = 11   # conv2 output spatial size
P2 = 5    # spatial size after pool2
C1 = 16   # conv1 channels
C2 = 32   # conv2 channels


# ---------------------------------------------------------------------------
# Fused kernel: conv1+relu+pool1 -> conv2+relu+pool2 -> fc, BT images per step
# ---------------------------------------------------------------------------
def _make_cnn_kernel(BT):
    def kernel(xle_ref, xlo_ref, m1_ref, b1_ref, pw1_ref,
               m2_ref, b2_ref, pw2_ref, wfc_ref, bfc_ref, o_ref):
        dot = functools.partial(jnp.dot, preferred_element_type=jnp.float32)
        bf16 = jnp.bfloat16

        # ---- conv1 (1->16) + ReLU: even / odd output rows as two matmuls,
        #      3 kernel-rows fused along K (host-packed).  rows = p*BT + image
        c1e = jnp.maximum(dot(xle_ref[0, :, :], m1_ref[...]) + b1_ref[...], 0.0)
        c1o = jnp.maximum(dot(xlo_ref[0, :, :], m1_ref[...]) + b1_ref[...], 0.0)

        # ---- maxpool1: rows via elementwise max, columns via 0/1 selection
        h1 = jnp.maximum(c1e, c1o).astype(bf16)                        # (13*BT, 416)
        p1 = jnp.maximum(dot(h1, pw1_ref[0, :, :]),
                         dot(h1, pw1_ref[1, :, :])).astype(bf16)       # (13*BT, 208)

        # ---- conv2 (16->32) + ReLU: 3 taps fused along K; with rows ordered
        #      (row_group*BT + image) each tap is a contiguous block slice.
        lhs2 = jnp.concatenate([p1[0:O2 * BT, :],
                                p1[BT:(O2 + 1) * BT, :],
                                p1[2 * BT:(O2 + 2) * BT, :]], axis=1)  # (11*BT, 624)
        c2 = jnp.maximum(dot(lhs2, m2_ref[...]) + b2_ref[...], 0.0)    # (11*BT, 352)
        c2 = c2.astype(bf16)

        # ---- maxpool2: columns first (selection matmuls), rows via block max
        lp = jnp.maximum(dot(c2, pw2_ref[0, :, :]),
                         dot(c2, pw2_ref[1, :, :]))                    # (11*BT, 160)
        feat = [jnp.maximum(lp[(2 * p) * BT:(2 * p + 1) * BT, :],
                            lp[(2 * p + 1) * BT:(2 * p + 2) * BT, :])
                for p in range(P2)]
        fc_in = jnp.concatenate(feat, axis=1).astype(bf16)             # (BT, 800)

        # ---- fc 800 -> 10 (PyTorch .view() permutation folded into wfc)
        o_ref[...] = dot(fc_in, wfc_ref[...]) + bfc_ref[...]

    return kernel


# ---------------------------------------------------------------------------
# Wrapper: host-side weight/input packing (cheap XLA) + one pallas_call
# ---------------------------------------------------------------------------
def cnn_forward(x, params, *, block_batch=32):
    W1, b1, W2, b2, Wfc, bfc = params
    f32, bf16 = jnp.float32, jnp.bfloat16
    BT = block_batch
    assert BT % 8 == 0, "block_batch must be a multiple of 8"

    B = x.shape[0]
    x2 = x[:, 0, :, :].astype(f32)                               # (B, 28, 28)
    Bp = ((B + BT - 1) // BT) * BT
    if Bp != B:                                                  # pad batch to BT multiple
        x2 = jnp.concatenate([x2, jnp.zeros((Bp - B, 28, 28), f32)], axis=0)
    G = Bp // BT
    xg = x2.reshape(G, BT, 28, 28)

    # conv1 LHS (im2row along K), even/odd output rows pre-split so that
    # pool1's row reduction is one elementwise max inside the kernel:
    #   XL[par][g, p*BT + b, di*28 + j] = x[g*BT + b, 2*p + par + di, j]
    ridx = (2 * jnp.arange(P1)[None, :, None]
            + jnp.arange(2)[:, None, None]
            + jnp.arange(3)[None, None, :])                      # (2, 13, 3) in [0, 28)
    gath = xg[:, :, ridx, :]                                     # (G, BT, 2, 13, 3, 28)
    XL = gath.transpose(0, 2, 3, 1, 4, 5).reshape(G, 2, P1 * BT, 3 * 28).astype(bf16)
    XLe, XLo = XL[:, 0], XL[:, 1]                                # (G, 13*BT, 84) each

    # conv1 band matrix, 3 kernel-rows stacked along K: (84, 26*16)
    M1 = jnp.concatenate(
        [sum(jnp.kron(jnp.eye(28, 26, k=-dj, dtype=f32), W1[:, 0, di, dj][None, :])
             for dj in range(3)) for di in range(3)], axis=0)
    b1row = jnp.tile(b1.astype(f32), 26)[None, :]                # (1, 416)

    # conv2 band matrix, 3 kernel-rows stacked along K: (624, 11*32)
    M2 = jnp.concatenate(
        [sum(jnp.kron(jnp.eye(13, 11, k=-dj, dtype=f32), W2[:, :, di, dj].T)
             for dj in range(3)) for di in range(3)], axis=0)
    b2row = jnp.tile(b2.astype(f32), 11)[None, :]                # (1, 352)

    # column-pool 0/1 selection matrices (BT-independent)
    e13 = jax.nn.one_hot(2 * jnp.arange(13), 26, dtype=f32)
    o13 = jax.nn.one_hot(2 * jnp.arange(13) + 1, 26, dtype=f32)
    PW1 = jnp.stack([jnp.kron(e13.T, jnp.eye(C1, dtype=f32)),
                     jnp.kron(o13.T, jnp.eye(C1, dtype=f32))])   # (2, 416, 208)
    e5 = jax.nn.one_hot(2 * jnp.arange(5), 11, dtype=f32)
    o5 = jax.nn.one_hot(2 * jnp.arange(5) + 1, 11, dtype=f32)
    PW2 = jnp.stack([jnp.kron(e5.T, jnp.eye(C2, dtype=f32)),
                     jnp.kron(o5.T, jnp.eye(C2, dtype=f32))])    # (2, 352, 160)

    # fc weight with the PyTorch .view(B,-1) permutation folded in:
    #   kernel lane p*160 + pw*32 + c  <->  PyTorch flat index c*25 + p*5 + pw
    Wfc_perm = jnp.transpose(Wfc.reshape(10, 32, 5, 5), (2, 3, 1, 0)).reshape(800, 10)
    bfc_row = bfc.astype(f32)[None, :]                           # (1, 10)

    # bf16 matmul operands (intentional; f32 accumulation in-kernel)
    M1, M2, PW1, PW2, Wfc_perm = (a.astype(bf16) for a in (M1, M2, PW1, PW2, Wfc_perm))

    const = lambda shape: pl.BlockSpec(shape, lambda g, s=shape: (0,) * len(s))

    out = pl.pallas_call(
        _make_cnn_kernel(BT),
        out_shape=jax.ShapeDtypeStruct((Bp, 10), f32),
        grid=(G,),
        in_specs=[
            pl.BlockSpec((1, P1 * BT, 84), lambda g: (g, 0, 0)),   # XLe
            pl.BlockSpec((1, P1 * BT, 84), lambda g: (g, 0, 0)),   # XLo
            const((84, 416)), const((1, 416)), const((2, 416, 208)),
            const((624, 352)), const((1, 352)), const((2, 352, 160)),
            const((800, 10)), const((1, 10)),
        ],
        out_specs=pl.BlockSpec((BT, 10), lambda g: (g, 0)),
        compiler_params=pltpu.CompilerParams(
            dimension_semantics=("parallel",)),
    )(XLe, XLo, M1, b1row, PW1, M2, b2row, PW2, Wfc_perm, bfc_row)

    return out[:B]


# ---------------------------------------------------------------------------
# Pure-JAX reference (mirrors the PyTorch forward) for a correctness check
# ---------------------------------------------------------------------------
def ref_forward(x, params):
    W1, b1, W2, b2, Wfc, bfc = params
    dn = ("NCHW", "OIHW", "NCHW")
    y = lax.conv_general_dilated(x, W1, (1, 1), "VALID", dimension_numbers=dn,
                                 precision=lax.Precision.HIGHEST)
    y = jnp.maximum(y + b1[None, :, None, None], 0.0)
    y = lax.reduce_window(y, -jnp.inf, lax.max, (1, 1, 2, 2), (1, 1, 2, 2), "VALID")
    y = lax.conv_general_dilated(y, W2, (1, 1), "VALID", dimension_numbers=dn,
                                 precision=lax.Precision.HIGHEST)
    y = jnp.maximum(y + b2[None, :, None, None], 0.0)
    y = lax.reduce_window(y, -jnp.inf, lax.max, (1, 1, 2, 2), (1, 1, 2, 2), "VALID")
    y = y.reshape(x.shape[0], -1)
    return jnp.dot(y, Wfc.T, precision=lax.Precision.HIGHEST) + bfc


if __name__ == "__main__":
    key = jax.random.PRNGKey(0)
    kx, k1, k2, k3, k4, k5, k6 = jax.random.split(key, 7)

    # deterministic synthetic parameters (PyTorch-default-style uniform bounds)
    bnd1 = 1.0 / (1 * 3 * 3) ** 0.5
    bnd2 = 1.0 / (16 * 3 * 3) ** 0.5
    bndf = 1.0 / 800 ** 0.5
    W1 = jax.random.uniform(k1, (16, 1, 3, 3), jnp.float32, -bnd1, bnd1)
    b1 = jax.random.uniform(k2, (16,), jnp.float32, -bnd1, bnd1)
    W2 = jax.random.uniform(k3, (32, 16, 3, 3), jnp.float32, -bnd2, bnd2)
    b2 = jax.random.uniform(k4, (32,), jnp.float32, -bnd2, bnd2)
    Wfc = jax.random.uniform(k5, (10, 800), jnp.float32, -bndf, bndf)
    bfc = jax.random.uniform(k6, (10,), jnp.float32, -bndf, bndf)
    params = (W1, b1, W2, b2, Wfc, bfc)

    # deterministic example input (NCHW; 28x28 implied by fc1 = 32*5*5)
    x = jax.random.normal(kx, (64, 1, 28, 28), jnp.float32)

    out = cnn_forward(x, params, block_batch=32)   # grid = (2,) -> both v7x cores used
    out = jax.block_until_ready(out)

    ref = ref_forward(x, params)
    assert out.shape == (64, 10), out.shape
    # bf16 MXU matmuls are intentional -> tolerance slightly above f32-exact.
    if not jnp.allclose(out, ref, rtol=2e-2, atol=3e-2):
        raise AssertionError(f"mismatch vs reference: max abs err "
                             f"{float(jnp.max(jnp.abs(out - ref)))}")
    print("KERNEL_OK")
</pallas_src>

<mosaic_0001>
module attributes {stable_mosaic.version = 11 : i64} {
  func.func @kernel(%arg0: i32, %arg1: memref<1x416x84xbf16, #tpu.memory_space<vmem>>, %arg2: memref<1x416x84xbf16, #tpu.memory_space<vmem>>, %arg3: memref<84x416xbf16, #tpu.memory_space<vmem>>, %arg4: memref<1x416xf32, #tpu.memory_space<vmem>>, %arg5: memref<2x416x208xbf16, #tpu.memory_space<vmem>>, %arg6: memref<624x352xbf16, #tpu.memory_space<vmem>>, %arg7: memref<1x352xf32, #tpu.memory_space<vmem>>, %arg8: memref<2x352x160xbf16, #tpu.memory_space<vmem>>, %arg9: memref<800x10xbf16, #tpu.memory_space<vmem>>, %arg10: memref<1x10xf32, #tpu.memory_space<vmem>>, %arg11: memref<32x10xf32, #tpu.memory_space<vmem>>) attributes {dimension_semantics = [#tpu.dimension_semantics<parallel>], iteration_bounds = array<i64: 2>, scalar_prefetch = 0 : i64, scratch_operands = 0 : i64, tpu.core_type = #tpu.core_type<tc>, window_params = [{transform_indices = @transform_0, window_bounds = array<i64: 1, 416, 84>}, {transform_indices = @transform_1, window_bounds = array<i64: 1, 416, 84>}, {pipeline_mode = #tpu.pipeline_mode<synchronous>, transform_indices = @transform_2, window_bounds = array<i64: 84, 416>}, {pipeline_mode = #tpu.pipeline_mode<synchronous>, transform_indices = @transform_3, window_bounds = array<i64: 1, 416>}, {pipeline_mode = #tpu.pipeline_mode<synchronous>, transform_indices = @transform_4, window_bounds = array<i64: 2, 416, 208>}, {pipeline_mode = #tpu.pipeline_mode<synchronous>, transform_indices = @transform_5, window_bounds = array<i64: 624, 352>}, {pipeline_mode = #tpu.pipeline_mode<synchronous>, transform_indices = @transform_6, window_bounds = array<i64: 1, 352>}, {pipeline_mode = #tpu.pipeline_mode<synchronous>, transform_indices = @transform_7, window_bounds = array<i64: 2, 352, 160>}, {pipeline_mode = #tpu.pipeline_mode<synchronous>, transform_indices = @transform_8, window_bounds = array<i64: 800, 10>}, {pipeline_mode = #tpu.pipeline_mode<synchronous>, transform_indices = @transform_9, window_bounds = array<i64: 1, 10>}, {transform_indices = @transform_10, window_bounds = array<i64: 32, 10>}]} {
    %c0 = arith.constant 0 : index
    %c0_0 = arith.constant 0 : index
    %c0_1 = arith.constant 0 : index
    %0 = vector.load %arg1[%c0, %c0_0, %c0_1] : memref<1x416x84xbf16, #tpu.memory_space<vmem>>, vector<1x416x84xbf16>
    %1 = vector.shape_cast %0 : vector<1x416x84xbf16> to vector<416x84xbf16>
    %c0_2 = arith.constant 0 : index
    %c0_3 = arith.constant 0 : index
    %2 = vector.load %arg3[%c0_2, %c0_3] : memref<84x416xbf16, #tpu.memory_space<vmem>>, vector<84x416xbf16>
    %cst = arith.constant dense<0.000000e+00> : vector<416x416xf32>
    %3 = tpu.matmul %1, %2, %cst {dimension_numbers = #tpu.dot_dimension_numbers<[1], [0], [0], [1], [0, 0, 1, 1], [], []>} : vector<416x84xbf16>, vector<84x416xbf16>, vector<416x416xf32> -> vector<416x416xf32>
    %c0_4 = arith.constant 0 : index
    %c0_5 = arith.constant 0 : index
    %4 = vector.load %arg4[%c0_4, %c0_5] : memref<1x416xf32, #tpu.memory_space<vmem>>, vector<1x416xf32>
    %5 = vector.broadcast %4 : vector<1x416xf32> to vector<416x416xf32>
    %6 = arith.addf %3, %5 : vector<416x416xf32>
    %cst_6 = arith.constant 0.000000e+00 : f32
    %7 = vector.broadcast %cst_6 : f32 to vector<416x416xf32>
    %8 = arith.maximumf %6, %7 : vector<416x416xf32>
    %c0_7 = arith.constant 0 : index
    %c0_8 = arith.constant 0 : index
    %c0_9 = arith.constant 0 : index
    %9 = vector.load %arg2[%c0_7, %c0_8, %c0_9] : memref<1x416x84xbf16, #tpu.memory_space<vmem>>, vector<1x416x84xbf16>
    %10 = vector.shape_cast %9 : vector<1x416x84xbf16> to vector<416x84xbf16>
    %c0_10 = arith.constant 0 : index
    %c0_11 = arith.constant 0 : index
    %11 = vector.load %arg3[%c0_10, %c0_11] : memref<84x416xbf16, #tpu.memory_space<vmem>>, vector<84x416xbf16>
    %cst_12 = arith.constant dense<0.000000e+00> : vector<416x416xf32>
    %12 = tpu.matmul %10, %11, %cst_12 {dimension_numbers = #tpu.dot_dimension_numbers<[1], [0], [0], [1], [0, 0, 1, 1], [], []>} : vector<416x84xbf16>, vector<84x416xbf16>, vector<416x416xf32> -> vector<416x416xf32>
    %c0_13 = arith.constant 0 : index
    %c0_14 = arith.constant 0 : index
    %13 = vector.load %arg4[%c0_13, %c0_14] : memref<1x416xf32, #tpu.memory_space<vmem>>, vector<1x416xf32>
    %14 = vector.broadcast %13 : vector<1x416xf32> to vector<416x416xf32>
    %15 = arith.addf %12, %14 : vector<416x416xf32>
    %cst_15 = arith.constant 0.000000e+00 : f32
    %16 = vector.broadcast %cst_15 : f32 to vector<416x416xf32>
    %17 = arith.maximumf %15, %16 : vector<416x416xf32>
    %18 = arith.maximumf %8, %17 : vector<416x416xf32>
    %19 = arith.truncf %18 : vector<416x416xf32> to vector<416x416xbf16>
    %c0_16 = arith.constant 0 : index
    %c0_17 = arith.constant 0 : index
    %c0_18 = arith.constant 0 : index
    %20 = vector.load %arg5[%c0_16, %c0_17, %c0_18] : memref<2x416x208xbf16, #tpu.memory_space<vmem>>, vector<1x416x208xbf16>
    %21 = vector.shape_cast %20 : vector<1x416x208xbf16> to vector<416x208xbf16>
    %cst_19 = arith.constant dense<0.000000e+00> : vector<416x208xf32>
    %22 = tpu.matmul %19, %21, %cst_19 {dimension_numbers = #tpu.dot_dimension_numbers<[1], [0], [0], [1], [0, 0, 1, 1], [], []>} : vector<416x416xbf16>, vector<416x208xbf16>, vector<416x208xf32> -> vector<416x208xf32>
    %c1 = arith.constant 1 : index
    %c0_20 = arith.constant 0 : index
    %c0_21 = arith.constant 0 : index
    %23 = vector.load %arg5[%c1, %c0_20, %c0_21] : memref<2x416x208xbf16, #tpu.memory_space<vmem>>, vector<1x416x208xbf16>
    %24 = vector.shape_cast %23 : vector<1x416x208xbf16> to vector<416x208xbf16>
    %cst_22 = arith.constant dense<0.000000e+00> : vector<416x208xf32>
    %25 = tpu.matmul %19, %24, %cst_22 {dimension_numbers = #tpu.dot_dimension_numbers<[1], [0], [0], [1], [0, 0, 1, 1], [], []>} : vector<416x416xbf16>, vector<416x208xbf16>, vector<416x208xf32> -> vector<416x208xf32>
    %26 = arith.maximumf %22, %25 : vector<416x208xf32>
    %27 = arith.truncf %26 : vector<416x208xf32> to vector<416x208xbf16>
    %28 = vector.extract_strided_slice %27 {offsets = [0, 0], sizes = [352, 208], strides = [1, 1]} : vector<416x208xbf16> to vector<352x208xbf16>
    %29 = vector.extract_strided_slice %27 {offsets = [32, 0], sizes = [352, 208], strides = [1, 1]} : vector<416x208xbf16> to vector<352x208xbf16>
    %30 = vector.extract_strided_slice %27 {offsets = [64, 0], sizes = [352, 208], strides = [1, 1]} : vector<416x208xbf16> to vector<352x208xbf16>
    %31 = tpu.concatenate %28, %29, %30 in 1 : vector<352x208xbf16>, vector<352x208xbf16>, vector<352x208xbf16> -> vector<352x624xbf16>
    %c0_23 = arith.constant 0 : index
    %c0_24 = arith.constant 0 : index
    %32 = vector.load %arg6[%c0_23, %c0_24] : memref<624x352xbf16, #tpu.memory_space<vmem>>, vector<624x352xbf16>
    %cst_25 = arith.constant dense<0.000000e+00> : vector<352x352xf32>
    %33 = tpu.matmul %31, %32, %cst_25 {dimension_numbers = #tpu.dot_dimension_numbers<[1], [0], [0], [1], [0, 0, 1, 1], [], []>} : vector<352x624xbf16>, vector<624x352xbf16>, vector<352x352xf32> -> vector<352x352xf32>
    %c0_26 = arith.constant 0 : index
    %c0_27 = arith.constant 0 : index
    %34 = vector.load %arg7[%c0_26, %c0_27] : memref<1x352xf32, #tpu.memory_space<vmem>>, vector<1x352xf32>
    %35 = vector.broadcast %34 : vector<1x352xf32> to vector<352x352xf32>
    %36 = arith.addf %33, %35 : vector<352x352xf32>
    %cst_28 = arith.constant 0.000000e+00 : f32
    %37 = vector.broadcast %cst_28 : f32 to vector<352x352xf32>
    %38 = arith.maximumf %36, %37 : vector<352x352xf32>
    %39 = arith.truncf %38 : vector<352x352xf32> to vector<352x352xbf16>
    %c0_29 = arith.constant 0 : index
    %c0_30 = arith.constant 0 : index
    %c0_31 = arith.constant 0 : index
    %40 = vector.load %arg8[%c0_29, %c0_30, %c0_31] : memref<2x352x160xbf16, #tpu.memory_space<vmem>>, vector<1x352x160xbf16>
    %41 = vector.shape_cast %40 : vector<1x352x160xbf16> to vector<352x160xbf16>
    %cst_32 = arith.constant dense<0.000000e+00> : vector<352x160xf32>
    %42 = tpu.matmul %39, %41, %cst_32 {dimension_numbers = #tpu.dot_dimension_numbers<[1], [0], [0], [1], [0, 0, 1, 1], [], []>} : vector<352x352xbf16>, vector<352x160xbf16>, vector<352x160xf32> -> vector<352x160xf32>
    %c1_33 = arith.constant 1 : index
    %c0_34 = arith.constant 0 : index
    %c0_35 = arith.constant 0 : index
    %43 = vector.load %arg8[%c1_33, %c0_34, %c0_35] : memref<2x352x160xbf16, #tpu.memory_space<vmem>>, vector<1x352x160xbf16>
    %44 = vector.shape_cast %43 : vector<1x352x160xbf16> to vector<352x160xbf16>
    %cst_36 = arith.constant dense<0.000000e+00> : vector<352x160xf32>
    %45 = tpu.matmul %39, %44, %cst_36 {dimension_numbers = #tpu.dot_dimension_numbers<[1], [0], [0], [1], [0, 0, 1, 1], [], []>} : vector<352x352xbf16>, vector<352x160xbf16>, vector<352x160xf32> -> vector<352x160xf32>
    %46 = arith.maximumf %42, %45 : vector<352x160xf32>
    %47 = vector.extract_strided_slice %46 {offsets = [0, 0], sizes = [32, 160], strides = [1, 1]} : vector<352x160xf32> to vector<32x160xf32>
    %48 = vector.extract_strided_slice %46 {offsets = [32, 0], sizes = [32, 160], strides = [1, 1]} : vector<352x160xf32> to vector<32x160xf32>
    %49 = arith.maximumf %47, %48 : vector<32x160xf32>
    %50 = vector.extract_strided_slice %46 {offsets = [64, 0], sizes = [32, 160], strides = [1, 1]} : vector<352x160xf32> to vector<32x160xf32>
    %51 = vector.extract_strided_slice %46 {offsets = [96, 0], sizes = [32, 160], strides = [1, 1]} : vector<352x160xf32> to vector<32x160xf32>
    %52 = arith.maximumf %50, %51 : vector<32x160xf32>
    %53 = vector.extract_strided_slice %46 {offsets = [128, 0], sizes = [32, 160], strides = [1, 1]} : vector<352x160xf32> to vector<32x160xf32>
    %54 = vector.extract_strided_slice %46 {offsets = [160, 0], sizes = [32, 160], strides = [1, 1]} : vector<352x160xf32> to vector<32x160xf32>
    %55 = arith.maximumf %53, %54 : vector<32x160xf32>
    %56 = vector.extract_strided_slice %46 {offsets = [192, 0], sizes = [32, 160], strides = [1, 1]} : vector<352x160xf32> to vector<32x160xf32>
    %57 = vector.extract_strided_slice %46 {offsets = [224, 0], sizes = [32, 160], strides = [1, 1]} : vector<352x160xf32> to vector<32x160xf32>
    %58 = arith.maximumf %56, %57 : vector<32x160xf32>
    %59 = vector.extract_strided_slice %46 {offsets = [256, 0], sizes = [32, 160], strides = [1, 1]} : vector<352x160xf32> to vector<32x160xf32>
    %60 = vector.extract_strided_slice %46 {offsets = [288, 0], sizes = [32, 160], strides = [1, 1]} : vector<352x160xf32> to vector<32x160xf32>
    %61 = arith.maximumf %59, %60 : vector<32x160xf32>
    %62 = tpu.concatenate %49, %52, %55, %58, %61 in 1 : vector<32x160xf32>, vector<32x160xf32>, vector<32x160xf32>, vector<32x160xf32>, vector<32x160xf32> -> vector<32x800xf32>
    %63 = arith.truncf %62 : vector<32x800xf32> to vector<32x800xbf16>
    %c0_37 = arith.constant 0 : index
    %c0_38 = arith.constant 0 : index
    %64 = vector.load %arg9[%c0_37, %c0_38] : memref<800x10xbf16, #tpu.memory_space<vmem>>, vector<800x10xbf16>
    %cst_39 = arith.constant dense<0.000000e+00> : vector<32x10xf32>
    %65 = tpu.matmul %63, %64, %cst_39 {dimension_numbers = #tpu.dot_dimension_numbers<[1], [0], [0], [1], [0, 0, 1, 1], [], []>} : vector<32x800xbf16>, vector<800x10xbf16>, vector<32x10xf32> -> vector<32x10xf32>
    %c0_40 = arith.constant 0 : index
    %c0_41 = arith.constant 0 : index
    %66 = vector.load %arg10[%c0_40, %c0_41] : memref<1x10xf32, #tpu.memory_space<vmem>>, vector<1x10xf32>
    %67 = vector.broadcast %66 : vector<1x10xf32> to vector<32x10xf32>
    %68 = arith.addf %65, %67 : vector<32x10xf32>
    %c0_42 = arith.constant 0 : index
    %c0_43 = arith.constant 0 : index
    %69 = vector.load %arg11[%c0_42, %c0_43] : memref<32x10xf32, #tpu.memory_space<vmem>>, vector<32x10xf32>
    tpu.vector_store %arg11[%c0_42, %c0_43], %68 {strides = array<i32>} : memref<32x10xf32, #tpu.memory_space<vmem>>, vector<32x10xf32>,
    return
  }
  func.func @transform_0(%arg0: i32) -> (i32, i32, i32) {
    %c0_i32 = arith.constant 0 : i32
    %c0_i32_0 = arith.constant 0 : i32
    %c0_i32_1 = arith.constant 0 : i32
    return %arg0, %c0_i32, %c0_i32_0 : i32, i32, i32
  }
  func.func @transform_1(%arg0: i32) -> (i32, i32, i32) {
    %c0_i32 = arith.constant 0 : i32
    %c0_i32_0 = arith.constant 0 : i32
    %c0_i32_1 = arith.constant 0 : i32
    return %arg0, %c0_i32, %c0_i32_0 : i32, i32, i32
  }
  func.func @transform_2(%arg0: i32) -> (i32, i32) {
    %c0_i32 = arith.constant 0 : i32
    %c0_i32_0 = arith.constant 0 : i32
    %c0_i32_1 = arith.constant 0 : i32
    return %c0_i32, %c0_i32_0 : i32, i32
  }
  func.func @transform_3(%arg0: i32) -> (i32, i32) {
    %c0_i32 = arith.constant 0 : i32
    %c0_i32_0 = arith.constant 0 : i32
    %c0_i32_1 = arith.constant 0 : i32
    return %c0_i32, %c0_i32_0 : i32, i32
  }
  func.func @transform_4(%arg0: i32) -> (i32, i32, i32) {
    %c0_i32 = arith.constant 0 : i32
    %c0_i32_0 = arith.constant 0 : i32
    %c0_i32_1 = arith.constant 0 : i32
    %c0_i32_2 = arith.constant 0 : i32
    return %c0_i32, %c0_i32_0, %c0_i32_1 : i32, i32, i32
  }
  func.func @transform_5(%arg0: i32) -> (i32, i32) {
    %c0_i32 = arith.constant 0 : i32
    %c0_i32_0 = arith.constant 0 : i32
    %c0_i32_1 = arith.constant 0 : i32
    return %c0_i32, %c0_i32_0 : i32, i32
  }
  func.func @transform_6(%arg0: i32) -> (i32, i32) {
    %c0_i32 = arith.constant 0 : i32
    %c0_i32_0 = arith.constant 0 : i32
    %c0_i32_1 = arith.constant 0 : i32
    return %c0_i32, %c0_i32_0 : i32, i32
  }
  func.func @transform_7(%arg0: i32) -> (i32, i32, i32) {
    %c0_i32 = arith.constant 0 : i32
    %c0_i32_0 = arith.constant 0 : i32
    %c0_i32_1 = arith.constant 0 : i32
    %c0_i32_2 = arith.constant 0 : i32
    return %c0_i32, %c0_i32_0, %c0_i32_1 : i32, i32, i32
  }
  func.func @transform_8(%arg0: i32) -> (i32, i32) {
    %c0_i32 = arith.constant 0 : i32
    %c0_i32_0 = arith.constant 0 : i32
    %c0_i32_1 = arith.constant 0 : i32
    return %c0_i32, %c0_i32_0 : i32, i32
  }
  func.func @transform_9(%arg0: i32) -> (i32, i32) {
    %c0_i32 = arith.constant 0 : i32
    %c0_i32_0 = arith.constant 0 : i32
    %c0_i32_1 = arith.constant 0 : i32
    return %c0_i32, %c0_i32_0 : i32, i32
  }
  func.func @transform_10(%arg0: i32) -> (i32, i32) {
    %c0_i32 = arith.constant 0 : i32
    %c0_i32_0 = arith.constant 0 : i32
    return %arg0, %c0_i32 : i32, i32
  }
}

</mosaic_0001>

<bundles_post_ra>
// kernel: tpu_custom_call.1
= control target key start
LH: loop header
LB: loop body
LE: loop exit
PB: predicated region body
PF: predicated region fallthrough
CT: control target
= control target key end

     0   :  { %s12895_s13 = smov 0   ;;  %s18084_s0 = inlined_call_operand.vmem [shape: bf16[2,416,84], index: 0, kind: input, shape index: {}]   ;;  %s18085_s1 = inlined_call_operand.vmem [shape: bf16[2,416,84], index: 1, kind: input, shape index: {}]   ;;  %s18086_s2 = inlined_call_operand.vmem [shape: bf16[84,416], index: 2, kind: input, shape index: {}]   ;;  %s18087_s3 = inlined_call_operand.vmem [shape: f32[1,416], index: 3, kind: input, shape index: {}]   ;;  %s18088_s4 = inlined_call_operand.vmem [shape: bf16[2,416,208], index: 4, kind: input, shape index: {}]   ;;  %s18089_s5 = inlined_call_operand.vmem [shape: bf16[624,352], index: 5, kind: input, shape index: {}]   ;;  %s18090_s6 = inlined_call_operand.vmem [shape: f32[1,352], index: 6, kind: input, shape index: {}]   ;;  %s18091_s7 = inlined_call_operand.vmem [shape: bf16[2,352,160], index: 7, kind: input, shape index: {}]   ;;  %s18092_s8 = inlined_call_operand.vmem [shape: bf16[800,10], index: 8, kind: input, shape index: {}]   ;;  %s18093_s9 = inlined_call_operand.vmem [shape: f32[1,10], index: 9, kind: input, shape index: {}]   ;;  %s18094_s10 = inlined_call_operand.vmem [shape: f32[64,10], index: 10, kind: output, shape index: {}]  }
   0x1 LB: > { %s12901_s14 = sadd.s32 4294967295, %s12833_s13   ;;  %p10436_p0 = scmp.ge.s32.totalorder %s12833_s13, 1  ;;  %s12833_s13 = sphi %s12895_s13, %s20_s13  }
   0x2   : > { %p322_p1 = scmp.lt.s32.totalorder %s12833_s13, 3 }
   0x4   : > { %p323_p2 = pnand %p10436_p0, %p322_p1 }
   0x6   : > { %326 = sbr.rel (%p323_p2) target bundleno = 2556 (0x9fc), region = 60 }
   0xd   : > { %v12246_v0 = vld [vmem:[%s18086_s2 + $0x4] ss:$16 sps:$4 sm:$0xff]   ;;  %v12248_v1 = vld [vmem:[%s18086_s2 + $0xc] ss:$16 sps:$4 sm:$0xff]   ;;  %v18095_v2 = vmov 0   ;;  %p365_p3 = scmp.lt.s32.totalorder %s12901_s14, 1  ;;  %v458_v42 = vlaneseq }
   0xe   : > { %842 = vmatprep.mubr.bf16.mxu0 %v18095_v2  ;;  %1135 = vmatprep.mubr.bf16.mxu1 %v18095_v2  ;;  %v12250_v3 = vld [vmem:[%s18086_s2] ss:$16 sps:$4 sm:$0xff]   ;;  %v12251_v4 = vld [vmem:[%s18086_s2 + $0x8] ss:$16 sps:$4 sm:$0xff]   ;;  %v12252_v5 = vld [vmem:[%s18086_s2 + $0x24] ss:$16 sps:$4 sm:$0xff]  }
   0xf   : > { %810 = vmatprep.subr.bf16.mxu0 %v12246_v0  ;;  %1103 = vmatprep.subr.bf16.mxu1 %v12248_v1  ;;  %v12254_v6 = vld [vmem:[%s18086_s2 + $0x2c] ss:$16 sps:$4 sm:$0xff]   ;;  %v12256_v7 = vld [vmem:[%s18086_s2 + $0x20] ss:$16 sps:$4 sm:$0xff]   ;;  %v12257_v8 = vld [vmem:[%s18086_s2 + $0x28] ss:$16 sps:$4 sm:$0xff]  }
  0x10   : > { %811 = vmatpush1.bf16.msra.mxu0 %v12250_v3  ;;  %1104 = vmatpush1.bf16.msra.mxu1 %v12251_v4  ;;  %s12933_s11 = scalar_select %p365_p3, %s12901_s14, 1  ;;  %v12258_v9 = vld [vmem:[%s18086_s2 + $0x44] ss:$16 sps:$4 sm:$0xff]   ;;  %v12260_v10 = vld [vmem:[%s18086_s2 + $0x4c] ss:$16 sps:$4 sm:$0xff]   ;;  %vm797_vm0 = vcmask 1041408  }
  0x11   : > { %812 = vmatprep.subr.bf16.mxu0 %v12252_v5  ;;  %1105 = vmatprep.subr.bf16.mxu1 %v12254_v6  ;;  %v12262_v11 = vld [vmem:[%s18086_s2 + $0x40] ss:$16 sps:$4 sm:$0xff]   ;;  %v12263_v12 = vld [vmem:[%s18086_s2 + $0x48] ss:$16 sps:$4 sm:$0xff]   ;;  %v12264_v13 = vld [vmem:[%s18086_s2 + $0x64] ss:$16 sps:$4 sm:$0xff]  }
  0x12   : > { %v12266_v14 = vld [vmem:[%s18086_s2 + $0x6c] ss:$16 sps:$4 sm:$0xff]   ;;  %s12172_s26 = smul.u32 208, %s12933_s11  ;;  %v12268_v15 = vld [vmem:[%s18086_s2 + $0x60] ss:$16 sps:$4 sm:$0xff]   ;;  %vm718_vm1 = vcmask 687104  }
  0x13   : > { %v12269_v16 = vld [vmem:[%s18086_s2 + $0x68] ss:$16 sps:$4 sm:$0xff]   ;;  %v12270_v17 = vld [vmem:[%s18086_s2 + $0x84] ss:$16 sps:$4 sm:$0xff]   ;;  %v12272_v18 = vld [vmem:[%s18086_s2 + $0x8c] ss:$16 sps:$4 sm:$0xff]  }
  0x14   : > { %813 = vmatpush1.bf16.msra.mxu0 %v12256_v7  ;;  %1106 = vmatpush1.bf16.msra.mxu1 %v12257_v8  ;;  %v454_v19 = vld [vmem:[%s18086_s2 + $0xa0] sm:$0x33]  ;;  %s12974_s22 = scalar_lea.vmem %s18084_s0, %s12172_s26  ;;  %v455_v20 = vld [vmem:[%s18086_s2 + $0xa8] sm:$0x33]  ;;  %s13004_s15 = scalar_lea.vmem %s18085_s1, %s12172_s26  ;;  %v13059_v43 = vshrl.u32 %v458_v42, 7  ;;  %vm3282_vm2 = vcmask 261120  }
  0x15   : > { %814 = vmatprep.subr.bf16.mxu0 %v12258_v9  ;;  %1107 = vmatprep.subr.bf16.mxu1 %v12260_v10  ;;  %v12274_v21 = vld [vmem:[%s18086_s2 + $0x80] ss:$16 sps:$4 sm:$0xff]   ;;  %v12275_v22 = vld [vmem:[%s18086_s2 + $0x88] ss:$16 sps:$4 sm:$0xff]   ;;  %v10488_v23 = vcombine.high %v454_v19, %v454_v19  ;;  %v10490_v24 = vcombine.high %v455_v20, %v455_v20  ;;  %v10487_v25 = vcombine.low %v454_v19, %v454_v19  ;;  %v12311_v46 = vld [vmem:[%s18088_s4 + $0x4] ss:$8 sps:$4 sm:$0xff]  }
  0x16   : > { %v10489_v26 = vcombine.low %v455_v20, %v455_v20  ;;  %v12280_v29 = vld [vmem:[%s12974_s22] sm:$0xff]   ;;  %v12281_v30 = vld [vmem:[%s12974_s22 + $0x8] sm:$0xff]   ;;  %v12282_v31 = vld [vmem:[%s12974_s22 + $0x10] sm:$0xff]   ;;  %18282 = vst [vmem:[#allocation2_spill] sm:$0xff] %v13059_v43  ;;  %v472_v44 = vsub.s32 3, %v13059_v43  ;;  %s12836_s27 = smov 80  }
  0x17   : > { %v799_v27 = vsel %vm797_vm0, %v10487_v25, 0  ;;  %v12283_v32 = vld [vmem:[%s12974_s22 + $0x18] sm:$0xff]   ;;  %v12284_v33 = vld [vmem:[%s12974_s22 + $0x20] sm:$0xff]   ;;  %v12285_v34 = vld [vmem:[%s12974_s22 + $0x28] sm:$0xff]   ;;  %vm5134_vm3 = vcmask 654336   ;;  %vm6268_vm4 = vcmask 916480  }
  0x18   : > { %815 = vmatpush1.bf16.msra.mxu0 %v12262_v11  ;;  %1108 = vmatpush1.bf16.msra.mxu1 %v12263_v12  ;;  %v805_v28 = vsel %vm797_vm0, %v10489_v26, 0  ;;  %v12286_v35 = vld [vmem:[%s12974_s22 + $0x30] sm:$0xff]   ;;  %v12287_v36 = vld [vmem:[%s12974_s22 + $0x38] sm:$0xff]   ;;  %v12288_v37 = vld [vmem:[%s12974_s22 + $0x40] sm:$0xff]   ;;  %vm8183_vm5 = vcmask 785408   ;;  %s12838_s17 = smov 64  }
  0x19   : > { %816 = vmatprep.subr.bf16.mxu0 %v12264_v13  ;;  %1109 = vmatprep.subr.bf16.mxu1 %v12266_v14  ;;  %v12289_v38 = vld [vmem:[%s12974_s22 + $0x48] sm:$0xff]   ;;  %v12290_v39 = vld [vmem:[%s12974_s22 + $0x50] sm:$0xff]   ;;  %v12291_v40 = vld [vmem:[%s12974_s22 + $0x58] sm:$0xff]   ;;  %vm9675_vm6 = vcmask 523264   ;;  %s10439_s26 = sshll.u32 %s12901_s14, 2  ;;  %vm10359_vm7 = vcmask 80896  }
  0x1a   : > { %v12292_v41 = vld [vmem:[%s12974_s22 + $0x60] sm:$0xff]   ;;  %v12293_v47 = vld [vmem:[%s12974_s22 + $0x68] sm:$0xff]   ;;  %v12294_v50 = vld [vmem:[%s12974_s22 + $0x70] sm:$0xff]   ;;  %p376_p4 = scmp.lt.s32.totalorder %s10439_s26, 7 }
  0x1b   : > { %v456_v45 = vld [vmem:[%s18087_s3] sm:$0xf]  ;;  %v12314_v48 = vld [vmem:[%s18088_s4 + $0x1a4] ss:$8 sps:$4 sm:$0xff]   ;;  %v12295_v51 = vld [vmem:[%s12974_s22 + $0x78] sm:$0xff]  }
  0x1c   : > { %817 = vmatpush1.bf16.msra.mxu0 %v12268_v15  ;;  %1110 = vmatpush1.bf16.msra.mxu1 %v12269_v16  ;;  %v13076_v49 = vrot.slane %v456_v45, %v472_v44  ;;  %v12296_v52 = vld [vmem:[%s12974_s22 + $0x80] sm:$0xff]   ;;  %v12297_v53 = vld [vmem:[%s12974_s22 + $0x88] sm:$0xff]   ;;  %v12298_v54 = vld [vmem:[%s12974_s22 + $0x90] sm:$0xff]   ;;  %s19112_s26 = smov (!%p376_p4, %s10439_s26), 7 }
  0x1d   : > { %818 = vmatprep.subr.bf16.mxu0 %v12270_v17  ;;  %1111 = vmatprep.subr.bf16.mxu1 %v12272_v18  ;;  %v12299_v55 = vld [vmem:[%s12974_s22 + $0x98] sm:$0xff]   ;;  %v12300_v56 = vld [vmem:[%s12974_s22 + $0xa0] sm:$0xff]   ;;  %v12301_v57 = vld [vmem:[%s12974_s22 + $0xa8] sm:$0xff]   ;;  %s10440_s16 = sshll.u32 %s19112_s26, 3 }
  0x1e   : > { %v12302_v58 = vld [vmem:[%s12974_s22 + $0xb0] sm:$0xff]   ;;  %v12303_v59 = vld [vmem:[%s12974_s22 + $0xb8] sm:$0xff]   ;;  %v12304_v60 = vld [vmem:[%s12974_s22 + $0xc0] sm:$0xff]   ;;  %s379_s14 = scalar_lea.vmem %s18094_s10, %s10440_s16 }
  0x1f   : > { %v12305_v61 = vld [vmem:[%s12974_s22 + $0xc8] sm:$0xff]   ;;  %v12306_v62 = vld [vmem:[%s13004_s15] sm:$0xff]   ;;  %v12333_v19 = vld [vmem:[%s18088_s4 + $0x34] ss:$8 sps:$4 sm:$0xff]  }
  0x20   : > { %819 = vmatpush1.bf16.msra.mxu0 %v12274_v21  ;;  %1112 = vmatpush1.bf16.msra.mxu1 %v12275_v22  ;;  %v12309_v63 = vld [vmem:[%s18088_s4] ss:$8 sps:$4 sm:$0xff]   ;;  %v12336_v20 = vld [vmem:[%s18088_s4 + $0x1d4] ss:$8 sps:$4 sm:$0xff]   ;;  %v12341_v25 = vld [vmem:[%s18088_s4 + $0x44] ss:$8 sps:$4 sm:$0xff]  }
  0x21   : > { %10491 = vmatprep.subr.msk.bf16.mxu0 %vm797_vm0, %v10488_v23  ;;  %10518 = vmatprep.subr.msk.bf16.mxu1 %vm797_vm0, %v10490_v24  ;;  %v12344_v26 = vld [vmem:[%s18088_s4 + $0x1e4] ss:$8 sps:$4 sm:$0xff]  }
  0x22   : > { %v12356_v42 = vld [vmem:[%s18088_s4 + $0x64] ss:$8 sps:$4 sm:$0xff]  }
  0x23   : > { %v12359_v44 = vld [vmem:[%s18088_s4 + $0x204] ss:$8 sps:$4 sm:$0xff]  }
  0x24   : > { %821 = vmatpush1.bf16.msra.mxu0 %v799_v27  ;;  %1114 = vmatpush1.bf16.msra.mxu1 %v805_v28 }
  0x25   : > { %1864 = vmatprep.subr.bf16.mxu0 %v12246_v0  ;;  %2157 = vmatprep.subr.bf16.mxu1 %v12248_v1  ;;  %v12312_v0 = vld [vmem:[%s18088_s4 + $0x1a0] ss:$8 sps:$4 sm:$0xff]   ;;  %v12318_v1 = vld [vmem:[%s18088_s4 + $0x14] ss:$8 sps:$4 sm:$0xff]  }
  0x27   : > { %10492 = vmatmul.mubr.msk.bf16.vlgmr.msra.gmra.mrb[0].mxu0 %vm718_vm1, %v12280_v29  ;;  %10519 = vmatmul.mubr.msk.bf16.vlgmr.msra.gmra.mrb[0].mxu1 %vm718_vm1, %v12280_v29 }
  0x28   : > { %1865 = vmatpush1.bf16.msra.mxu0 %v12250_v3  ;;  %852 = vmatprep.mubr.bf16.mxu0 %v18095_v2  ;;  %v12321_v3 = vld [vmem:[%s18088_s4 + $0x1b4] ss:$8 sps:$4 sm:$0xff]  }
  0x29   : > { %1145 = vmatprep.mubr.bf16.mxu1 %v18095_v2  ;;  %2158 = vmatpush1.bf16.msra.mxu1 %v12251_v4  ;;  %v12316_v4 = vld [vmem:[%s18088_s4 + $0x10] ss:$8 sps:$4 sm:$0xff]  }
  0x2a   : > { %1866 = vmatprep.subr.bf16.mxu0 %v12252_v5  ;;  %2159 = vmatprep.subr.bf16.mxu1 %v12254_v6  ;;  %v12319_v5 = vld [vmem:[%s18088_s4 + $0x1b0] ss:$8 sps:$4 sm:$0xff]  }
  0x2c   : > { %1867 = vmatpush1.bf16.msra.mxu0 %v12256_v7 }
  0x2d   : > { %2160 = vmatpush1.bf16.msra.mxu1 %v12257_v8  ;;  %1868 = vmatprep.subr.bf16.mxu0 %v12258_v9  ;;  %v12326_v8 = vld [vmem:[%s18088_s4 + $0x24] ss:$8 sps:$4 sm:$0xff]  }
  0x2e   : > { %2161 = vmatprep.subr.bf16.mxu1 %v12260_v10  ;;  %v12329_v9 = vld [vmem:[%s18088_s4 + $0x1c4] ss:$8 sps:$4 sm:$0xff]  }
  0x2f   : > { %10493 = vmatmul.mubr.msk.bf16.gmra.mrb[4].mxu0 %vm718_vm1, %v12281_v30  ;;  %10520 = vmatmul.mubr.msk.bf16.gmra.mrb[4].mxu1 %vm718_vm1, %v12281_v30 }
  0x30   : > { %862 = vmatprep.mubr.bf16.mxu0 %v18095_v2  ;;  %1155 = vmatprep.mubr.bf16.mxu1 %v18095_v2 }
  0x31   : > { %1869 = vmatpush1.bf16.msra.mxu0 %v12262_v11  ;;  %2162 = vmatpush1.bf16.msra.mxu1 %v12263_v12  ;;  %v12307_v11 = vld [vmem:[%s13004_s15 + $0x8] sm:$0xff]  }
  0x32   : > { %1870 = vmatprep.subr.bf16.mxu0 %v12264_v13  ;;  %2163 = vmatprep.subr.bf16.mxu1 %v12266_v14 }
  0x35   : > { %1871 = vmatpush1.bf16.msra.mxu0 %v12268_v15  ;;  %2164 = vmatpush1.bf16.msra.mxu1 %v12269_v16 }
  0x36   : > { %1872 = vmatprep.subr.bf16.mxu0 %v12270_v17  ;;  %2165 = vmatprep.subr.bf16.mxu1 %v12272_v18  ;;  %v12324_v17 = vld [vmem:[%s18088_s4 + $0x20] ss:$8 sps:$4 sm:$0xff]  }
  0x37   : > { %10494 = vmatmul.mubr.msk.bf16.gmra.mrb[8].mxu0 %vm718_vm1, %v12282_v31  ;;  %10521 = vmatmul.mubr.msk.bf16.gmra.mrb[8].mxu1 %vm718_vm1, %v12282_v31  ;;  %v12327_v18 = vld [vmem:[%s18088_s4 + $0x1c0] ss:$8 sps:$4 sm:$0xff]  }
  0x38   : > { %872 = vmatprep.mubr.bf16.mxu0 %v18095_v2  ;;  %1165 = vmatprep.mubr.bf16.mxu1 %v18095_v2 }
  0x39   : > { %1873 = vmatpush1.bf16.msra.mxu0 %v12274_v21  ;;  %2166 = vmatpush1.bf16.msra.mxu1 %v12275_v22  ;;  %v12331_v21 = vld [vmem:[%s18088_s4 + $0x30] ss:$8 sps:$4 sm:$0xff]  }
  0x3a   : > { %10571 = vmatprep.subr.msk.bf16.mxu0 %vm797_vm0, %v10488_v23  ;;  %10598 = vmatprep.subr.msk.bf16.mxu1 %vm797_vm0, %v10490_v24  ;;  %v12334_v22 = vld [vmem:[%s18088_s4 + $0x1d0] ss:$8 sps:$4 sm:$0xff]  }
  0x3d   : > { %1875 = vmatpush1.bf16.msra.mxu0 %v799_v27  ;;  %2168 = vmatpush1.bf16.msra.mxu1 %v805_v28  ;;  %v12308_v28 = vld [vmem:[%s13004_s15 + $0x10] sm:$0xff]  }
  0x3e   : > { %3361 = vmatprep.subr.bf16.mxu0 %v12311_v46  ;;  %4260 = vmatprep.subr.bf16.mxu1 %v12314_v48  ;;  %v12315_v46 = vld [vmem:[%s13004_s15 + $0x18] sm:$0xff]  }
  0x3f   : > { %10495 = vmatmul.mubr.msk.bf16.gmra.mrb[12].mxu0 %vm718_vm1, %v12283_v32  ;;  %10522 = vmatmul.mubr.msk.bf16.gmra.mrb[12].mxu1 %vm718_vm1, %v12283_v32 }
  0x40   : > { %882 = vmatprep.mubr.bf16.mxu0 %v18095_v2  ;;  %1175 = vmatprep.mubr.bf16.mxu1 %v18095_v2 }
  0x47   : > { %10496 = vmatmul.mubr.msk.bf16.gmra.mrb[16].mxu0 %vm718_vm1, %v12284_v33  ;;  %10523 = vmatmul.mubr.msk.bf16.gmra.mrb[16].mxu1 %vm718_vm1, %v12284_v33 }
  0x48   : > { %892 = vmatprep.mubr.bf16.mxu0 %v18095_v2  ;;  %1185 = vmatprep.mubr.bf16.mxu1 %v18095_v2 }
  0x4f   : > { %10497 = vmatmul.mubr.msk.bf16.gmra.mrb[20].mxu0 %vm718_vm1, %v12285_v34  ;;  %10524 = vmatmul.mubr.msk.bf16.gmra.mrb[20].mxu1 %vm718_vm1, %v12285_v34  ;;  %v12339_v34 = vld [vmem:[%s18088_s4 + $0x40] ss:$8 sps:$4 sm:$0xff]  }
  0x50   : > { %902 = vmatprep.mubr.bf16.mxu0 %v18095_v2  ;;  %1195 = vmatprep.mubr.bf16.mxu1 %v18095_v2 }
  0x57   : > { %10498 = vmatmul.mubr.msk.bf16.gmra.mrb[24].mxu0 %vm718_vm1, %v12286_v35  ;;  %10525 = vmatmul.mubr.msk.bf16.gmra.mrb[24].mxu1 %vm718_vm1, %v12286_v35  ;;  %v12342_v35 = vld [vmem:[%s18088_s4 + $0x1e0] ss:$8 sps:$4 sm:$0xff]  }
  0x58   : > { %912 = vmatprep.mubr.bf16.mxu0 %v18095_v2  ;;  %1205 = vmatprep.mubr.bf16.mxu1 %v18095_v2 }
  0x5f   : > { %10499 = vmatmul.mubr.msk.bf16.gmra.mrb[28].mxu0 %vm718_vm1, %v12287_v36  ;;  %10526 = vmatmul.mubr.msk.bf16.gmra.mrb[28].mxu1 %vm718_vm1, %v12287_v36  ;;  %v12349_v36 = vld [vmem:[%s18088_s4 + $0x54] ss:$8 sps:$4 sm:$0xff]  }
  0x60   : > { %922 = vmatprep.mubr.bf16.mxu0 %v18095_v2  ;;  %1215 = vmatprep.mubr.bf16.mxu1 %v18095_v2 }
  0x67   : > { %10500 = vmatmul.mubr.msk.bf16.gmra.mrb[32].mxu0 %vm718_vm1, %v12288_v37  ;;  %10527 = vmatmul.mubr.msk.bf16.gmra.mrb[32].mxu1 %vm718_vm1, %v12288_v37  ;;  %v12352_v37 = vld [vmem:[%s18088_s4 + $0x1f4] ss:$8 sps:$4 sm:$0xff]  }
  0x68   : > { %932 = vmatprep.mubr.bf16.mxu0 %v18095_v2  ;;  %1225 = vmatprep.mubr.bf16.mxu1 %v18095_v2 }
  0x6f   : > { %10501 = vmatmul.mubr.msk.bf16.gmra.mrb[36].mxu0 %vm718_vm1, %v12289_v38  ;;  %10528 = vmatmul.mubr.msk.bf16.gmra.mrb[36].mxu1 %vm718_vm1, %v12289_v38  ;;  %v12347_v38 = vld [vmem:[%s18088_s4 + $0x50] ss:$8 sps:$4 sm:$0xff]  }
  0x70   : > { %942 = vmatprep.mubr.bf16.mxu0 %v18095_v2  ;;  %1235 = vmatprep.mubr.bf16.mxu1 %v18095_v2 }
  0x77   : > { %10502 = vmatmul.mubr.msk.bf16.gmra.mrb[40].mxu0 %vm718_vm1, %v12290_v39  ;;  %10529 = vmatmul.mubr.msk.bf16.gmra.mrb[40].mxu1 %vm718_vm1, %v12290_v39  ;;  %v12350_v39 = vld [vmem:[%s18088_s4 + $0x1f0] ss:$8 sps:$4 sm:$0xff]  }
  0x78   : > { %952 = vmatprep.mubr.bf16.mxu0 %v18095_v2  ;;  %1245 = vmatprep.mubr.bf16.mxu1 %v18095_v2 }
  0x7f   : > { %10503 = vmatmul.mubr.msk.bf16.gmra.mrb[44].mxu0 %vm718_vm1, %v12291_v40  ;;  %10530 = vmatmul.mubr.msk.bf16.gmra.mrb[44].mxu1 %vm718_vm1, %v12291_v40 }
  0x80   : > { %962 = vmatprep.mubr.bf16.mxu0 %v18095_v2  ;;  %1255 = vmatprep.mubr.bf16.mxu1 %v18095_v2 }
  0x87   : > { %10504 = vmatmul.mubr.msk.bf16.gmra.mrb[48].mxu0 %vm718_vm1, %v12292_v41  ;;  %10531 = vmatmul.mubr.msk.bf16.gmra.mrb[48].mxu1 %vm718_vm1, %v12292_v41 }
  0x88   : > { %972 = vmatprep.mubr.bf16.mxu0 %v18095_v2  ;;  %1265 = vmatprep.mubr.bf16.mxu1 %v18095_v2 }
  0x8f   : > { %10505 = vmatmul.mubr.msk.bf16.gmra.mrb[52].mxu0 %vm718_vm1, %v12293_v47  ;;  %10532 = vmatmul.mubr.msk.bf16.gmra.mrb[52].mxu1 %vm718_vm1, %v12293_v47 }
  0x90   : > { %982 = vmatprep.mubr.bf16.mxu0 %v18095_v2  ;;  %1275 = vmatprep.mubr.bf16.mxu1 %v18095_v2 }
  0x97   : > { %10506 = vmatmul.mubr.msk.bf16.gmra.mrb[56].mxu0 %vm718_vm1, %v12294_v50  ;;  %10533 = vmatmul.mubr.msk.bf16.gmra.mrb[56].mxu1 %vm718_vm1, %v12294_v50 }
  0x98   : > { %992 = vmatprep.mubr.bf16.mxu0 %v18095_v2  ;;  %1285 = vmatprep.mubr.bf16.mxu1 %v18095_v2 }
  0x9f   : > { %10507 = vmatmul.mubr.msk.bf16.gmra.mrb[60].mxu0 %vm718_vm1, %v12295_v51  ;;  %10534 = vmatmul.mubr.msk.bf16.gmra.mrb[60].mxu1 %vm718_vm1, %v12295_v51 }
  0xa0   : > { %1002 = vmatprep.mubr.bf16.mxu0 %v18095_v2  ;;  %1295 = vmatprep.mubr.bf16.mxu1 %v18095_v2 }
  0xa7   : > { %10508 = vmatmul.mubr.msk.bf16.gmra.mrb[64].mxu0 %vm718_vm1, %v12296_v52  ;;  %10535 = vmatmul.mubr.msk.bf16.gmra.mrb[64].mxu1 %vm718_vm1, %v12296_v52 }
  0xa8   : > { %1012 = vmatprep.mubr.bf16.mxu0 %v18095_v2  ;;  %1305 = vmatprep.mubr.bf16.mxu1 %v18095_v2 }
  0xaf   : > { %10509 = vmatmul.mubr.msk.bf16.gmra.mrb[68].mxu0 %vm718_vm1, %v12297_v53  ;;  %10536 = vmatmul.mubr.msk.bf16.gmra.mrb[68].mxu1 %vm718_vm1, %v12297_v53  ;;  %v12354_v53 = vld [vmem:[%s18088_s4 + $0x60] ss:$8 sps:$4 sm:$0xff]  }
  0xb0   : > { %1022 = vmatprep.mubr.bf16.mxu0 %v18095_v2  ;;  %1315 = vmatprep.mubr.bf16.mxu1 %v18095_v2 }
  0xb7   : > { %10510 = vmatmul.mubr.msk.bf16.gmra.mrb[72].mxu0 %vm718_vm1, %v12298_v54  ;;  %10537 = vmatmul.mubr.msk.bf16.gmra.mrb[72].mxu1 %vm718_vm1, %v12298_v54  ;;  %v12357_v54 = vld [vmem:[%s18088_s4 + $0x200] ss:$8 sps:$4 sm:$0xff]  }
  0xb8   : > { %1032 = vmatprep.mubr.bf16.mxu0 %v18095_v2  ;;  %1325 = vmatprep.mubr.bf16.mxu1 %v18095_v2 }
  0xbf   : > { %10511 = vmatmul.mubr.msk.bf16.gmra.mrb[76].mxu0 %vm718_vm1, %v12299_v55  ;;  %10538 = vmatmul.mubr.msk.bf16.gmra.mrb[76].mxu1 %vm718_vm1, %v12299_v55  ;;  %v12364_v55 = vld [vmem:[%s18088_s4 + $0x74] ss:$8 sps:$4 sm:$0xff]  }
  0xc0   : > { %1042 = vmatprep.mubr.bf16.mxu0 %v18095_v2  ;;  %1335 = vmatprep.mubr.bf16.mxu1 %v18095_v2 }
  0xc7   : > { %10512 = vmatmul.mubr.msk.bf16.gmra.mrb[80].mxu0 %vm718_vm1, %v12300_v56  ;;  %10539 = vmatmul.mubr.msk.bf16.gmra.mrb[80].mxu1 %vm718_vm1, %v12300_v56  ;;  %v12367_v56 = vld [vmem:[%s18088_s4 + $0x214] ss:$8 sps:$4 sm:$0xff]  }
  0xc8   : > { %1052 = vmatprep.mubr.bf16.mxu0 %v18095_v2  ;;  %1345 = vmatprep.mubr.bf16.mxu1 %v18095_v2 }
  0xcf   : > { %10513 = vmatmul.mubr.msk.bf16.gmra.mrb[84].mxu0 %vm718_vm1, %v12301_v57  ;;  %10540 = vmatmul.mubr.msk.bf16.gmra.mrb[84].mxu1 %vm718_vm1, %v12301_v57  ;;  %v12362_v57 = vld [vmem:[%s18088_s4 + $0x70] ss:$8 sps:$4 sm:$0xff]  }
  0xd0   : > { %1062 = vmatprep.mubr.bf16.mxu0 %v18095_v2  ;;  %1355 = vmatprep.mubr.bf16.mxu1 %v18095_v2 }
  0xd7   : > { %10514 = vmatmul.mubr.msk.bf16.gmra.mrb[88].mxu0 %vm718_vm1, %v12302_v58  ;;  %10541 = vmatmul.mubr.msk.bf16.gmra.mrb[88].mxu1 %vm718_vm1, %v12302_v58  ;;  %v12365_v58 = vld [vmem:[%s18088_s4 + $0x210] ss:$8 sps:$4 sm:$0xff]  }
  0xd8   : > { %1072 = vmatprep.mubr.bf16.mxu0 %v18095_v2  ;;  %1365 = vmatprep.mubr.bf16.mxu1 %v18095_v2 }
  0xdf   : > { %10515 = vmatmul.mubr.msk.bf16.gmra.mrb[92].mxu0 %vm718_vm1, %v12303_v59  ;;  %10542 = vmatmul.mubr.msk.bf16.gmra.mrb[92].mxu1 %vm718_vm1, %v12303_v59 }
  0xe0   : > { %1082 = vmatprep.mubr.bf16.mxu0 %v18095_v2  ;;  %1375 = vmatprep.mubr.bf16.mxu1 %v18095_v2 }
  0xe7   : > { %10516 = vmatmul.mubr.msk.bf16.gmra.mrb[96].mxu0 %vm718_vm1, %v12304_v60  ;;  %10543 = vmatmul.mubr.msk.bf16.gmra.mrb[96].mxu1 %vm718_vm1, %v12304_v60 }
  0xe8   : > { %1092 = vmatprep.mubr.bf16.mxu0 %v18095_v2  ;;  %1385 = vmatprep.mubr.bf16.mxu1 %v18095_v2 }
  0xef   : > { %10517 = vmatmul.mubr.msk.bf16.gmra.mrb[100].mxu0 %vm718_vm1, %v12305_v61  ;;  %10544 = vmatmul.mubr.msk.bf16.gmra.mrb[100].mxu1 %vm718_vm1, %v12305_v61  ;;  %v12372_v61 = vld [vmem:[%s18088_s4 + $0x84] ss:$8 sps:$4 sm:$0xff]  }
  0xf0   : > { %1896 = vmatprep.mubr.bf16.mxu0 %v18095_v2  ;;  %2189 = vmatprep.mubr.bf16.mxu1 %v18095_v2 }
  0xf7   : > { %10572 = vmatmul.mubr.msk.bf16.vlgmr.msra.gmra.mrb[104].mxu0 %vm718_vm1, %v12306_v62  ;;  %10599 = vmatmul.mubr.msk.bf16.vlgmr.msra.gmra.mrb[104].mxu1 %vm718_vm1, %v12306_v62  ;;  %v12375_v62 = vld [vmem:[%s18088_s4 + $0x224] ss:$8 sps:$4 sm:$0xff]  }
  0xf8   : > { %1906 = vmatprep.mubr.bf16.mxu0 %v18095_v2  ;;  %2199 = vmatprep.mubr.bf16.mxu1 %v18095_v2 }
  0xf9   : > { %3362 = vmatpush1.bf16.msra.mxu0 %v12309_v63  ;;  %4261 = vmatpush1.bf16.msra.mxu1 %v12312_v0  ;;  %v12322_v0 = vld [vmem:[%s13004_s15 + $0x20] sm:$0xff]  }
  0xfa   : > { %v13165_v6 = vpop.f32.mrb[0].mxu0  ;;  %v13167_v7 = vpop.f32.mrb[0].mxu1  ;;  %3363 = vmatprep.subr.bf16.mxu0 %v12318_v1  ;;  %4262 = vmatprep.subr.bf16.mxu1 %v12321_v3 }
  0xfb   : > { %v13175_v10 = vpop.f32.mrb[1].mxu0  ;;  %v13178_v12 = vpop.f32.mrb[1].mxu1 }
  0xfc   : > { %v13180_v13 = vpop.f32.mrb[2].mxu0  ;;  %v13182_v14 = vpop.f32.mrb[2].mxu1 }
  0xfd   : > { %v13184_v15 = vpop.f32.mrb[3].mxu0  ;;  %v13186_v16 = vpop.f32.mrb[3].mxu1  ;;  %3364 = vmatpush1.bf16.msra.mxu0 %v12316_v4  ;;  %4263 = vmatpush1.bf16.msra.mxu1 %v12319_v5 }
  0xfe   : > { %3365 = vmatprep.subr.bf16.mxu0 %v12326_v8  ;;  %4264 = vmatprep.subr.bf16.mxu1 %v12329_v9  ;;  %v12370_v9 = vld [vmem:[%s18088_s4 + $0x80] ss:$8 sps:$4 sm:$0xff]  }
  0xff   : > { %10573 = vmatmul.mubr.msk.bf16.gmra.mrb[108].mxu0 %vm718_vm1, %v12307_v11  ;;  %10600 = vmatmul.mubr.msk.bf16.gmra.mrb[108].mxu1 %vm718_vm1, %v12307_v11  ;;  %v12373_v11 = vld [vmem:[%s18088_s4 + $0x220] ss:$8 sps:$4 sm:$0xff]  }
 0x100   : > { %1916 = vmatprep.mubr.bf16.mxu0 %v18095_v2  ;;  %2209 = vmatprep.mubr.bf16.mxu1 %v18095_v2 }
 0x101   : > { %3366 = vmatpush1.bf16.msra.mxu0 %v12324_v17  ;;  %4265 = vmatpush1.bf16.msra.mxu1 %v12327_v18  ;;  %v12379_v17 = vld [vmem:[%s18088_s4 + $0x94] ss:$8 sps:$4 sm:$0xff]  }
 0x102   : > { %v13210_v23 = vpop.f32.mrb[4].mxu0  ;;  %v13212_v24 = vpop.f32.mrb[4].mxu1  ;;  %3367 = vmatprep.subr.bf16.mxu0 %v12333_v19  ;;  %4266 = vmatprep.subr.bf16.mxu1 %v12336_v20  ;;  %v12382_v18 = vld [vmem:[%s18088_s4 + $0x234] ss:$8 sps:$4 sm:$0xff]   ;;  %v12377_v19 = vld [vmem:[%s18088_s4 + $0x90] ss:$8 sps:$4 sm:$0xff]  }
 0x103   : > { %v13220_v27 = vpop.f32.mrb[5].mxu0  ;;  %v13223_v29 = vpop.f32.mrb[5].mxu1  ;;  %v12380_v20 = vld [vmem:[%s18088_s4 + $0x230] ss:$8 sps:$4 sm:$0xff]  }
 0x104   : > { %v13225_v30 = vpop.f32.mrb[6].mxu0  ;;  %v13227_v31 = vpop.f32.mrb[6].mxu1 }
 0x105   : > { %v13229_v32 = vpop.f32.mrb[7].mxu0  ;;  %v13231_v33 = vpop.f32.mrb[7].mxu1  ;;  %3368 = vmatpush1.bf16.msra.mxu0 %v12331_v21  ;;  %4267 = vmatpush1.bf16.msra.mxu1 %v12334_v22 }
 0x106   : > { %3369 = vmatprep.subr.bf16.mxu0 %v12341_v25  ;;  %4268 = vmatprep.subr.bf16.mxu1 %v12344_v26  ;;  %v12387_v25 = vld [vmem:[%s18088_s4 + $0xa4] ss:$8 sps:$4 sm:$0xff]  }
 0x107   : > { %10574 = vmatmul.mubr.msk.bf16.gmra.mrb[112].mxu0 %vm718_vm1, %v12308_v28  ;;  %10601 = vmatmul.mubr.msk.bf16.gmra.mrb[112].mxu1 %vm718_vm1, %v12308_v28  ;;  %v12390_v26 = vld [vmem:[%s18088_s4 + $0x244] ss:$8 sps:$4 sm:$0xff]  }
 0x108   : > { %1926 = vmatprep.mubr.bf16.mxu0 %v18095_v2  ;;  %2219 = vmatprep.mubr.bf16.mxu1 %v18095_v2 }
 0x109   : > { %3370 = vmatpush1.bf16.msra.mxu0 %v12339_v34  ;;  %4269 = vmatpush1.bf16.msra.mxu1 %v12342_v35  ;;  %v12323_v34 = vld [vmem:[%s13004_s15 + $0x28] sm:$0xff]  }
 0x10a   : > { %v13255_v40 = vpop.f32.mrb[8].mxu0  ;;  %v13257_v41 = vpop.f32.mrb[8].mxu1  ;;  %3371 = vmatprep.subr.bf16.mxu0 %v12349_v36  ;;  %4270 = vmatprep.subr.bf16.mxu1 %v12352_v37 }
 0x10b   : > { %v13265_v45 = vpop.f32.mrb[9].mxu0  ;;  %v13268_v47 = vpop.f32.mrb[9].mxu1 }
 0x10c   : > { %v13270_v48 = vpop.f32.mrb[10].mxu0  ;;  %v13272_v50 = vpop.f32.mrb[10].mxu1 }
 0x10d   : > { %v13274_v51 = vpop.f32.mrb[11].mxu0  ;;  %v13276_v52 = vpop.f32.mrb[11].mxu1  ;;  %3372 = vmatpush1.bf16.msra.mxu0 %v12347_v38  ;;  %4271 = vmatpush1.bf16.msra.mxu1 %v12350_v39 }
 0x10e   : > { %3373 = vmatprep.subr.bf16.mxu0 %v12356_v42  ;;  %4272 = vmatprep.subr.bf16.mxu1 %v12359_v44  ;;  %v12385_v42 = vld [vmem:[%s18088_s4 + $0xa0] ss:$8 sps:$4 sm:$0xff]  }
 0x10f   : > { %10575 = vmatmul.mubr.msk.bf16.gmra.mrb[116].mxu0 %vm718_vm1, %v12315_v46  ;;  %10602 = vmatmul.mubr.msk.bf16.gmra.mrb[116].mxu1 %vm718_vm1, %v12315_v46  ;;  %v12388_v44 = vld [vmem:[%s18088_s4 + $0x240] ss:$8 sps:$4 sm:$0xff]   ;;  %v12394_v46 = vld [vmem:[%s18088_s4 + $0xb4] ss:$8 sps:$4 sm:$0xff]  }
 0x110   : > { %1936 = vmatprep.mubr.bf16.mxu0 %v18095_v2  ;;  %2229 = vmatprep.mubr.bf16.mxu1 %v18095_v2 }
 0x111   : > { %3374 = vmatpush1.bf16.msra.mxu0 %v12354_v53  ;;  %4273 = vmatpush1.bf16.msra.mxu1 %v12357_v54  ;;  %v12397_v53 = vld [vmem:[%s18088_s4 + $0x254] ss:$8 sps:$4 sm:$0xff]   ;;  %v12392_v54 = vld [vmem:[%s18088_s4 + $0xb0] ss:$8 sps:$4 sm:$0xff]  }
 0x112   : > { %v13300_v59 = vpop.f32.mrb[12].mxu0  ;;  %v13302_v60 = vpop.f32.mrb[12].mxu1  ;;  %3375 = vmatprep.subr.bf16.mxu0 %v12364_v55  ;;  %4274 = vmatprep.subr.bf16.mxu1 %v12367_v56  ;;  %v12395_v55 = vld [vmem:[%s18088_s4 + $0x250] ss:$8 sps:$4 sm:$0xff]  }
 0x113   : > { %v13310_v63 = vpop.f32.mrb[13].mxu0  ;;  %v13313_v1 = vpop.f32.mrb[13].mxu1 }
 0x114   : > { %v13315_v3 = vpop.f32.mrb[14].mxu0  ;;  %v13317_v4 = vpop.f32.mrb[14].mxu1 }
 0x115   : > { %v13319_v5 = vpop.f32.mrb[15].mxu0  ;;  %v13321_v8 = vpop.f32.mrb[15].mxu1  ;;  %3376 = vmatpush1.bf16.msra.mxu0 %v12362_v57  ;;  %4275 = vmatpush1.bf16.msra.mxu1 %v12365_v58 }
 0x116   : > { %3377 = vmatprep.subr.bf16.mxu0 %v12372_v61  ;;  %4276 = vmatprep.subr.bf16.mxu1 %v12375_v62  ;;  %v12330_v61 = vld [vmem:[%s13004_s15 + $0x30] sm:$0xff]  }
 0x117   : > { %10576 = vmatmul.mubr.msk.bf16.gmra.mrb[120].mxu0 %vm718_vm1, %v12322_v0  ;;  %10603 = vmatmul.mubr.msk.bf16.gmra.mrb[120].mxu1 %vm718_vm1, %v12322_v0 }
 0x118   : > { %1946 = vmatprep.mubr.bf16.mxu0 %v18095_v2  ;;  %2239 = vmatprep.mubr.bf16.mxu1 %v18095_v2 }
 0x119   : > { %3378 = vmatpush1.bf16.msra.mxu0 %v12370_v9  ;;  %4277 = vmatpush1.bf16.msra.mxu1 %v12373_v11 }
 0x11a   : > { %v13345_v21 = vpop.f32.mrb[16].mxu0  ;;  %v13347_v22 = vpop.f32.mrb[16].mxu1  ;;  %3379 = vmatprep.subr.bf16.mxu0 %v12379_v17  ;;  %4278 = vmatprep.subr.bf16.mxu1 %v12382_v18  ;;  %v12400_v18 = vld [vmem:[%s18088_s4 + $0xc0] ss:$8 sps:$4 sm:$0xff]  }
 0x11b   : > { %v13355_v28 = vpop.f32.mrb[17].mxu0  ;;  %v13358_v35 = vpop.f32.mrb[17].mxu1 }
 0x11c   : > { %v13360_v36 = vpop.f32.mrb[18].mxu0  ;;  %v13362_v37 = vpop.f32.mrb[18].mxu1 }
 0x11d   : > { %v13364_v38 = vpop.f32.mrb[19].mxu0  ;;  %v13366_v39 = vpop.f32.mrb[19].mxu1  ;;  %3380 = vmatpush1.bf16.msra.mxu0 %v12377_v19  ;;  %4279 = vmatpush1.bf16.msra.mxu1 %v12380_v20  ;;  %v12402_v19 = vld [vmem:[%s18088_s4 + $0xc4] ss:$8 sps:$4 sm:$0xff]   ;;  %v12403_v20 = vld [vmem:[%s18088_s4 + $0x260] ss:$8 sps:$4 sm:$0xff]  }
 0x11e   : > { %3381 = vmatprep.subr.bf16.mxu0 %v12387_v25  ;;  %4280 = vmatprep.subr.bf16.mxu1 %v12390_v26  ;;  %v12405_v25 = vld [vmem:[%s18088_s4 + $0x264] ss:$8 sps:$4 sm:$0xff]  }
 0x11f   : > { %10577 = vmatmul.mubr.msk.bf16.gmra.mrb[124].mxu0 %vm718_vm1, %v12323_v34  ;;  %10604 = vmatmul.mubr.msk.bf16.gmra.mrb[124].mxu1 %vm718_vm1, %v12323_v34 }
 0x120   : > { %1956 = vmatprep.mubr.bf16.mxu0 %v18095_v2  ;;  %2249 = vmatprep.mubr.bf16.mxu1 %v18095_v2 }
 0x121   : > { %3382 = vmatpush1.bf16.msra.mxu0 %v12385_v42  ;;  %4281 = vmatpush1.bf16.msra.mxu1 %v12388_v44  ;;  %v12337_v44 = vld [vmem:[%s13004_s15 + $0x38] sm:$0xff]  }
 0x122   : > { %v13390_v56 = vpop.f32.mrb[20].mxu0  ;;  %v13392_v57 = vpop.f32.mrb[20].mxu1  ;;  %3383 = vmatprep.subr.bf16.mxu0 %v12394_v46  ;;  %4282 = vmatprep.subr.bf16.mxu1 %v12397_v53 }
 0x123   : > { %v13394_v58 = vpop.f32.mrb[21].mxu0  ;;  %v13397_v62 = vpop.f32.mrb[21].mxu1 }
 0x124   : > { %v13399_v0 = vpop.f32.mrb[22].mxu0  ;;  %v13401_v9 = vpop.f32.mrb[22].mxu1 }
 0x125   : > { %v13403_v11 = vpop.f32.mrb[23].mxu0  ;;  %v13405_v17 = vpop.f32.mrb[23].mxu1  ;;  %3384 = vmatpush1.bf16.msra.mxu0 %v12392_v54  ;;  %4283 = vmatpush1.bf16.msra.mxu1 %v12395_v55 }
 0x126   : > { %3385 = vmatprep.subr.bf16.mxu0 %v12402_v19  ;;  %4284 = vmatprep.subr.bf16.mxu1 %v12405_v25  ;;  %v12410_v19 = vld [vmem:[%s18088_s4 + $0xd4] ss:$8 sps:$4 sm:$0xff]  }
 0x127   : > { %10578 = vmatmul.mubr.msk.bf16.gmra.mrb[128].mxu0 %vm718_vm1, %v12330_v61  ;;  %10605 = vmatmul.mubr.msk.bf16.gmra.mrb[128].mxu1 %vm718_vm1, %v12330_v61  ;;  %v12413_v25 = vld [vmem:[%s18088_s4 + $0x274] ss:$8 sps:$4 sm:$0xff]  }
 0x128   : > { %1966 = vmatprep.mubr.bf16.mxu0 %v18095_v2  ;;  %2259 = vmatprep.mubr.bf16.mxu1 %v18095_v2 }
 0x129   : > { %3386 = vmatpush1.bf16.msra.mxu0 %v12400_v18  ;;  %4285 = vmatpush1.bf16.msra.mxu1 %v12403_v20  ;;  %v12408_v18 = vld [vmem:[%s18088_s4 + $0xd0] ss:$8 sps:$4 sm:$0xff]  }
 0x12a   : > { %v13423_v26 = vpop.f32.mrb[24].mxu0  ;;  %v13425_v34 = vpop.f32.mrb[24].mxu1  ;;  %v12411_v20 = vld [vmem:[%s18088_s4 + $0x270] ss:$8 sps:$4 sm:$0xff]   ;;  %3387 = vmatprep.subr.bf16.mxu0 %v12410_v19  ;;  %4286 = vmatprep.subr.bf16.mxu1 %v12413_v25 }
 0x12b   : > { %18283 = vst [vmem:[#allocation3_spill] sm:$0xff] %v13425_v34  ;;  %v13427_v42 = vpop.f32.mrb[25].mxu0  ;;  %v13430_v46 = vpop.f32.mrb[25].mxu1 }
 0x12c   : > { %18284 = vst [vmem:[#allocation4_spill] sm:$0xff] %v13427_v42  ;;  %18285 = vst [vmem:[#allocation5_spill] sm:$0xff] %v13430_v46  ;;  %v13432_v53 = vpop.f32.mrb[26].mxu0  ;;  %v13434_v54 = vpop.f32.mrb[26].mxu1 }
 0x12d   : > { %18286 = vst [vmem:[#allocation6_spill] sm:$0xff] %v13432_v53  ;;  %18287 = vst [vmem:[#allocation7_spill] sm:$0xff] %v13434_v54  ;;  %v13436_v55 = vpop.f32.mrb[27].mxu0  ;;  %v13438_v61 = vpop.f32.mrb[27].mxu1  ;;  %3388 = vmatpush1.bf16.msra.mxu0 %v12408_v18  ;;  %4287 = vmatpush1.bf16.msra.mxu1 %v12411_v20  ;;  %v18298_v18 = vmov 0  }
 0x12e   : > { %18288 = vst [vmem:[#allocation8_spill] sm:$0xff] %v13436_v55  ;;  %18289 = vst [vmem:[#allocation9_spill] sm:$0xff] %v13438_v61  ;;  %v12338_v55 = vld [vmem:[%s13004_s15 + $0x40] sm:$0xff]  }
 0x12f   : > { %10579 = vmatmul.mubr.msk.bf16.gmra.mrb[132].mxu0 %vm718_vm1, %v12337_v44  ;;  %10606 = vmatmul.mubr.msk.bf16.gmra.mrb[132].mxu1 %vm718_vm1, %v12337_v44 }
 0x130   : > { %1976 = vmatprep.mubr.bf16.mxu0 %v18095_v2  ;;  %2269 = vmatprep.mubr.bf16.mxu1 %v18095_v2 }
 0x132   : > { %v13456_v44 = vpop.f32.mrb[28].mxu0  ;;  %v13458_v61 = vpop.f32.mrb[28].mxu1 }
 0x133   : > { %18290 = vst [vmem:[#allocation10_spill] sm:$0xff] %v13456_v44  ;;  %18291 = vst [vmem:[#allocation11_spill] sm:$0xff] %v13458_v61  ;;  %v13460_v54 = vpop.f32.mrb[29].mxu0  ;;  %v13463_v2 = vpop.f32.mrb[29].mxu1 }
 0x134   : > { %18292 = vst [vmem:[#allocation12_spill] sm:$0xff] %v13460_v54  ;;  %18293 = vst [vmem:[#allocation13_spill] sm:$0xff] %v13463_v2  ;;  %v13465_v53 = vpop.f32.mrb[30].mxu0  ;;  %v13467_v46 = vpop.f32.mrb[30].mxu1 }
 0x135   : > { %18294 = vst [vmem:[#allocation14_spill] sm:$0xff] %v13465_v53  ;;  %18295 = vst [vmem:[#allocation15_spill] sm:$0xff] %v13467_v46  ;;  %v13469_v42 = vpop.f32.mrb[31].mxu0  ;;  %v13471_v19 = vpop.f32.mrb[31].mxu1  ;;  %v12345_v53 = vld [vmem:[%s13004_s15 + $0x48] sm:$0xff]  }
 0x136   : > { %18296 = vst [vmem:[#allocation16_spill] sm:$0xff] %v13469_v42  ;;  %18297 = vst [vmem:[#allocation17_spill] sm:$0xff] %v13471_v19 }
 0x137   : > { %10580 = vmatmul.mubr.msk.bf16.gmra.mrb[136].mxu0 %vm718_vm1, %v12338_v55  ;;  %10607 = vmatmul.mubr.msk.bf16.gmra.mrb[136].mxu1 %vm718_vm1, %v12338_v55 }
 0x138   : > { %1986 = vmatprep.mubr.bf16.mxu0 %v18298_v18  ;;  %2279 = vmatprep.mubr.bf16.mxu1 %v18298_v18 }
 0x13a   : > { %v13477_v25 = vpop.f32.mrb[32].mxu0  ;;  %v13479_v2 = vpop.f32.mrb[32].mxu1 }
 0x13b   : > { %18299 = vst [vmem:[#allocation18_spill] sm:$0xff] %v13477_v25  ;;  %18300 = vst [vmem:[#allocation19_spill] sm:$0xff] %v13479_v2  ;;  %v13481_v20 = vpop.f32.mrb[33].mxu0  ;;  %v13484_v46 = vpop.f32.mrb[33].mxu1  ;;  %v12346_v2 = vld [vmem:[%s13004_s15 + $0x50] sm:$0xff]  }
 0x13c   : > { %18301 = vst [vmem:[#allocation20_spill] sm:$0xff] %v13481_v20  ;;  %18302 = vst [vmem:[#allocation21_spill] sm:$0xff] %v13484_v46  ;;  %v13486_v42 = vpop.f32.mrb[34].mxu0  ;;  %v13488_v19 = vpop.f32.mrb[34].mxu1  ;;  %v12415_v20 = vld [vmem:[%s18088_s4 + $0xe0] ss:$8 sps:$4 sm:$0xff]  }
 0x13d   : > { %18303 = vst [vmem:[#allocation22_spill] sm:$0xff] %v13486_v42  ;;  %18304 = vst [vmem:[#allocation23_spill] sm:$0xff] %v13488_v19  ;;  %v13490_v61 = vpop.f32.mrb[35].mxu0  ;;  %v13492_v55 = vpop.f32.mrb[35].mxu1  ;;  %v12417_v46 = vld [vmem:[%s18088_s4 + $0xe4] ss:$8 sps:$4 sm:$0xff]  }
 0x13e   : > { %18305 = vst [vmem:[#allocation24_spill] sm:$0xff] %v13490_v61  ;;  %18306 = vst [vmem:[#allocation25_spill] sm:$0xff] %v13492_v55  ;;  %v12418_v55 = vld [vmem:[%s18088_s4 + $0x280] ss:$8 sps:$4 sm:$0xff]   ;;  %3389 = vmatprep.subr.bf16.mxu0 %v12417_v46 }
 0x13f   : > { %10581 = vmatmul.mubr.msk.bf16.gmra.mrb[140].mxu0 %vm718_vm1, %v12345_v53  ;;  %10608 = vmatmul.mubr.msk.bf16.gmra.mrb[140].mxu1 %vm718_vm1, %v12345_v53  ;;  %v12420_v53 = vld [vmem:[%s18088_s4 + $0x284] ss:$8 sps:$4 sm:$0xff]  }
 0x140   : > { %1996 = vmatprep.mubr.bf16.mxu0 %v18298_v18  ;;  %2289 = vmatprep.mubr.bf16.mxu1 %v18298_v18 }
 0x141   : > { %4288 = vmatprep.subr.bf16.mxu1 %v12420_v53  ;;  %3390 = vmatpush1.bf16.msra.mxu0 %v12415_v20 }
 0x142   : > { %v13510_v19 = vpop.f32.mrb[36].mxu0  ;;  %v13512_v61 = vpop.f32.mrb[36].mxu1  ;;  %4289 = vmatpush1.bf16.msra.mxu1 %v12418_v55 }
 0x143   : > { %18307 = vst [vmem:[#allocation26_spill] sm:$0xff] %v13510_v19  ;;  %18308 = vst [vmem:[#allocation27_spill] sm:$0xff] %v13512_v61  ;;  %v13514_v42 = vpop.f32.mrb[37].mxu0  ;;  %v13517_v25 = vpop.f32.mrb[37].mxu1 }
 0x144   : > { %18309 = vst [vmem:[#allocation28_spill] sm:$0xff] %v13514_v42  ;;  %18310 = vst [vmem:[#allocation29_spill] sm:$0xff] %v13517_v25  ;;  %v13519_v54 = vpop.f32.mrb[38].mxu0  ;;  %v13521_v44 = vpop.f32.mrb[38].mxu1 }
 0x145   : > { %18311 = vst [vmem:[#allocation30_spill] sm:$0xff] %v13519_v54  ;;  %18312 = vst [vmem:[#allocation31_spill] sm:$0xff] %v13521_v44  ;;  %v13523_v34 = vpop.f32.mrb[39].mxu0  ;;  %v13525_v46 = vpop.f32.mrb[39].mxu1  ;;  %v12353_v54 = vld [vmem:[%s13004_s15 + $0x58] sm:$0xff]  }
 0x146   : > { %18313 = vst [vmem:[#allocation32_spill] sm:$0xff] %v13523_v34  ;;  %18314 = vst [vmem:[#allocation33_spill] sm:$0xff] %v13525_v46 }
 0x147   : > { %10582 = vmatmul.mubr.msk.bf16.gmra.mrb[144].mxu0 %vm718_vm1, %v12346_v2  ;;  %10609 = vmatmul.mubr.msk.bf16.gmra.mrb[144].mxu1 %vm718_vm1, %v12346_v2 }
 0x148   : > { %2006 = vmatprep.mubr.bf16.mxu0 %v18298_v18  ;;  %2299 = vmatprep.mubr.bf16.mxu1 %v18298_v18 }
 0x14a   : > { %v13531_v20 = vpop.f32.mrb[40].mxu0  ;;  %v13533_v53 = vpop.f32.mrb[40].mxu1 }
 0x14b   : > { %18315 = vst [vmem:[#allocation34_spill] sm:$0xff] %v13531_v20  ;;  %18316 = vst [vmem:[#allocation35_spill] sm:$0xff] %v13533_v53  ;;  %v13535_v55 = vpop.f32.mrb[41].mxu0  ;;  %v13538_v44 = vpop.f32.mrb[41].mxu1  ;;  %v12360_v53 = vld [vmem:[%s13004_s15 + $0x60] sm:$0xff]  }
 0x14c   : > { %18317 = vst [vmem:[#allocation36_spill] sm:$0xff] %v13535_v55  ;;  %18318 = vst [vmem:[#allocation37_spill] sm:$0xff] %v13538_v44  ;;  %v13540_v34 = vpop.f32.mrb[42].mxu0  ;;  %v13542_v46 = vpop.f32.mrb[42].mxu1  ;;  %v12422_v55 = vld [vmem:[%s18088_s4 + $0xf0] ss:$8 sps:$4 sm:$0xff]  }
 0x14d   : > { %18319 = vst [vmem:[#allocation38_spill] sm:$0xff] %v13540_v34  ;;  %18320 = vst [vmem:[#allocation39_spill] sm:$0xff] %v13542_v46  ;;  %v13544_v25 = vpop.f32.mrb[43].mxu0  ;;  %v13546_v2 = vpop.f32.mrb[43].mxu1  ;;  %v12424_v44 = vld [vmem:[%s18088_s4 + $0xf4] ss:$8 sps:$4 sm:$0xff]  }
 0x14e   : > { %18321 = vst [vmem:[#allocation40_spill] sm:$0xff] %v13544_v25  ;;  %18322 = vst [vmem:[#allocation41_spill] sm:$0xff] %v13546_v2  ;;  %v12425_v2 = vld [vmem:[%s18088_s4 + $0x290] ss:$8 sps:$4 sm:$0xff]   ;;  %3391 = vmatprep.subr.bf16.mxu0 %v12424_v44 }
 0x14f   : > { %10583 = vmatmul.mubr.msk.bf16.gmra.mrb[148].mxu0 %vm718_vm1, %v12353_v54  ;;  %10610 = vmatmul.mubr.msk.bf16.gmra.mrb[148].mxu1 %vm718_vm1, %v12353_v54  ;;  %v12427_v54 = vld [vmem:[%s18088_s4 + $0x294] ss:$8 sps:$4 sm:$0xff]  }
 0x150   : > { %2016 = vmatprep.mubr.bf16.mxu0 %v18298_v18  ;;  %2309 = vmatprep.mubr.bf16.mxu1 %v18298_v18 }
 0x151   : > { %4290 = vmatprep.subr.bf16.mxu1 %v12427_v54  ;;  %3392 = vmatpush1.bf16.msra.mxu0 %v12422_v55 }
 0x152   : > { %v13564_v46 = vpop.f32.mrb[44].mxu0  ;;  %v13566_v25 = vpop.f32.mrb[44].mxu1  ;;  %4291 = vmatpush1.bf16.msra.mxu1 %v12425_v2  ;;  %v12430_v2 = vld [vmem:[%s18088_s4 + $0x104] ss:$8 sps:$4 sm:$0xff]  }
 0x153   : > { %18323 = vst [vmem:[#allocation42_spill] sm:$0xff] %v13566_v25  ;;  %v13568_v34 = vpop.f32.mrb[45].mxu0  ;;  %v13571_v20 = vpop.f32.mrb[45].mxu1  ;;  %3654 = vmatprep.subr.bf16.mxu0 %v12430_v2  ;;  %v12368_v2 = vld [vmem:[%s13004_s15 + $0x70] sm:$0xff]  }
 0x154   : > { %18324 = vst [vmem:[#allocation43_spill] sm:$0xff] %v13568_v34  ;;  %18325 = vst [vmem:[#allocation44_spill] sm:$0xff] %v13571_v20  ;;  %v13573_v61 = vpop.f32.mrb[46].mxu0  ;;  %v13575_v42 = vpop.f32.mrb[46].mxu1 }
 0x155   : > { %18326 = vst [vmem:[#allocation45_spill] sm:$0xff] %v13573_v61  ;;  %18327 = vst [vmem:[#allocation46_spill] sm:$0xff] %v13575_v42  ;;  %v13577_v19 = vpop.f32.mrb[47].mxu0  ;;  %v13579_v44 = vpop.f32.mrb[47].mxu1 }
 0x156   : > { %18328 = vst [vmem:[#allocation47_spill] sm:$0xff] %v13577_v19  ;;  %18329 = vst [vmem:[#allocation48_spill] sm:$0xff] %v13579_v44  ;;  %v12361_v19 = vld [vmem:[%s13004_s15 + $0x68] sm:$0xff]  }
 0x157   : > { %10584 = vmatmul.mubr.msk.bf16.gmra.mrb[152].mxu0 %vm718_vm1, %v12360_v53  ;;  %10611 = vmatmul.mubr.msk.bf16.gmra.mrb[152].mxu1 %vm718_vm1, %v12360_v53  ;;  %v12433_v53 = vld [vmem:[%s18088_s4 + $0x2a4] ss:$8 sps:$4 sm:$0xff]  }
 0x158   : > { %2026 = vmatprep.mubr.bf16.mxu0 %v18298_v18  ;;  %2319 = vmatprep.mubr.bf16.mxu1 %v18298_v18 }
 0x159   : > { %4553 = vmatprep.subr.bf16.mxu1 %v12433_v53 }
 0x15a   : > { %v13585_v55 = vpop.f32.mrb[48].mxu0  ;;  %v13587_v54 = vpop.f32.mrb[48].mxu1 }
 0x15b   : > { %18330 = vst [vmem:[#allocation49_spill] sm:$0xff] %v13585_v55  ;;  %18331 = vst [vmem:[#allocation50_spill] sm:$0xff] %v13587_v54  ;;  %v13592_v42 = vpop.f32.mrb[49].mxu0  ;;  %v13595_v44 = vpop.f32.mrb[49].mxu1 }
 0x15c   : > { %18332 = vst [vmem:[#allocation51_spill] sm:$0xff] %v13592_v42  ;;  %18333 = vst [vmem:[#allocation52_spill] sm:$0xff] %v13595_v44  ;;  %v13600_v61 = vpop.f32.mrb[50].mxu0  ;;  %v13602_v20 = vpop.f32.mrb[50].mxu1 }
 0x15d   : > { %18334 = vst [vmem:[#allocation53_spill] sm:$0xff] %v13600_v61  ;;  %18335 = vst [vmem:[#allocation54_spill] sm:$0xff] %v13602_v20  ;;  %v13604_v54 = vpop.f32.mrb[51].mxu0  ;;  %v13606_v55 = vpop.f32.mrb[51].mxu1 }
 0x15e   : > { %18336 = vst [vmem:[#allocation55_spill] sm:$0xff] %v13604_v54  ;;  %18337 = vst [vmem:[#allocation56_spill] sm:$0xff] %v13606_v55 }
 0x15f   : > { %10585 = vmatmul.mubr.msk.bf16.gmra.mrb[156].mxu0 %vm718_vm1, %v12361_v19  ;;  %10612 = vmatmul.mubr.msk.bf16.gmra.mrb[156].mxu1 %vm718_vm1, %v12361_v19 }
 0x160   : > { %2036 = vmatprep.mubr.bf16.mxu0 %v18298_v18  ;;  %2329 = vmatprep.mubr.bf16.mxu1 %v18298_v18 }
 0x162   : > { %v13612_v44 = vpop.f32.mrb[52].mxu0  ;;  %v13614_v61 = vpop.f32.mrb[52].mxu1 }
 0x163   : > { %18338 = vst [vmem:[#allocation57_spill] sm:$0xff] %v13612_v44  ;;  %18339 = vst [vmem:[#allocation58_spill] sm:$0xff] %v13614_v61  ;;  %v13616_v20 = vpop.f32.mrb[53].mxu0  ;;  %v13619_v54 = vpop.f32.mrb[53].mxu1 }
 0x164   : > { %18340 = vst [vmem:[#allocation59_spill] sm:$0xff] %v13616_v20  ;;  %18341 = vst [vmem:[#allocation60_spill] sm:$0xff] %v13619_v54  ;;  %v13621_v55 = vpop.f32.mrb[54].mxu0  ;;  %v13623_v53 = vpop.f32.mrb[54].mxu1 }
 0x165   : > { %18342 = vst [vmem:[#allocation61_spill] sm:$0xff] %v13621_v55  ;;  %18343 = vst [vmem:[#allocation62_spill] sm:$0xff] %v13623_v53  ;;  %v13625_v42 = vpop.f32.mrb[55].mxu0  ;;  %v13627_v19 = vpop.f32.mrb[55].mxu1  ;;  %v12369_v53 = vld [vmem:[%s13004_s15 + $0x78] sm:$0xff]  }
 0x166   : > { %18344 = vst [vmem:[#allocation63_spill] sm:$0xff] %v13625_v42  ;;  %18345 = vst [vmem:[#allocation64_spill] sm:$0xff] %v13627_v19 }
 0x167   : > { %10586 = vmatmul.mubr.msk.bf16.gmra.mrb[160].mxu0 %vm718_vm1, %v12368_v2  ;;  %10613 = vmatmul.mubr.msk.bf16.gmra.mrb[160].mxu1 %vm718_vm1, %v12368_v2 }
 0x168   : > { %2046 = vmatprep.mubr.bf16.mxu0 %v18298_v18  ;;  %2339 = vmatprep.mubr.bf16.mxu1 %v18298_v18 }
 0x16a   : > { %v13633_v61 = vpop.f32.mrb[56].mxu0  ;;  %v13635_v20 = vpop.f32.mrb[56].mxu1 }
 0x16b   : > { %18346 = vst [vmem:[#allocation65_spill] sm:$0xff] %v13633_v61  ;;  %18347 = vst [vmem:[#allocation66_spill] sm:$0xff] %v13635_v20  ;;  %v13637_v54 = vpop.f32.mrb[57].mxu0  ;;  %v13640_v55 = vpop.f32.mrb[57].mxu1 }
 0x16c   : > { %18348 = vst [vmem:[#allocation67_spill] sm:$0xff] %v13637_v54  ;;  %18349 = vst [vmem:[#allocation68_spill] sm:$0xff] %v13640_v55  ;;  %v13642_v42 = vpop.f32.mrb[58].mxu0  ;;  %v13644_v19 = vpop.f32.mrb[58].mxu1 }
 0x16d   : > { %18350 = vst [vmem:[#allocation69_spill] sm:$0xff] %v13642_v42  ;;  %18351 = vst [vmem:[#allocation70_spill] sm:$0xff] %v13644_v19  ;;  %v13646_v44 = vpop.f32.mrb[59].mxu0  ;;  %v13648_v2 = vpop.f32.mrb[59].mxu1  ;;  %v18097_v42 = vsub.s32 0, %v13059_v43 }
 0x16e   : > { %18352 = vst [vmem:[#allocation71_spill] sm:$0xff] %v13646_v44  ;;  %18353 = vst [vmem:[#allocation72_spill] sm:$0xff] %v13648_v2  ;;  %v12376_v44 = vld [vmem:[%s13004_s15 + $0x80] sm:$0xff]  }
 0x16f   : > { %10587 = vmatmul.mubr.msk.bf16.gmra.mrb[164].mxu0 %vm718_vm1, %v12369_v53  ;;  %10614 = vmatmul.mubr.msk.bf16.gmra.mrb[164].mxu1 %vm718_vm1, %v12369_v53  ;;  %v12826_v19 = vld [vmem:[%s18087_s3] sm:$0xf] }
 0x170   : > { %2056 = vmatprep.mubr.bf16.mxu0 %v18298_v18  ;;  %2349 = vmatprep.mubr.bf16.mxu1 %v18298_v18 }
 0x172   : > { %v13654_v54 = vpop.f32.mrb[60].mxu0  ;;  %v13656_v20 = vpop.f32.mrb[60].mxu1 }
 0x173   : > { %18354 = vst [vmem:[#allocation73_spill] sm:$0xff] %v13654_v54  ;;  %v13660_v55 = vpop.f32.mrb[61].mxu0  ;;  %v13663_v2 = vpop.f32.mrb[61].mxu1 }
 0x174   : > { %18355 = vst [vmem:[#allocation74_spill] sm:$0xff] %v13660_v55  ;;  %18356 = vst [vmem:[#allocation75_spill] sm:$0xff] %v13663_v2  ;;  %v13666_v53 = vpop.f32.mrb[62].mxu0  ;;  %v13668_v25 = vpop.f32.mrb[62].mxu1  ;;  %v13679_v55 = vrot.slane %v12826_v19, %v18097_v42  ;;  %v18361_v2 = vsub.s32 2, %v13059_v43 }
 0x175   : > { %18357 = vst [vmem:[#allocation76_spill] sm:$0xff] %v13666_v53  ;;  %18358 = vst [vmem:[#allocation77_spill] sm:$0xff] %v13668_v25  ;;  %v13670_v34 = vpop.f32.mrb[63].mxu0  ;;  %v13672_v54 = vpop.f32.mrb[63].mxu1 }
 0x176   : > { %18359 = vst [vmem:[#allocation78_spill] sm:$0xff] %v13670_v34  ;;  %18360 = vst [vmem:[#allocation79_spill] sm:$0xff] %v13672_v54  ;;  %v13683_v61 = vrot.slane %v12826_v19, %v18361_v2  ;;  %v18362_v34 = vsub.s32 1, %v13059_v43  ;;  %v13699_v2 = vadd.f32 %v13165_v6, %v13679_v55 }
 0x177   : > { %10588 = vmatmul.mubr.msk.bf16.gmra.mrb[168].mxu0 %vm718_vm1, %v12376_v44  ;;  %10615 = vmatmul.mubr.msk.bf16.gmra.mrb[168].mxu1 %vm718_vm1, %v12376_v44 }
 0x178   : > { %v13689_v25 = vrot.slane %v12826_v19, %v18362_v34  ;;  %2066 = vmatprep.mubr.bf16.mxu0 %v18298_v18  ;;  %2359 = vmatprep.mubr.bf16.mxu1 %v18298_v18  ;;  %v13703_v53 = vadd.f32 %v13167_v7, %v13683_v61  ;;  %v12383_v34 = vld [vmem:[%s13004_s15 + $0x88] sm:$0xff]   ;;  %v13724_v7 = vadd.f32 %v13180_v13, %v13679_v55 }
 0x179   : > { %v13744_v13 = vadd.f32 %v13210_v23, %v13679_v55 }
 0x17a   : > { %v13693_v54 = vpop.f32.mrb[64].mxu0  ;;  %v13695_v42 = vpop.f32.mrb[64].mxu1  ;;  %18365 = vst [vmem:[#allocation82_spill] sm:$0xff] %v13703_v53  ;;  %v13712_v43 = vadd.f32 %v13175_v10, %v13689_v25  ;;  %v13732_v10 = vadd.f32 %v13182_v14, %v13683_v61  ;;  %v13752_v14 = vadd.f32 %v13212_v24, %v13683_v61 }
 0x17b   : > { %18363 = vst [vmem:[#allocation80_spill] sm:$0xff] %v13693_v54  ;;  %18364 = vst [vmem:[#allocation81_spill] sm:$0xff] %v13695_v42  ;;  %v13705_v44 = vpop.f32.mrb[65].mxu0  ;;  %v13708_v19 = vpop.f32.mrb[65].mxu1  ;;  %v13716_v42 = vadd.f32 %v13178_v12, %v13076_v49  ;;  %v13736_v12 = vadd.f32 %v13186_v16, %v13076_v49  ;;  %v13796_v16 = vadd.f32 %v13231_v33, %v13076_v49 }
 0x17c   : > { %18366 = vst [vmem:[#allocation83_spill] sm:$0xff] %v13705_v44  ;;  %18367 = vst [vmem:[#allocation84_spill] sm:$0xff] %v13708_v19  ;;  %v13718_v54 = vpop.f32.mrb[66].mxu0  ;;  %v13720_v6 = vpop.f32.mrb[66].mxu1  ;;  %v13728_v44 = vadd.f32 %v13184_v15, %v13689_v25  ;;  %v13748_v15 = vadd.f32 %v13220_v27, %v13689_v25  ;;  %v13765_v27 = vadd.f32 %v13225_v30, %v13679_v55 }
 0x17d   : > { %18368 = vst [vmem:[#allocation85_spill] sm:$0xff] %v13712_v43  ;;  %18369 = vst [vmem:[#allocation86_spill] sm:$0xff] %v13716_v42  ;;  %v13738_v19 = vpop.f32.mrb[67].mxu0  ;;  %v12384_v43 = vld [vmem:[%s13004_s15 + $0x90] sm:$0xff]   ;;  %v13815_v33 = vadd.f32 %v13268_v47, %v13076_v49  ;;  %v13835_v47 = vadd.f32 %v13276_v52, %v13076_v49  ;;  %v13871_v52 = vadd.f32 %v13317_v4, %v13683_v61 }
 0x17e   : > { %18370 = vst [vmem:[#allocation87_spill] sm:$0xff] %v13718_v54  ;;  %18371 = vst [vmem:[#allocation88_spill] sm:$0xff] %v13720_v6  ;;  %v13740_v54 = vpop.f32.mrb[67].mxu1  ;;  %v13770_v6 = vadd.f32 %v13227_v31, %v13683_v61  ;;  %v13782_v31 = vadd.f32 %v13229_v32, %v13689_v25  ;;  %v13800_v32 = vadd.f32 %v13257_v41, %v13683_v61 }
 0x17f   : > { %18372 = vst [vmem:[#allocation89_spill] sm:$0xff] %v13738_v19  ;;  %18373 = vst [vmem:[#allocation90_spill] sm:$0xff] %v13744_v13  ;;  %v13758_v19 = vadd.f32 %v13223_v29, %v13076_v49  ;;  %10589 = vmatmul.mubr.msk.bf16.gmra.mrb[172].mxu0 %vm718_vm1, %v12383_v34  ;;  %10616 = vmatmul.mubr.msk.bf16.gmra.mrb[172].mxu1 %vm718_vm1, %v12383_v34  ;;  %v13791_v34 = vadd.f32 %v13255_v40, %v13679_v55 }
 0x180   : > { %18374 = vst [vmem:[#allocation91_spill] sm:$0xff] %v13748_v15  ;;  %18375 = vst [vmem:[#allocation92_spill] sm:$0xff] %v13752_v14  ;;  %2076 = vmatprep.mubr.bf16.mxu0 %v18298_v18  ;;  %2369 = vmatprep.mubr.bf16.mxu1 %v18298_v18  ;;  %v13810_v40 = vadd.f32 %v13265_v45, %v13689_v25  ;;  %v13827_v29 = vadd.f32 %v13274_v51, %v13689_v25  ;;  %v12391_v14 = vld [vmem:[%s13004_s15 + $0x98] sm:$0xff]  }
 0x181   : > { %18376 = vst [vmem:[#allocation93_spill] sm:$0xff] %v13758_v19  ;;  %18377 = vst [vmem:[#allocation94_spill] sm:$0xff] %v13765_v27  ;;  %v13823_v19 = vadd.f32 %v13270_v48, %v13679_v55  ;;  %v13831_v45 = vadd.f32 %v13272_v50, %v13683_v61  ;;  %v13844_v48 = vadd.f32 %v13300_v59, %v13679_v55 }
 0x182   : > { %18378 = vst [vmem:[#allocation95_spill] sm:$0xff] %v13770_v6  ;;  %18379 = vst [vmem:[#allocation96_spill] sm:$0xff] %v13782_v31  ;;  %v13785_v42 = vpop.f32.mrb[68].mxu0  ;;  %v13787_v53 = vpop.f32.mrb[68].mxu1  ;;  %v13848_v51 = vadd.f32 %v13310_v63, %v13689_v25  ;;  %v13852_v50 = vadd.f32 %v13302_v60, %v13683_v61  ;;  %v13859_v27 = vadd.f32 %v13313_v1, %v13076_v49 }
 0x183   : > { %18380 = vst [vmem:[#allocation97_spill] sm:$0xff] %v13791_v34  ;;  %18381 = vst [vmem:[#allocation98_spill] sm:$0xff] %v13796_v16  ;;  %v13802_v24 = vpop.f32.mrb[69].mxu0  ;;  %v13805_v23 = vpop.f32.mrb[69].mxu1  ;;  %v13866_v60 = vadd.f32 %v13315_v3, %v13679_v55  ;;  %v13883_v4 = vadd.f32 %v13319_v5, %v13689_v25  ;;  %v13897_v59 = vadd.f32 %v13321_v8, %v13076_v49 }
 0x184   : > { %18382 = vst [vmem:[#allocation99_spill] sm:$0xff] %v13800_v32  ;;  %18383 = vst [vmem:[#allocation100_spill] sm:$0xff] %v13810_v40  ;;  %v13817_v15 = vpop.f32.mrb[70].mxu0  ;;  %v13819_v41 = vpop.f32.mrb[70].mxu1  ;;  %v13901_v5 = vadd.f32 %v13347_v22, %v13683_v61  ;;  %v13916_v8 = vadd.f32 %v13358_v35, %v13076_v49  ;;  %v13928_v1 = vadd.f32 %v13364_v38, %v13689_v25 }
 0x185   : > { %18384 = vst [vmem:[#allocation101_spill] sm:$0xff] %v13815_v33  ;;  %18385 = vst [vmem:[#allocation102_spill] sm:$0xff] %v13823_v19  ;;  %v13837_v30 = vpop.f32.mrb[71].mxu0  ;;  %v13839_v6 = vpop.f32.mrb[71].mxu1  ;;  %v13936_v35 = vadd.f32 %v13366_v39, %v13076_v49  ;;  %v13949_v38 = vadd.f32 %v13394_v58, %v13689_v25  ;;  %v13972_v39 = vadd.f32 %v13401_v9, %v13683_v61  ;;  %v18414_v58 = vld [vmem:[#allocation3_spill] sm:$0xff]  ;;  %v18468_v33 = vld [vmem:[#allocation29_spill] sm:$0xff] }
 0x186   : > { %18386 = vst [vmem:[#allocation103_spill] sm:$0xff] %v13827_v29  ;;  %18387 = vst [vmem:[#allocation104_spill] sm:$0xff] %v13831_v45  ;;  %v13984_v9 = vadd.f32 %v13403_v11, %v13689_v25  ;;  %v14002_v11 = vadd.f32 %v18414_v58, %v13683_v61  ;;  %v18438_v29 = vld [vmem:[#allocation15_spill] sm:$0xff] }
 0x187   : > { %18388 = vst [vmem:[#allocation105_spill] sm:$0xff] %v13835_v47  ;;  %18389 = vst [vmem:[#allocation106_spill] sm:$0xff] %v13844_v48  ;;  %10590 = vmatmul.mubr.msk.bf16.gmra.mrb[176].mxu0 %vm718_vm1, %v12384_v43  ;;  %10617 = vmatmul.mubr.msk.bf16.gmra.mrb[176].mxu1 %vm718_vm1, %v12384_v43  ;;  %v13892_v43 = vadd.f32 %v13345_v21, %v13679_v55  ;;  %v13911_v21 = vadd.f32 %v13355_v28, %v13689_v25  ;;  %v18444_v47 = vld [vmem:[#allocation17_spill] sm:$0xff] }
 0x188   : > { %18390 = vst [vmem:[#allocation107_spill] sm:$0xff] %v13848_v51  ;;  %18391 = vst [vmem:[#allocation108_spill] sm:$0xff] %v13852_v50  ;;  %2086 = vmatprep.mubr.bf16.mxu0 %v18298_v18  ;;  %2379 = vmatprep.mubr.bf16.mxu1 %v18298_v18  ;;  %v13924_v51 = vadd.f32 %v13360_v36, %v13679_v55  ;;  %v13932_v28 = vadd.f32 %v13362_v37, %v13683_v61 }
 0x189   : > { %18392 = vst [vmem:[#allocation109_spill] sm:$0xff] %v13859_v27  ;;  %18393 = vst [vmem:[#allocation110_spill] sm:$0xff] %v13866_v60  ;;  %v13945_v36 = vadd.f32 %v13390_v56, %v13679_v55  ;;  %v13953_v37 = vadd.f32 %v13392_v57, %v13683_v61  ;;  %v13960_v60 = vadd.f32 %v13397_v62, %v13076_v49  ;;  %v12398_v27 = vld [vmem:[%s13004_s15 + $0xa0] sm:$0xff]  }
 0x18a   : > { %18394 = vst [vmem:[#allocation111_spill] sm:$0xff] %v13871_v52  ;;  %18395 = vst [vmem:[#allocation112_spill] sm:$0xff] %v13883_v4  ;;  %v13886_v32 = vpop.f32.mrb[72].mxu0  ;;  %v13888_v40 = vpop.f32.mrb[72].mxu1  ;;  %v13967_v57 = vadd.f32 %v13399_v0, %v13679_v55  ;;  %v13998_v56 = vadd.f32 %v13405_v17, %v13076_v49  ;;  %v18418_v17 = vld [vmem:[#allocation5_spill] sm:$0xff] }
 0x18b   : > { %18396 = vst [vmem:[#allocation113_spill] sm:$0xff] %v13892_v43  ;;  %18397 = vst [vmem:[#allocation114_spill] sm:$0xff] %v13897_v59  ;;  %v13903_v63 = vpop.f32.mrb[73].mxu0  ;;  %v13906_v13 = vpop.f32.mrb[73].mxu1  ;;  %v18426_v0 = vld [vmem:[#allocation9_spill] sm:$0xff] }
 0x18c   : > { %18398 = vst [vmem:[#allocation115_spill] sm:$0xff] %v13901_v5  ;;  %18399 = vst [vmem:[#allocation116_spill] sm:$0xff] %v13911_v21  ;;  %v13918_v50 = vpop.f32.mrb[74].mxu0  ;;  %v13920_v22 = vpop.f32.mrb[74].mxu1 }
 0x18d   : > { %18400 = vst [vmem:[#allocation117_spill] sm:$0xff] %v13916_v8  ;;  %18401 = vst [vmem:[#allocation118_spill] sm:$0xff] %v13924_v51  ;;  %v13938_v3 = vpop.f32.mrb[75].mxu0  ;;  %v13940_v52 = vpop.f32.mrb[75].mxu1  ;;  %v18434_v8 = vld [vmem:[#allocation13_spill] sm:$0xff] }
 0x18e   : > { %18402 = vst [vmem:[#allocation119_spill] sm:$0xff] %v13928_v1  ;;  %18403 = vst [vmem:[#allocation120_spill] sm:$0xff] %v13932_v28  ;;  %v18420_v1 = vld [vmem:[#allocation6_spill] sm:$0xff] }
 0x18f   : > { %18404 = vst [vmem:[#allocation121_spill] sm:$0xff] %v13936_v35  ;;  %18405 = vst [vmem:[#allocation122_spill] sm:$0xff] %v13945_v36  ;;  %10591 = vmatmul.mubr.msk.bf16.gmra.mrb[180].mxu0 %vm718_vm1, %v12391_v14  ;;  %10618 = vmatmul.mubr.msk.bf16.gmra.mrb[180].mxu1 %vm718_vm1, %v12391_v14  ;;  %v13993_v14 = vadd.f32 %v13423_v26, %v13679_v55  ;;  %v18416_v26 = vld [vmem:[#allocation4_spill] sm:$0xff]  ;;  %v14025_v35 = vadd.f32 %v18420_v1, %v13679_v55  ;;  %v18428_v1 = vld [vmem:[#allocation10_spill] sm:$0xff] }
 0x190   : > { %18406 = vst [vmem:[#allocation123_spill] sm:$0xff] %v13949_v38  ;;  %18407 = vst [vmem:[#allocation124_spill] sm:$0xff] %v13953_v37  ;;  %2096 = vmatprep.mubr.bf16.mxu0 %v18298_v18  ;;  %2389 = vmatprep.mubr.bf16.mxu1 %v18298_v18  ;;  %v14012_v38 = vadd.f32 %v18416_v26, %v13689_v25  ;;  %v18422_v37 = vld [vmem:[#allocation8_spill] sm:$0xff]  ;;  %v18424_v26 = vld [vmem:[#allocation7_spill] sm:$0xff]  ;;  %v14046_v43 = vadd.f32 %v18428_v1, %v13679_v55 }
 0x191   : > { %18408 = vst [vmem:[#allocation125_spill] sm:$0xff] %v13960_v60  ;;  %18409 = vst [vmem:[#allocation126_spill] sm:$0xff] %v13967_v57  ;;  %v14017_v60 = vadd.f32 %v18418_v17, %v13076_v49  ;;  %v14029_v57 = vadd.f32 %v18422_v37, %v13689_v25  ;;  %v14033_v28 = vadd.f32 %v18424_v26, %v13683_v61  ;;  %v18430_v37 = vld [vmem:[#allocation12_spill] sm:$0xff]  ;;  %v18432_v26 = vld [vmem:[#allocation11_spill] sm:$0xff] }
 0x192   : > { %18410 = vst [vmem:[#allocation127_spill] sm:$0xff] %v13972_v39  ;;  %18411 = vst [vmem:[#allocation128_spill] sm:$0xff] %v13984_v9  ;;  %v13987_v5 = vpop.f32.mrb[76].mxu0  ;;  %v13989_v21 = vpop.f32.mrb[76].mxu1  ;;  %v14037_v17 = vadd.f32 %v18426_v0, %v13076_v49  ;;  %v14050_v4 = vadd.f32 %v18430_v37, %v13689_v25  ;;  %v14054_v59 = vadd.f32 %v18432_v26, %v13683_v61  ;;  %v18436_v37 = vld [vmem:[#allocation14_spill] sm:$0xff]  ;;  %v18446_v0 = vld [vmem:[#allocation19_spill] sm:$0xff] }
 0x193   : > { %18412 = vst [vmem:[#allocation129_spill] sm:$0xff] %v13993_v14  ;;  %18413 = vst [vmem:[#allocation130_spill] sm:$0xff] %v13998_v56  ;;  %v14004_v48 = vpop.f32.mrb[77].mxu0  ;;  %v14007_v62 = vpop.f32.mrb[77].mxu1  ;;  %v14061_v9 = vadd.f32 %v18434_v8, %v13076_v49  ;;  %v14068_v26 = vadd.f32 %v18436_v37, %v13679_v55  ;;  %v14073_v14 = vadd.f32 %v18438_v29, %v13683_v61  ;;  %v18440_v29 = vld [vmem:[#allocation16_spill] sm:$0xff]  ;;  %v18458_v37 = vld [vmem:[#allocation25_spill] sm:$0xff] }
 0x194   : > { %18415 = vst [vmem:[#allocation3_spill] sm:$0xff] %v14002_v11  ;;  %18417 = vst [vmem:[#allocation4_spill] sm:$0xff] %v14012_v38  ;;  %v14019_v36 = vpop.f32.mrb[78].mxu0  ;;  %v14021_v58 = vpop.f32.mrb[78].mxu1  ;;  %v14085_v38 = vadd.f32 %v18440_v29, %v13689_v25  ;;  %v14099_v1 = vadd.f32 %v18444_v47, %v13076_v49  ;;  %v14103_v29 = vadd.f32 %v18446_v0, %v13683_v61  ;;  %v18450_v47 = vld [vmem:[#allocation21_spill] sm:$0xff] }
 0x195   : > { %18419 = vst [vmem:[#allocation5_spill] sm:$0xff] %v14017_v60  ;;  %18421 = vst [vmem:[#allocation6_spill] sm:$0xff] %v14025_v35  ;;  %v14039_v39 = vpop.f32.mrb[79].mxu0  ;;  %v14041_v51 = vpop.f32.mrb[79].mxu1  ;;  %v12399_v60 = vld [vmem:[%s13004_s15 + $0xa8] sm:$0xff]  }
 0x196   : > { %18423 = vst [vmem:[#allocation8_spill] sm:$0xff] %v14029_v57  ;;  %18425 = vst [vmem:[#allocation7_spill] sm:$0xff] %v14033_v28  ;;  %v18452_v28 = vld [vmem:[#allocation22_spill] sm:$0xff] }
 0x197   : > { %18427 = vst [vmem:[#allocation9_spill] sm:$0xff] %v14037_v17  ;;  %18429 = vst [vmem:[#allocation10_spill] sm:$0xff] %v14046_v43  ;;  %10592 = vmatmul.mubr.msk.bf16.gmra.mrb[184].mxu0 %vm718_vm1, %v12398_v27  ;;  %10619 = vmatmul.mubr.msk.bf16.gmra.mrb[184].mxu1 %vm718_vm1, %v12398_v27  ;;  %v18442_v27 = vld [vmem:[#allocation18_spill] sm:$0xff]  ;;  %v14126_v35 = vadd.f32 %v18452_v28, %v13679_v55  ;;  %v18454_v43 = vld [vmem:[#allocation24_spill] sm:$0xff] }
 0x198   : > { %18431 = vst [vmem:[#allocation12_spill] sm:$0xff] %v14050_v4  ;;  %18433 = vst [vmem:[#allocation11_spill] sm:$0xff] %v14054_v59  ;;  %2106 = vmatprep.mubr.bf16.mxu0 %v18298_v18  ;;  %2399 = vmatprep.mubr.bf16.mxu1 %v18298_v18  ;;  %v14094_v8 = vadd.f32 %v18442_v27, %v13679_v55  ;;  %v18448_v27 = vld [vmem:[#allocation20_spill] sm:$0xff]  ;;  %v18462_v28 = vld [vmem:[#allocation26_spill] sm:$0xff] }
 0x199   : > { %18435 = vst [vmem:[#allocation13_spill] sm:$0xff] %v14061_v9  ;;  %18437 = vst [vmem:[#allocation14_spill] sm:$0xff] %v14068_v26  ;;  %v14113_v57 = vadd.f32 %v18448_v27, %v13689_v25  ;;  %v14118_v9 = vadd.f32 %v18450_v47, %v13076_v49  ;;  %v14130_v26 = vadd.f32 %v18454_v43, %v13689_v25  ;;  %v18456_v27 = vld [vmem:[#allocation23_spill] sm:$0xff]  ;;  %v18464_v43 = vld [vmem:[#allocation28_spill] sm:$0xff] }
 0x19a   : > { %18439 = vst [vmem:[#allocation15_spill] sm:$0xff] %v14073_v14  ;;  %18441 = vst [vmem:[#allocation16_spill] sm:$0xff] %v14085_v38  ;;  %v14088_v11 = vpop.f32.mrb[80].mxu0  ;;  %v14090_v56 = vpop.f32.mrb[80].mxu1  ;;  %v14134_v45 = vadd.f32 %v18456_v27, %v13683_v61  ;;  %v14138_v47 = vadd.f32 %v18458_v37, %v13076_v49  ;;  %v14147_v34 = vadd.f32 %v18462_v28, %v13679_v55  ;;  %v18466_v27 = vld [vmem:[#allocation27_spill] sm:$0xff] }
 0x19b   : > { %18443 = vst [vmem:[#allocation18_spill] sm:$0xff] %v14094_v8  ;;  %18445 = vst [vmem:[#allocation17_spill] sm:$0xff] %v14099_v1  ;;  %v14105_v4 = vpop.f32.mrb[81].mxu0  ;;  %v14108_v59 = vpop.f32.mrb[81].mxu1  ;;  %v14151_v31 = vadd.f32 %v18464_v43, %v13689_v25  ;;  %v14155_v16 = vadd.f32 %v18466_v27, %v13683_v61  ;;  %v14162_v38 = vadd.f32 %v18468_v33, %v13076_v49  ;;  %v18470_v43 = vld [vmem:[#allocation30_spill] sm:$0xff]  ;;  %v18481_v37 = vld [vmem:[#allocation35_spill] sm:$0xff] }
 0x19c   : > { %18447 = vst [vmem:[#allocation19_spill] sm:$0xff] %v14103_v29  ;;  %18449 = vst [vmem:[#allocation20_spill] sm:$0xff] %v14113_v57  ;;  %v14120_v17 = vpop.f32.mrb[82].mxu0  ;;  %v14122_v0 = vpop.f32.mrb[82].mxu1  ;;  %v14169_v27 = vadd.f32 %v18470_v43, %v13679_v55  ;;  %v18497_v43 = vld [vmem:[#allocation41_spill] sm:$0xff] }
 0x19d   : > { %18451 = vst [vmem:[#allocation21_spill] sm:$0xff] %v14118_v9  ;;  %18453 = vst [vmem:[#allocation22_spill] sm:$0xff] %v14126_v35  ;;  %v14140_v14 = vpop.f32.mrb[83].mxu0  ;;  %v14142_v19 = vpop.f32.mrb[83].mxu1  ;;  %v12406_v9 = vld [vmem:[%s13004_s15 + $0xb0] sm:$0xff]  }
 0x19e   : > { %18455 = vst [vmem:[#allocation24_spill] sm:$0xff] %v14130_v26  ;;  %18457 = vst [vmem:[#allocation23_spill] sm:$0xff] %v14134_v45  ;;  %v18491_v45 = vld [vmem:[#allocation38_spill] sm:$0xff] }
 0x19f   : > { %18459 = vst [vmem:[#allocation25_spill] sm:$0xff] %v14138_v47  ;;  %18460 = vst [vmem:[#allocation131_spill] sm:$0xff] %v14140_v14  ;;  %10593 = vmatmul.mubr.msk.bf16.gmra.mrb[188].mxu0 %vm718_vm1, %v12399_v60  ;;  %10620 = vmatmul.mubr.msk.bf16.gmra.mrb[188].mxu1 %vm718_vm1, %v12399_v60  ;;  %v18472_v14 = vld [vmem:[#allocation31_spill] sm:$0xff]  ;;  %v18477_v60 = vld [vmem:[#allocation34_spill] sm:$0xff]  ;;  %v14227_v35 = vadd.f32 %v18491_v45, %v13679_v55  ;;  %v14248_v45 = vadd.f32 %v13564_v46, %v13679_v55 }
 0x1a0   : > { %18461 = vst [vmem:[#allocation132_spill] sm:$0xff] %v14142_v19  ;;  %18463 = vst [vmem:[#allocation26_spill] sm:$0xff] %v14147_v34  ;;  %v14174_v8 = vadd.f32 %v18472_v14, %v13683_v61  ;;  %2116 = vmatprep.mubr.bf16.mxu0 %v18298_v18  ;;  %2409 = vmatprep.mubr.bf16.mxu1 %v18298_v18  ;;  %v18474_v14 = vld [vmem:[#allocation32_spill] sm:$0xff]  ;;  %v14195_v33 = vadd.f32 %v18477_v60, %v13679_v55  ;;  %v18479_v19 = vld [vmem:[#allocation33_spill] sm:$0xff] }
 0x1a1   : > { %18465 = vst [vmem:[#allocation28_spill] sm:$0xff] %v14151_v31  ;;  %18467 = vst [vmem:[#allocation27_spill] sm:$0xff] %v14155_v16  ;;  %v14186_v57 = vadd.f32 %v18474_v14, %v13689_v25  ;;  %v14200_v28 = vadd.f32 %v18479_v19, %v13076_v49  ;;  %v14204_v14 = vadd.f32 %v18481_v37, %v13683_v61  ;;  %v18485_v60 = vld [vmem:[#allocation36_spill] sm:$0xff]  ;;  %v18487_v19 = vld [vmem:[#allocation37_spill] sm:$0xff] }
 0x1a2   : > { %18469 = vst [vmem:[#allocation29_spill] sm:$0xff] %v14162_v38  ;;  %18471 = vst [vmem:[#allocation30_spill] sm:$0xff] %v14169_v27  ;;  %v14189_v29 = vpop.f32.mrb[84].mxu0  ;;  %v14191_v1 = vpop.f32.mrb[84].mxu1  ;;  %v14214_v26 = vadd.f32 %v18485_v60, %v13689_v25  ;;  %v14219_v38 = vadd.f32 %v18487_v19, %v13076_v49  ;;  %v18493_v34 = vld [vmem:[#allocation40_spill] sm:$0xff]  ;;  %v18495_v60 = vld [vmem:[#allocation39_spill] sm:$0xff]  ;;  %v14239_v19 = vadd.f32 %v18497_v43, %v13076_v49 }
 0x1a3   : > { %18473 = vst [vmem:[#allocation31_spill] sm:$0xff] %v14174_v8  ;;  %18475 = vst [vmem:[#allocation32_spill] sm:$0xff] %v14186_v57  ;;  %v14206_v31 = vpop.f32.mrb[85].mxu0  ;;  %v14209_v16 = vpop.f32.mrb[85].mxu1  ;;  %v14231_v27 = vadd.f32 %v18493_v34, %v13689_v25  ;;  %v18502_v34 = vld [vmem:[#allocation43_spill] sm:$0xff]  ;;  %v18518_v46 = vld [vmem:[#allocation48_spill] sm:$0xff] }
 0x1a4   : > { %18476 = vst [vmem:[#allocation133_spill] sm:$0xff] %v14191_v1  ;;  %18478 = vst [vmem:[#allocation34_spill] sm:$0xff] %v14195_v33  ;;  %v14221_v47 = vpop.f32.mrb[86].mxu0  ;;  %v14223_v37 = vpop.f32.mrb[86].mxu1  ;;  %v18520_v43 = vld [vmem:[#allocation50_spill] sm:$0xff] }
 0x1a5   : > { %18480 = vst [vmem:[#allocation33_spill] sm:$0xff] %v14200_v28  ;;  %18482 = vst [vmem:[#allocation35_spill] sm:$0xff] %v14204_v14  ;;  %v14241_v8 = vpop.f32.mrb[87].mxu0 }
 0x1a6   : > { %18483 = vst [vmem:[#allocation134_spill] sm:$0xff] %v14206_v31  ;;  %18484 = vst [vmem:[#allocation135_spill] sm:$0xff] %v14209_v16  ;;  %v14235_v31 = vadd.f32 %v18495_v60, %v13683_v61  ;;  %v14252_v16 = vadd.f32 %v18502_v34, %v13689_v25  ;;  %v18504_v60 = vld [vmem:[#allocation42_spill] sm:$0xff]  ;;  %v18508_v34 = vld [vmem:[#allocation45_spill] sm:$0xff] }
 0x1a7   : > { %18486 = vst [vmem:[#allocation36_spill] sm:$0xff] %v14214_v26  ;;  %18488 = vst [vmem:[#allocation37_spill] sm:$0xff] %v14219_v38  ;;  %v14256_v1 = vadd.f32 %v18504_v60, %v13683_v61  ;;  %10594 = vmatmul.mubr.msk.bf16.gmra.mrb[192].mxu0 %vm718_vm1, %v12406_v9  ;;  %10621 = vmatmul.mubr.msk.bf16.gmra.mrb[192].mxu1 %vm718_vm1, %v12406_v9  ;;  %v14270_v60 = vadd.f32 %v18508_v34, %v13679_v55  ;;  %v18516_v9 = vld [vmem:[#allocation49_spill] sm:$0xff]  ;;  %v18536_v34 = vld [vmem:[#allocation56_spill] sm:$0xff] }
 0x1a8   : > { %18489 = vst [vmem:[#allocation136_spill] sm:$0xff] %v14221_v47  ;;  %18490 = vst [vmem:[#allocation137_spill] sm:$0xff] %v14223_v37  ;;  %v14243_v47 = vpop.f32.mrb[87].mxu1  ;;  %v18506_v37 = vld [vmem:[#allocation44_spill] sm:$0xff]  ;;  %2126 = vmatprep.mubr.bf16.mxu0 %v18298_v18  ;;  %2419 = vmatprep.mubr.bf16.mxu1 %v18298_v18  ;;  %v12407_v26 = vld [vmem:[%s13004_s15 + $0xb8] sm:$0xff]  }
 0x1a9   : > { %18492 = vst [vmem:[#allocation38_spill] sm:$0xff] %v14227_v35  ;;  %18494 = vst [vmem:[#allocation40_spill] sm:$0xff] %v14231_v27  ;;  %v14263_v57 = vadd.f32 %v18506_v37, %v13076_v49  ;;  %v14296_v37 = vadd.f32 %v18516_v9, %v13679_v55  ;;  %v18524_v9 = vld [vmem:[#allocation51_spill] sm:$0xff] }
 0x1aa   : > { %18496 = vst [vmem:[#allocation39_spill] sm:$0xff] %v14235_v31  ;;  %18498 = vst [vmem:[#allocation41_spill] sm:$0xff] %v14239_v19  ;;  %v14290_v38 = vpop.f32.mrb[88].mxu0  ;;  %v14292_v28 = vpop.f32.mrb[88].mxu1  ;;  %v14315_v27 = vadd.f32 %v18524_v9, %v13689_v25  ;;  %v18530_v31 = vld [vmem:[#allocation53_spill] sm:$0xff]  ;;  %v18534_v9 = vld [vmem:[#allocation54_spill] sm:$0xff] }
 0x1ab   : > { %18499 = vst [vmem:[#allocation138_spill] sm:$0xff] %v14241_v8  ;;  %18500 = vst [vmem:[#allocation139_spill] sm:$0xff] %v14243_v47  ;;  %v18510_v8 = vld [vmem:[#allocation46_spill] sm:$0xff]  ;;  %v14301_v47 = vadd.f32 %v18518_v46, %v13076_v49  ;;  %v18526_v46 = vld [vmem:[#allocation52_spill] sm:$0xff]  ;;  %v14328_v35 = vadd.f32 %v18530_v31, %v13679_v55 }
 0x1ac   : > { %18501 = vst [vmem:[#allocation140_spill] sm:$0xff] %v14248_v45  ;;  %18503 = vst [vmem:[#allocation43_spill] sm:$0xff] %v14252_v16  ;;  %v14275_v33 = vadd.f32 %v18510_v8, %v13683_v61  ;;  %v18512_v8 = vld [vmem:[#allocation47_spill] sm:$0xff]  ;;  %v14307_v16 = vpop.f32.mrb[89].mxu0  ;;  %v18540_v31 = vld [vmem:[#allocation57_spill] sm:$0xff] }
 0x1ad   : > { %18505 = vst [vmem:[#allocation42_spill] sm:$0xff] %v14256_v1  ;;  %18507 = vst [vmem:[#allocation44_spill] sm:$0xff] %v14263_v57  ;;  %v14287_v14 = vadd.f32 %v18512_v8, %v13689_v25  ;;  %v14305_v8 = vadd.f32 %v18520_v43, %v13683_v61  ;;  %v14310_v1 = vpop.f32.mrb[89].mxu1  ;;  %v14320_v57 = vadd.f32 %v18526_v46, %v13076_v49  ;;  %v14322_v19 = vpop.f32.mrb[90].mxu0  ;;  %v18532_v45 = vld [vmem:[#allocation55_spill] sm:$0xff] }
 0x1ae   : > { %18509 = vst [vmem:[#allocation45_spill] sm:$0xff] %v14270_v60  ;;  %18511 = vst [vmem:[#allocation46_spill] sm:$0xff] %v14275_v33  ;;  %v14324_v43 = vpop.f32.mrb[90].mxu1  ;;  %v14332_v60 = vadd.f32 %v18532_v45, %v13689_v25  ;;  %v14340_v46 = vadd.f32 %v18536_v34, %v13076_v49  ;;  %v14342_v33 = vpop.f32.mrb[91].mxu0  ;;  %v18542_v45 = vld [vmem:[#allocation59_spill] sm:$0xff]  ;;  %v18560_v34 = vld [vmem:[#allocation66_spill] sm:$0xff] }
 0x1af   : > { %18513 = vst [vmem:[#allocation47_spill] sm:$0xff] %v14287_v14  ;;  %18514 = vst [vmem:[#allocation141_spill] sm:$0xff] %v14290_v38  ;;  %10595 = vmatmul.mubr.msk.bf16.gmra.mrb[196].mxu0 %vm718_vm1, %v12407_v26  ;;  %10622 = vmatmul.mubr.msk.bf16.gmra.mrb[196].mxu1 %vm718_vm1, %v12407_v26  ;;  %v18556_v26 = vld [vmem:[#allocation65_spill] sm:$0xff] }
 0x1b0   : > { %18515 = vst [vmem:[#allocation142_spill] sm:$0xff] %v14292_v28  ;;  %18517 = vst [vmem:[#allocation49_spill] sm:$0xff] %v14296_v37  ;;  %v14353_v28 = vadd.f32 %v18542_v45, %v13689_v25  ;;  %v18548_v45 = vld [vmem:[#allocation61_spill] sm:$0xff]  ;;  %2136 = vmatprep.mubr.bf16.mxu0 %v18298_v18  ;;  %2429 = vmatprep.mubr.bf16.mxu1 %v18298_v18 }
 0x1b1   : > { %18519 = vst [vmem:[#allocation48_spill] sm:$0xff] %v14301_v47  ;;  %18521 = vst [vmem:[#allocation50_spill] sm:$0xff] %v14305_v8 }
 0x1b2   : > { %18522 = vst [vmem:[#allocation143_spill] sm:$0xff] %v14307_v16  ;;  %18523 = vst [vmem:[#allocation144_spill] sm:$0xff] %v14310_v1  ;;  %v14336_v16 = vadd.f32 %v18534_v9, %v13683_v61  ;;  %v14349_v1 = vadd.f32 %v18540_v31, %v13679_v55  ;;  %v18544_v9 = vld [vmem:[#allocation58_spill] sm:$0xff]  ;;  %v14391_v8 = vpop.f32.mrb[92].mxu0 }
 0x1b3   : > { %18525 = vst [vmem:[#allocation51_spill] sm:$0xff] %v14315_v27  ;;  %18527 = vst [vmem:[#allocation52_spill] sm:$0xff] %v14320_v57  ;;  %v14357_v38 = vadd.f32 %v18544_v9, %v13683_v61  ;;  %v14371_v9 = vadd.f32 %v18548_v45, %v13679_v55  ;;  %v12414_v57 = vld [vmem:[%s13004_s15 + $0xc0] sm:$0xff]  }
 0x1b4   : > { %18528 = vst [vmem:[#allocation145_spill] sm:$0xff] %v14322_v19  ;;  %18529 = vst [vmem:[#allocation146_spill] sm:$0xff] %v14324_v43  ;;  %v14344_v19 = vpop.f32.mrb[91].mxu1  ;;  %v18546_v43 = vld [vmem:[#allocation60_spill] sm:$0xff] }
 0x1b5   : > { %18531 = vst [vmem:[#allocation53_spill] sm:$0xff] %v14328_v35  ;;  %18533 = vst [vmem:[#allocation55_spill] sm:$0xff] %v14332_v60  ;;  %v14364_v14 = vadd.f32 %v18546_v43, %v13076_v49  ;;  %v14393_v47 = vpop.f32.mrb[92].mxu1  ;;  %v14397_v43 = vadd.f32 %v18556_v26, %v13679_v55  ;;  %v18571_v26 = vld [vmem:[#allocation72_spill] sm:$0xff] }
 0x1b6   : > { %18535 = vst [vmem:[#allocation54_spill] sm:$0xff] %v14336_v16  ;;  %18537 = vst [vmem:[#allocation56_spill] sm:$0xff] %v14340_v46 }
 0x1b7   : > { %18538 = vst [vmem:[#allocation147_spill] sm:$0xff] %v14342_v33  ;;  %18539 = vst [vmem:[#allocation148_spill] sm:$0xff] %v14344_v19  ;;  %v18550_v33 = vld [vmem:[#allocation62_spill] sm:$0xff]  ;;  %v18558_v19 = vld [vmem:[#allocation64_spill] sm:$0xff]  ;;  %10596 = vmatmul.mubr.msk.bf16.gmra.mrb[200].mxu0 %vm718_vm1, %v12414_v57  ;;  %10623 = vmatmul.mubr.msk.bf16.gmra.mrb[200].mxu1 %vm718_vm1, %v12414_v57 }
 0x1b8   : > { %18541 = vst [vmem:[#allocation57_spill] sm:$0xff] %v14349_v1  ;;  %18543 = vst [vmem:[#allocation59_spill] sm:$0xff] %v14353_v28  ;;  %v14376_v37 = vadd.f32 %v18550_v33, %v13683_v61  ;;  %v18552_v33 = vld [vmem:[#allocation63_spill] sm:$0xff]  ;;  %v14402_v31 = vadd.f32 %v18558_v19, %v13076_v49  ;;  %v14408_v28 = vpop.f32.mrb[93].mxu0  ;;  %2146 = vmatprep.mubr.bf16.mxu0 %v18298_v18  ;;  %2439 = vmatprep.mubr.bf16.mxu1 %v18298_v18 }
 0x1b9   : > { %18545 = vst [vmem:[#allocation58_spill] sm:$0xff] %v14357_v38  ;;  %18547 = vst [vmem:[#allocation60_spill] sm:$0xff] %v14364_v14  ;;  %v14388_v27 = vadd.f32 %v18552_v33, %v13689_v25  ;;  %v14406_v33 = vadd.f32 %v18560_v34, %v13683_v61  ;;  %v18564_v38 = vld [vmem:[#allocation68_spill] sm:$0xff]  ;;  %v14419_v14 = vpop.f32.mrb[94].mxu0  ;;  %v18568_v34 = vld [vmem:[#allocation67_spill] sm:$0xff] }
 0x1ba   : > { %18549 = vst [vmem:[#allocation61_spill] sm:$0xff] %v14371_v9  ;;  %18551 = vst [vmem:[#allocation62_spill] sm:$0xff] %v14376_v37  ;;  %v14417_v45 = vadd.f32 %v18564_v38, %v13076_v49  ;;  %v14425_v1 = vadd.f32 %v18568_v34, %v13689_v25  ;;  %v14437_v38 = vadd.f32 %v18571_v26, %v13076_v49  ;;  %v14439_v37 = vpop.f32.mrb[95].mxu0  ;;  %v18580_v26 = vld [vmem:[#allocation75_spill] sm:$0xff] }
 0x1bb   : > { %18553 = vst [vmem:[#allocation63_spill] sm:$0xff] %v14388_v27  ;;  %18554 = vst [vmem:[#allocation149_spill] sm:$0xff] %v14391_v8  ;;  %v14411_v8 = vpop.f32.mrb[93].mxu1  ;;  %v14458_v16 = vadd.f32 %v18580_v26, %v13076_v49  ;;  %v14492_v35 = vpop.f32.mrb[96].mxu0 }
 0x1bc   : > { %18555 = vst [vmem:[#allocation150_spill] sm:$0xff] %v14393_v47  ;;  %18557 = vst [vmem:[#allocation65_spill] sm:$0xff] %v14397_v43  ;;  %v14421_v19 = vpop.f32.mrb[94].mxu1  ;;  %v18570_v47 = vld [vmem:[#allocation70_spill] sm:$0xff]  ;;  %v14504_v26 = vpop.f32.mrb[97].mxu0 }
 0x1bd   : > { %18559 = vst [vmem:[#allocation64_spill] sm:$0xff] %v14402_v31  ;;  %18561 = vst [vmem:[#allocation66_spill] sm:$0xff] %v14406_v33  ;;  %v18586_v33 = vld [vmem:[#allocation79_spill] sm:$0xff] }
 0x1be   : > { %18562 = vst [vmem:[#allocation151_spill] sm:$0xff] %v14408_v28  ;;  %18563 = vst [vmem:[#allocation152_spill] sm:$0xff] %v14411_v8  ;;  %v18569_v28 = vld [vmem:[#allocation69_spill] sm:$0xff]  ;;  %v14433_v8 = vadd.f32 %v18570_v47, %v13683_v61  ;;  %v14454_v47 = vadd.f32 %v13656_v20, %v13683_v61  ;;  %v18583_v20 = vld [vmem:[#allocation76_spill] sm:$0xff]  ;;  %v14490_v31 = vadd.f32 %v18586_v33, %v13076_v49 }
 0x1bf   : > { %18565 = vst [vmem:[#allocation68_spill] sm:$0xff] %v14417_v45  ;;  %18566 = vst [vmem:[#allocation153_spill] sm:$0xff] %v14419_v14  ;;  %v14429_v60 = vadd.f32 %v18569_v28, %v13679_v55  ;;  %v14441_v14 = vpop.f32.mrb[95].mxu1  ;;  %v18577_v28 = vld [vmem:[#allocation73_spill] sm:$0xff]  ;;  %v14471_v27 = vadd.f32 %v18583_v20, %v13679_v55  ;;  %v18594_v33 = vld [vmem:[#allocation78_spill] sm:$0xff] }
 0x1c0   : > { %18567 = vst [vmem:[#allocation154_spill] sm:$0xff] %v14421_v19  ;;  %18572 = vst [vmem:[#allocation67_spill] sm:$0xff] %v14437_v38  ;;  %v18575_v19 = vld [vmem:[#allocation71_spill] sm:$0xff]  ;;  %v14450_v46 = vadd.f32 %v18577_v28, %v13679_v55  ;;  %v18582_v28 = vld [vmem:[#allocation74_spill] sm:$0xff]  ;;  %v14494_v57 = vpop.f32.mrb[96].mxu1 }
 0x1c1   : > { %18573 = vst [vmem:[#allocation69_spill] sm:$0xff] %v14439_v37  ;;  %18574 = vst [vmem:[#allocation70_spill] sm:$0xff] %v14441_v14  ;;  %v14445_v34 = vadd.f32 %v18575_v19, %v13689_v25  ;;  %v14467_v9 = vadd.f32 %v18582_v28, %v13689_v25  ;;  %v18584_v37 = vld [vmem:[#allocation77_spill] sm:$0xff]  ;;  %v18589_v19 = vld [vmem:[#allocation80_spill] sm:$0xff]  ;;  %v14507_v45 = vpop.f32.mrb[97].mxu1 }
 0x1c2   : > { %18578 = vst [vmem:[#allocation71_spill] sm:$0xff] %v14450_v46  ;;  %18579 = vst [vmem:[#allocation73_spill] sm:$0xff] %v14454_v47  ;;  %v14476_v43 = vadd.f32 %v18584_v37, %v13683_v61  ;;  %v14498_v28 = vadd.f32 %v18589_v19, %v13679_v55  ;;  %v18590_v14 = vld [vmem:[#allocation81_spill] sm:$0xff]  ;;  %v12421_v37 = vld [vmem:[%s13004_s15 + $0xc8] sm:$0xff]   ;;  %s12837_s15 = smov 32  }
 0x1c3   : > { %18576 = vst [vmem:[#allocation72_spill] sm:$0xff] %v14445_v34  ;;  %18581 = vst [vmem:[#allocation75_spill] sm:$0xff] %v14458_v16  ;;  %v14502_v20 = vadd.f32 %v18590_v14, %v13683_v61  ;;  %v14511_v16 = vadd.f32 %v18594_v33, %v13689_v25  ;;  %v18595_v47 = vld [vmem:[#allocation84_spill] sm:$0xff]  ;;  %v14520_v14 = vpop.f32.mrb[98].mxu0  ;;  %v18600_v33 = vld [vmem:[#allocation87_spill] sm:$0xff]  ;;  %10597 = vmatmul.mubr.msk.bf16.gmra.mrb[204].mxu0 %vm718_vm1, %v12421_v37  ;;  %10624 = vmatmul.mubr.msk.bf16.gmra.mrb[204].mxu1 %vm718_vm1, %v12421_v37 }
 0x1c4   : > { %18585 = vst [vmem:[#allocation74_spill] sm:$0xff] %v14476_v43  ;;  %18587 = vst [vmem:[#allocation76_spill] sm:$0xff] %v14492_v35  ;;  %v14518_v46 = vadd.f32 %v18595_v47, %v13076_v49  ;;  %v14530_v38 = vadd.f32 %v18600_v33, %v13679_v55  ;;  %v14538_v47 = vadd.f32 %v13740_v54, %v13076_v49  ;;  %v14540_v19 = vpop.f32.mrb[99].mxu0 }
 0x1c5   : > { %18588 = vst [vmem:[#allocation77_spill] sm:$0xff] %v14494_v57  ;;  %18591 = vst [vmem:[#allocation79_spill] sm:$0xff] %v14502_v20  ;;  %v18601_v57 = vld [vmem:[#allocation88_spill] sm:$0xff]  ;;  %v14550_v33 = vadd.f32 %v13785_v42, %v13679_v55  ;;  %v14559_v54 = vadd.f32 %v13805_v23, %v13076_v49  ;;  %v14597_v42 = vadd.f32 %v13886_v32, %v13679_v55 }
 0x1c6   : > { %18592 = vst [vmem:[#allocation80_spill] sm:$0xff] %v14504_v26  ;;  %18593 = vst [vmem:[#allocation81_spill] sm:$0xff] %v14507_v45  ;;  %v14522_v26 = vpop.f32.mrb[98].mxu1  ;;  %v18599_v45 = vld [vmem:[#allocation83_spill] sm:$0xff]  ;;  %v14534_v35 = vadd.f32 %v18601_v57, %v13683_v61  ;;  %v14555_v57 = vadd.f32 %v13787_v53, %v13683_v61  ;;  %v14572_v53 = vadd.f32 %v13817_v15, %v13679_v55 }
 0x1c7   : > { %18596 = vst [vmem:[#allocation78_spill] sm:$0xff] %v14518_v46  ;;  %18597 = vst [vmem:[#allocation84_spill] sm:$0xff] %v14520_v14  ;;  %v14526_v34 = vadd.f32 %v18599_v45, %v13689_v25  ;;  %v14542_v14 = vpop.f32.mrb[99].mxu1  ;;  %v14591_v46 = vpop.f32.mrb[100].mxu0  ;;  %v14616_v32 = vadd.f32 %v13906_v13, %v13076_v49  ;;  %v14632_v43 = vadd.f32 %v13920_v22, %v13683_v61 }
 0x1c8   : > { %18598 = vst [vmem:[#allocation155_spill] sm:$0xff] %v14522_v26  ;;  %18602 = vst [vmem:[#allocation83_spill] sm:$0xff] %v14540_v19  ;;  %v18604_v26 = vld [vmem:[#allocation89_spill] sm:$0xff]  ;;  %v14577_v19 = vadd.f32 %v13819_v41, %v13683_v61  ;;  %v14589_v41 = vadd.f32 %v13839_v6, %v13076_v49  ;;  %v14603_v20 = vpop.f32.mrb[101].mxu0  ;;  %v14609_v6 = vadd.f32 %v13837_v30, %v13689_v25 }
 0x1c9   : > { %18603 = vst [vmem:[#allocation87_spill] sm:$0xff] %v14542_v14  ;;  %v14546_v45 = vadd.f32 %v18604_v26, %v13689_v25  ;;  %v14568_v26 = vadd.f32 %v13802_v24, %v13689_v25  ;;  %18606 = vst [vmem:[#allocation89_spill] sm:$0xff] %v14591_v46  ;;  %v14593_v14 = vpop.f32.mrb[100].mxu1  ;;  %v14601_v24 = vadd.f32 %v13888_v40, %v13683_v61  ;;  %v14618_v40 = vpop.f32.mrb[102].mxu0 }
 0x1ca   : > { %18605 = vst [vmem:[#allocation88_spill] sm:$0xff] %v14589_v41  ;;  %18607 = vst [vmem:[#allocation156_spill] sm:$0xff] %v14593_v14  ;;  %v14605_v15 = vpop.f32.mrb[101].mxu1  ;;  %v14628_v30 = vadd.f32 %v13918_v50, %v13679_v55  ;;  %v14636_v13 = vadd.f32 %v13940_v52, %v13076_v49  ;;  %v14638_v37 = vpop.f32.mrb[103].mxu0  ;;  %v14648_v50 = vadd.f32 %v13987_v5, %v13679_v55 }
 0x1cb   : > { %18608 = vst [vmem:[#allocation157_spill] sm:$0xff] %v14597_v42  ;;  %18609 = vst [vmem:[#allocation158_spill] sm:$0xff] %v14601_v24  ;;  %v14620_v14 = vpop.f32.mrb[102].mxu1  ;;  %v14653_v22 = vadd.f32 %v13989_v21, %v13683_v61  ;;  %v14657_v52 = vadd.f32 %v14007_v62, %v13076_v49  ;;  %v14664_v5 = vadd.f32 %v14004_v48, %v13689_v25  ;;  %v1898_v46 = vpop.f32.mrb[104].mxu0 }
 0x1cc   : > { %18610 = vst [vmem:[#allocation159_spill] sm:$0xff] %v14603_v20  ;;  %18611 = vst [vmem:[#allocation160_spill] sm:$0xff] %v14605_v15  ;;  %v14624_v20 = vadd.f32 %v13903_v63, %v13689_v25  ;;  %v14640_v23 = vpop.f32.mrb[103].mxu1  ;;  %v14644_v63 = vadd.f32 %v13938_v3, %v13689_v25  ;;  %v14673_v62 = vadd.f32 %v14021_v58, %v13683_v61 }
 0x1cd   : > { %18612 = vst [vmem:[#allocation161_spill] sm:$0xff] %v14609_v6  ;;  %18613 = vst [vmem:[#allocation162_spill] sm:$0xff] %v14616_v32  ;;  %v14685_v58 = vadd.f32 %v14041_v51, %v13076_v49  ;;  %v14691_v48 = vadd.f32 %v14039_v39, %v13689_v25  ;;  %v18632_v32 = vld [vmem:[#allocation86_spill] sm:$0xff]  ;;  %v18634_v6 = vld [vmem:[#allocation85_spill] sm:$0xff] }
 0x1ce   : > { %18614 = vst [vmem:[#allocation163_spill] sm:$0xff] %v14618_v40  ;;  %18615 = vst [vmem:[#allocation164_spill] sm:$0xff] %v14620_v14  ;;  %v14668_v14 = vadd.f32 %v14019_v36, %v13679_v55 }
 0x1cf   : > { %18616 = vst [vmem:[#allocation165_spill] sm:$0xff] %v14624_v20  ;;  %18617 = vst [vmem:[#allocation166_spill] sm:$0xff] %v14628_v30 }
 0x1d0   : > { %18618 = vst [vmem:[#allocation167_spill] sm:$0xff] %v14632_v43  ;;  %18619 = vst [vmem:[#allocation168_spill] sm:$0xff] %v14636_v13  ;;  %v1900_v43 = vpop.f32.mrb[105].mxu0 }
 0x1d1   : > { %18620 = vst [vmem:[#allocation169_spill] sm:$0xff] %v14638_v37  ;;  %18621 = vst [vmem:[#allocation170_spill] sm:$0xff] %v14640_v23  ;;  %v2191_v37 = vpop.f32.mrb[104].mxu1  ;;  %v1899_v23 = vadd.f32 %v1898_v46, %v13679_v55  ;;  %v1901_v46 = vadd.f32 %v1900_v43, %v13689_v25 }
 0x1d2   : > { %18622 = vst [vmem:[#allocation171_spill] sm:$0xff] %v14644_v63  ;;  %18623 = vst [vmem:[#allocation172_spill] sm:$0xff] %v14648_v50  ;;  %v2192_v3 = vadd.f32 %v2191_v37, %v13683_v61  ;;  %v2193_v40 = vpop.f32.mrb[105].mxu1 }
 0x1d3   : > { %18624 = vst [vmem:[#allocation173_spill] sm:$0xff] %v14653_v22  ;;  %18625 = vst [vmem:[#allocation174_spill] sm:$0xff] %v14657_v52  ;;  %v2194_v51 = vadd.f32 %v2193_v40, %v13076_v49  ;;  %v1902_v52 = vpop.f32.mrb[106].mxu0  ;;  %v2195_v22 = vpop.f32.mrb[106].mxu1  ;;  %v2450_v50 = vmax.f32 %v1899_v23, 0.0  ;;  %v2451_v15 = vmax.f32 %v1901_v46, 0.0 }
 0x1d4   : > { %18626 = vst [vmem:[#allocation175_spill] sm:$0xff] %v14664_v5  ;;  %18627 = vst [vmem:[#allocation176_spill] sm:$0xff] %v14668_v14  ;;  %v2452_v37 = vmax.f32 %v2192_v3, 0.0  ;;  %v1903_v63 = vadd.f32 %v1902_v52, %v13679_v55  ;;  %v2196_v13 = vadd.f32 %v2195_v22, %v13683_v61  ;;  %v1904_v39 = vpop.f32.mrb[107].mxu0  ;;  %v2197_v30 = vpop.f32.mrb[107].mxu1  ;;  %v18629_v40 = vmax.f32 %v13699_v2, 0.0 }
 0x1d5   : > { %18628 = vst [vmem:[#allocation177_spill] sm:$0xff] %v14673_v62  ;;  %v2453_v20 = vmax.f32 %v2194_v51, 0.0  ;;  %v2198_v36 = vadd.f32 %v2197_v30, %v13076_v49  ;;  %v1905_v21 = vadd.f32 %v1904_v39, %v13689_v25  ;;  %v18630_v14 = vld [vmem:[#allocation82_spill] sm:$0xff]  ;;  %v18633_v52 = vmax.f32 %v18632_v32, 0.0  ;;  %v1908_v32 = vpop.f32.mrb[108].mxu0 }
 0x1d6   : > { %v2658_v62 = vmax.f32 %v18629_v40, %v2450_v50  ;;  %v18631_v5 = vmax.f32 %v18630_v14, 0.0  ;;  %v2454_v23 = vmax.f32 %v1903_v63, 0.0  ;;  %v2456_v3 = vmax.f32 %v2196_v13, 0.0  ;;  %v1910_v46 = vpop.f32.mrb[109].mxu0 }
 0x1d7   : > { %v2661_v24 = vmax.f32 %v18633_v52, %v2453_v20  ;;  %v2457_v22 = vmax.f32 %v2198_v36, 0.0  ;;  %v2455_v42 = vmax.f32 %v1905_v21, 0.0  ;;  %v18635_v51 = vmax.f32 %v18634_v6, 0.0  ;;  %v1912_v40 = vpop.f32.mrb[110].mxu0 }
 0x1d8   : > { %v2660_v43 = vmax.f32 %v18631_v5, %v2452_v37  ;;  %v14712_v30 = vadd.f32 %v14088_v11, %v13679_v55  ;;  %v18637_v50 = vmax.f32 %v13724_v7, 0.0  ;;  %v18638_v63 = vmax.f32 %v13732_v10, 0.0  ;;  %v2201_v5 = vpop.f32.mrb[108].mxu1 }
 0x1d9   : > { %v2659_v41 = vmax.f32 %v18635_v51, %v2451_v15  ;;  %v14721_v20 = vadd.f32 %v14090_v56, %v13683_v61  ;;  %v14725_v6 = vadd.f32 %v14108_v59, %v13076_v49  ;;  %v18640_v15 = vmax.f32 %v13736_v12, 0.0  ;;  %v2203_v37 = vpop.f32.mrb[109].mxu1  ;;  %v12428_v59 = vld [vmem:[%s18088_s4 + $0x100] ss:$8 sps:$4 sm:$0xff]   ;;  %v1914_v51 = vpop.f32.mrb[111].mxu0 }
 0x1da   : > { %18636 = vst [vmem:[#allocation82_spill] sm:$0xff] %v14712_v30  ;;  %v2662_v14 = vmax.f32 %v18637_v50, %v2454_v23  ;;  %v2664_v13 = vmax.f32 %v18638_v63, %v2456_v3  ;;  %v18641_v21 = vmax.f32 %v13728_v44, 0.0  ;;  %v2202_v10 = vadd.f32 %v2201_v5, %v13683_v61  ;;  %v2205_v23 = vpop.f32.mrb[110].mxu1  ;;  %v12431_v44 = vld [vmem:[%s18088_s4 + $0x2a0] ss:$8 sps:$4 sm:$0xff]  }
 0x1db   : > { %18639 = vst [vmem:[#allocation86_spill] sm:$0xff] %v14721_v20  ;;  %v2665_v11 = vmax.f32 %v18640_v15, %v2457_v22  ;;  %v1909_v39 = vadd.f32 %v1908_v32, %v13679_v55  ;;  %v2204_v12 = vadd.f32 %v2203_v37, %v13076_v49  ;;  %v2206_v22 = vadd.f32 %v2205_v23, %v13683_v61  ;;  %v2207_v50 = vpop.f32.mrb[111].mxu1  ;;  %v12439_v63 = vld [vmem:[%s18088_s4 + $0x2b4] ss:$8 sps:$4 sm:$0xff]  }
 0x1dc   : > { %v2663_v7 = vmax.f32 %v18641_v21, %v2455_v42  ;;  %v14731_v36 = vpack.c.bf16 %v2664_v13, %v2660_v43  ;;  %v2866_v56 = vpack.c.bf16 %v2662_v14, %v2658_v62  ;;  %v1911_v42 = vadd.f32 %v1910_v46, %v13689_v25  ;;  %v12436_v62 = vld [vmem:[%s18088_s4 + $0x114] ss:$8 sps:$4 sm:$0xff]   ;;  %v18644_v21 = vld [vmem:[#allocation90_spill] sm:$0xff] }
 0x1dd   : > { %v14746_v43 = vpack.c.bf16 %v2665_v11, %v2661_v24  ;;  %v2460_v52 = vmax.f32 %v2202_v10, 0.0  ;;  %v1913_v14 = vadd.f32 %v1912_v40, %v13679_v55  ;;  %v2461_v13 = vmax.f32 %v2204_v12, 0.0  ;;  %v18646_v46 = vld [vmem:[#allocation92_spill] sm:$0xff]  ;;  %v18648_v40 = vld [vmem:[#allocation93_spill] sm:$0xff] }
 0x1de   : > { %18642 = vst [vmem:[#allocation85_spill] sm:$0xff] %v14731_v36  ;;  %v2867_v3 = vpack.c.bf16 %v2663_v7, %v2659_v41  ;;  %v2458_v41 = vmax.f32 %v1909_v39, 0.0  ;;  %v2208_v15 = vadd.f32 %v2207_v50, %v13076_v49  ;;  %v1915_v24 = vadd.f32 %v1914_v51, %v13689_v25  ;;  %v18650_v50 = vld [vmem:[#allocation91_spill] sm:$0xff] }
 0x1df   : > { %18643 = vst [vmem:[#allocation178_spill] sm:$0xff] %v14746_v43  ;;  %v2459_v11 = vmax.f32 %v1911_v42, 0.0  ;;  %v2464_v32 = vmax.f32 %v2206_v22, 0.0  ;;  %v2462_v5 = vmax.f32 %v1913_v14, 0.0  ;;  %v18645_v7 = vmax.f32 %v18644_v21, 0.0  ;;  %v18652_v14 = vld [vmem:[#allocation94_spill] sm:$0xff] }
 0x1e0   : > { %3393 = vmatprep.mubr.bf16.mxu0 %v2867_v3  ;;  %4292 = vmatprep.mubr.bf16.mxu1 %v2867_v3  ;;  %v18647_v37 = vmax.f32 %v18646_v46, 0.0  ;;  %v18649_v23 = vmax.f32 %v18648_v40, 0.0  ;;  %v2465_v2 = vmax.f32 %v2208_v15, 0.0  ;;  %v2463_v3 = vmax.f32 %v1915_v24, 0.0  ;;  %v12437_v22 = vld [vmem:[%s18088_s4 + $0x2b0] ss:$8 sps:$4 sm:$0xff]  }
 0x1e1   : > { %3394 = vmatmul.mubr.bf16.vlgmr.msra.gmra.mrb[208].mxu0 %v2866_v56  ;;  %4293 = vmatmul.mubr.bf16.vlgmr.msra.gmra.mrb[208].mxu1 %v2866_v56  ;;  %v2666_v10 = vmax.f32 %v18645_v7, %v2458_v41  ;;  %v18651_v51 = vmax.f32 %v18650_v50, 0.0  ;;  %v12434_v56 = vld [vmem:[%s18088_s4 + $0x110] ss:$8 sps:$4 sm:$0xff]   ;;  %v14780_v15 = vadd.f32 %v14105_v4, %v13689_v25  ;;  %v18654_v24 = vld [vmem:[#allocation95_spill] sm:$0xff]  ;;  %v2211_v40 = vpop.f32.mrb[112].mxu1 }
 0x1e2   : > { %v2668_v39 = vmax.f32 %v18647_v37, %v2460_v52  ;;  %v2669_v12 = vmax.f32 %v18649_v23, %v2461_v13  ;;  %3655 = vmatpush1.bf16.msra.mxu0 %v12428_v59  ;;  %4554 = vmatpush1.bf16.msra.mxu1 %v12431_v44  ;;  %v18653_v52 = vmax.f32 %v18652_v14, 0.0  ;;  %v12442_v59 = vld [vmem:[%s18088_s4 + $0x124] ss:$8 sps:$4 sm:$0xff]   ;;  %v1918_v37 = vpop.f32.mrb[112].mxu0  ;;  %v18658_v23 = vld [vmem:[#allocation96_spill] sm:$0xff] }
 0x1e3   : > { %v2667_v42 = vmax.f32 %v18651_v51, %v2459_v11  ;;  %3656 = vmatprep.subr.bf16.mxu0 %v12436_v62  ;;  %4555 = vmatprep.subr.bf16.mxu1 %v12439_v63  ;;  %v12445_v44 = vld [vmem:[%s18088_s4 + $0x2c4] ss:$8 sps:$4 sm:$0xff]   ;;  %v18655_v11 = vmax.f32 %v18654_v24, 0.0  ;;  %v14786_v62 = vadd.f32 %v14120_v17, %v13679_v55  ;;  %v14790_v63 = vadd.f32 %v14122_v0, %v13683_v61  ;;  %v1920_v14 = vpop.f32.mrb[113].mxu0  ;;  %v12440_v0 = vld [vmem:[%s18088_s4 + $0x120] ss:$8 sps:$4 sm:$0xff]  }
 0x1e4   : > { %v2670_v41 = vmax.f32 %v18653_v52, %v2462_v5  ;;  %v18656_v5 = vld [vmem:[#allocation98_spill] sm:$0xff]  ;;  %v18659_v50 = vmax.f32 %v18658_v23, 0.0  ;;  %v2212_v51 = vadd.f32 %v2211_v40, %v13683_v61  ;;  %v1919_v17 = vadd.f32 %v1918_v37, %v13679_v55 }
 0x1e5   : > { %v2672_v21 = vmax.f32 %v18655_v11, %v2464_v32  ;;  %v18657_v7 = vmax.f32 %v18656_v5, 0.0  ;;  %v2213_v32 = vpop.f32.mrb[113].mxu1  ;;  %v1922_v5 = vpop.f32.mrb[114].mxu0 }
 0x1e6   : > { %v2671_v4 = vmax.f32 %v18659_v50, %v2463_v3  ;;  %v2870_v52 = vpack.c.bf16 %v2670_v41, %v2666_v10  ;;  %v2214_v3 = vadd.f32 %v2213_v32, %v13076_v49  ;;  %v1921_v10 = vadd.f32 %v1920_v14, %v13689_v25  ;;  %3657 = vmatpush1.bf16.msra.mxu0 %v12434_v56  ;;  %v12448_v41 = vld [vmem:[%s18088_s4 + $0x134] ss:$8 sps:$4 sm:$0xff]  }
 0x1e7   : > { %v2673_v46 = vmax.f32 %v18657_v7, %v2465_v2  ;;  %v12443_v2 = vld [vmem:[%s18088_s4 + $0x2c0] ss:$8 sps:$4 sm:$0xff]   ;;  %v14804_v24 = vpack.c.bf16 %v2672_v21, %v2668_v39  ;;  %v2215_v7 = vpop.f32.mrb[114].mxu1  ;;  %4556 = vmatpush1.bf16.msra.mxu1 %v12437_v22  ;;  %v2468_v37 = vmax.f32 %v2212_v51, 0.0  ;;  %v1924_v39 = vpop.f32.mrb[115].mxu0  ;;  %v1923_v50 = vadd.f32 %v1922_v5, %v13679_v55  ;;  %3658 = vmatprep.subr.bf16.mxu0 %v12442_v59  ;;  %v18661_v5 = vld [vmem:[#allocation97_spill] sm:$0xff] }
 0x1e8   : > { %v2871_v40 = vpack.c.bf16 %v2671_v4, %v2667_v42  ;;  %v2216_v23 = vadd.f32 %v2215_v7, %v13683_v61  ;;  %v2217_v21 = vpop.f32.mrb[115].mxu1  ;;  %v2466_v11 = vmax.f32 %v1919_v17, 0.0  ;;  %4557 = vmatprep.subr.bf16.mxu1 %v12445_v44  ;;  %v12451_v42 = vld [vmem:[%s18088_s4 + $0x2d4] ss:$8 sps:$4 sm:$0xff]   ;;  %v2469_v56 = vmax.f32 %v2214_v3, 0.0 }
 0x1e9   : > { %18660 = vst [vmem:[#allocation90_spill] sm:$0xff] %v14804_v24  ;;  %v2218_v22 = vadd.f32 %v2217_v21, %v13076_v49  ;;  %v1925_v4 = vadd.f32 %v1924_v39, %v13689_v25  ;;  %v2467_v51 = vmax.f32 %v1921_v10, 0.0  ;;  %v2470_v32 = vmax.f32 %v1923_v50, 0.0  ;;  %v18664_v7 = vld [vmem:[#allocation101_spill] sm:$0xff]  ;;  %v18666_v21 = vld [vmem:[#allocation100_spill] sm:$0xff] }
 0x1ea   : > { %3403 = vmatprep.mubr.bf16.mxu0 %v2871_v40  ;;  %4302 = vmatprep.mubr.bf16.mxu1 %v2871_v40  ;;  %v2472_v14 = vmax.f32 %v2216_v23, 0.0  ;;  %v18662_v17 = vmax.f32 %v18661_v5, 0.0  ;;  %v14821_v44 = vpack.c.bf16 %v2673_v46, %v2669_v12  ;;  %v18665_v13 = vmax.f32 %v18664_v7, 0.0  ;;  %v18668_v46 = vld [vmem:[#allocation102_spill] sm:$0xff]  ;;  %v18672_v50 = vld [vmem:[#allocation104_spill] sm:$0xff]  ;;  %v1928_v5 = vpop.f32.mrb[116].mxu0 }
 0x1eb   : > { %3404 = vmatmul.mubr.bf16.gmra.mrb[212].mxu0 %v2870_v52  ;;  %4303 = vmatmul.mubr.bf16.gmra.mrb[212].mxu1 %v2870_v52  ;;  %v2473_v3 = vmax.f32 %v2218_v22, 0.0  ;;  %v2471_v36 = vmax.f32 %v1925_v4, 0.0  ;;  %v18667_v43 = vmax.f32 %v18666_v21, 0.0  ;;  %v12446_v52 = vld [vmem:[%s18088_s4 + $0x130] ss:$8 sps:$4 sm:$0xff]   ;;  %v18669_v10 = vmax.f32 %v18668_v46, 0.0 }
 0x1ec   : > { %v2674_v59 = vmax.f32 %v18662_v17, %v2466_v11  ;;  %18663 = vst [vmem:[#allocation92_spill] sm:$0xff] %v14821_v44  ;;  %v2677_v24 = vmax.f32 %v18665_v13, %v2469_v56  ;;  %3659 = vmatpush1.bf16.msra.mxu0 %v12440_v0  ;;  %4558 = vmatpush1.bf16.msra.mxu1 %v12443_v2  ;;  %v12449_v11 = vld [vmem:[%s18088_s4 + $0x2d0] ss:$8 sps:$4 sm:$0xff]   ;;  %v12457_v0 = vld [vmem:[%s18088_s4 + $0x2e4] ss:$8 sps:$4 sm:$0xff]   ;;  %v18673_v56 = vmax.f32 %v18672_v50, 0.0 }
 0x1ed   : > { %v2675_v40 = vmax.f32 %v18667_v43, %v2467_v51  ;;  %v2678_v13 = vmax.f32 %v18669_v10, %v2470_v32  ;;  %3660 = vmatprep.subr.bf16.mxu0 %v12448_v41  ;;  %4559 = vmatprep.subr.bf16.mxu1 %v12451_v42  ;;  %v12454_v43 = vld [vmem:[%s18088_s4 + $0x144] ss:$8 sps:$4 sm:$0xff]   ;;  %v18674_v4 = vld [vmem:[#allocation132_spill] sm:$0xff]  ;;  %v18676_v41 = vld [vmem:[#allocation105_spill] sm:$0xff]  ;;  %v2221_v17 = vpop.f32.mrb[116].mxu1  ;;  %v1929_v50 = vadd.f32 %v1928_v5, %v13679_v55 }
 0x1ee   : > { %v18670_v2 = vld [vmem:[#allocation99_spill] sm:$0xff]  ;;  %v2680_v22 = vmax.f32 %v18673_v56, %v2472_v14  ;;  %v14848_v51 = vadd.f32 %v18674_v4, %v13076_v49  ;;  %v18677_v42 = vmax.f32 %v18676_v41, 0.0  ;;  %v2223_v14 = vpop.f32.mrb[117].mxu1 }
 0x1ef   : > { %v18671_v23 = vmax.f32 %v18670_v2, 0.0  ;;  %v18678_v7 = vld [vmem:[#allocation103_spill] sm:$0xff]  ;;  %v1930_v2 = vpop.f32.mrb[117].mxu0  ;;  %v2224_v4 = vadd.f32 %v2223_v14, %v13076_v49  ;;  %v2225_v41 = vpop.f32.mrb[118].mxu1 }
 0x1f0   : > { %18675 = vst [vmem:[#allocation93_spill] sm:$0xff] %v14848_v51  ;;  %v2681_v32 = vmax.f32 %v18677_v42, %v2473_v3  ;;  %v18679_v21 = vmax.f32 %v18678_v7, 0.0  ;;  %v18680_v10 = vld [vmem:[#allocation131_spill] sm:$0xff]  ;;  %v1931_v7 = vadd.f32 %v1930_v2, %v13689_v25  ;;  %3661 = vmatpush1.bf16.msra.mxu0 %v12446_v52  ;;  %4560 = vmatpush1.bf16.msra.mxu1 %v12449_v11  ;;  %v12463_v52 = vld [vmem:[%s18088_s4 + $0x2f4] ss:$8 sps:$4 sm:$0xff]  }
 0x1f1   : > { %v2676_v39 = vmax.f32 %v18671_v23, %v2468_v37  ;;  %v14856_v12 = vadd.f32 %v18680_v10, %v13689_v25  ;;  %v2222_v37 = vadd.f32 %v2221_v17, %v13683_v61  ;;  %v2874_v23 = vpack.c.bf16 %v2678_v13, %v2674_v59  ;;  %v12452_v3 = vld [vmem:[%s18088_s4 + $0x140] ss:$8 sps:$4 sm:$0xff]   ;;  %v12460_v13 = vld [vmem:[%s18088_s4 + $0x154] ss:$8 sps:$4 sm:$0xff]   ;;  %v2227_v17 = vpop.f32.mrb[119].mxu1  ;;  %3662 = vmatprep.subr.bf16.mxu0 %v12454_v43 }
 0x1f2   : > { %v2679_v46 = vmax.f32 %v18679_v21, %v2471_v36  ;;  %v1932_v36 = vpop.f32.mrb[118].mxu0  ;;  %v12455_v59 = vld [vmem:[%s18088_s4 + $0x2e0] ss:$8 sps:$4 sm:$0xff]   ;;  %4561 = vmatprep.subr.bf16.mxu1 %v12457_v0  ;;  %v2477_v11 = vmax.f32 %v2224_v4, 0.0  ;;  %v14882_v0 = vpack.c.bf16 %v2681_v32, %v2677_v24 }
 0x1f3   : > { %18681 = vst [vmem:[#allocation91_spill] sm:$0xff] %v14856_v12  ;;  %v14863_v56 = vpack.c.bf16 %v2680_v22, %v2676_v39  ;;  %v2476_v5 = vmax.f32 %v2222_v37, 0.0  ;;  %v2226_v39 = vadd.f32 %v2225_v41, %v13683_v61  ;;  %v1934_v22 = vpop.f32.mrb[119].mxu0  ;;  %v1933_v21 = vadd.f32 %v1932_v36, %v13679_v55  ;;  %v18683_v36 = vld [vmem:[#allocation106_spill] sm:$0xff]  ;;  %v18686_v41 = vld [vmem:[#allocation109_spill] sm:$0xff]  ;;  %v18772_v12 = vld [vmem:[#allocation12_spill] sm:$0xff] }
 0x1f4   : > { %v2875_v42 = vpack.c.bf16 %v2679_v46, %v2675_v40  ;;  %v2474_v40 = vmax.f32 %v1929_v50, 0.0  ;;  %v2228_v46 = vadd.f32 %v2227_v17, %v13076_v49  ;;  %v1935_v10 = vadd.f32 %v1934_v22, %v13689_v25  ;;  %18685 = vst [vmem:[#allocation95_spill] sm:$0xff] %v14882_v0  ;;  %v18688_v17 = vld [vmem:[#allocation107_spill] sm:$0xff]  ;;  %3663 = vmatpush1.bf16.msra.mxu0 %v12452_v3  ;;  %v18690_v32 = vld [vmem:[#allocation110_spill] sm:$0xff] }
 0x1f5   : > { %18682 = vst [vmem:[#allocation94_spill] sm:$0xff] %v14863_v56  ;;  %v2475_v37 = vmax.f32 %v1931_v7, 0.0  ;;  %v2480_v2 = vmax.f32 %v2226_v39, 0.0  ;;  %v2478_v14 = vmax.f32 %v1933_v21, 0.0  ;;  %v18684_v50 = vmax.f32 %v18683_v36, 0.0  ;;  %4562 = vmatpush1.bf16.msra.mxu1 %v12455_v59  ;;  %3664 = vmatprep.subr.bf16.mxu0 %v12460_v13  ;;  %v18692_v59 = vld [vmem:[#allocation108_spill] sm:$0xff] }
 0x1f6   : > { %3413 = vmatprep.mubr.bf16.mxu0 %v2875_v42  ;;  %4312 = vmatprep.mubr.bf16.mxu1 %v2875_v42  ;;  %v18687_v56 = vmax.f32 %v18686_v41, 0.0  ;;  %v2481_v4 = vmax.f32 %v2228_v46, 0.0  ;;  %v2479_v20 = vmax.f32 %v1935_v10, 0.0  ;;  %v18689_v30 = vmax.f32 %v18688_v17, 0.0  ;;  %v12461_v7 = vld [vmem:[%s18088_s4 + $0x2f0] ss:$8 sps:$4 sm:$0xff]  }
 0x1f7   : > { %3414 = vmatmul.mubr.bf16.gmra.mrb[216].mxu0 %v2874_v23  ;;  %4313 = vmatmul.mubr.bf16.gmra.mrb[216].mxu1 %v2874_v23  ;;  %v2682_v43 = vmax.f32 %v18684_v50, %v2474_v40  ;;  %v12458_v23 = vld [vmem:[%s18088_s4 + $0x150] ss:$8 sps:$4 sm:$0xff]   ;;  %v18691_v39 = vmax.f32 %v18690_v32, 0.0  ;;  %v12469_v3 = vld [vmem:[%s18088_s4 + $0x304] ss:$8 sps:$4 sm:$0xff]   ;;  %v18693_v22 = vmax.f32 %v18692_v59, 0.0 }
 0x1f8   : > { %v2685_v44 = vmax.f32 %v18687_v56, %v2477_v11  ;;  %v2683_v42 = vmax.f32 %v18689_v30, %v2475_v37  ;;  %4563 = vmatprep.subr.bf16.mxu1 %v12463_v52  ;;  %v12466_v30 = vld [vmem:[%s18088_s4 + $0x164] ss:$8 sps:$4 sm:$0xff]   ;;  %v1938_v52 = vpop.f32.mrb[120].mxu0  ;;  %v2231_v36 = vpop.f32.mrb[120].mxu1  ;;  %v18698_v50 = vld [vmem:[#allocation112_spill] sm:$0xff]  ;;  %3665 = vmatpush1.bf16.msra.mxu0 %v12458_v23 }
 0x1f9   : > { %v2686_v56 = vmax.f32 %v18691_v39, %v2478_v14  ;;  %v2684_v21 = vmax.f32 %v18693_v22, %v2476_v5  ;;  %v18694_v40 = vld [vmem:[#allocation111_spill] sm:$0xff]  ;;  %v18696_v37 = vld [vmem:[#allocation114_spill] sm:$0xff]  ;;  %v18699_v41 = vmax.f32 %v18698_v50, 0.0  ;;  %v2232_v39 = vadd.f32 %v2231_v36, %v13683_v61  ;;  %v1940_v24 = vpop.f32.mrb[121].mxu0  ;;  %v2233_v59 = vpop.f32.mrb[121].mxu1  ;;  %4564 = vmatpush1.bf16.msra.mxu1 %v12461_v7  ;;  %3666 = vmatprep.subr.bf16.mxu0 %v12466_v30 }
 0x1fa   : > { %v18695_v11 = vmax.f32 %v18694_v40, 0.0  ;;  %v18697_v14 = vmax.f32 %v18696_v37, 0.0  ;;  %v1939_v22 = vadd.f32 %v1938_v52, %v13679_v55  ;;  %v2235_v37 = vpop.f32.mrb[122].mxu1  ;;  %4565 = vmatprep.subr.bf16.mxu1 %v12469_v3  ;;  %v12475_v23 = vld [vmem:[%s18088_s4 + $0x314] ss:$8 sps:$4 sm:$0xff]  }
 0x1fb   : > { %v2687_v17 = vmax.f32 %v18699_v41, %v2479_v20  ;;  %v2878_v5 = vpack.c.bf16 %v2686_v56, %v2682_v43  ;;  %v12467_v43 = vld [vmem:[%s18088_s4 + $0x300] ss:$8 sps:$4 sm:$0xff]   ;;  %v12472_v56 = vld [vmem:[%s18088_s4 + $0x174] ss:$8 sps:$4 sm:$0xff]   ;;  %v2484_v52 = vmax.f32 %v2232_v39, 0.0  ;;  %v2237_v36 = vpop.f32.mrb[123].mxu1 }
 0x1fc   : > { %v2688_v46 = vmax.f32 %v18695_v11, %v2480_v2  ;;  %v2689_v13 = vmax.f32 %v18697_v14, %v2481_v4  ;;  %v12464_v2 = vld [vmem:[%s18088_s4 + $0x160] ss:$8 sps:$4 sm:$0xff]   ;;  %v2234_v4 = vadd.f32 %v2233_v59, %v13076_v49  ;;  %v1942_v11 = vpop.f32.mrb[122].mxu0  ;;  %v1941_v14 = vadd.f32 %v1940_v24, %v13689_v25 }
 0x1fd   : > { %v2879_v20 = vpack.c.bf16 %v2687_v17, %v2683_v42  ;;  %v1943_v50 = vadd.f32 %v1942_v11, %v13679_v55  ;;  %v2482_v42 = vmax.f32 %v1939_v22, 0.0  ;;  %v2238_v24 = vadd.f32 %v2237_v36, %v13076_v49  ;;  %v18701_v11 = vld [vmem:[#allocation113_spill] sm:$0xff]  ;;  %v18706_v36 = vld [vmem:[#allocation116_spill] sm:$0xff]  ;;  %3667 = vmatpush1.bf16.msra.mxu0 %v12464_v2  ;;  %4566 = vmatpush1.bf16.msra.mxu1 %v12467_v43 }
 0x1fe   : > { %v14918_v40 = vpack.c.bf16 %v2688_v46, %v2684_v21  ;;  %v2236_v21 = vadd.f32 %v2235_v37, %v13683_v61  ;;  %v1944_v46 = vpop.f32.mrb[123].mxu0  ;;  %v2485_v7 = vmax.f32 %v2234_v4, 0.0  ;;  %v2483_v17 = vmax.f32 %v1941_v14, 0.0  ;;  %v18704_v37 = vld [vmem:[#allocation117_spill] sm:$0xff]  ;;  %3668 = vmatprep.subr.bf16.mxu0 %v12472_v56  ;;  %4567 = vmatprep.subr.bf16.mxu1 %v12475_v23  ;;  %v18712_v2 = vld [vmem:[#allocation120_spill] sm:$0xff] }
 0x1ff   : > { %3423 = vmatprep.mubr.bf16.mxu0 %v2879_v20  ;;  %4322 = vmatprep.mubr.bf16.mxu1 %v2879_v20  ;;  %v1945_v41 = vadd.f32 %v1944_v46, %v13689_v25  ;;  %v2486_v59 = vmax.f32 %v1943_v50, 0.0  ;;  %v18702_v22 = vmax.f32 %v18701_v11, 0.0  ;;  %v14937_v3 = vpack.c.bf16 %v2689_v13, %v2685_v44  ;;  %v12473_v14 = vld [vmem:[%s18088_s4 + $0x310] ss:$8 sps:$4 sm:$0xff]   ;;  %v18708_v13 = vld [vmem:[#allocation118_spill] sm:$0xff]  ;;  %v18710_v46 = vld [vmem:[#allocation115_spill] sm:$0xff] }
 0x200   : > { %18700 = vst [vmem:[#allocation98_spill] sm:$0xff] %v14918_v40  ;;  %v2488_v39 = vmax.f32 %v2236_v21, 0.0  ;;  %3424 = vmatmul.mubr.bf16.gmra.mrb[220].mxu0 %v2878_v5  ;;  %4323 = vmatmul.mubr.bf16.gmra.mrb[220].mxu1 %v2878_v5  ;;  %v18705_v10 = vmax.f32 %v18704_v37, 0.0  ;;  %v2489_v4 = vmax.f32 %v2238_v24, 0.0  ;;  %v18707_v0 = vmax.f32 %v18706_v36, 0.0  ;;  %v2241_v37 = vpop.f32.mrb[124].mxu1 }
 0x201   : > { %v2690_v30 = vmax.f32 %v18702_v22, %v2482_v42  ;;  %18703 = vst [vmem:[#allocation96_spill] sm:$0xff] %v14937_v3  ;;  %v2487_v40 = vmax.f32 %v1945_v41, 0.0  ;;  %v12470_v5 = vld [vmem:[%s18088_s4 + $0x170] ss:$8 sps:$4 sm:$0xff]   ;;  %v18709_v21 = vmax.f32 %v18708_v13, 0.0  ;;  %v18711_v50 = vmax.f32 %v18710_v46, 0.0  ;;  %4568 = vmatpush1.bf16.msra.mxu1 %v12473_v14 }
 0x202   : > { %v2693_v32 = vmax.f32 %v18705_v10, %v2485_v7  ;;  %v2691_v20 = vmax.f32 %v18707_v0, %v2483_v17  ;;  %v18713_v43 = vmax.f32 %v18712_v2, 0.0  ;;  %v14958_v7 = vadd.f32 %v14189_v29, %v13679_v55  ;;  %v18715_v41 = vld [vmem:[#allocation121_spill] sm:$0xff]  ;;  %v1948_v22 = vpop.f32.mrb[124].mxu0  ;;  %v2243_v13 = vpop.f32.mrb[125].mxu1  ;;  %3669 = vmatpush1.bf16.msra.mxu0 %v12470_v5  ;;  %v18731_v24 = vld [vmem:[#allocation124_spill] sm:$0xff] }
 0x203   : > { %v2694_v10 = vmax.f32 %v18709_v21, %v2486_v59  ;;  %v2692_v0 = vmax.f32 %v18711_v50, %v2484_v52  ;;  %v18716_v17 = vmax.f32 %v18715_v41, 0.0  ;;  %v18717_v59 = vld [vmem:[#allocation119_spill] sm:$0xff]  ;;  %v2242_v36 = vadd.f32 %v2241_v37, %v13683_v61  ;;  %v1950_v52 = vpop.f32.mrb[125].mxu0  ;;  %v2245_v2 = vpop.f32.mrb[126].mxu1  ;;  %v18770_v3 = vld [vmem:[#allocation13_spill] sm:$0xff] }
 0x204   : > { %v2696_v42 = vmax.f32 %v18713_v43, %v2488_v39  ;;  %18714 = vst [vmem:[#allocation97_spill] sm:$0xff] %v14958_v7  ;;  %v18718_v56 = vmax.f32 %v18717_v59, 0.0  ;;  %v1949_v39 = vadd.f32 %v1948_v22, %v13679_v55  ;;  %v2244_v29 = vadd.f32 %v2243_v13, %v13076_v49  ;;  %v1952_v50 = vpop.f32.mrb[126].mxu0  ;;  %v18723_v13 = vld [vmem:[#allocation125_spill] sm:$0xff] }
 0x205   : > { %v2697_v11 = vmax.f32 %v18716_v17, %v2489_v4  ;;  %v2882_v21 = vpack.c.bf16 %v2694_v10, %v2690_v30  ;;  %v1951_v4 = vadd.f32 %v1950_v52, %v13689_v25  ;;  %v2492_v41 = vmax.f32 %v2242_v36, 0.0  ;;  %v1954_v37 = vpop.f32.mrb[127].mxu0  ;;  %v2247_v30 = vpop.f32.mrb[127].mxu1 }
 0x206   : > { %v2695_v23 = vmax.f32 %v18718_v56, %v2487_v40  ;;  %v14967_v46 = vpack.c.bf16 %v2696_v42, %v2692_v0  ;;  %v2246_v17 = vadd.f32 %v2245_v2, %v13683_v61  ;;  %v1953_v10 = vadd.f32 %v1952_v50, %v13679_v55  ;;  %v18720_v56 = vld [vmem:[#allocation122_spill] sm:$0xff] }
 0x207   : > { %v2490_v0 = vmax.f32 %v1949_v39, 0.0  ;;  %v2493_v42 = vmax.f32 %v2244_v29, 0.0  ;;  %v2248_v22 = vadd.f32 %v2247_v30, %v13076_v49  ;;  %v2491_v59 = vmax.f32 %v1951_v4, 0.0  ;;  %v18725_v30 = vld [vmem:[#allocation123_spill] sm:$0xff] }
 0x208   : > { %18719 = vst [vmem:[#allocation101_spill] sm:$0xff] %v14967_v46  ;;  %v2883_v43 = vpack.c.bf16 %v2695_v23, %v2691_v20  ;;  %v1955_v20 = vadd.f32 %v1954_v37, %v13689_v25  ;;  %v2496_v5 = vmax.f32 %v2246_v17, 0.0  ;;  %v2494_v14 = vmax.f32 %v1953_v10, 0.0  ;;  %v18727_v37 = vld [vmem:[#allocation133_spill] sm:$0xff]  ;;  %v18729_v17 = vld [vmem:[#allocation126_spill] sm:$0xff]  ;;  %v18750_v46 = vld [vmem:[#allocation4_spill] sm:$0xff] }
 0x209   : > { %v18721_v23 = vmax.f32 %v18720_v56, 0.0  ;;  %v14978_v52 = vpack.c.bf16 %v2697_v11, %v2693_v32  ;;  %v18724_v50 = vmax.f32 %v18723_v13, 0.0  ;;  %v2497_v29 = vmax.f32 %v2248_v22, 0.0  ;;  %v18733_v32 = vld [vmem:[#allocation127_spill] sm:$0xff] }
 0x20a   : > { %3433 = vmatprep.mubr.bf16.mxu0 %v2883_v43  ;;  %4332 = vmatprep.mubr.bf16.mxu1 %v2883_v43  ;;  %v2495_v2 = vmax.f32 %v1955_v20, 0.0  ;;  %v18726_v40 = vmax.f32 %v18725_v30, 0.0  ;;  %v14986_v4 = vadd.f32 %v18727_v37, %v13683_v61  ;;  %v18732_v56 = vmax.f32 %v18731_v24, 0.0  ;;  %v18736_v20 = vld [vmem:[#allocation130_spill] sm:$0xff]  ;;  %v18738_v30 = vld [vmem:[#allocation128_spill] sm:$0xff] }
 0x20b   : > { %3434 = vmatmul.mubr.bf16.gmra.mrb[224].mxu0 %v2882_v21  ;;  %4333 = vmatmul.mubr.bf16.gmra.mrb[224].mxu1 %v2882_v21  ;;  %v2698_v36 = vmax.f32 %v18721_v23, %v2490_v0  ;;  %18722 = vst [vmem:[#allocation100_spill] sm:$0xff] %v14978_v52  ;;  %v2701_v39 = vmax.f32 %v18724_v50, %v2493_v42  ;;  %v18730_v21 = vmax.f32 %v18729_v17, 0.0  ;;  %v18734_v11 = vmax.f32 %v18733_v32, 0.0  ;;  %v18735_v42 = vld [vmem:[#allocation135_spill] sm:$0xff]  ;;  %v2251_v50 = vpop.f32.mrb[128].mxu1 }
 0x20c   : > { %v2699_v43 = vmax.f32 %v18726_v40, %v2491_v59  ;;  %18728 = vst [vmem:[#allocation102_spill] sm:$0xff] %v14986_v4  ;;  %v2700_v0 = vmax.f32 %v18732_v56, %v2492_v41  ;;  %v14996_v22 = vadd.f32 %v18735_v42, %v13076_v49  ;;  %v18737_v13 = vmax.f32 %v18736_v20, 0.0  ;;  %v1958_v59 = vpop.f32.mrb[128].mxu0 }
 0x20d   : > { %v2702_v10 = vmax.f32 %v18730_v21, %v2494_v14  ;;  %v2704_v23 = vmax.f32 %v18734_v11, %v2496_v5  ;;  %v18739_v37 = vmax.f32 %v18738_v30, 0.0  ;;  %v18740_v14 = vld [vmem:[#allocation134_spill] sm:$0xff]  ;;  %v2252_v24 = vadd.f32 %v2251_v50, %v13683_v61  ;;  %v1960_v41 = vpop.f32.mrb[129].mxu0  ;;  %v2253_v5 = vpop.f32.mrb[129].mxu1 }
 0x20e   : > { %v2705_v40 = vmax.f32 %v18737_v13, %v2497_v29  ;;  %v15004_v17 = vadd.f32 %v18740_v14, %v13689_v25  ;;  %v1959_v56 = vadd.f32 %v1958_v59, %v13679_v55  ;;  %v2254_v29 = vadd.f32 %v2253_v5, %v13076_v49  ;;  %v1962_v11 = vpop.f32.mrb[130].mxu0  ;;  %v2255_v42 = vpop.f32.mrb[130].mxu1  ;;  %v18746_v5 = vld [vmem:[#allocation3_spill] sm:$0xff] }
 0x20f   : > { %v2703_v44 = vmax.f32 %v18739_v37, %v2495_v2  ;;  %v2886_v21 = vpack.c.bf16 %v2702_v10, %v2698_v36  ;;  %v15008_v32 = vpack.c.bf16 %v2704_v23, %v2700_v0  ;;  %v1961_v2 = vadd.f32 %v1960_v41, %v13689_v25  ;;  %v1964_v50 = vpop.f32.mrb[131].mxu0  ;;  %v2257_v14 = vpop.f32.mrb[131].mxu1 }
 0x210   : > { %18741 = vst [vmem:[#allocation99_spill] sm:$0xff] %v15004_v17  ;;  %v15012_v13 = vpack.c.bf16 %v2705_v40, %v2701_v39  ;;  %v2500_v30 = vmax.f32 %v2252_v24, 0.0  ;;  %v2256_v37 = vadd.f32 %v2255_v42, %v13683_v61  ;;  %v1963_v36 = vadd.f32 %v1962_v11, %v13679_v55  ;;  %v18744_v40 = vld [vmem:[#allocation129_spill] sm:$0xff] }
 0x211   : > { %18742 = vst [vmem:[#allocation104_spill] sm:$0xff] %v15008_v32  ;;  %v2887_v20 = vpack.c.bf16 %v2703_v44, %v2699_v43  ;;  %v2498_v10 = vmax.f32 %v1959_v56, 0.0  ;;  %v2501_v59 = vmax.f32 %v2254_v29, 0.0  ;;  %v2258_v0 = vadd.f32 %v2257_v14, %v13076_v49  ;;  %v18748_v11 = vld [vmem:[#allocation5_spill] sm:$0xff] }
 0x212   : > { %18743 = vst [vmem:[#allocation132_spill] sm:$0xff] %v15012_v13  ;;  %v1965_v23 = vadd.f32 %v1964_v50, %v13689_v25  ;;  %v2499_v44 = vmax.f32 %v1961_v2, 0.0  ;;  %v2504_v43 = vmax.f32 %v2256_v37, 0.0  ;;  %v2502_v39 = vmax.f32 %v1963_v36, 0.0  ;;  %v18752_v37 = vld [vmem:[#allocation136_spill] sm:$0xff]  ;;  %v18754_v50 = vld [vmem:[#allocation6_spill] sm:$0xff] }
 0x213   : > { %3443 = vmatprep.mubr.bf16.mxu0 %v2887_v20  ;;  %4342 = vmatprep.mubr.bf16.mxu1 %v2887_v20  ;;  %v18745_v24 = vmax.f32 %v18744_v40, 0.0  ;;  %v18747_v42 = vmax.f32 %v18746_v5, 0.0  ;;  %v18749_v56 = vmax.f32 %v18748_v11, 0.0  ;;  %v2505_v13 = vmax.f32 %v2258_v0, 0.0  ;;  %v18756_v40 = vld [vmem:[#allocation7_spill] sm:$0xff]  ;;  %v2261_v11 = vpop.f32.mrb[132].mxu1 }
 0x214   : > { %3444 = vmatmul.mubr.bf16.gmra.mrb[228].mxu0 %v2886_v21  ;;  %4343 = vmatmul.mubr.bf16.gmra.mrb[228].mxu1 %v2886_v21  ;;  %v2503_v14 = vmax.f32 %v1965_v23, 0.0  ;;  %v18751_v20 = vmax.f32 %v18750_v46, 0.0  ;;  %v15029_v21 = vadd.f32 %v18752_v37, %v13679_v55  ;;  %v18755_v36 = vmax.f32 %v18754_v50, 0.0  ;;  %v18760_v46 = vld [vmem:[#allocation9_spill] sm:$0xff]  ;;  %v18766_v2 = vld [vmem:[#allocation10_spill] sm:$0xff] }
 0x215   : > { %v2706_v41 = vmax.f32 %v18745_v24, %v2498_v10  ;;  %v2708_v32 = vmax.f32 %v18747_v42, %v2500_v30  ;;  %v2709_v29 = vmax.f32 %v18749_v56, %v2501_v59  ;;  %v18757_v24 = vmax.f32 %v18756_v40, 0.0  ;;  %v18758_v59 = vld [vmem:[#allocation137_spill] sm:$0xff]  ;;  %v1968_v42 = vpop.f32.mrb[132].mxu0  ;;  %v18762_v56 = vld [vmem:[#allocation8_spill] sm:$0xff] }
 0x216   : > { %v2707_v52 = vmax.f32 %v18751_v20, %v2499_v44  ;;  %18753 = vst [vmem:[#allocation105_spill] sm:$0xff] %v15029_v21  ;;  %v2710_v10 = vmax.f32 %v18755_v36, %v2502_v39  ;;  %v15038_v0 = vadd.f32 %v18758_v59, %v13683_v61  ;;  %v18761_v23 = vmax.f32 %v18760_v46, 0.0  ;;  %v1970_v39 = vpop.f32.mrb[133].mxu0  ;;  %v2263_v36 = vpop.f32.mrb[133].mxu1 }
 0x217   : > { %v2712_v30 = vmax.f32 %v18757_v24, %v2504_v43  ;;  %v18763_v20 = vmax.f32 %v18762_v56, 0.0  ;;  %v2262_v50 = vadd.f32 %v2261_v11, %v13683_v61  ;;  %v1969_v43 = vadd.f32 %v1968_v42, %v13679_v55  ;;  %v12478_v24 = vld [vmem:[%s18088_s4 + $0x184] ss:$8 sps:$4 sm:$0xff]   ;;  %v1972_v46 = vpop.f32.mrb[134].mxu0  ;;  %v12476_v11 = vld [vmem:[%s18088_s4 + $0x180] ss:$8 sps:$4 sm:$0xff]  }
 0x218   : > { %18759 = vst [vmem:[#allocation103_spill] sm:$0xff] %v15038_v0  ;;  %v2713_v44 = vmax.f32 %v18761_v23, %v2505_v13  ;;  %v2890_v40 = vpack.c.bf16 %v2710_v10, %v2706_v41  ;;  %v2264_v13 = vadd.f32 %v2263_v36, %v13076_v49  ;;  %v2265_v23 = vpop.f32.mrb[134].mxu1  ;;  %v12481_v41 = vld [vmem:[%s18088_s4 + $0x324] ss:$8 sps:$4 sm:$0xff]   ;;  %3670 = vmatprep.subr.bf16.mxu0 %v12478_v24  ;;  %v18771_v4 = vmax.f32 %v18770_v3, 0.0 }
 0x219   : > { %v2711_v37 = vmax.f32 %v18763_v20, %v2503_v14  ;;  %v15049_v59 = vpack.c.bf16 %v2712_v30, %v2708_v32  ;;  %v1971_v14 = vadd.f32 %v1970_v39, %v13689_v25  ;;  %v2508_v42 = vmax.f32 %v2262_v50, 0.0  ;;  %v1974_v30 = vpop.f32.mrb[135].mxu0  ;;  %v2267_v56 = vpop.f32.mrb[135].mxu1  ;;  %v18768_v24 = vld [vmem:[#allocation11_spill] sm:$0xff]  ;;  %4569 = vmatprep.subr.bf16.mxu1 %v12481_v41  ;;  %3671 = vmatpush1.bf16.msra.mxu0 %v12476_v11  ;;  %v18782_v41 = vld [vmem:[#allocation16_spill] sm:$0xff] }
 0x21a   : > { %v15059_v10 = vpack.c.bf16 %v2713_v44, %v2709_v29  ;;  %v2266_v32 = vadd.f32 %v2265_v23, %v13683_v61  ;;  %v1973_v20 = vadd.f32 %v1972_v46, %v13679_v55  ;;  %v2509_v39 = vmax.f32 %v2264_v13, 0.0 }
 0x21b   : > { %18764 = vst [vmem:[#allocation131_spill] sm:$0xff] %v15049_v59  ;;  %v2891_v5 = vpack.c.bf16 %v2711_v37, %v2707_v52  ;;  %v2506_v52 = vmax.f32 %v1969_v43, 0.0  ;;  %v12479_v37 = vld [vmem:[%s18088_s4 + $0x320] ss:$8 sps:$4 sm:$0xff]   ;;  %v2268_v36 = vadd.f32 %v2267_v56, %v13076_v49  ;;  %v1975_v29 = vadd.f32 %v1974_v30, %v13689_v25 }
 0x21c   : > { %18765 = vst [vmem:[#allocation106_spill] sm:$0xff] %v15059_v10  ;;  %v2507_v44 = vmax.f32 %v1971_v14, 0.0  ;;  %v2512_v50 = vmax.f32 %v2266_v32, 0.0  ;;  %v2510_v23 = vmax.f32 %v1973_v20, 0.0  ;;  %v18767_v46 = vmax.f32 %v18766_v2, 0.0  ;;  %v18776_v2 = vld [vmem:[#allocation14_spill] sm:$0xff]  ;;  %4570 = vmatpush1.bf16.msra.mxu1 %v12479_v37 }
 0x21d   : > { %3453 = vmatprep.mubr.bf16.mxu0 %v2891_v5  ;;  %4352 = vmatprep.mubr.bf16.mxu1 %v2891_v5  ;;  %v18769_v59 = vmax.f32 %v18768_v24, 0.0  ;;  %v2717_v13 = vmax.f32 %v18771_v4, %v2509_v39  ;;  %v2513_v7 = vmax.f32 %v2268_v36, 0.0  ;;  %v2511_v56 = vmax.f32 %v1975_v29, 0.0  ;;  %v2271_v36 = vpop.f32.mrb[136].mxu1  ;;  %v18794_v14 = vld [vmem:[#allocation20_spill] sm:$0xff] }
 0x21e   : > { %3454 = vmatmul.mubr.bf16.gmra.mrb[232].mxu0 %v2890_v40  ;;  %4353 = vmatmul.mubr.bf16.gmra.mrb[232].mxu1 %v2890_v40  ;;  %v2714_v43 = vmax.f32 %v18767_v46, %v2506_v52  ;;  %v18773_v5 = vmax.f32 %v18772_v12, 0.0  ;;  %v18774_v40 = vld [vmem:[#allocation139_spill] sm:$0xff]  ;;  %v18777_v30 = vmax.f32 %v18776_v2, 0.0  ;;  %v1978_v12 = vpop.f32.mrb[136].mxu0  ;;  %v18783_v11 = vmax.f32 %v18782_v41, 0.0 }
 0x21f   : > { %v2716_v10 = vmax.f32 %v18769_v59, %v2508_v42  ;;  %v15079_v32 = vadd.f32 %v18774_v40, %v13076_v49  ;;  %v18778_v59 = vld [vmem:[#allocation15_spill] sm:$0xff]  ;;  %v18780_v42 = vld [vmem:[#allocation17_spill] sm:$0xff]  ;;  %v1980_v37 = vpop.f32.mrb[137].mxu0 }
 0x220   : > { %v2715_v51 = vmax.f32 %v18773_v5, %v2507_v44  ;;  %v2718_v20 = vmax.f32 %v18777_v30, %v2510_v23  ;;  %v18779_v3 = vmax.f32 %v18778_v59, 0.0  ;;  %v18781_v52 = vmax.f32 %v18780_v42, 0.0  ;;  %v18784_v44 = vld [vmem:[#allocation138_spill] sm:$0xff]  ;;  %v2273_v5 = vpop.f32.mrb[137].mxu1  ;;  %v1982_v30 = vpop.f32.mrb[138].mxu0 }
 0x221   : > { %18775 = vst [vmem:[#allocation109_spill] sm:$0xff] %v15079_v32  ;;  %v2719_v29 = vmax.f32 %v18783_v11, %v2511_v56  ;;  %v15091_v46 = vadd.f32 %v18784_v44, %v13689_v25  ;;  %v2272_v23 = vadd.f32 %v2271_v36, %v13683_v61  ;;  %v2275_v59 = vpop.f32.mrb[138].mxu1  ;;  %v1984_v36 = vpop.f32.mrb[139].mxu0 }
 0x222   : > { %v2720_v4 = vmax.f32 %v18779_v3, %v2512_v50  ;;  %v2721_v39 = vmax.f32 %v18781_v52, %v2513_v7  ;;  %v2894_v40 = vpack.c.bf16 %v2718_v20, %v2714_v43  ;;  %v1979_v50 = vadd.f32 %v1978_v12, %v13679_v55  ;;  %v2277_v11 = vpop.f32.mrb[139].mxu1 }
 0x223   : > { %18785 = vst [vmem:[#allocation107_spill] sm:$0xff] %v15091_v46  ;;  %v2274_v7 = vadd.f32 %v2273_v5, %v13076_v49  ;;  %v2895_v56 = vpack.c.bf16 %v2719_v29, %v2715_v51  ;;  %v1981_v3 = vadd.f32 %v1980_v37, %v13689_v25  ;;  %v2516_v52 = vmax.f32 %v2272_v23, 0.0  ;;  %v18790_v37 = vld [vmem:[#allocation19_spill] sm:$0xff] }
 0x224   : > { %v15096_v2 = vpack.c.bf16 %v2720_v4, %v2716_v10  ;;  %v15100_v42 = vpack.c.bf16 %v2721_v39, %v2717_v13  ;;  %v2276_v41 = vadd.f32 %v2275_v59, %v13683_v61  ;;  %v1983_v43 = vadd.f32 %v1982_v30, %v13679_v55  ;;  %v18788_v39 = vld [vmem:[#allocation18_spill] sm:$0xff]  ;;  %v18792_v30 = vld [vmem:[#allocation21_spill] sm:$0xff] }
 0x225   : > { %v2514_v20 = vmax.f32 %v1979_v50, 0.0  ;;  %v2517_v12 = vmax.f32 %v2274_v7, 0.0  ;;  %v2278_v10 = vadd.f32 %v2277_v11, %v13076_v49  ;;  %3463 = vmatprep.mubr.bf16.mxu0 %v2895_v56  ;;  %4362 = vmatprep.mubr.bf16.mxu1 %v2895_v56  ;;  %v1985_v4 = vadd.f32 %v1984_v36, %v13689_v25 }
 0x226   : > { %18786 = vst [vmem:[#allocation110_spill] sm:$0xff] %v15096_v2  ;;  %18787 = vst [vmem:[#allocation108_spill] sm:$0xff] %v15100_v42  ;;  %v2515_v51 = vmax.f32 %v1981_v3, 0.0  ;;  %v2520_v29 = vmax.f32 %v2276_v41, 0.0  ;;  %3464 = vmatmul.mubr.bf16.gmra.mrb[236].mxu0 %v2894_v40  ;;  %4363 = vmatmul.mubr.bf16.gmra.mrb[236].mxu1 %v2894_v40  ;;  %v2518_v13 = vmax.f32 %v1983_v43, 0.0  ;;  %v18789_v44 = vmax.f32 %v18788_v39, 0.0 }
 0x227   : > { %v18791_v5 = vmax.f32 %v18790_v37, 0.0  ;;  %v18793_v50 = vmax.f32 %v18792_v30, 0.0  ;;  %v2521_v24 = vmax.f32 %v2278_v10, 0.0  ;;  %v2519_v11 = vmax.f32 %v1985_v4, 0.0  ;;  %v18796_v40 = vld [vmem:[#allocation22_spill] sm:$0xff]  ;;  %v18798_v39 = vld [vmem:[#allocation23_spill] sm:$0xff] }
 0x228   : > { %v2722_v23 = vmax.f32 %v18789_v44, %v2514_v20  ;;  %v18795_v56 = vmax.f32 %v18794_v14, 0.0  ;;  %v18797_v36 = vmax.f32 %v18796_v40, 0.0  ;;  %v18799_v20 = vmax.f32 %v18798_v39, 0.0  ;;  %v18802_v10 = vld [vmem:[#allocation25_spill] sm:$0xff]  ;;  %v18804_v30 = vld [vmem:[#allocation24_spill] sm:$0xff] }
 0x229   : > { %v2724_v59 = vmax.f32 %v18791_v5, %v2516_v52  ;;  %v2725_v7 = vmax.f32 %v18793_v50, %v2517_v12  ;;  %v18800_v52 = vld [vmem:[#allocation141_spill] sm:$0xff]  ;;  %v18803_v4 = vmax.f32 %v18802_v10, 0.0  ;;  %v2281_v5 = vpop.f32.mrb[140].mxu1  ;;  %v18805_v50 = vmax.f32 %v18804_v30, 0.0 }
 0x22a   : > { %v2723_v2 = vmax.f32 %v18795_v56, %v2515_v51  ;;  %v2726_v43 = vmax.f32 %v18797_v36, %v2518_v13  ;;  %v2728_v44 = vmax.f32 %v18799_v20, %v2520_v29  ;;  %v15122_v37 = vadd.f32 %v18800_v52, %v13679_v55  ;;  %v1988_v51 = vpop.f32.mrb[140].mxu0  ;;  %v2283_v36 = vpop.f32.mrb[141].mxu1 }
 0x22b   : > { %v2729_v14 = vmax.f32 %v18803_v4, %v2521_v24  ;;  %v2727_v56 = vmax.f32 %v18805_v50, %v2519_v11  ;;  %v2282_v40 = vadd.f32 %v2281_v5, %v13683_v61  ;;  %v1990_v13 = vpop.f32.mrb[141].mxu0  ;;  %v1989_v29 = vadd.f32 %v1988_v51, %v13679_v55  ;;  %v2285_v41 = vpop.f32.mrb[142].mxu1 }
 0x22c   : > { %18801 = vst [vmem:[#allocation111_spill] sm:$0xff] %v15122_v37  ;;  %v2898_v39 = vpack.c.bf16 %v2726_v43, %v2722_v23  ;;  %v15131_v20 = vpack.c.bf16 %v2728_v44, %v2724_v59  ;;  %v2284_v52 = vadd.f32 %v2283_v36, %v13076_v49  ;;  %v1992_v12 = vpop.f32.mrb[142].mxu0  ;;  %v1991_v24 = vadd.f32 %v1990_v13, %v13689_v25  ;;  %v2287_v50 = vpop.f32.mrb[143].mxu1  ;;  %v18810_v13 = vld [vmem:[#allocation27_spill] sm:$0xff] }
 0x22d   : > { %v2899_v10 = vpack.c.bf16 %v2727_v56, %v2723_v2  ;;  %v15135_v4 = vpack.c.bf16 %v2729_v14, %v2725_v7  ;;  %v2524_v30 = vmax.f32 %v2282_v40, 0.0  ;;  %v2286_v11 = vadd.f32 %v2285_v41, %v13683_v61  ;;  %v1994_v5 = vpop.f32.mrb[143].mxu0  ;;  %v18808_v14 = vld [vmem:[#allocation26_spill] sm:$0xff] }
 0x22e   : > { %18806 = vst [vmem:[#allocation114_spill] sm:$0xff] %v15131_v20  ;;  %v1993_v23 = vadd.f32 %v1992_v12, %v13679_v55  ;;  %v2522_v43 = vmax.f32 %v1989_v29, 0.0  ;;  %v2525_v51 = vmax.f32 %v2284_v52, 0.0  ;;  %v2288_v59 = vadd.f32 %v2287_v50, %v13076_v49  ;;  %v18812_v12 = vld [vmem:[#allocation29_spill] sm:$0xff] }
 0x22f   : > { %18807 = vst [vmem:[#allocation112_spill] sm:$0xff] %v15135_v4  ;;  %3473 = vmatprep.mubr.bf16.mxu0 %v2899_v10  ;;  %4372 = vmatprep.mubr.bf16.mxu1 %v2899_v10  ;;  %v1995_v44 = vadd.f32 %v1994_v5, %v13689_v25  ;;  %v2523_v2 = vmax.f32 %v1991_v24, 0.0  ;;  %v2528_v56 = vmax.f32 %v2286_v11, 0.0  ;;  %v18809_v40 = vmax.f32 %v18808_v14, 0.0  ;;  %v18814_v4 = vld [vmem:[#allocation28_spill] sm:$0xff]  ;;  %v18816_v11 = vld [vmem:[#allocation142_spill] sm:$0xff] }
 0x230   : > { %3474 = vmatmul.mubr.bf16.gmra.mrb[240].mxu0 %v2898_v39  ;;  %4373 = vmatmul.mubr.bf16.gmra.mrb[240].mxu1 %v2898_v39  ;;  %v2526_v7 = vmax.f32 %v1993_v23, 0.0  ;;  %v18811_v36 = vmax.f32 %v18810_v13, 0.0  ;;  %v18813_v29 = vmax.f32 %v18812_v12, 0.0  ;;  %v2529_v20 = vmax.f32 %v2288_v59, 0.0  ;;  %v12482_v24 = vld [vmem:[%s18088_s4 + $0x190] ss:$8 sps:$4 sm:$0xff]  }
 0x231   : > { %v2730_v41 = vmax.f32 %v18809_v40, %v2522_v43  ;;  %v2527_v50 = vmax.f32 %v1995_v44, 0.0  ;;  %v18815_v10 = vmax.f32 %v18814_v4, 0.0  ;;  %v12484_v39 = vld [vmem:[%s18088_s4 + $0x194] ss:$8 sps:$4 sm:$0xff]   ;;  %v15157_v5 = vadd.f32 %v18816_v11, %v13683_v61  ;;  %v12485_v4 = vld [vmem:[%s18088_s4 + $0x330] ss:$8 sps:$4 sm:$0xff]  }
 0x232   : > { %v2732_v3 = vmax.f32 %v18811_v36, %v2524_v30  ;;  %v2733_v52 = vmax.f32 %v18813_v29, %v2525_v51  ;;  %v18817_v30 = vld [vmem:[#allocation30_spill] sm:$0xff]  ;;  %v12487_v59 = vld [vmem:[%s18088_s4 + $0x334] ss:$8 sps:$4 sm:$0xff]   ;;  %v18819_v44 = vld [vmem:[#allocation31_spill] sm:$0xff]  ;;  %v1998_v29 = vpop.f32.mrb[144].mxu0  ;;  %3672 = vmatprep.subr.bf16.mxu0 %v12484_v39 }
 0x233   : > { %v2731_v42 = vmax.f32 %v18815_v10, %v2523_v2  ;;  %v18818_v23 = vmax.f32 %v18817_v30, 0.0  ;;  %v18820_v2 = vmax.f32 %v18819_v44, 0.0  ;;  %v18821_v40 = vld [vmem:[#allocation144_spill] sm:$0xff]  ;;  %v18822_v36 = vld [vmem:[#allocation33_spill] sm:$0xff]  ;;  %v2291_v10 = vpop.f32.mrb[144].mxu1  ;;  %v18826_v51 = vld [vmem:[#allocation143_spill] sm:$0xff]  ;;  %4571 = vmatprep.subr.bf16.mxu1 %v12487_v59  ;;  %3673 = vmatpush1.bf16.msra.mxu0 %v12482_v24 }
 0x234   : > { %v15172_v13 = vadd.f32 %v18821_v40, %v13076_v49  ;;  %v18823_v12 = vmax.f32 %v18822_v36, 0.0  ;;  %v18824_v11 = vld [vmem:[#allocation32_spill] sm:$0xff]  ;;  %v15180_v46 = vadd.f32 %v18826_v51, %v13689_v25  ;;  %v2000_v40 = vpop.f32.mrb[145].mxu0  ;;  %v2293_v32 = vpop.f32.mrb[145].mxu1  ;;  %4572 = vmatpush1.bf16.msra.mxu1 %v12485_v4 }
 0x235   : > { %v2734_v43 = vmax.f32 %v18818_v23, %v2526_v7  ;;  %v2736_v14 = vmax.f32 %v18820_v2, %v2528_v56  ;;  %v18825_v30 = vmax.f32 %v18824_v11, 0.0  ;;  %v1999_v56 = vadd.f32 %v1998_v29, %v13679_v55  ;;  %v2295_v11 = vpop.f32.mrb[146].mxu1  ;;  %7094 = vmatprep.subr.bf16.mxu1 %v18298_v18 }
 0x236   : > { %v2737_v7 = vmax.f32 %v18823_v12, %v2529_v20  ;;  %v2292_v2 = vadd.f32 %v2291_v10, %v13683_v61  ;;  %v2001_v20 = vadd.f32 %v2000_v40, %v13689_v25  ;;  %v2002_v12 = vpop.f32.mrb[146].mxu0  ;;  %v2296_v10 = vadd.f32 %v2295_v11, %v13683_v61  ;;  %v18831_v40 = vld [vmem:[#allocation37_spill] sm:$0xff]  ;;  %v18833_v11 = vld [vmem:[#allocation36_spill] sm:$0xff] }
 0x237   : > { %v2735_v23 = vmax.f32 %v18825_v30, %v2527_v50  ;;  %v2902_v36 = vpack.c.bf16 %v2734_v43, %v2730_v41  ;;  %v2294_v50 = vadd.f32 %v2293_v32, %v13076_v49  ;;  %v2530_v30 = vmax.f32 %v1999_v56, 0.0  ;;  %v2004_v37 = vpop.f32.mrb[147].mxu0  ;;  %v2297_v41 = vpop.f32.mrb[147].mxu1 }
 0x238   : > { %v15187_v39 = vpack.c.bf16 %v2737_v7, %v2733_v52  ;;  %v2532_v44 = vmax.f32 %v2292_v2, 0.0  ;;  %v2003_v29 = vadd.f32 %v2002_v12, %v13679_v55  ;;  %v2531_v24 = vmax.f32 %v2001_v20, 0.0 }
 0x239   : > { %v2903_v51 = vpack.c.bf16 %v2735_v23, %v2731_v42  ;;  %v2533_v43 = vmax.f32 %v2294_v50, 0.0  ;;  %v2005_v32 = vadd.f32 %v2004_v37, %v13689_v25  ;;  %v2298_v59 = vadd.f32 %v2297_v41, %v13076_v49  ;;  %v18828_v42 = vld [vmem:[#allocation145_spill] sm:$0xff]  ;;  %v18829_v23 = vld [vmem:[#allocation34_spill] sm:$0xff] }
 0x23a   : > { %18827 = vst [vmem:[#allocation113_spill] sm:$0xff] %v15187_v39  ;;  %v15196_v52 = vadd.f32 %v18828_v42, %v13679_v55  ;;  %v2534_v4 = vmax.f32 %v2003_v29, 0.0  ;;  %v2536_v7 = vmax.f32 %v2296_v10, 0.0  ;;  %v18830_v56 = vmax.f32 %v18829_v23, 0.0  ;;  %v18838_v29 = vld [vmem:[#allocation35_spill] sm:$0xff] }
 0x23b   : > { %3483 = vmatprep.mubr.bf16.mxu0 %v2903_v51  ;;  %4382 = vmatprep.mubr.bf16.mxu1 %v2903_v51  ;;  %v18832_v20 = vmax.f32 %v18831_v40, 0.0  ;;  %v2535_v12 = vmax.f32 %v2005_v32, 0.0  ;;  %v2537_v37 = vmax.f32 %v2298_v59, 0.0  ;;  %v18834_v41 = vmax.f32 %v18833_v11, 0.0  ;;  %v18835_v51 = vld [vmem:[#allocation38_spill] sm:$0xff]  ;;  %v18843_v59 = vld [vmem:[#allocation41_spill] sm:$0xff] }
 0x23c   : > { %3484 = vmatmul.mubr.bf16.gmra.mrb[244].mxu0 %v2902_v36  ;;  %4383 = vmatmul.mubr.bf16.gmra.mrb[244].mxu1 %v2902_v36  ;;  %v2738_v2 = vmax.f32 %v18830_v56, %v2530_v30  ;;  %v18836_v39 = vmax.f32 %v18835_v51, 0.0  ;;  %v15206_v42 = vpack.c.bf16 %v2736_v14, %v2732_v3  ;;  %v18839_v10 = vmax.f32 %v18838_v29, 0.0  ;;  %v18840_v36 = vld [vmem:[#allocation39_spill] sm:$0xff]  ;;  %v2008_v40 = vpop.f32.mrb[148].mxu0 }
 0x23d   : > { %v2741_v50 = vmax.f32 %v18832_v20, %v2533_v43  ;;  %v2739_v18 = vmax.f32 %v18834_v41, %v2531_v24  ;;  %v18841_v17 = vmax.f32 %v18840_v36, 0.0  ;;  %v18842_v43 = vld [vmem:[#allocation146_spill] sm:$0xff]  ;;  %v18844_v56 = vmax.f32 %v18843_v59, 0.0  ;;  %v2301_v20 = vpop.f32.mrb[148].mxu1  ;;  %v2010_v11 = vpop.f32.mrb[149].mxu0 }
 0x23e   : > { %v2742_v0 = vmax.f32 %v18836_v39, %v2534_v4  ;;  %18837 = vst [vmem:[#allocation117_spill] sm:$0xff] %v15206_v42  ;;  %v2740_v21 = vmax.f32 %v18839_v10, %v2532_v44  ;;  %v15215_v32 = vadd.f32 %v18842_v43, %v13683_v61  ;;  %v18845_v39 = vld [vmem:[#allocation40_spill] sm:$0xff]  ;;  %v2009_v4 = vadd.f32 %v2008_v40, %v13679_v55  ;;  %v2012_v10 = vpop.f32.mrb[150].mxu0 }
 0x23f   : > { %v2744_v23 = vmax.f32 %v18841_v17, %v2536_v7  ;;  %v2745_v24 = vmax.f32 %v18844_v56, %v2537_v37  ;;  %v18846_v3 = vmax.f32 %v18845_v39, 0.0  ;;  %v2302_v44 = vadd.f32 %v2301_v20, %v13683_v61  ;;  %v2303_v17 = vpop.f32.mrb[149].mxu1  ;;  %v2014_v20 = vpop.f32.mrb[151].mxu0 }
 0x240   : > { %v2906_v7 = vpack.c.bf16 %v2742_v0, %v2738_v2  ;;  %v2011_v51 = vadd.f32 %v2010_v11, %v13689_v25  ;;  %v2304_v29 = vadd.f32 %v2303_v17, %v13076_v49  ;;  %v2305_v37 = vpop.f32.mrb[150].mxu1  ;;  %v2538_v59 = vmax.f32 %v2009_v4, 0.0  ;;  %v18851_v4 = vld [vmem:[#allocation42_spill] sm:$0xff]  ;;  %v18853_v17 = vld [vmem:[#allocation44_spill] sm:$0xff] }
 0x241   : > { %v2743_v14 = vmax.f32 %v18846_v3, %v2535_v12  ;;  %v15223_v41 = vpack.c.bf16 %v2744_v23, %v2740_v21  ;;  %v15227_v43 = vpack.c.bf16 %v2745_v24, %v2741_v50  ;;  %v2540_v12 = vmax.f32 %v2302_v44, 0.0  ;;  %v2307_v39 = vpop.f32.mrb[151].mxu1  ;;  %v18849_v50 = vld [vmem:[#allocation140_spill] sm:$0xff] }
 0x242   : > { %v2013_v56 = vadd.f32 %v2012_v10, %v13679_v55  ;;  %v2306_v40 = vadd.f32 %v2305_v37, %v13683_v61  ;;  %v2539_v0 = vmax.f32 %v2011_v51, 0.0  ;;  %v2541_v21 = vmax.f32 %v2304_v29, 0.0 }
 0x243   : > { %18847 = vst [vmem:[#allocation116_spill] sm:$0xff] %v15223_v41  ;;  %v2907_v36 = vpack.c.bf16 %v2743_v14, %v2739_v18  ;;  %18848 = vst [vmem:[#allocation118_spill] sm:$0xff] %v15227_v43  ;;  %v2015_v2 = vadd.f32 %v2014_v20, %v13689_v25  ;;  %v2308_v23 = vadd.f32 %v2307_v39, %v13076_v49  ;;  %v18850_v24 = vmax.f32 %v18849_v50, 0.0  ;;  %v18855_v20 = vld [vmem:[#allocation43_spill] sm:$0xff] }
 0x244   : > { %v2542_v3 = vmax.f32 %v2013_v56, 0.0  ;;  %v2544_v18 = vmax.f32 %v2306_v40, 0.0  ;;  %v18852_v44 = vmax.f32 %v18851_v4, 0.0  ;;  %v18854_v10 = vmax.f32 %v18853_v17, 0.0  ;;  %v18857_v56 = vld [vmem:[#allocation148_spill] sm:$0xff] }
 0x245   : > { %3493 = vmatprep.mubr.bf16.mxu0 %v2907_v36  ;;  %4392 = vmatprep.mubr.bf16.mxu1 %v2907_v36  ;;  %v2746_v14 = vmax.f32 %v18850_v24, %v2538_v59  ;;  %v2543_v29 = vmax.f32 %v2015_v2, 0.0  ;;  %v2545_v37 = vmax.f32 %v2308_v23, 0.0  ;;  %v18856_v30 = vmax.f32 %v18855_v20, 0.0  ;;  %v18861_v24 = vld [vmem:[#allocation46_spill] sm:$0xff]  ;;  %v2018_v2 = vpop.f32.mrb[152].mxu0  ;;  %v2311_v23 = vpop.f32.mrb[152].mxu1 }
 0x246   : > { %3494 = vmatmul.mubr.bf16.gmra.mrb[248].mxu0 %v2906_v7  ;;  %4393 = vmatmul.mubr.bf16.gmra.mrb[248].mxu1 %v2906_v7  ;;  %v2748_v11 = vmax.f32 %v18852_v44, %v2540_v12  ;;  %v2749_v51 = vmax.f32 %v18854_v10, %v2541_v21  ;;  %v15244_v40 = vadd.f32 %v18857_v56, %v13076_v49  ;;  %v18859_v7 = vld [vmem:[#allocation45_spill] sm:$0xff]  ;;  %v18862_v4 = vmax.f32 %v18861_v24, 0.0  ;;  %v18863_v44 = vld [vmem:[#allocation48_spill] sm:$0xff]  ;;  %v18865_v10 = vld [vmem:[#allocation47_spill] sm:$0xff] }
 0x247   : > { %v2747_v39 = vmax.f32 %v18856_v30, %v2539_v0  ;;  %v18860_v50 = vmax.f32 %v18859_v7, 0.0  ;;  %v18864_v17 = vmax.f32 %v18863_v44, 0.0  ;;  %v18866_v20 = vmax.f32 %v18865_v10, 0.0  ;;  %v18867_v0 = vld [vmem:[#allocation147_spill] sm:$0xff] }
 0x248   : > { %18858 = vst [vmem:[#allocation115_spill] sm:$0xff] %v15244_v40  ;;  %v2752_v12 = vmax.f32 %v18862_v4, %v2544_v18  ;;  %v15256_v36 = vadd.f32 %v18867_v0, %v13689_v25  ;;  %v2019_v7 = vadd.f32 %v2018_v2, %v13679_v55  ;;  %v2313_v18 = vpop.f32.mrb[153].mxu1 }
 0x249   : > { %v2750_v59 = vmax.f32 %v18860_v50, %v2542_v3  ;;  %v2753_v21 = vmax.f32 %v18864_v17, %v2545_v37  ;;  %v2751_v30 = vmax.f32 %v18866_v20, %v2543_v29  ;;  %v2312_v3 = vadd.f32 %v2311_v23, %v13683_v61  ;;  %v2020_v50 = vpop.f32.mrb[153].mxu0  ;;  %v2315_v17 = vpop.f32.mrb[154].mxu1 }
 0x24a   : > { %18868 = vst [vmem:[#allocation120_spill] sm:$0xff] %v15256_v36  ;;  %v15261_v4 = vpack.c.bf16 %v2752_v12, %v2748_v11  ;;  %v2021_v37 = vadd.f32 %v2020_v50, %v13689_v25  ;;  %v2314_v44 = vadd.f32 %v2313_v18, %v13076_v49  ;;  %v2022_v29 = vpop.f32.mrb[154].mxu0  ;;  %v2546_v0 = vmax.f32 %v2019_v7, 0.0  ;;  %v2317_v43 = vpop.f32.mrb[155].mxu1  ;;  %v18871_v50 = vld [vmem:[#allocation49_spill] sm:$0xff] }
 0x24b   : > { %v2910_v24 = vpack.c.bf16 %v2750_v59, %v2746_v14  ;;  %v2911_v10 = vpack.c.bf16 %v2751_v30, %v2747_v39  ;;  %v15265_v20 = vpack.c.bf16 %v2753_v21, %v2749_v51  ;;  %v2548_v56 = vmax.f32 %v2312_v3, 0.0  ;;  %v2024_v41 = vpop.f32.mrb[155].mxu0  ;;  %v18873_v21 = vld [vmem:[#allocation50_spill] sm:$0xff] }
 0x24c   : > { %18869 = vst [vmem:[#allocation121_spill] sm:$0xff] %v15261_v4  ;;  %v2023_v2 = vadd.f32 %v2022_v29, %v13679_v55  ;;  %v2316_v23 = vadd.f32 %v2315_v17, %v13683_v61  ;;  %v2547_v14 = vmax.f32 %v2021_v37, 0.0  ;;  %v2549_v11 = vmax.f32 %v2314_v44, 0.0  ;;  %v18875_v29 = vld [vmem:[#allocation52_spill] sm:$0xff] }
 0x24d   : > { %18870 = vst [vmem:[#allocation119_spill] sm:$0xff] %v15265_v20  ;;  %v2025_v59 = vadd.f32 %v2024_v41, %v13689_v25  ;;  %v2318_v12 = vadd.f32 %v2317_v43, %v13076_v49  ;;  %3503 = vmatprep.mubr.bf16.mxu0 %v2911_v10  ;;  %4402 = vmatprep.mubr.bf16.mxu1 %v2911_v10  ;;  %v18872_v39 = vmax.f32 %v18871_v50, 0.0  ;;  %v18874_v30 = vmax.f32 %v18873_v21, 0.0  ;;  %v18877_v41 = vld [vmem:[#allocation51_spill] sm:$0xff] }
 0x24e   : > { %v2550_v3 = vmax.f32 %v2023_v2, 0.0  ;;  %v2552_v18 = vmax.f32 %v2316_v23, 0.0  ;;  %3504 = vmatmul.mubr.bf16.gmra.mrb[252].mxu0 %v2910_v24  ;;  %4403 = vmatmul.mubr.bf16.gmra.mrb[252].mxu1 %v2910_v24  ;;  %v18876_v17 = vmax.f32 %v18875_v29, 0.0  ;;  %v18878_v20 = vmax.f32 %v18877_v41, 0.0 }
 0x24f   : > { %v2754_v51 = vmax.f32 %v18872_v39, %v2546_v0  ;;  %v2756_v7 = vmax.f32 %v18874_v30, %v2548_v56  ;;  %v2551_v44 = vmax.f32 %v2025_v59, 0.0  ;;  %v2553_v4 = vmax.f32 %v2318_v12, 0.0  ;;  %v18879_v0 = vld [vmem:[#allocation53_spill] sm:$0xff]  ;;  %v18881_v56 = vld [vmem:[#allocation54_spill] sm:$0xff]  ;;  %v18883_v30 = vld [vmem:[#allocation56_spill] sm:$0xff]  ;;  %v2028_v59 = vpop.f32.mrb[156].mxu0 }
 0x250   : > { %v2757_v37 = vmax.f32 %v18876_v17, %v2549_v11  ;;  %v2755_v43 = vmax.f32 %v18878_v20, %v2547_v14  ;;  %v18880_v39 = vmax.f32 %v18879_v0, 0.0  ;;  %v18882_v2 = vmax.f32 %v18881_v56, 0.0  ;;  %v2321_v12 = vpop.f32.mrb[156].mxu1  ;;  %v18885_v17 = vld [vmem:[#allocation55_spill] sm:$0xff] }
 0x251   : > { %v18884_v29 = vmax.f32 %v18883_v30, 0.0  ;;  %v18886_v41 = vmax.f32 %v18885_v17, 0.0  ;;  %v2322_v0 = vadd.f32 %v2321_v12, %v13683_v61 }
 0x252   : > { %v2758_v21 = vmax.f32 %v18880_v39, %v2550_v3  ;;  %v2760_v23 = vmax.f32 %v18882_v2, %v2552_v18  ;;  %v2029_v3 = vadd.f32 %v2028_v59, %v13679_v55  ;;  %v2030_v18 = vpop.f32.mrb[157].mxu0  ;;  %v2323_v39 = vpop.f32.mrb[157].mxu1 }
 0x253   : > { %v2761_v11 = vmax.f32 %v18884_v29, %v2553_v4  ;;  %v2759_v20 = vmax.f32 %v18886_v41, %v2551_v44  ;;  %v2031_v56 = vadd.f32 %v2030_v18, %v13689_v25  ;;  %v2324_v4 = vadd.f32 %v2323_v39, %v13076_v49  ;;  %v2032_v2 = vpop.f32.mrb[158].mxu0  ;;  %v2325_v30 = vpop.f32.mrb[158].mxu1  ;;  %v18889_v39 = vld [vmem:[#allocation57_spill] sm:$0xff] }
 0x254   : > { %v2914_v10 = vpack.c.bf16 %v2758_v21, %v2754_v51  ;;  %v15291_v50 = vpack.c.bf16 %v2760_v23, %v2756_v7  ;;  %v2554_v44 = vmax.f32 %v2029_v3, 0.0  ;;  %v2556_v41 = vmax.f32 %v2322_v0, 0.0  ;;  %v2034_v21 = vpop.f32.mrb[159].mxu0  ;;  %v2327_v23 = vpop.f32.mrb[159].mxu1 }
 0x255   : > { %v2915_v29 = vpack.c.bf16 %v2759_v20, %v2755_v43  ;;  %v15297_v17 = vpack.c.bf16 %v2761_v11, %v2757_v37  ;;  %v2033_v51 = vadd.f32 %v2032_v2, %v13679_v55  ;;  %v2326_v7 = vadd.f32 %v2325_v30, %v13683_v61  ;;  %v18891_v11 = vld [vmem:[#allocation58_spill] sm:$0xff]  ;;  %v18893_v30 = vld [vmem:[#allocation60_spill] sm:$0xff] }
 0x256   : > { %18887 = vst [vmem:[#allocation122_spill] sm:$0xff] %v15291_v50  ;;  %v2555_v59 = vmax.f32 %v2031_v56, 0.0  ;;  %v2557_v12 = vmax.f32 %v2324_v4, 0.0  ;;  %v2035_v14 = vadd.f32 %v2034_v21, %v13689_v25  ;;  %v2328_v18 = vadd.f32 %v2327_v23, %v13076_v49  ;;  %v18895_v21 = vld [vmem:[#allocation59_spill] sm:$0xff] }
 0x257   : > { %18888 = vst [vmem:[#allocation125_spill] sm:$0xff] %v15297_v17  ;;  %3513 = vmatprep.mubr.bf16.mxu0 %v2915_v29  ;;  %4412 = vmatprep.mubr.bf16.mxu1 %v2915_v29  ;;  %v18890_v43 = vmax.f32 %v18889_v39, 0.0  ;;  %v18892_v20 = vmax.f32 %v18891_v11, 0.0  ;;  %v2558_v0 = vmax.f32 %v2033_v51, 0.0  ;;  %v2560_v2 = vmax.f32 %v2326_v7, 0.0  ;;  %v18897_v29 = vld [vmem:[#allocation149_spill] sm:$0xff] }
 0x258   : > { %3514 = vmatmul.mubr.bf16.gmra.mrb[0].mxu0 %v2914_v10  ;;  %4413 = vmatmul.mubr.bf16.gmra.mrb[0].mxu1 %v2914_v10  ;;  %v18894_v24 = vmax.f32 %v18893_v30, 0.0  ;;  %v2559_v4 = vmax.f32 %v2035_v14, 0.0  ;;  %v2561_v50 = vmax.f32 %v2328_v18, 0.0  ;;  %v18896_v17 = vmax.f32 %v18895_v21, 0.0  ;;  %v18901_v10 = vld [vmem:[#allocation62_spill] sm:$0xff]  ;;  %v2038_v18 = vpop.f32.mrb[160].mxu0 }
 0x259   : > { %v2762_v37 = vmax.f32 %v18890_v43, %v2554_v44  ;;  %v2764_v3 = vmax.f32 %v18892_v20, %v2556_v41  ;;  %v15313_v42 = vadd.f32 %v18897_v29, %v13679_v55  ;;  %v18898_v44 = vld [vmem:[#allocation150_spill] sm:$0xff]  ;;  %v18899_v41 = vld [vmem:[#allocation61_spill] sm:$0xff]  ;;  %v18902_v43 = vmax.f32 %v18901_v10, 0.0  ;;  %v2331_v20 = vpop.f32.mrb[160].mxu1  ;;  %v18906_v30 = vld [vmem:[#allocation63_spill] sm:$0xff]  ;;  %v2040_v10 = vpop.f32.mrb[161].mxu0 }
 0x25a   : > { %v2765_v56 = vmax.f32 %v18894_v24, %v2557_v12  ;;  %v2763_v23 = vmax.f32 %v18896_v17, %v2555_v59  ;;  %v15317_v39 = vadd.f32 %v18898_v44, %v13683_v61  ;;  %v18900_v51 = vmax.f32 %v18899_v41, 0.0  ;;  %v18903_v24 = vld [vmem:[#allocation152_spill] sm:$0xff]  ;;  %v18908_v44 = vld [vmem:[#allocation151_spill] sm:$0xff] }
 0x25b   : > { %v2768_v11 = vmax.f32 %v18902_v43, %v2560_v2  ;;  %v15325_v14 = vadd.f32 %v18903_v24, %v13076_v49  ;;  %v18904_v12 = vld [vmem:[#allocation64_spill] sm:$0xff]  ;;  %v18907_v21 = vmax.f32 %v18906_v30, 0.0  ;;  %v15333_v36 = vadd.f32 %v18908_v44, %v13689_v25  ;;  %v2333_v43 = vpop.f32.mrb[161].mxu1 }
 0x25c   : > { %v2766_v7 = vmax.f32 %v18900_v51, %v2558_v0  ;;  %v18905_v17 = vmax.f32 %v18904_v12, 0.0  ;;  %v2039_v2 = vadd.f32 %v2038_v18, %v13679_v55  ;;  %v2332_v51 = vadd.f32 %v2331_v20, %v13683_v61  ;;  %v2042_v12 = vpop.f32.mrb[162].mxu0 }
 0x25d   : > { %v2767_v29 = vmax.f32 %v18907_v21, %v2559_v4  ;;  %v15335_v41 = vpack.c.bf16 %v2768_v11, %v2764_v3  ;;  %v2334_v24 = vadd.f32 %v2333_v43, %v13076_v49  ;;  %v18911_v43 = vld [vmem:[#allocation65_spill] sm:$0xff] }
 0x25e   : > { %v2769_v59 = vmax.f32 %v18905_v17, %v2561_v50  ;;  %v2918_v0 = vpack.c.bf16 %v2766_v7, %v2762_v37  ;;  %v2041_v50 = vadd.f32 %v2040_v10, %v13689_v25  ;;  %v2335_v17 = vpop.f32.mrb[162].mxu1  ;;  %v2562_v21 = vmax.f32 %v2039_v2, 0.0  ;;  %v2044_v7 = vpop.f32.mrb[163].mxu0 }
 0x25f   : > { %18909 = vst [vmem:[#allocation123_spill] sm:$0xff] %v15335_v41  ;;  %v2919_v4 = vpack.c.bf16 %v2767_v29, %v2763_v23  ;;  %v2564_v44 = vmax.f32 %v2332_v51, 0.0  ;;  %v2043_v37 = vadd.f32 %v2042_v12, %v13679_v55  ;;  %v2336_v3 = vadd.f32 %v2335_v17, %v13683_v61  ;;  %v2337_v11 = vpop.f32.mrb[163].mxu1  ;;  %v18915_v17 = vld [vmem:[#allocation68_spill] sm:$0xff] }
 0x260   : > { %v15341_v30 = vpack.c.bf16 %v2769_v59, %v2765_v56  ;;  %v2563_v18 = vmax.f32 %v2041_v50, 0.0  ;;  %v2565_v20 = vmax.f32 %v2334_v24, 0.0  ;;  %v2045_v41 = vadd.f32 %v2044_v7, %v13689_v25  ;;  %v18913_v59 = vld [vmem:[#allocation66_spill] sm:$0xff] }
 0x261   : > { %v2338_v10 = vadd.f32 %v2337_v11, %v13076_v49  ;;  %3523 = vmatprep.mubr.bf16.mxu0 %v2919_v4  ;;  %4422 = vmatprep.mubr.bf16.mxu1 %v2919_v4  ;;  %v18912_v23 = vmax.f32 %v18911_v43, 0.0  ;;  %v18914_v29 = vmax.f32 %v18913_v59, 0.0  ;;  %v2566_v51 = vmax.f32 %v2043_v37, 0.0  ;;  %v18918_v43 = vld [vmem:[#allocation153_spill] sm:$0xff]  ;;  %v2341_v59 = vpop.f32.mrb[164].mxu1 }
 0x262   : > { %18910 = vst [vmem:[#allocation133_spill] sm:$0xff] %v15341_v30  ;;  %v2568_v12 = vmax.f32 %v2336_v3, 0.0  ;;  %3524 = vmatmul.mubr.bf16.gmra.mrb[4].mxu0 %v2918_v0  ;;  %4423 = vmatmul.mubr.bf16.gmra.mrb[4].mxu1 %v2918_v0  ;;  %v18916_v30 = vmax.f32 %v18915_v17, 0.0  ;;  %v2567_v24 = vmax.f32 %v2045_v41, 0.0  ;;  %v18917_v7 = vmax.f32 %v14425_v1, 0.0  ;;  %v18921_v41 = vld [vmem:[#allocation154_spill] sm:$0xff] }
 0x263   : > { %v2770_v56 = vmax.f32 %v18912_v23, %v2562_v21  ;;  %v2772_v2 = vmax.f32 %v18914_v29, %v2564_v44  ;;  %v2569_v40 = vmax.f32 %v2338_v10, 0.0  ;;  %v15358_v21 = vadd.f32 %v18918_v43, %v13679_v55  ;;  %v18922_v1 = vld [vmem:[#allocation67_spill] sm:$0xff]  ;;  %v2048_v10 = vpop.f32.mrb[164].mxu0  ;;  %v18924_v29 = vld [vmem:[#allocation72_spill] sm:$0xff] }
 0x264   : > { %v2773_v50 = vmax.f32 %v18916_v30, %v2565_v20  ;;  %v2771_v11 = vmax.f32 %v18917_v7, %v2563_v18  ;;  %v18919_v44 = vmax.f32 %v14429_v60, 0.0  ;;  %v18920_v3 = vmax.f32 %v14433_v8, 0.0 }
 0x265   : > { %v15367_v30 = vadd.f32 %v18921_v41, %v13683_v61  ;;  %v18923_v18 = vmax.f32 %v18922_v1, 0.0  ;;  %v18925_v17 = vmax.f32 %v18924_v29, 0.0  ;;  %v2049_v8 = vadd.f32 %v2048_v10, %v13679_v55 }
 0x266   : > { %v2774_v37 = vmax.f32 %v18919_v44, %v2566_v51  ;;  %v2776_v0 = vmax.f32 %v18920_v3, %v2568_v12  ;;  %v2342_v51 = vadd.f32 %v2341_v59, %v13683_v61  ;;  %v2050_v12 = vpop.f32.mrb[165].mxu0  ;;  %v2343_v44 = vpop.f32.mrb[165].mxu1 }
 0x267   : > { %v2777_v20 = vmax.f32 %v18923_v18, %v2569_v40  ;;  %v2775_v7 = vmax.f32 %v18925_v17, %v2567_v24  ;;  %v2051_v3 = vadd.f32 %v2050_v12, %v13689_v25  ;;  %v2344_v41 = vadd.f32 %v2343_v44, %v13076_v49  ;;  %v2052_v1 = vpop.f32.mrb[166].mxu0  ;;  %v2345_v40 = vpop.f32.mrb[166].mxu1  ;;  %v18927_v44 = vld [vmem:[#allocation71_spill] sm:$0xff] }
 0x268   : > { %v2922_v43 = vpack.c.bf16 %v2774_v37, %v2770_v56  ;;  %v15373_v60 = vpack.c.bf16 %v2776_v0, %v2772_v2  ;;  %v2570_v29 = vmax.f32 %v2049_v8, 0.0  ;;  %v2572_v24 = vmax.f32 %v2342_v51, 0.0  ;;  %v2054_v37 = vpop.f32.mrb[167].mxu0  ;;  %v2347_v0 = vpop.f32.mrb[167].mxu1 }
 0x269   : > { %v2923_v18 = vpack.c.bf16 %v2775_v7, %v2771_v11  ;;  %v15379_v23 = vpack.c.bf16 %v2777_v20, %v2773_v50  ;;  %v2053_v56 = vadd.f32 %v2052_v1, %v13679_v55  ;;  %v2346_v2 = vadd.f32 %v2345_v40, %v13683_v61  ;;  %v18929_v20 = vld [vmem:[#allocation73_spill] sm:$0xff]  ;;  %v18931_v40 = vld [vmem:[#allocation75_spill] sm:$0xff] }
 0x26a   : > { %18926 = vst [vmem:[#allocation126_spill] sm:$0xff] %v15373_v60  ;;  %v2571_v10 = vmax.f32 %v2051_v3, 0.0  ;;  %v2573_v59 = vmax.f32 %v2344_v41, 0.0  ;;  %v2055_v17 = vadd.f32 %v2054_v37, %v13689_v25  ;;  %v2348_v12 = vadd.f32 %v2347_v0, %v13076_v49 }
 0x26b   : > { %3533 = vmatprep.mubr.bf16.mxu0 %v2923_v18  ;;  %4432 = vmatprep.mubr.bf16.mxu1 %v2923_v18  ;;  %v18928_v11 = vmax.f32 %v18927_v44, 0.0  ;;  %v18930_v7 = vmax.f32 %v18929_v20, 0.0  ;;  %v2574_v51 = vmax.f32 %v2053_v56, 0.0  ;;  %v2576_v1 = vmax.f32 %v2346_v2, 0.0  ;;  %v18934_v44 = vld [vmem:[#allocation70_spill] sm:$0xff] }
 0x26c   : > { %3534 = vmatmul.mubr.bf16.gmra.mrb[8].mxu0 %v2922_v43  ;;  %4433 = vmatmul.mubr.bf16.gmra.mrb[8].mxu1 %v2922_v43  ;;  %v18932_v4 = vmax.f32 %v18931_v40, 0.0  ;;  %v2575_v41 = vmax.f32 %v2055_v17, 0.0  ;;  %v2577_v60 = vmax.f32 %v2348_v12, 0.0  ;;  %v18933_v37 = vmax.f32 %v14467_v9, 0.0  ;;  %v18936_v2 = vld [vmem:[#allocation74_spill] sm:$0xff]  ;;  %v2351_v17 = vpop.f32.mrb[168].mxu1 }
 0x26d   : > { %v2778_v50 = vmax.f32 %v18928_v11, %v2570_v29  ;;  %v2780_v8 = vmax.f32 %v18930_v7, %v2572_v24  ;;  %v15396_v29 = vadd.f32 %v18934_v44, %v13076_v49  ;;  %v18935_v24 = vmax.f32 %v14471_v27, 0.0  ;;  %v18940_v12 = vld [vmem:[#allocation69_spill] sm:$0xff] }
 0x26e   : > { %v2781_v3 = vmax.f32 %v18932_v4, %v2573_v59  ;;  %v2779_v0 = vmax.f32 %v18933_v37, %v2571_v10  ;;  %v18937_v11 = vmax.f32 %v18936_v2, 0.0  ;;  %v18938_v20 = vmax.f32 %v14490_v31, 0.0  ;;  %v2058_v59 = vpop.f32.mrb[168].mxu0 }
 0x26f   : > { %v2782_v56 = vmax.f32 %v18935_v24, %v2574_v51  ;;  %v18939_v9 = vmax.f32 %v14511_v16, 0.0  ;;  %v15408_v7 = vadd.f32 %v18940_v12, %v13689_v25  ;;  %v2059_v51 = vadd.f32 %v2058_v59, %v13679_v55  ;;  %v2060_v31 = vpop.f32.mrb[169].mxu0 }
 0x270   : > { %v2784_v43 = vmax.f32 %v18937_v11, %v2576_v1  ;;  %v2785_v4 = vmax.f32 %v18938_v20, %v2577_v60  ;;  %v2352_v1 = vadd.f32 %v2351_v17, %v13683_v61  ;;  %v2353_v60 = vpop.f32.mrb[169].mxu1  ;;  %v2061_v44 = vadd.f32 %v2060_v31, %v13689_v25 }
 0x271   : > { %v2783_v10 = vmax.f32 %v18939_v9, %v2575_v41  ;;  %v2926_v37 = vpack.c.bf16 %v2782_v56, %v2778_v50  ;;  %v2354_v16 = vadd.f32 %v2353_v60, %v13076_v49  ;;  %v2062_v41 = vpop.f32.mrb[170].mxu0  ;;  %v2355_v24 = vpop.f32.mrb[170].mxu1  ;;  %v2578_v20 = vmax.f32 %v2059_v51, 0.0 }
 0x272   : > { %v15411_v27 = vpack.c.bf16 %v2784_v43, %v2780_v8  ;;  %v15417_v11 = vpack.c.bf16 %v2785_v4, %v2781_v3  ;;  %v2580_v9 = vmax.f32 %v2352_v1, 0.0  ;;  %v2063_v50 = vadd.f32 %v2062_v41, %v13679_v55  ;;  %v2064_v56 = vpop.f32.mrb[171].mxu0  ;;  %v2357_v43 = vpop.f32.mrb[171].mxu1  ;;  %v18942_v4 = vld [vmem:[#allocation79_spill] sm:$0xff]  ;;  %v18944_v41 = vld [vmem:[#allocation78_spill] sm:$0xff] }
 0x273   : > { %v2927_v2 = vpack.c.bf16 %v2783_v10, %v2779_v0  ;;  %v2356_v8 = vadd.f32 %v2355_v24, %v13683_v61  ;;  %v2579_v59 = vmax.f32 %v2061_v44, 0.0  ;;  %v2581_v17 = vmax.f32 %v2354_v16, 0.0 }
 0x274   : > { %v2065_v12 = vadd.f32 %v2064_v56, %v13689_v25  ;;  %v2358_v31 = vadd.f32 %v2357_v43, %v13076_v49  ;;  %v18941_v0 = vmax.f32 %v14498_v28, 0.0  ;;  %v18943_v10 = vmax.f32 %v18942_v4, 0.0 }
 0x275   : > { %3543 = vmatprep.mubr.bf16.mxu0 %v2927_v2  ;;  %4442 = vmatprep.mubr.bf16.mxu1 %v2927_v2  ;;  %v2582_v1 = vmax.f32 %v2063_v50, 0.0  ;;  %v2584_v60 = vmax.f32 %v2356_v8, 0.0  ;;  %v18945_v24 = vmax.f32 %v18944_v41, 0.0  ;;  %v18946_v56 = vmax.f32 %v14526_v34, 0.0 }
 0x276   : > { %v2786_v3 = vmax.f32 %v18941_v0, %v2578_v20  ;;  %v2788_v51 = vmax.f32 %v18943_v10, %v2580_v9  ;;  %3544 = vmatmul.mubr.bf16.gmra.mrb[12].mxu0 %v2926_v37  ;;  %4443 = vmatmul.mubr.bf16.gmra.mrb[12].mxu1 %v2926_v37  ;;  %v2583_v16 = vmax.f32 %v2065_v12, 0.0  ;;  %v2585_v40 = vmax.f32 %v2358_v31, 0.0  ;;  %v2068_v12 = vpop.f32.mrb[172].mxu0  ;;  %v2361_v31 = vpop.f32.mrb[172].mxu1 }
 0x277   : > { %v2789_v44 = vmax.f32 %v18945_v24, %v2581_v17  ;;  %v2787_v43 = vmax.f32 %v18946_v56, %v2579_v59  ;;  %v18947_v20 = vmax.f32 %v14530_v38, 0.0  ;;  %v18948_v9 = vmax.f32 %v14534_v35, 0.0 }
 0x278   : > { %v18949_v8 = vmax.f32 %v14538_v47, 0.0  ;;  %v18950_v34 = vmax.f32 %v14546_v45, 0.0  ;;  %v2069_v38 = vadd.f32 %v2068_v12, %v13679_v55  ;;  %v2362_v35 = vadd.f32 %v2361_v31, %v13683_v61 }
 0x279   : > { %v2790_v0 = vmax.f32 %v18947_v20, %v2582_v1  ;;  %v2792_v50 = vmax.f32 %v18948_v9, %v2584_v60  ;;  %v2070_v1 = vpop.f32.mrb[173].mxu0  ;;  %v2363_v60 = vpop.f32.mrb[173].mxu1 }
 0x27a   : > { %v2793_v17 = vmax.f32 %v18949_v8, %v2585_v40  ;;  %v2791_v59 = vmax.f32 %v18950_v34, %v2583_v16  ;;  %v2071_v24 = vadd.f32 %v2070_v1, %v13689_v25  ;;  %v2364_v47 = vadd.f32 %v2363_v60, %v13076_v49  ;;  %v2072_v40 = vpop.f32.mrb[174].mxu0  ;;  %v2365_v56 = vpop.f32.mrb[174].mxu1 }
 0x27b   : > { %v2930_v10 = vpack.c.bf16 %v2790_v0, %v2786_v3  ;;  %v15443_v41 = vpack.c.bf16 %v2792_v50, %v2788_v51  ;;  %v2586_v16 = vmax.f32 %v2069_v38, 0.0  ;;  %v2588_v9 = vmax.f32 %v2362_v35, 0.0  ;;  %v2074_v0 = vpop.f32.mrb[175].mxu0  ;;  %v2367_v50 = vpop.f32.mrb[175].mxu1 }
 0x27c   : > { %v2931_v20 = vpack.c.bf16 %v2791_v59, %v2787_v43  ;;  %v15449_v45 = vpack.c.bf16 %v2793_v17, %v2789_v44  ;;  %v2073_v3 = vadd.f32 %v2072_v40, %v13679_v55  ;;  %v2366_v51 = vadd.f32 %v2365_v56, %v13683_v61 }
 0x27d   : > { %v2587_v8 = vmax.f32 %v2071_v24, 0.0  ;;  %v2589_v12 = vmax.f32 %v2364_v47, 0.0  ;;  %v2075_v31 = vadd.f32 %v2074_v0, %v13689_v25  ;;  %v2368_v34 = vadd.f32 %v2367_v50, %v13076_v49 }
 0x27e   : > { %3553 = vmatprep.mubr.bf16.mxu0 %v2931_v20  ;;  %4452 = vmatprep.mubr.bf16.mxu1 %v2931_v20  ;;  %v18951_v43 = vmax.f32 %v14550_v33, 0.0  ;;  %v18952_v17 = vmax.f32 %v14555_v57, 0.0  ;;  %v2590_v38 = vmax.f32 %v2073_v3, 0.0  ;;  %v2592_v35 = vmax.f32 %v2366_v51, 0.0  ;;  %v18955_v20 = vld [vmem:[#allocation76_spill] sm:$0xff]  ;;  %v18956_v33 = vld [vmem:[#allocation77_spill] sm:$0xff] }
 0x27f   : > { %3554 = vmatmul.mubr.bf16.gmra.mrb[16].mxu0 %v2930_v10  ;;  %4453 = vmatmul.mubr.bf16.gmra.mrb[16].mxu1 %v2930_v10  ;;  %v18953_v1 = vmax.f32 %v14559_v54, 0.0  ;;  %v2591_v24 = vmax.f32 %v2075_v31, 0.0  ;;  %v2593_v47 = vmax.f32 %v2368_v34, 0.0  ;;  %v18954_v40 = vmax.f32 %v14568_v26, 0.0  ;;  %v18959_v3 = vld [vmem:[#allocation81_spill] sm:$0xff]  ;;  %v18960_v26 = vld [vmem:[#allocation88_spill] sm:$0xff] }
 0x280   : > { %v2794_v44 = vmax.f32 %v18951_v43, %v2586_v16  ;;  %v2796_v59 = vmax.f32 %v18952_v17, %v2588_v9  ;;  %v15465_v0 = vadd.f32 %v18955_v20, %v13679_v55  ;;  %v15469_v57 = vadd.f32 %v18956_v33, %v13683_v61  ;;  %v2371_v31 = vpop.f32.mrb[176].mxu1  ;;  %v18962_v34 = vld [vmem:[#allocation161_spill] sm:$0xff] }
 0x281   : > { %v2797_v60 = vmax.f32 %v18953_v1, %v2589_v12  ;;  %v2795_v56 = vmax.f32 %v18954_v40, %v2587_v8  ;;  %v18957_v16 = vmax.f32 %v14572_v53, 0.0  ;;  %v18958_v10 = vmax.f32 %v14577_v19, 0.0  ;;  %v2078_v12 = vpop.f32.mrb[176].mxu0  ;;  %v18964_v1 = vld [vmem:[#allocation80_spill] sm:$0xff]  ;;  %v2373_v33 = vpop.f32.mrb[177].mxu1 }
 0x282   : > { %v15477_v51 = vadd.f32 %v18959_v3, %v13076_v49  ;;  %v18961_v50 = vmax.f32 %v18960_v26, 0.0  ;;  %v18963_v43 = vmax.f32 %v18962_v34, 0.0  ;;  %v15485_v40 = vadd.f32 %v18964_v1, %v13689_v25  ;;  %v2080_v20 = vpop.f32.mrb[177].mxu0  ;;  %v2375_v3 = vpop.f32.mrb[178].mxu1 }
 0x283   : > { %v2798_v9 = vmax.f32 %v18957_v16, %v2590_v38  ;;  %v2800_v54 = vmax.f32 %v18958_v10, %v2592_v35  ;;  %v2079_v19 = vadd.f32 %v2078_v12, %v13679_v55  ;;  %v2372_v35 = vadd.f32 %v2371_v31, %v13683_v61  ;;  %v2082_v10 = vpop.f32.mrb[178].mxu0 }
 0x284   : > { %v2801_v8 = vmax.f32 %v18961_v50, %v2593_v47  ;;  %v2799_v17 = vmax.f32 %v18963_v43, %v2591_v24  ;;  %v2081_v47 = vadd.f32 %v2080_v20, %v13689_v25  ;;  %v2374_v16 = vadd.f32 %v2373_v33, %v13076_v49  ;;  %v18965_v20 = vld [vmem:[#allocation157_spill] sm:$0xff] }
 0x285   : > { %v2934_v53 = vpack.c.bf16 %v2798_v9, %v2794_v44  ;;  %v15487_v38 = vpack.c.bf16 %v2800_v54, %v2796_v59  ;;  %v2594_v50 = vmax.f32 %v2079_v19, 0.0  ;;  %v2596_v34 = vmax.f32 %v2372_v35, 0.0  ;;  %v2084_v9 = vpop.f32.mrb[179].mxu0  ;;  %v2377_v54 = vpop.f32.mrb[179].mxu1 }
 0x286   : > { %v2935_v24 = vpack.c.bf16 %v2799_v17, %v2795_v56  ;;  %v15493_v26 = vpack.c.bf16 %v2801_v8, %v2797_v60  ;;  %v2083_v44 = vadd.f32 %v2082_v10, %v13679_v55  ;;  %v2376_v59 = vadd.f32 %v2375_v3, %v13683_v61  ;;  %v18967_v8 = vld [vmem:[#allocation158_spill] sm:$0xff] }
 0x287   : > { %v2595_v12 = vmax.f32 %v2081_v47, 0.0  ;;  %v2597_v31 = vmax.f32 %v2374_v16, 0.0  ;;  %v2085_v43 = vadd.f32 %v2084_v9, %v13689_v25  ;;  %v2378_v1 = vadd.f32 %v2377_v54, %v13076_v49  ;;  %v18969_v10 = vld [vmem:[#allocation162_spill] sm:$0xff]  ;;  %v18971_v9 = vld [vmem:[#allocation165_spill] sm:$0xff] }
 0x288   : > { %3563 = vmatprep.mubr.bf16.mxu0 %v2935_v24  ;;  %4462 = vmatprep.mubr.bf16.mxu1 %v2935_v24  ;;  %v18966_v56 = vmax.f32 %v18965_v20, 0.0  ;;  %v18968_v17 = vmax.f32 %v18967_v8, 0.0  ;;  %v2598_v35 = vmax.f32 %v2083_v44, 0.0  ;;  %v2600_v33 = vmax.f32 %v2376_v59, 0.0  ;;  %v18973_v20 = vld [vmem:[#allocation84_spill] sm:$0xff]  ;;  %v18976_v59 = vld [vmem:[#allocation167_spill] sm:$0xff] }
 0x289   : > { %3564 = vmatmul.mubr.bf16.gmra.mrb[20].mxu0 %v2934_v53  ;;  %4463 = vmatmul.mubr.bf16.gmra.mrb[20].mxu1 %v2934_v53  ;;  %v18970_v3 = vmax.f32 %v18969_v10, 0.0  ;;  %v2599_v16 = vmax.f32 %v2085_v43, 0.0  ;;  %v2601_v4 = vmax.f32 %v2378_v1, 0.0  ;;  %v18972_v37 = vmax.f32 %v18971_v9, 0.0  ;;  %v18979_v1 = vld [vmem:[#allocation168_spill] sm:$0xff]  ;;  %v2088_v10 = vpop.f32.mrb[180].mxu0 }
 0x28a   : > { %v2802_v60 = vmax.f32 %v18966_v56, %v2594_v50  ;;  %v2804_v19 = vmax.f32 %v18968_v17, %v2596_v34  ;;  %v15510_v50 = vadd.f32 %v18973_v20, %v13679_v55  ;;  %v18974_v56 = vld [vmem:[#allocation166_spill] sm:$0xff]  ;;  %v18977_v8 = vmax.f32 %v18976_v59, 0.0  ;;  %v18981_v9 = vld [vmem:[#allocation171_spill] sm:$0xff] }
 0x28b   : > { %v2805_v47 = vmax.f32 %v18970_v3, %v2597_v31  ;;  %v2803_v54 = vmax.f32 %v18972_v37, %v2595_v12  ;;  %v18975_v34 = vmax.f32 %v18974_v56, 0.0  ;;  %v18978_v31 = vld [vmem:[#allocation155_spill] sm:$0xff]  ;;  %v18980_v37 = vmax.f32 %v18979_v1, 0.0  ;;  %v2381_v3 = vpop.f32.mrb[180].mxu1 }
 0x28c   : > { %v2808_v53 = vmax.f32 %v18977_v8, %v2600_v33  ;;  %v15519_v43 = vadd.f32 %v18978_v31, %v13683_v61  ;;  %v18982_v20 = vmax.f32 %v18981_v9, 0.0  ;;  %v2382_v33 = vadd.f32 %v2381_v3, %v13683_v61  ;;  %v2383_v59 = vpop.f32.mrb[181].mxu1 }
 0x28d   : > { %v2806_v44 = vmax.f32 %v18975_v34, %v2598_v35  ;;  %v2809_v12 = vmax.f32 %v18980_v37, %v2601_v4  ;;  %v2089_v35 = vadd.f32 %v2088_v10, %v13679_v55  ;;  %v2090_v34 = vpop.f32.mrb[181].mxu0  ;;  %v2384_v31 = vadd.f32 %v2383_v59, %v13076_v49  ;;  %v2385_v4 = vpop.f32.mrb[182].mxu1  ;;  %v18984_v59 = vld [vmem:[#allocation172_spill] sm:$0xff] }
 0x28e   : > { %v2807_v24 = vmax.f32 %v18982_v20, %v2599_v16  ;;  %v15525_v56 = vpack.c.bf16 %v2808_v53, %v2804_v19  ;;  %v2091_v8 = vadd.f32 %v2090_v34, %v13689_v25  ;;  %v2092_v1 = vpop.f32.mrb[182].mxu0  ;;  %v2604_v16 = vmax.f32 %v2382_v33, 0.0  ;;  %v2387_v53 = vpop.f32.mrb[183].mxu1 }
 0x28f   : > { %v2938_v28 = vpack.c.bf16 %v2806_v44, %v2802_v60  ;;  %v15531_v17 = vpack.c.bf16 %v2809_v12, %v2805_v47  ;;  %v2602_v9 = vmax.f32 %v2089_v35, 0.0  ;;  %v2093_v60 = vadd.f32 %v2092_v1, %v13679_v55  ;;  %v2094_v44 = vpop.f32.mrb[183].mxu0 }
 0x290   : > { %18983 = vst [vmem:[#allocation124_spill] sm:$0xff] %v15525_v56  ;;  %v2939_v37 = vpack.c.bf16 %v2807_v24, %v2803_v54  ;;  %v2386_v19 = vadd.f32 %v2385_v4, %v13683_v61  ;;  %v2603_v10 = vmax.f32 %v2091_v8, 0.0  ;;  %v2605_v3 = vmax.f32 %v2384_v31, 0.0  ;;  %v18986_v24 = vld [vmem:[#allocation173_spill] sm:$0xff]  ;;  %v18988_v4 = vld [vmem:[#allocation174_spill] sm:$0xff] }
 0x291   : > { %v2095_v20 = vadd.f32 %v2094_v44, %v13689_v25  ;;  %v2388_v34 = vadd.f32 %v2387_v53, %v13076_v49  ;;  %v18985_v54 = vmax.f32 %v18984_v59, 0.0  ;;  %v18987_v12 = vmax.f32 %v18986_v24, 0.0  ;;  %v18990_v44 = vld [vmem:[#allocation175_spill] sm:$0xff] }
 0x292   : > { %3573 = vmatprep.mubr.bf16.mxu0 %v2939_v37  ;;  %4472 = vmatprep.mubr.bf16.mxu1 %v2939_v37  ;;  %v2606_v33 = vmax.f32 %v2093_v60, 0.0  ;;  %v2608_v1 = vmax.f32 %v2386_v19, 0.0  ;;  %v18989_v2 = vmax.f32 %v18988_v4, 0.0  ;;  %v18991_v56 = vmax.f32 %v18990_v44, 0.0  ;;  %v18992_v59 = vld [vmem:[#allocation87_spill] sm:$0xff]  ;;  %v18995_v19 = vld [vmem:[#allocation177_spill] sm:$0xff] }
 0x293   : > { %v2810_v47 = vmax.f32 %v18985_v54, %v2602_v9  ;;  %v2812_v35 = vmax.f32 %v18987_v12, %v2604_v16  ;;  %3574 = vmatmul.mubr.bf16.gmra.mrb[24].mxu0 %v2938_v28  ;;  %4473 = vmatmul.mubr.bf16.gmra.mrb[24].mxu1 %v2938_v28  ;;  %v2607_v31 = vmax.f32 %v2095_v20, 0.0  ;;  %v2609_v18 = vmax.f32 %v2388_v34, 0.0  ;;  %v18993_v54 = vld [vmem:[#allocation176_spill] sm:$0xff]  ;;  %v2391_v20 = vpop.f32.mrb[184].mxu1 }
 0x294   : > { %v2813_v8 = vmax.f32 %v18989_v2, %v2605_v3  ;;  %v2811_v53 = vmax.f32 %v18991_v56, %v2603_v10  ;;  %v15548_v9 = vadd.f32 %v18992_v59, %v13076_v49  ;;  %v18994_v16 = vmax.f32 %v18993_v54, 0.0  ;;  %v2098_v3 = vpop.f32.mrb[184].mxu0  ;;  %v18999_v10 = vld [vmem:[#allocation83_spill] sm:$0xff] }
 0x295   : > { %v18996_v24 = vmax.f32 %v18995_v19, 0.0  ;;  %v18997_v12 = vmax.f32 %v14685_v58, 0.0  ;;  %v18998_v34 = vmax.f32 %v14691_v48, 0.0  ;;  %v15560_v4 = vadd.f32 %v18999_v10, %v13689_v25  ;;  %v2100_v58 = vpop.f32.mrb[185].mxu0 }
 0x296   : > { %v2814_v60 = vmax.f32 %v18994_v16, %v2606_v33  ;;  %v2099_v33 = vadd.f32 %v2098_v3, %v13679_v55  ;;  %v2101_v16 = vadd.f32 %v2100_v58, %v13689_v25 }
 0x297   : > { %v2816_v28 = vmax.f32 %v18996_v24, %v2608_v1  ;;  %v2817_v2 = vmax.f32 %v18997_v12, %v2609_v18  ;;  %v2815_v56 = vmax.f32 %v18998_v34, %v2607_v31  ;;  %v2392_v1 = vadd.f32 %v2391_v20, %v13683_v61  ;;  %v2393_v18 = vpop.f32.mrb[185].mxu1  ;;  %v2102_v31 = vpop.f32.mrb[186].mxu0 }
 0x298   : > { %v2942_v59 = vpack.c.bf16 %v2814_v60, %v2810_v47  ;;  %v2394_v48 = vadd.f32 %v2393_v18, %v13076_v49  ;;  %v2395_v19 = vpop.f32.mrb[186].mxu1  ;;  %v2610_v34 = vmax.f32 %v2099_v33, 0.0  ;;  %v2103_v47 = vadd.f32 %v2102_v31, %v13679_v55  ;;  %v2104_v60 = vpop.f32.mrb[187].mxu0  ;;  %v19000_v18 = vld [vmem:[#allocation82_spill] sm:$0xff] }
 0x299   : > { %v15563_v54 = vpack.c.bf16 %v2816_v28, %v2812_v35  ;;  %v2943_v24 = vpack.c.bf16 %v2815_v56, %v2811_v53  ;;  %v15569_v12 = vpack.c.bf16 %v2817_v2, %v2813_v8  ;;  %v2612_v10 = vmax.f32 %v2392_v1, 0.0  ;;  %v2397_v28 = vpop.f32.mrb[187].mxu1  ;;  %v19002_v2 = vld [vmem:[#allocation86_spill] sm:$0xff] }
 0x29a   : > { %v2396_v35 = vadd.f32 %v2395_v19, %v13683_v61  ;;  %v2611_v3 = vmax.f32 %v2101_v16, 0.0  ;;  %v2613_v20 = vmax.f32 %v2394_v48, 0.0  ;;  %v2105_v44 = vadd.f32 %v2104_v60, %v13689_v25 }
 0x29b   : > { %v2398_v58 = vadd.f32 %v2397_v28, %v13076_v49  ;;  %3583 = vmatprep.mubr.bf16.mxu0 %v2943_v24  ;;  %4482 = vmatprep.mubr.bf16.mxu1 %v2943_v24  ;;  %v19001_v53 = vmax.f32 %v19000_v18, 0.0  ;;  %v19003_v56 = vmax.f32 %v19002_v2, 0.0  ;;  %v2614_v1 = vmax.f32 %v2103_v47, 0.0  ;;  %v19010_v2 = vld [vmem:[#allocation91_spill] sm:$0xff] }
 0x29c   : > { %v2616_v31 = vmax.f32 %v2396_v35, 0.0  ;;  %3584 = vmatmul.mubr.bf16.gmra.mrb[28].mxu0 %v2942_v59  ;;  %4483 = vmatmul.mubr.bf16.gmra.mrb[28].mxu1 %v2942_v59  ;;  %v19004_v19 = vmax.f32 %v14725_v6, 0.0  ;;  %v2615_v48 = vmax.f32 %v2105_v44, 0.0  ;;  %v19005_v60 = vmax.f32 %v14780_v15, 0.0  ;;  %v19008_v35 = vld [vmem:[#allocation93_spill] sm:$0xff]  ;;  %v2108_v44 = vpop.f32.mrb[188].mxu0 }
 0x29d   : > { %v2818_v8 = vmax.f32 %v19001_v53, %v2610_v34  ;;  %v2820_v33 = vmax.f32 %v19003_v56, %v2612_v10  ;;  %v2617_v37 = vmax.f32 %v2398_v58, 0.0  ;;  %v19006_v34 = vmax.f32 %v14786_v62, 0.0  ;;  %v2401_v58 = vpop.f32.mrb[188].mxu1 }
 0x29e   : > { %v2821_v16 = vmax.f32 %v19004_v19, %v2613_v20  ;;  %v2819_v28 = vmax.f32 %v19005_v60, %v2611_v3  ;;  %v19007_v10 = vmax.f32 %v14790_v63, 0.0  ;;  %v19009_v6 = vmax.f32 %v19008_v35, 0.0 }
 0x29f   : > { %v2822_v53 = vmax.f32 %v19006_v34, %v2614_v1  ;;  %v19011_v15 = vmax.f32 %v19010_v2, 0.0  ;;  %v2109_v62 = vadd.f32 %v2108_v44, %v13679_v55  ;;  %v2402_v63 = vadd.f32 %v2401_v58, %v13683_v61  ;;  %v2110_v1 = vpop.f32.mrb[189].mxu0 }
 0x2a0   : > { %v2824_v47 = vmax.f32 %v19007_v10, %v2616_v31  ;;  %v2825_v20 = vmax.f32 %v19009_v6, %v2617_v37  ;;  %v2403_v31 = vpop.f32.mrb[189].mxu1  ;;  %v2111_v34 = vadd.f32 %v2110_v1, %v13689_v25  ;;  %v2112_v10 = vpop.f32.mrb[190].mxu0 }
 0x2a1   : > { %v2823_v3 = vmax.f32 %v19011_v15, %v2615_v48  ;;  %v2946_v19 = vpack.c.bf16 %v2822_v53, %v2818_v8  ;;  %v2404_v37 = vadd.f32 %v2403_v31, %v13076_v49  ;;  %v2405_v35 = vpop.f32.mrb[190].mxu1  ;;  %v2618_v48 = vmax.f32 %v2109_v62, 0.0  ;;  %v2114_v53 = vpop.f32.mrb[191].mxu0  ;;  %v19013_v31 = vld [vmem:[#allocation97_spill] sm:$0xff] }
 0x2a2   : > { %v15595_v60 = vpack.c.bf16 %v2824_v47, %v2820_v33  ;;  %v15601_v2 = vpack.c.bf16 %v2825_v20, %v2821_v16  ;;  %v2620_v15 = vmax.f32 %v2402_v63, 0.0  ;;  %v2113_v8 = vadd.f32 %v2112_v10, %v13679_v55  ;;  %v2407_v47 = vpop.f32.mrb[191].mxu1  ;;  %v19015_v20 = vld [vmem:[#allocation102_spill] sm:$0xff] }
 0x2a3   : > { %v2947_v6 = vpack.c.bf16 %v2823_v3, %v2819_v28  ;;  %v2406_v33 = vadd.f32 %v2405_v35, %v13683_v61  ;;  %v2619_v44 = vmax.f32 %v2111_v34, 0.0  ;;  %v2621_v58 = vmax.f32 %v2404_v37, 0.0 }
 0x2a4   : > { %19012 = vst [vmem:[#allocation127_spill] sm:$0xff] %v15595_v60  ;;  %v2115_v56 = vadd.f32 %v2114_v53, %v13689_v25  ;;  %v2408_v1 = vadd.f32 %v2407_v47, %v13076_v49  ;;  %v19014_v28 = vmax.f32 %v19013_v31, 0.0  ;;  %v19016_v3 = vmax.f32 %v19015_v20, 0.0  ;;  %v19018_v53 = vld [vmem:[#allocation99_spill] sm:$0xff]  ;;  %v2118_v20 = vpop.f32.mrb[192].mxu0 }
 0x2a5   : > { %3593 = vmatprep.mubr.bf16.mxu0 %v2947_v6  ;;  %4492 = vmatprep.mubr.bf16.mxu1 %v2947_v6  ;;  %v2622_v63 = vmax.f32 %v2113_v8, 0.0  ;;  %v2624_v10 = vmax.f32 %v2406_v33, 0.0  ;;  %v19017_v35 = vmax.f32 %v14996_v22, 0.0  ;;  %v19019_v18 = vmax.f32 %v19018_v53, 0.0  ;;  %v19020_v6 = vld [vmem:[#allocation89_spill] sm:$0xff] }
 0x2a6   : > { %v2826_v16 = vmax.f32 %v19014_v28, %v2618_v48  ;;  %v2828_v62 = vmax.f32 %v19016_v3, %v2620_v15  ;;  %3594 = vmatmul.mubr.bf16.gmra.mrb[32].mxu0 %v2946_v19  ;;  %4493 = vmatmul.mubr.bf16.gmra.mrb[32].mxu1 %v2946_v19  ;;  %v2623_v37 = vmax.f32 %v2115_v56, 0.0  ;;  %v2625_v59 = vmax.f32 %v2408_v1, 0.0  ;;  %v19021_v48 = vld [vmem:[#allocation156_spill] sm:$0xff]  ;;  %v19022_v15 = vld [vmem:[#allocation105_spill] sm:$0xff]  ;;  %v19024_v19 = vld [vmem:[#allocation103_spill] sm:$0xff]  ;;  %v2411_v3 = vpop.f32.mrb[192].mxu1 }
 0x2a7   : > { %v2829_v34 = vmax.f32 %v19017_v35, %v2621_v58  ;;  %v2827_v47 = vmax.f32 %v19019_v18, %v2619_v44  ;;  %v15617_v24 = vadd.f32 %v19020_v6, %v13679_v55  ;;  %v15621_v31 = vadd.f32 %v19021_v48, %v13683_v61  ;;  %v19026_v56 = vld [vmem:[#allocation160_spill] sm:$0xff]  ;;  %v19027_v1 = vld [vmem:[#allocation109_spill] sm:$0xff]  ;;  %v19029_v35 = vld [vmem:[#allocation107_spill] sm:$0xff] }
 0x2a8   : > { %v19023_v8 = vmax.f32 %v19022_v15, 0.0  ;;  %v19025_v28 = vmax.f32 %v19024_v19, 0.0  ;;  %v15629_v58 = vadd.f32 %v19026_v56, %v13076_v49  ;;  %v19028_v18 = vmax.f32 %v19027_v1, 0.0  ;;  %v19031_v48 = vld [vmem:[#allocation159_spill] sm:$0xff]  ;;  %v2120_v19 = vpop.f32.mrb[193].mxu0 }
 0x2a9   : > { %v19030_v53 = vmax.f32 %v19029_v35, 0.0  ;;  %v15637_v60 = vadd.f32 %v19031_v48, %v13689_v25  ;;  %v2122_v1 = vpop.f32.mrb[194].mxu0 }
 0x2aa   : > { %v2830_v33 = vmax.f32 %v19023_v8, %v2622_v63  ;;  %v2832_v22 = vmax.f32 %v19025_v28, %v2624_v10  ;;  %v2833_v44 = vmax.f32 %v19028_v18, %v2625_v59  ;;  %v2119_v10 = vadd.f32 %v2118_v20, %v13679_v55  ;;  %v2413_v28 = vpop.f32.mrb[193].mxu1 }
 0x2ab   : > { %v2831_v6 = vmax.f32 %v19030_v53, %v2623_v37  ;;  %v2412_v8 = vadd.f32 %v2411_v3, %v13683_v61  ;;  %v2121_v59 = vadd.f32 %v2120_v19, %v13689_v25  ;;  %v2414_v56 = vadd.f32 %v2413_v28, %v13076_v49  ;;  %v2415_v18 = vpop.f32.mrb[194].mxu1  ;;  %v19033_v28 = vld [vmem:[#allocation111_spill] sm:$0xff] }
 0x2ac   : > { %v2950_v63 = vpack.c.bf16 %v2830_v33, %v2826_v16  ;;  %v15639_v15 = vpack.c.bf16 %v2832_v22, %v2828_v62  ;;  %v15645_v35 = vpack.c.bf16 %v2833_v44, %v2829_v34  ;;  %v2626_v53 = vmax.f32 %v2119_v10, 0.0  ;;  %v2124_v33 = vpop.f32.mrb[195].mxu0  ;;  %v2417_v22 = vpop.f32.mrb[195].mxu1 }
 0x2ad   : > { %v2951_v37 = vpack.c.bf16 %v2831_v6, %v2827_v47  ;;  %v2628_v48 = vmax.f32 %v2412_v8, 0.0  ;;  %v2123_v16 = vadd.f32 %v2122_v1, %v13679_v55  ;;  %v2416_v62 = vadd.f32 %v2415_v18, %v13683_v61 }
 0x2ae   : > { %19032 = vst [vmem:[#allocation135_spill] sm:$0xff] %v15639_v15  ;;  %v2627_v20 = vmax.f32 %v2121_v59, 0.0  ;;  %v2629_v3 = vmax.f32 %v2414_v56, 0.0  ;;  %v2125_v15 = vadd.f32 %v2124_v33, %v13689_v25  ;;  %v2418_v19 = vadd.f32 %v2417_v22, %v13076_v49 }
 0x2af   : > { %3603 = vmatprep.mubr.bf16.mxu0 %v2951_v37  ;;  %4502 = vmatprep.mubr.bf16.mxu1 %v2951_v37  ;;  %v19034_v47 = vmax.f32 %v19033_v28, 0.0  ;;  %v19035_v44 = vmax.f32 %v15157_v5, 0.0  ;;  %v2630_v10 = vmax.f32 %v2123_v16, 0.0  ;;  %v2632_v8 = vmax.f32 %v2416_v62, 0.0  ;;  %v19038_v28 = vld [vmem:[#allocation163_spill] sm:$0xff] }
 0x2b0   : > { %3604 = vmatmul.mubr.bf16.gmra.mrb[36].mxu0 %v2950_v63  ;;  %4503 = vmatmul.mubr.bf16.gmra.mrb[36].mxu1 %v2950_v63  ;;  %v19036_v1 = vmax.f32 %v15172_v13, 0.0  ;;  %v2631_v56 = vmax.f32 %v2125_v15, 0.0  ;;  %v2633_v18 = vmax.f32 %v2418_v19, 0.0  ;;  %v19037_v33 = vmax.f32 %v15180_v46, 0.0  ;;  %v19041_v15 = vld [vmem:[#allocation164_spill] sm:$0xff]  ;;  %v19042_v46 = vld [vmem:[#allocation115_spill] sm:$0xff] }
 0x2b1   : > { %v2834_v34 = vmax.f32 %v19034_v47, %v2626_v53  ;;  %v2836_v6 = vmax.f32 %v19035_v44, %v2628_v48  ;;  %v1596_v37 = vmax.f32 %v15617_v24, 0.0  ;;  %v15662_v53 = vadd.f32 %v19038_v28, %v13679_v55  ;;  %v2128_v19 = vpop.f32.mrb[196].mxu0  ;;  %v2421_v47 = vpop.f32.mrb[196].mxu1  ;;  %v19044_v44 = vld [vmem:[#allocation120_spill] sm:$0xff] }
 0x2b2   : > { %v2837_v59 = vmax.f32 %v19036_v1, %v2629_v3  ;;  %v2835_v22 = vmax.f32 %v19037_v33, %v2627_v20  ;;  %v19039_v5 = vmax.f32 %v15196_v52, 0.0  ;;  %v19040_v16 = vmax.f32 %v15215_v32, 0.0 }
 0x2b3   : > { %v15671_v62 = vadd.f32 %v19041_v15, %v13683_v61  ;;  %v19043_v20 = vmax.f32 %v19042_v46, 0.0  ;;  %v19045_v1 = vmax.f32 %v19044_v44, 0.0  ;;  %v2129_v32 = vadd.f32 %v2128_v19, %v13679_v55 }
 0x2b4   : > { %v2838_v48 = vmax.f32 %v19039_v5, %v2630_v10  ;;  %v2840_v63 = vmax.f32 %v19040_v16, %v2632_v8  ;;  %v2422_v10 = vadd.f32 %v2421_v47, %v13683_v61  ;;  %v2130_v8 = vpop.f32.mrb[197].mxu0  ;;  %v2423_v5 = vpop.f32.mrb[197].mxu1 }
 0x2b5   : > { %v2841_v3 = vmax.f32 %v19043_v20, %v2633_v18  ;;  %v2839_v33 = vmax.f32 %v19045_v1, %v2631_v56  ;;  %v2131_v16 = vadd.f32 %v2130_v8, %v13689_v25  ;;  %v2424_v15 = vadd.f32 %v2423_v5, %v13076_v49  ;;  %v2132_v46 = vpop.f32.mrb[198].mxu0  ;;  %v2425_v18 = vpop.f32.mrb[198].mxu1 }
 0x2b6   : > { %v2954_v28 = vpack.c.bf16 %v2838_v48, %v2834_v34  ;;  %v15677_v52 = vpack.c.bf16 %v2840_v63, %v2836_v6  ;;  %v2634_v44 = vmax.f32 %v2129_v32, 0.0  ;;  %v2636_v56 = vmax.f32 %v2422_v10, 0.0  ;;  %v2134_v48 = vpop.f32.mrb[199].mxu0  ;;  %v2427_v63 = vpop.f32.mrb[199].mxu1 }
 0x2b7   : > { %v2955_v20 = vpack.c.bf16 %v2839_v33, %v2835_v22  ;;  %v15683_v13 = vpack.c.bf16 %v2841_v3, %v2837_v59  ;;  %v2133_v34 = vadd.f32 %v2132_v46, %v13679_v55  ;;  %v2426_v6 = vadd.f32 %v2425_v18, %v13683_v61 }
 0x2b8   : > { %v2635_v19 = vmax.f32 %v2131_v16, 0.0  ;;  %v2637_v47 = vmax.f32 %v2424_v15, 0.0  ;;  %v2135_v1 = vadd.f32 %v2134_v48, %v13689_v25  ;;  %v2428_v8 = vadd.f32 %v2427_v63, %v13076_v49  ;;  %v2138_v63 = vpop.f32.mrb[200].mxu0 }
 0x2b9   : > { %3613 = vmatprep.mubr.bf16.mxu0 %v2955_v20  ;;  %4512 = vmatprep.mubr.bf16.mxu1 %v2955_v20  ;;  %v19046_v22 = vmax.f32 %v15313_v42, 0.0  ;;  %v19047_v3 = vmax.f32 %v15317_v39, 0.0  ;;  %v2638_v32 = vmax.f32 %v2133_v34, 0.0  ;;  %v2640_v10 = vmax.f32 %v2426_v6, 0.0  ;;  %v19050_v42 = vld [vmem:[#allocation170_spill] sm:$0xff] }
 0x2ba   : > { %3614 = vmatmul.mubr.bf16.gmra.mrb[40].mxu0 %v2954_v28  ;;  %4513 = vmatmul.mubr.bf16.gmra.mrb[40].mxu1 %v2954_v28  ;;  %v19048_v5 = vmax.f32 %v15325_v14, 0.0  ;;  %v2639_v15 = vmax.f32 %v2135_v1, 0.0  ;;  %v2641_v46 = vmax.f32 %v2428_v8, 0.0  ;;  %v19049_v18 = vmax.f32 %v15333_v36, 0.0  ;;  %v19055_v1 = vld [vmem:[#allocation169_spill] sm:$0xff] }
 0x2bb   : > { %v2842_v59 = vmax.f32 %v19046_v22, %v2634_v44  ;;  %v2844_v33 = vmax.f32 %v19047_v3, %v2636_v56  ;;  %v1599_v20 = vmax.f32 %v15629_v58, 0.0  ;;  %v15700_v44 = vadd.f32 %v19050_v42, %v13076_v49  ;;  %v19065_v58 = vld [vmem:[#allocation178_spill] sm:$0xff] }
 0x2bc   : > { %v2845_v16 = vmax.f32 %v19048_v5, %v2637_v47  ;;  %v2843_v48 = vmax.f32 %v19049_v18, %v2635_v19  ;;  %v19051_v39 = vmax.f32 %v15358_v21, 0.0  ;;  %v19052_v34 = vmax.f32 %v15367_v30, 0.0  ;;  %v2431_v47 = vpop.f32.mrb[200].mxu1 }
 0x2bd   : > { %v19053_v14 = vmax.f32 %v15396_v29, 0.0  ;;  %v19054_v36 = vmax.f32 %v15408_v7, 0.0  ;;  %v15712_v8 = vadd.f32 %v19055_v1, %v13689_v25  ;;  %v1597_v22 = vmax.f32 %v15637_v60, 0.0  ;;  %v2140_v29 = vpop.f32.mrb[201].mxu0  ;;  %v19066_v60 = vld [vmem:[#allocation85_spill] sm:$0xff] }
 0x2be   : > { %v2846_v56 = vmax.f32 %v19051_v39, %v2638_v32  ;;  %v2848_v28 = vmax.f32 %v19052_v34, %v2640_v10  ;;  %v2139_v30 = vadd.f32 %v2138_v63, %v13679_v55  ;;  %v2432_v32 = vadd.f32 %v2431_v47, %v13683_v61  ;;  %v2433_v10 = vpop.f32.mrb[201].mxu1 }
 0x2bf   : > { %v2849_v6 = vmax.f32 %v19053_v14, %v2641_v46  ;;  %v2847_v19 = vmax.f32 %v19054_v36, %v2639_v15  ;;  %v2141_v5 = vadd.f32 %v2140_v29, %v13689_v25  ;;  %v2434_v7 = vadd.f32 %v2433_v10, %v13076_v49  ;;  %v2142_v15 = vpop.f32.mrb[202].mxu0  ;;  %v2435_v46 = vpop.f32.mrb[202].mxu1 }
 0x2c0   : > { %v2958_v3 = vpack.c.bf16 %v2846_v56, %v2842_v59  ;;  %v15715_v21 = vpack.c.bf16 %v2848_v28, %v2844_v33  ;;  %v2642_v39 = vmax.f32 %v2139_v30, 0.0  ;;  %v2644_v34 = vmax.f32 %v2432_v32, 0.0  ;;  %v2144_v56 = vpop.f32.mrb[203].mxu0  ;;  %v2437_v28 = vpop.f32.mrb[203].mxu1 }
 0x2c1   : > { %v2959_v18 = vpack.c.bf16 %v2847_v19, %v2843_v48  ;;  %v15721_v42 = vpack.c.bf16 %v2849_v6, %v2845_v16  ;;  %v2143_v59 = vadd.f32 %v2142_v15, %v13679_v55  ;;  %v2436_v33 = vadd.f32 %v2435_v46, %v13683_v61 }
 0x2c2   : > { %v2643_v14 = vmax.f32 %v2141_v5, 0.0  ;;  %v2645_v63 = vmax.f32 %v2434_v7, 0.0  ;;  %v2145_v47 = vadd.f32 %v2144_v56, %v13689_v25  ;;  %v2438_v36 = vadd.f32 %v2437_v28, %v13076_v49  ;;  %v2441_v56 = vpop.f32.mrb[204].mxu1 }
 0x2c3   : > { %3623 = vmatprep.mubr.bf16.mxu0 %v2959_v18  ;;  %4522 = vmatprep.mubr.bf16.mxu1 %v2959_v18  ;;  %v19056_v48 = vmax.f32 %v15465_v0, 0.0  ;;  %v19057_v6 = vmax.f32 %v15469_v57, 0.0  ;;  %v2646_v1 = vmax.f32 %v2143_v59, 0.0  ;;  %v2648_v30 = vmax.f32 %v2436_v33, 0.0  ;;  %v2148_v33 = vpop.f32.mrb[204].mxu0 }
 0x2c4   : > { %3624 = vmatmul.mubr.bf16.gmra.mrb[44].mxu0 %v2958_v3  ;;  %4523 = vmatmul.mubr.bf16.gmra.mrb[44].mxu1 %v2958_v3  ;;  %v19058_v32 = vmax.f32 %v15477_v51, 0.0  ;;  %v2647_v10 = vmax.f32 %v2145_v47, 0.0  ;;  %v2649_v5 = vmax.f32 %v2438_v36, 0.0  ;;  %v19059_v7 = vmax.f32 %v15485_v40, 0.0  ;;  %v2443_v47 = vpop.f32.mrb[205].mxu1 }
 0x2c5   : > { %v2850_v16 = vmax.f32 %v19056_v48, %v2642_v39  ;;  %v2852_v19 = vmax.f32 %v19057_v6, %v2644_v34  ;;  %v1600_v46 = vmax.f32 %v15662_v53, 0.0  ;;  %v1602_v0 = vmax.f32 %v15671_v62, 0.0  ;;  %v2445_v48 = vpop.f32.mrb[206].mxu1 }
 0x2c6   : > { %v2853_v29 = vmax.f32 %v19058_v32, %v2645_v63  ;;  %v2851_v15 = vmax.f32 %v19059_v7, %v2643_v14  ;;  %v19060_v18 = vmax.f32 %v15510_v50, 0.0  ;;  %v19061_v39 = vmax.f32 %v15519_v43, 0.0  ;;  %v2150_v63 = vpop.f32.mrb[205].mxu0  ;;  %v2447_v32 = vpop.f32.mrb[207].mxu1 }
 0x2c7   : > { %v1603_v3 = vmax.f32 %v15700_v44, 0.0  ;;  %v19062_v51 = vmax.f32 %v15548_v9, 0.0  ;;  %v19063_v40 = vmax.f32 %v15560_v4, 0.0  ;;  %v1601_v53 = vmax.f32 %v15712_v8, 0.0  ;;  %v2152_v36 = vpop.f32.mrb[206].mxu0 }
 0x2c8   : > { %v2854_v57 = vmax.f32 %v19060_v18, %v2646_v1  ;;  %v2856_v34 = vmax.f32 %v19061_v39, %v2648_v30  ;;  %v2149_v50 = vadd.f32 %v2148_v33, %v13679_v55  ;;  %v2442_v43 = vadd.f32 %v2441_v56, %v13683_v61  ;;  %v2154_v30 = vpop.f32.mrb[207].mxu0 }
 0x2c9   : > { %v2857_v59 = vmax.f32 %v19062_v51, %v2649_v5  ;;  %v2855_v28 = vmax.f32 %v19063_v40, %v2647_v10  ;;  %v2151_v44 = vadd.f32 %v2150_v63, %v13689_v25  ;;  %v2444_v9 = vadd.f32 %v2443_v47, %v13076_v49  ;;  %v12493_v63 = vld [vmem:[%s18089_s5 + $0x1c] ss:$12 sps:$4 sm:$0xff]  }
 0x2ca   : > { %v2962_v14 = vpack.c.bf16 %v2854_v57, %v2850_v16  ;;  %v15747_v62 = vpack.c.bf16 %v2856_v34, %v2852_v19  ;;  %v2650_v1 = vmax.f32 %v2149_v50, 0.0  ;;  %v2652_v8 = vmax.f32 %v2442_v43, 0.0  ;;  %v19073_v50 = vld [vmem:[#allocation100_spill] sm:$0xff]  ;;  %v12491_v43 = vld [vmem:[%s18089_s5 + $0x18] ss:$12 sps:$4 sm:$0xff]  }
 0x2cb   : > { %v2963_v6 = vpack.c.bf16 %v2855_v28, %v2851_v15  ;;  %v15753_v4 = vpack.c.bf16 %v2857_v59, %v2853_v29  ;;  %v2153_v16 = vadd.f32 %v2152_v36, %v13679_v55  ;;  %v2446_v19 = vadd.f32 %v2445_v48, %v13683_v61  ;;  %v19070_v28 = vld [vmem:[#allocation94_spill] sm:$0xff]  ;;  %v19074_v47 = vld [vmem:[#allocation101_spill] sm:$0xff] }
 0x2cc   : > { %v2651_v10 = vmax.f32 %v2151_v44, 0.0  ;;  %v2653_v5 = vmax.f32 %v2444_v9, 0.0  ;;  %v2155_v7 = vadd.f32 %v2154_v30, %v13689_v25  ;;  %v2448_v18 = vadd.f32 %v2447_v32, %v13076_v49  ;;  %v19075_v44 = vld [vmem:[#allocation132_spill] sm:$0xff]  ;;  %v19077_v36 = vld [vmem:[#allocation106_spill] sm:$0xff] }
 0x2cd   : > { %3633 = vmatprep.mubr.bf16.mxu0 %v2963_v6  ;;  %4532 = vmatprep.mubr.bf16.mxu1 %v2963_v6  ;;  %v2858_v29 = vmax.f32 %v1596_v37, %v2650_v1  ;;  %v19064_v15 = vmax.f32 %v15621_v31, 0.0  ;;  %v2654_v39 = vmax.f32 %v2153_v16, 0.0  ;;  %v2656_v55 = vmax.f32 %v2446_v19, 0.0  ;;  %v19076_v9 = vld [vmem:[#allocation104_spill] sm:$0xff]  ;;  %v19078_v1 = vld [vmem:[#allocation131_spill] sm:$0xff]  ;;  %v19080_v30 = vld [vmem:[#allocation110_spill] sm:$0xff] }
 0x2ce   : > { %3634 = vmatmul.mubr.bf16.gmra.mrb[48].mxu0 %v2962_v14  ;;  %4533 = vmatmul.mubr.bf16.gmra.mrb[48].mxu1 %v2962_v14  ;;  %v2861_v61 = vmax.f32 %v1599_v20, %v2653_v5  ;;  %v2655_v34 = vmax.f32 %v2155_v7, 0.0  ;;  %v2657_v51 = vmax.f32 %v2448_v18, 0.0  ;;  %v2859_v49 = vmax.f32 %v1597_v22, %v2651_v10  ;;  %v19067_v20 = vld [vmem:[#allocation92_spill] sm:$0xff]  ;;  %v19068_v22 = vld [vmem:[#allocation90_spill] sm:$0xff]  ;;  %v12499_v19 = vld [vmem:[%s18089_s5 + $0x4c] ss:$12 sps:$4 sm:$0xff]  }
 0x2cf   : > { %v2860_v57 = vmax.f32 %v19064_v15, %v2652_v8  ;;  %v2862_v25 = vmax.f32 %v1600_v46, %v2654_v39  ;;  %v2864_v59 = vmax.f32 %v1602_v0, %v2656_v55  ;;  %v19069_v46 = vld [vmem:[#allocation95_spill] sm:$0xff]  ;;  %v19072_v14 = vld [vmem:[#allocation98_spill] sm:$0xff]  ;;  %v12494_v48 = vld [vmem:[%s18089_s5 + $0x30] ss:$12 sps:$4 sm:$0xff]  }
 0x2d0   : > { %v2865_v33 = vmax.f32 %v1603_v3, %v2657_v51  ;;  %v2863_v24 = vmax.f32 %v1601_v53, %v2655_v34  ;;  %v12488_v0 = vld [vmem:[%s18089_s5] ss:$12 sps:$4 sm:$0xff]   ;;  %v12490_v3 = vld [vmem:[%s18089_s5 + $0x4] ss:$12 sps:$4 sm:$0xff]   ;;  %v12497_v16 = vld [vmem:[%s18089_s5 + $0x48] ss:$12 sps:$4 sm:$0xff]  }
 0x2d1   : > { %v2966_v37 = vpack.c.bf16 %v2862_v25, %v2858_v29  ;;  %v15767_v56 = vpack.c.bf16 %v2864_v59, %v2860_v57  ;;  %6335 = vmatprep.subr.bf16.mxu0 %v12490_v3  ;;  %v19071_v53 = vld [vmem:[#allocation96_spill] sm:$0xff]  ;;  %v19082_v10 = vld [vmem:[#allocation114_spill] sm:$0xff]  ;;  %v19083_v5 = vld [vmem:[#allocation113_spill] sm:$0xff] }
 0x2d2   : > { %v2967_v31 = vpack.c.bf16 %v2863_v24, %v2859_v49  ;;  %v15769_v40 = vpack.c.bf16 %v2865_v33, %v2861_v61  ;;  %v12496_v6 = vld [vmem:[%s18089_s5 + $0x34] ss:$12 sps:$4 sm:$0xff]   ;;  %v12502_v18 = vld [vmem:[%s18089_s5 + $0x64] ss:$12 sps:$4 sm:$0xff]   ;;  %v19084_v29 = vld [vmem:[#allocation117_spill] sm:$0xff] }
 0x2d3   : > { %v19079_v8 = vld [vmem:[#allocation108_spill] sm:$0xff]  ;;  %v12500_v7 = vld [vmem:[%s18089_s5 + $0x60] ss:$12 sps:$4 sm:$0xff]   ;;  %v12503_v15 = vld [vmem:[%s18089_s5 + $0x78] ss:$12 sps:$4 sm:$0xff]  }
 0x2d4   : > { %3643 = vmatprep.mubr.bf16.mxu0 %v2967_v31  ;;  %4542 = vmatprep.mubr.bf16.mxu1 %v2967_v31  ;;  %v19081_v32 = vld [vmem:[#allocation112_spill] sm:$0xff]  ;;  %v12505_v57 = vld [vmem:[%s18089_s5 + $0x7c] ss:$12 sps:$4 sm:$0xff]   ;;  %v19085_v39 = vld [vmem:[#allocation118_spill] sm:$0xff] }
 0x2d5   : > { %v19086_v55 = vld [vmem:[#allocation116_spill] sm:$0xff]  ;;  %v19087_v61 = vld [vmem:[#allocation119_spill] sm:$0xff]  ;;  %v19088_v34 = vld [vmem:[#allocation121_spill] sm:$0xff] }
 0x2d6   : > { %3644 = vmatmul.mubr.bf16.gmra.mrb[52].mxu0 %v2966_v37  ;;  %4543 = vmatmul.mubr.bf16.gmra.mrb[52].mxu1 %v2966_v37  ;;  %v19089_v51 = vld [vmem:[#allocation125_spill] sm:$0xff]  ;;  %v19090_v49 = vld [vmem:[#allocation122_spill] sm:$0xff]  ;;  %v12509_v24 = vld [vmem:[%s18089_s5 + $0xa8] ss:$12 sps:$4 sm:$0xff]  }
 0x2d7   : > { %10677 = vmatprep.mubr.msk.bf16.mxu0 %vm3282_vm2, %v19065_v58  ;;  %10807 = vmatprep.mubr.msk.bf16.mxu1 %vm3282_vm2, %v19065_v58  ;;  %v12506_v25 = vld [vmem:[%s18089_s5 + $0x90] ss:$12 sps:$4 sm:$0xff]   ;;  %v12508_v59 = vld [vmem:[%s18089_s5 + $0x94] ss:$12 sps:$4 sm:$0xff]   ;;  %v12511_v37 = vld [vmem:[%s18089_s5 + $0xac] ss:$12 sps:$4 sm:$0xff]  }
 0x2d8   : > { %v19091_v33 = vld [vmem:[#allocation133_spill] sm:$0xff]  ;;  %v19092_v31 = vld [vmem:[#allocation123_spill] sm:$0xff]  ;;  %v19093_v58 = vld [vmem:[#allocation126_spill] sm:$0xff] }
 0x2d9   : > { %v12530_v3 = vld [vmem:[%s18089_s5 + $0x50] ss:$12 sps:$4 sm:$0xff]  }
 0x2de   : > { %3687 = vmatmul.mubr.bf16.vlgmr.msra.gmra.mrb[208].mxu0 %v19066_v60  ;;  %4586 = vmatmul.mubr.bf16.vlgmr.msra.gmra.mrb[208].mxu1 %v19066_v60  ;;  %v12512_v60 = vld [vmem:[%s18089_s5 + $0xc0] ss:$12 sps:$4 sm:$0xff]  }
 0x2df   : > { %10678 = vmatprep.mubr.msk.bf16.mxu0 %vm3282_vm2, %v19067_v20  ;;  %10808 = vmatprep.mubr.msk.bf16.mxu1 %vm3282_vm2, %v19067_v20  ;;  %v12524_v20 = vld [vmem:[%s18089_s5 + $0x10c] ss:$12 sps:$4 sm:$0xff]  }
 0x2e0   : > { %6336 = vmatpush1.bf16.msra.mxu0 %v12488_v0  ;;  %v12529_v0 = vld [vmem:[%s18089_s5 + $0x124] ss:$12 sps:$4 sm:$0xff]  }
 0x2e1   : > { %6337 = vmatprep.subr.bf16.mxu0 %v12493_v63  ;;  %v12545_v63 = vld [vmem:[%s18089_s5 + $0x128] ss:$12 sps:$4 sm:$0xff]  }
 0x2e4   : > { %6338 = vmatpush1.bf16.msra.mxu0 %v12491_v43  ;;  %v12544_v43 = vld [vmem:[%s18089_s5 + $0x110] ss:$12 sps:$4 sm:$0xff]  }
 0x2e5   : > { %6339 = vmatprep.subr.bf16.mxu0 %v12496_v6 }
 0x2e6   : > { %3697 = vmatmul.mubr.bf16.gmra.mrb[212].mxu0 %v19068_v22  ;;  %4596 = vmatmul.mubr.bf16.gmra.mrb[212].mxu1 %v19068_v22  ;;  %v19096_v22 = vld [vmem:[#allocation127_spill] sm:$0xff] }
 0x2e7   : > { %10679 = vmatprep.mubr.msk.bf16.mxu0 %vm3282_vm2, %v19069_v46  ;;  %10809 = vmatprep.mubr.msk.bf16.mxu1 %vm3282_vm2, %v19069_v46  ;;  %v19097_v46 = vld [vmem:[#allocation135_spill] sm:$0xff] }
 0x2e8   : > { %6340 = vmatpush1.bf16.msra.mxu0 %v12494_v48 }
 0x2e9   : > { %6341 = vmatprep.subr.bf16.mxu0 %v12499_v19  ;;  %v12549_v19 = vld [vmem:[%s18089_s5 + $0x140] ss:$12 sps:$4 sm:$0xff]  }
 0x2ec   : > { %6342 = vmatpush1.bf16.msra.mxu0 %v12497_v16 }
 0x2ed   : > { %6343 = vmatprep.subr.bf16.mxu0 %v12502_v18  ;;  %v12550_v18 = vld [vmem:[%s18089_s5 + $0x158] ss:$12 sps:$4 sm:$0xff]  }
 0x2ee   : > { %3707 = vmatmul.mubr.bf16.gmra.mrb[216].mxu0 %v19070_v28  ;;  %4606 = vmatmul.mubr.bf16.gmra.mrb[216].mxu1 %v19070_v28  ;;  %v12532_v28 = vld [vmem:[%s18089_s5 + $0x80] ss:$12 sps:$4 sm:$0xff]  }
 0x2ef   : > { %10680 = vmatprep.mubr.msk.bf16.mxu0 %vm3282_vm2, %v19071_v53  ;;  %10810 = vmatprep.mubr.msk.bf16.mxu1 %vm3282_vm2, %v19071_v53  ;;  %v12535_v53 = vld [vmem:[%s18089_s5 + $0x13c] ss:$12 sps:$4 sm:$0xff]  }
 0x2f0   : > { %6344 = vmatpush1.bf16.msra.mxu0 %v12500_v7 }
 0x2f1   : > { %6345 = vmatprep.subr.bf16.mxu0 %v12505_v57 }
 0x2f4   : > { %6346 = vmatpush1.bf16.msra.mxu0 %v12503_v15 }
 0x2f5   : > { %6347 = vmatprep.subr.bf16.mxu0 %v12508_v59 }
 0x2f6   : > { %3717 = vmatmul.mubr.bf16.gmra.mrb[220].mxu0 %v19072_v14  ;;  %4616 = vmatmul.mubr.bf16.gmra.mrb[220].mxu1 %v19072_v14  ;;  %v12537_v14 = vld [vmem:[%s18089_s5 + $0xb0] ss:$12 sps:$4 sm:$0xff]  }
 0x2f7   : > { %10681 = vmatprep.mubr.msk.bf16.mxu0 %vm3282_vm2, %v19073_v50  ;;  %10811 = vmatprep.mubr.msk.bf16.mxu1 %vm3282_vm2, %v19073_v50  ;;  %v12540_v50 = vld [vmem:[%s18089_s5 + $0x150] ss:$12 sps:$4 sm:$0xff]  }
 0x2f8   : > { %6348 = vmatpush1.bf16.msra.mxu0 %v12506_v25 }
 0x2f9   : > { %6349 = vmatprep.subr.bf16.mxu0 %v12511_v37 }
 0x2fc   : > { %6350 = vmatpush1.bf16.msra.mxu0 %v12509_v24 }
 0x2fe   : > { %3727 = vmatmul.mubr.bf16.gmra.mrb[224].mxu0 %v19074_v47  ;;  %4626 = vmatmul.mubr.bf16.gmra.mrb[224].mxu1 %v19074_v47  ;;  %v12548_v47 = vld [vmem:[%s18089_s5 + $0x16c] ss:$12 sps:$4 sm:$0xff]  }
 0x2ff   : > { %10682 = vmatprep.mubr.msk.bf16.mxu0 %vm3282_vm2, %v19075_v44  ;;  %10812 = vmatprep.mubr.msk.bf16.mxu1 %vm3282_vm2, %v19075_v44 }
 0x306   : > { %3737 = vmatmul.mubr.bf16.gmra.mrb[228].mxu0 %v19076_v9  ;;  %4636 = vmatmul.mubr.bf16.gmra.mrb[228].mxu1 %v19076_v9 }
 0x307   : > { %10683 = vmatprep.mubr.msk.bf16.mxu0 %vm3282_vm2, %v19077_v36  ;;  %10813 = vmatprep.mubr.msk.bf16.mxu1 %vm3282_vm2, %v19077_v36 }
 0x30e   : > { %3747 = vmatmul.mubr.bf16.gmra.mrb[232].mxu0 %v19078_v1  ;;  %4646 = vmatmul.mubr.bf16.gmra.mrb[232].mxu1 %v19078_v1 }
 0x30f   : > { %10684 = vmatprep.mubr.msk.bf16.mxu0 %vm3282_vm2, %v19079_v8  ;;  %10814 = vmatprep.mubr.msk.bf16.mxu1 %vm3282_vm2, %v19079_v8 }
 0x316   : > { %3757 = vmatmul.mubr.bf16.gmra.mrb[236].mxu0 %v19080_v30  ;;  %4656 = vmatmul.mubr.bf16.gmra.mrb[236].mxu1 %v19080_v30 }
 0x317   : > { %10685 = vmatprep.mubr.msk.bf16.mxu0 %vm3282_vm2, %v19081_v32  ;;  %10815 = vmatprep.mubr.msk.bf16.mxu1 %vm3282_vm2, %v19081_v32 }
 0x31e   : > { %3767 = vmatmul.mubr.bf16.gmra.mrb[240].mxu0 %v19082_v10  ;;  %4666 = vmatmul.mubr.bf16.gmra.mrb[240].mxu1 %v19082_v10 }
 0x31f   : > { %10686 = vmatprep.mubr.msk.bf16.mxu0 %vm3282_vm2, %v19083_v5  ;;  %10816 = vmatprep.mubr.msk.bf16.mxu1 %vm3282_vm2, %v19083_v5 }
 0x326   : > { %3777 = vmatmul.mubr.bf16.gmra.mrb[244].mxu0 %v19084_v29  ;;  %4676 = vmatmul.mubr.bf16.gmra.mrb[244].mxu1 %v19084_v29 }
 0x327   : > { %10687 = vmatprep.mubr.msk.bf16.mxu0 %vm3282_vm2, %v19085_v39  ;;  %10817 = vmatprep.mubr.msk.bf16.mxu1 %vm3282_vm2, %v19085_v39 }
 0x32e   : > { %3787 = vmatmul.mubr.bf16.gmra.mrb[248].mxu0 %v19086_v55  ;;  %4686 = vmatmul.mubr.bf16.gmra.mrb[248].mxu1 %v19086_v55 }
 0x32f   : > { %10688 = vmatprep.mubr.msk.bf16.mxu0 %vm3282_vm2, %v19087_v61  ;;  %10818 = vmatprep.mubr.msk.bf16.mxu1 %vm3282_vm2, %v19087_v61 }
 0x336   : > { %3797 = vmatmul.mubr.bf16.gmra.mrb[252].mxu0 %v19088_v34  ;;  %4696 = vmatmul.mubr.bf16.gmra.mrb[252].mxu1 %v19088_v34  ;;  %v12551_v34 = vld [vmem:[%s18089_s5 + $0x170] ss:$12 sps:$4 sm:$0xff]  }
 0x337   : > { %10689 = vmatprep.mubr.msk.bf16.mxu0 %vm3282_vm2, %v19089_v51  ;;  %10819 = vmatprep.mubr.msk.bf16.mxu1 %vm3282_vm2, %v19089_v51 }
 0x33e   : > { %3807 = vmatmul.mubr.bf16.gmra.mrb[0].mxu0 %v19090_v49  ;;  %4706 = vmatmul.mubr.bf16.gmra.mrb[0].mxu1 %v19090_v49 }
 0x33f   : > { %10690 = vmatprep.mubr.msk.bf16.mxu0 %vm3282_vm2, %v19091_v33  ;;  %10820 = vmatprep.mubr.msk.bf16.mxu1 %vm3282_vm2, %v19091_v33 }
 0x346   : > { %3817 = vmatmul.mubr.bf16.gmra.mrb[4].mxu0 %v19092_v31  ;;  %4716 = vmatmul.mubr.bf16.gmra.mrb[4].mxu1 %v19092_v31 }
 0x347   : > { %10691 = vmatprep.mubr.msk.bf16.mxu0 %vm3282_vm2, %v15379_v23  ;;  %10821 = vmatprep.mubr.msk.bf16.mxu1 %vm3282_vm2, %v15379_v23  ;;  %v12514_v23 = vld [vmem:[%s18089_s5 + $0xc4] ss:$12 sps:$4 sm:$0xff]  }
 0x348   : > { %6351 = vmatprep.subr.bf16.mxu0 %v12514_v23 }
 0x349   : > { %6352 = vmatpush1.bf16.msra.mxu0 %v12512_v60 }
 0x34e   : > { %3827 = vmatmul.mubr.bf16.gmra.mrb[8].mxu0 %v19093_v58  ;;  %4726 = vmatmul.mubr.bf16.gmra.mrb[8].mxu1 %v19093_v58  ;;  %v12554_v58 = vld [vmem:[%s18089_s5 + $0x184] ss:$12 sps:$4 sm:$0xff]  }
 0x34f   : > { %10692 = vmatprep.mubr.msk.bf16.mxu0 %vm3282_vm2, %v15417_v11  ;;  %10822 = vmatprep.mubr.msk.bf16.mxu1 %vm3282_vm2, %v15417_v11  ;;  %v12515_v11 = vld [vmem:[%s18089_s5 + $0xd8] ss:$12 sps:$4 sm:$0xff]  }
 0x356   : > { %3837 = vmatmul.mubr.bf16.gmra.mrb[12].mxu0 %v15411_v27  ;;  %4736 = vmatmul.mubr.bf16.gmra.mrb[12].mxu1 %v15411_v27  ;;  %v12517_v27 = vld [vmem:[%s18089_s5 + $0xdc] ss:$12 sps:$4 sm:$0xff]  }
 0x357   : > { %10693 = vmatprep.mubr.msk.bf16.mxu0 %vm3282_vm2, %v15449_v45  ;;  %10823 = vmatprep.mubr.msk.bf16.mxu1 %vm3282_vm2, %v15449_v45  ;;  %v12520_v45 = vld [vmem:[%s18089_s5 + $0xf4] ss:$12 sps:$4 sm:$0xff]  }
 0x358   : > { %6353 = vmatprep.subr.bf16.mxu0 %v12517_v27 }
 0x359   : > { %6354 = vmatpush1.bf16.msra.mxu0 %v12515_v11 }
 0x35a   : > { %6355 = vmatprep.subr.bf16.mxu0 %v12520_v45 }
 0x35e   : > { %3847 = vmatmul.mubr.bf16.gmra.mrb[16].mxu0 %v15443_v41  ;;  %4746 = vmatmul.mubr.bf16.gmra.mrb[16].mxu1 %v15443_v41  ;;  %v12518_v41 = vld [vmem:[%s18089_s5 + $0xf0] ss:$12 sps:$4 sm:$0xff]  }
 0x35f   : > { %10694 = vmatprep.mubr.msk.bf16.mxu0 %vm3282_vm2, %v15493_v26  ;;  %10824 = vmatprep.mubr.msk.bf16.mxu1 %vm3282_vm2, %v15493_v26  ;;  %v19094_v26 = vld [vmem:[#allocation124_spill] sm:$0xff] }
 0x360   : > { %6356 = vmatpush1.bf16.msra.mxu0 %v12518_v41 }
 0x361   : > { %6357 = vmatprep.subr.bf16.mxu0 %v12524_v20 }
 0x366   : > { %3857 = vmatmul.mubr.bf16.gmra.mrb[20].mxu0 %v15487_v38  ;;  %4756 = vmatmul.mubr.bf16.gmra.mrb[20].mxu1 %v15487_v38  ;;  %v12521_v38 = vld [vmem:[%s18089_s5 + $0x8] ss:$12 sps:$4 sm:$0xff]  }
 0x367   : > { %10695 = vmatprep.mubr.msk.bf16.mxu0 %vm3282_vm2, %v15531_v17  ;;  %10825 = vmatprep.mubr.msk.bf16.mxu1 %vm3282_vm2, %v15531_v17  ;;  %v19095_v17 = vmov 0  }
 0x368   : > { %7095 = vmatpush1.bf16.msra.mxu1 %v12521_v38 }
 0x369   : > { %7096 = vmatprep.subr.bf16.mxu1 %v19095_v17 }
 0x36e   : > { %3867 = vmatmul.mubr.bf16.gmra.mrb[24].mxu0 %v19094_v26  ;;  %4766 = vmatmul.mubr.bf16.gmra.mrb[24].mxu1 %v19094_v26 }
 0x36f   : > { %10696 = vmatprep.mubr.msk.bf16.mxu0 %vm3282_vm2, %v15569_v12  ;;  %10826 = vmatprep.mubr.msk.bf16.mxu1 %vm3282_vm2, %v15569_v12  ;;  %v12522_v12 = vld [vmem:[%s18089_s5 + $0x108] ss:$12 sps:$4 sm:$0xff]  }
 0x370   : > { %6358 = vmatpush1.bf16.msra.mxu0 %v12522_v12 }
 0x371   : > { %6359 = vmatprep.subr.bf16.mxu0 %v12529_v0 }
 0x376   : > { %3877 = vmatmul.mubr.bf16.gmra.mrb[28].mxu0 %v15563_v54  ;;  %4776 = vmatmul.mubr.bf16.gmra.mrb[28].mxu1 %v15563_v54  ;;  %v12525_v54 = vld [vmem:[%s18089_s5 + $0x20] ss:$12 sps:$4 sm:$0xff]  }
 0x377   : > { %10697 = vmatprep.mubr.msk.bf16.mxu0 %vm3282_vm2, %v15601_v2  ;;  %10827 = vmatprep.mubr.msk.bf16.mxu1 %vm3282_vm2, %v15601_v2  ;;  %v12526_v2 = vld [vmem:[%s18089_s5 + $0x38] ss:$12 sps:$4 sm:$0xff]  }
 0x378   : > { %7097 = vmatpush1.bf16.msra.mxu1 %v12525_v54 }
 0x379   : > { %7098 = vmatprep.subr.bf16.mxu1 %v19095_v17 }
 0x37c   : > { %7099 = vmatpush1.bf16.msra.mxu1 %v12526_v2 }
 0x37d   : > { %7100 = vmatprep.subr.bf16.mxu1 %v19095_v17 }
 0x37e   : > { %3887 = vmatmul.mubr.bf16.gmra.mrb[32].mxu0 %v19096_v22  ;;  %4786 = vmatmul.mubr.bf16.gmra.mrb[32].mxu1 %v19096_v22 }
 0x37f   : > { %10698 = vmatprep.mubr.msk.bf16.mxu0 %vm3282_vm2, %v15645_v35  ;;  %10828 = vmatprep.mubr.msk.bf16.mxu1 %vm3282_vm2, %v15645_v35  ;;  %v12527_v35 = vld [vmem:[%s18089_s5 + $0x120] ss:$12 sps:$4 sm:$0xff]  }
 0x380   : > { %6360 = vmatpush1.bf16.msra.mxu0 %v12527_v35  ;;  %7101 = vmatpush1.bf16.msra.mxu1 %v12530_v3 }
 0x381   : > { %7102 = vmatprep.subr.bf16.mxu1 %v19095_v17  ;;  %6361 = vmatprep.subr.bf16.mxu0 %v12535_v53 }
 0x386   : > { %3897 = vmatmul.mubr.bf16.gmra.mrb[36].mxu0 %v19097_v46  ;;  %4796 = vmatmul.mubr.bf16.gmra.mrb[36].mxu1 %v19097_v46 }
 0x387   : > { %10699 = vmatprep.mubr.msk.bf16.mxu0 %vm3282_vm2, %v15683_v13  ;;  %10829 = vmatprep.mubr.msk.bf16.mxu1 %vm3282_vm2, %v15683_v13  ;;  %v12531_v13 = vld [vmem:[%s18089_s5 + $0x68] ss:$12 sps:$4 sm:$0xff]  }
 0x388   : > { %7103 = vmatpush1.bf16.msra.mxu1 %v12531_v13 }
 0x389   : > { %7104 = vmatprep.subr.bf16.mxu1 %v19095_v17 }
 0x38c   : > { %7105 = vmatpush1.bf16.msra.mxu1 %v12532_v28 }
 0x38d   : > { %7106 = vmatprep.subr.bf16.mxu1 %v19095_v17 }
 0x38e   : > { %3907 = vmatmul.mubr.bf16.gmra.mrb[40].mxu0 %v15677_v52  ;;  %4806 = vmatmul.mubr.bf16.gmra.mrb[40].mxu1 %v15677_v52  ;;  %v12533_v52 = vld [vmem:[%s18089_s5 + $0x138] ss:$12 sps:$4 sm:$0xff]  }
 0x38f   : > { %10700 = vmatprep.mubr.msk.bf16.mxu0 %vm3282_vm2, %v15721_v42  ;;  %10830 = vmatprep.mubr.msk.bf16.mxu1 %vm3282_vm2, %v15721_v42  ;;  %v12536_v42 = vld [vmem:[%s18089_s5 + $0x98] ss:$12 sps:$4 sm:$0xff]  }
 0x390   : > { %7107 = vmatpush1.bf16.msra.mxu1 %v12536_v42  ;;  %6362 = vmatpush1.bf16.msra.mxu0 %v12533_v52 }
 0x391   : > { %7108 = vmatprep.subr.bf16.mxu1 %v19095_v17 }
 0x394   : > { %7109 = vmatpush1.bf16.msra.mxu1 %v12537_v14 }
 0x395   : > { %7110 = vmatprep.subr.bf16.mxu1 %v19095_v17 }
 0x396   : > { %3917 = vmatmul.mubr.bf16.gmra.mrb[44].mxu0 %v15715_v21  ;;  %4816 = vmatmul.mubr.bf16.gmra.mrb[44].mxu1 %v15715_v21  ;;  %v12538_v21 = vld [vmem:[%s18089_s5 + $0xc8] ss:$12 sps:$4 sm:$0xff]  }
 0x397   : > { %10701 = vmatprep.mubr.msk.bf16.mxu0 %vm3282_vm2, %v15753_v4  ;;  %10831 = vmatprep.mubr.msk.bf16.mxu1 %vm3282_vm2, %v15753_v4  ;;  %v12539_v4 = vld [vmem:[%s18089_s5 + $0xe0] ss:$12 sps:$4 sm:$0xff]  }
 0x398   : > { %7111 = vmatpush1.bf16.msra.mxu1 %v12538_v21 }
 0x399   : > { %7112 = vmatprep.subr.bf16.mxu1 %v19095_v17 }
 0x39c   : > { %7113 = vmatpush1.bf16.msra.mxu1 %v12539_v4 }
 0x39d   : > { %7114 = vmatprep.subr.bf16.mxu1 %v19095_v17 }
 0x39e   : > { %3927 = vmatmul.mubr.bf16.gmra.mrb[48].mxu0 %v15747_v62  ;;  %4826 = vmatmul.mubr.bf16.gmra.mrb[48].mxu1 %v15747_v62  ;;  %v12542_v62 = vld [vmem:[%s18089_s5 + $0x154] ss:$12 sps:$4 sm:$0xff]  }
 0x39f   : > { %10702 = vmatprep.mubr.msk.bf16.mxu0 %vm3282_vm2, %v15769_v40  ;;  %10832 = vmatprep.mubr.msk.bf16.mxu1 %vm3282_vm2, %v15769_v40  ;;  %v12543_v40 = vld [vmem:[%s18089_s5 + $0xf8] ss:$12 sps:$4 sm:$0xff]  }
 0x3a0   : > { %6363 = vmatprep.subr.bf16.mxu0 %v12542_v62  ;;  %7115 = vmatpush1.bf16.msra.mxu1 %v12543_v40 }
 0x3a1   : > { %6364 = vmatpush1.bf16.msra.mxu0 %v12540_v50  ;;  %7116 = vmatprep.subr.bf16.mxu1 %v19095_v17 }
 0x3a2   : > { %6365 = vmatprep.subr.bf16.mxu0 %v12548_v47 }
 0x3a4   : > { %7117 = vmatpush1.bf16.msra.mxu1 %v12544_v43 }
 0x3a5   : > { %7118 = vmatprep.subr.bf16.mxu1 %v19095_v17 }
 0x3a6   : > { %3937 = vmatmul.mubr.bf16.gmra.mrb[52].mxu0 %v15767_v56  ;;  %4836 = vmatmul.mubr.bf16.gmra.mrb[52].mxu1 %v15767_v56  ;;  %v12546_v56 = vld [vmem:[%s18089_s5 + $0x168] ss:$12 sps:$4 sm:$0xff]  }
 0x3a7   : > { %6366 = vmatpush1.bf16.msra.mxu0 %v12546_v56 }
 0x3a8   : > { %7119 = vmatpush1.bf16.msra.mxu1 %v12545_v63  ;;  %6588 = vmatprep.subr.bf16.mxu0 %v12554_v58 }
 0x3a9   : > { %7120 = vmatprep.subr.bf16.mxu1 %v19095_v17 }
 0x3ac   : > { %7121 = vmatpush1.bf16.msra.mxu1 %v12549_v19 }
 0x3ad   : > { %7122 = vmatprep.subr.bf16.mxu1 %v19095_v17 }
 0x3b0   : > { %7123 = vmatpush1.bf16.msra.mxu1 %v12550_v18 }
 0x3b1   : > { %v3688_v44 = vpop.f32.mrb[208].mxu0  ;;  %v4587_v9 = vpop.f32.mrb[208].mxu1  ;;  %7124 = vmatprep.subr.bf16.mxu1 %v19095_v17 }
 0x3b2   : > { %v4846_v36 = vmax.f32 %v3688_v44, %v4587_v9  ;;  %v3690_v48 = vpop.f32.mrb[209].mxu0  ;;  %v4589_v6 = vpop.f32.mrb[209].mxu1 }
 0x3b3   : > { %v4847_v1 = vmax.f32 %v3690_v48, %v4589_v6  ;;  %v3692_v8 = vpop.f32.mrb[210].mxu0  ;;  %v4591_v16 = vpop.f32.mrb[210].mxu1 }
 0x3b4   : > { %v4848_v30 = vmax.f32 %v3692_v8, %v4591_v16  ;;  %v3694_v32 = vpop.f32.mrb[211].mxu0  ;;  %v4593_v10 = vpop.f32.mrb[211].mxu1  ;;  %7125 = vmatpush1.bf16.msra.mxu1 %v12551_v34 }
 0x3b5   : > { %v4849_v5 = vmax.f32 %v3694_v32, %v4593_v10  ;;  %7303 = vmatprep.subr.bf16.mxu1 %v19095_v17 }
 0x3b6   : > { %v16078_v7 = vpack.c.bf16 %v4848_v30, %v4846_v36 }
 0x3b7   : > { %v16084_v29 = vpack.c.bf16 %v4849_v5, %v4847_v1 }
 0x3b9   : > { %v3698_v15 = vpop.f32.mrb[212].mxu0  ;;  %v4597_v57 = vpop.f32.mrb[212].mxu1 }
 0x3ba   : > { %v4850_v39 = vmax.f32 %v3698_v15, %v4597_v57  ;;  %v3700_v55 = vpop.f32.mrb[213].mxu0  ;;  %v4599_v61 = vpop.f32.mrb[213].mxu1 }
 0x3bb   : > { %v4851_v51 = vmax.f32 %v3700_v55, %v4599_v61  ;;  %v3702_v49 = vpop.f32.mrb[214].mxu0  ;;  %v4601_v25 = vpop.f32.mrb[214].mxu1 }
 0x3bc   : > { %v4852_v59 = vmax.f32 %v3702_v49, %v4601_v25  ;;  %v3704_v33 = vpop.f32.mrb[215].mxu0  ;;  %v4603_v24 = vpop.f32.mrb[215].mxu1 }
 0x3bd   : > { %v4853_v37 = vmax.f32 %v3704_v33, %v4603_v24 }
 0x3be   : > { %v16090_v31 = vpack.c.bf16 %v4852_v59, %v4850_v39 }
 0x3bf   : > { %v16096_v60 = vpack.c.bf16 %v4853_v37, %v4851_v51 }
 0x3c1   : > { %v3708_v23 = vpop.f32.mrb[216].mxu0  ;;  %v4607_v27 = vpop.f32.mrb[216].mxu1 }
 0x3c2   : > { %v4854_v11 = vmax.f32 %v3708_v23, %v4607_v27  ;;  %v3710_v41 = vpop.f32.mrb[217].mxu0  ;;  %v4609_v45 = vpop.f32.mrb[217].mxu1 }
 0x3c3   : > { %v4855_v26 = vmax.f32 %v3710_v41, %v4609_v45  ;;  %v3712_v38 = vpop.f32.mrb[218].mxu0  ;;  %v4611_v12 = vpop.f32.mrb[218].mxu1 }
 0x3c4   : > { %v4856_v20 = vmax.f32 %v3712_v38, %v4611_v12  ;;  %v3714_v22 = vpop.f32.mrb[219].mxu0  ;;  %v4613_v54 = vpop.f32.mrb[219].mxu1 }
 0x3c5   : > { %v4857_v2 = vmax.f32 %v3714_v22, %v4613_v54 }
 0x3c6   : > { %v16098_v46 = vpack.c.bf16 %v4856_v20, %v4854_v11 }
 0x3c7   : > { %v16100_v35 = vpack.c.bf16 %v4857_v2, %v4855_v26 }
 0x3c8   : > { %5046 = vrot.lane.b32.xlu0 %v16098_v46, %s12836_s27 }
 0x3c9   : > { %v3718_v0 = vpop.f32.mrb[220].mxu0  ;;  %v4617_v3 = vpop.f32.mrb[220].mxu1 }
 0x3ca   : > { %v4858_v13 = vmax.f32 %v3718_v0, %v4617_v3  ;;  %v3720_v28 = vpop.f32.mrb[221].mxu0  ;;  %v4619_v52 = vpop.f32.mrb[221].mxu1 }
 0x3cb   : > { %v4859_v53 = vmax.f32 %v3720_v28, %v4619_v52  ;;  %v3722_v42 = vpop.f32.mrb[222].mxu0  ;;  %v4621_v14 = vpop.f32.mrb[222].mxu1 }
 0x3cc   : > { %v4860_v21 = vmax.f32 %v3722_v42, %v4621_v14  ;;  %v3724_v4 = vpop.f32.mrb[223].mxu0  ;;  %v4623_v50 = vpop.f32.mrb[223].mxu1 }
 0x3cd   : > { %v4861_v62 = vmax.f32 %v3724_v4, %v4623_v50 }
 0x3ce   : > { %v16104_v40 = vpack.c.bf16 %v4860_v21, %v4858_v13 }
 0x3cf   : > { %v16106_v43 = vpack.c.bf16 %v4861_v62, %v4859_v53 }
 0x3d0   : > { %5050 = vrot.lane.b32.xlu0 %v16104_v40, %s12836_s27 }
 0x3d1   : > { %v3728_v63 = vpop.f32.mrb[224].mxu0  ;;  %v4627_v56 = vpop.f32.mrb[224].mxu1 }
 0x3d2   : > { %v4862_v47 = vmax.f32 %v3728_v63, %v4627_v56  ;;  %v3730_v44 = vpop.f32.mrb[225].mxu0  ;;  %v4629_v9 = vpop.f32.mrb[225].mxu1 }
 0x3d3   : > { %v4863_v36 = vmax.f32 %v3730_v44, %v4629_v9  ;;  %v3732_v48 = vpop.f32.mrb[226].mxu0  ;;  %v4631_v6 = vpop.f32.mrb[226].mxu1 }
 0x3d4   : > { %v4864_v1 = vmax.f32 %v3732_v48, %v4631_v6  ;;  %v3734_v8 = vpop.f32.mrb[227].mxu0  ;;  %v4633_v16 = vpop.f32.mrb[227].mxu1 }
 0x3d5   : > { %v4865_v19 = vmax.f32 %v3734_v8, %v4633_v16 }
 0x3d6   : > { %v16110_v30 = vpack.c.bf16 %v4864_v1, %v4862_v47 }
 0x3d7   : > { %v16112_v32 = vpack.c.bf16 %v4865_v19, %v4863_v36 }
 0x3d8   : > { %5054 = vrot.lane.b32.xlu1 %v16110_v30, %s12836_s27 }
 0x3d9   : > { %v3738_v10 = vpop.f32.mrb[228].mxu0  ;;  %v4637_v5 = vpop.f32.mrb[228].mxu1 }
 0x3da   : > { %v4866_v18 = vmax.f32 %v3738_v10, %v4637_v5  ;;  %v3740_v15 = vpop.f32.mrb[229].mxu0  ;;  %v4639_v57 = vpop.f32.mrb[229].mxu1 }
 0x3db   : > { %v4867_v39 = vmax.f32 %v3740_v15, %v4639_v57  ;;  %v3742_v55 = vpop.f32.mrb[230].mxu0  ;;  %v4641_v61 = vpop.f32.mrb[230].mxu1 }
 0x3dc   : > { %v4868_v34 = vmax.f32 %v3742_v55, %v4641_v61  ;;  %v3744_v51 = vpop.f32.mrb[231].mxu0  ;;  %v4643_v49 = vpop.f32.mrb[231].mxu1 }
 0x3dd   : > { %v4869_v25 = vmax.f32 %v3744_v51, %v4643_v49 }
 0x3de   : > { %v16116_v59 = vpack.c.bf16 %v4868_v34, %v4866_v18 }
 0x3df   : > { %v16118_v33 = vpack.c.bf16 %v4869_v25, %v4867_v39 }
 0x3e0   : > { %5058 = vrot.lane.b32.xlu1 %v16116_v59, %s12836_s27 }
 0x3e1   : > { %v3748_v24 = vpop.f32.mrb[232].mxu0  ;;  %v4647_v37 = vpop.f32.mrb[232].mxu1 }
 0x3e2   : > { %v4870_v58 = vmax.f32 %v3748_v24, %v4647_v37  ;;  %v3750_v23 = vpop.f32.mrb[233].mxu0  ;;  %v4649_v27 = vpop.f32.mrb[233].mxu1 }
 0x3e3   : > { %v4871_v11 = vmax.f32 %v3750_v23, %v4649_v27  ;;  %v3752_v41 = vpop.f32.mrb[234].mxu0  ;;  %v4651_v45 = vpop.f32.mrb[234].mxu1 }
 0x3e4   : > { %v4872_v26 = vmax.f32 %v3752_v41, %v4651_v45  ;;  %v3754_v38 = vpop.f32.mrb[235].mxu0  ;;  %v4653_v12 = vpop.f32.mrb[235].mxu1 }
 0x3e5   : > { %v4873_v20 = vmax.f32 %v3754_v38, %v4653_v12 }
 0x3e6   : > { %v16122_v22 = vpack.c.bf16 %v4872_v26, %v4870_v58 }
 0x3e7   : > { %v16124_v54 = vpack.c.bf16 %v4873_v20, %v4871_v11 }
 0x3e8   : > { %5062 = vrot.lane.b32.xlu0 %v16122_v22, %s12836_s27 }
 0x3e9   : > { %v3758_v2 = vpop.f32.mrb[236].mxu0  ;;  %v4657_v0 = vpop.f32.mrb[236].mxu1 }
 0x3ea   : > { %v4874_v3 = vmax.f32 %v3758_v2, %v4657_v0  ;;  %v3760_v13 = vpop.f32.mrb[237].mxu0  ;;  %v4659_v28 = vpop.f32.mrb[237].mxu1 }
 0x3eb   : > { %v4875_v52 = vmax.f32 %v3760_v13, %v4659_v28  ;;  %v3762_v53 = vpop.f32.mrb[238].mxu0  ;;  %v4661_v42 = vpop.f32.mrb[238].mxu1 }
 0x3ec   : > { %v4876_v14 = vmax.f32 %v3762_v53, %v4661_v42  ;;  %v3764_v21 = vpop.f32.mrb[239].mxu0  ;;  %v4663_v4 = vpop.f32.mrb[239].mxu1 }
 0x3ed   : > { %v4877_v50 = vmax.f32 %v3764_v21, %v4663_v4 }
 0x3ee   : > { %v16128_v62 = vpack.c.bf16 %v4876_v14, %v4874_v3 }
 0x3ef   : > { %v16130_v63 = vpack.c.bf16 %v4877_v50, %v4875_v52 }
 0x3f0   : > { %5066 = vrot.lane.b32.xlu1 %v16128_v62, %s12836_s27 }
 0x3f1   : > { %v3768_v56 = vpop.f32.mrb[240].mxu0  ;;  %v4667_v47 = vpop.f32.mrb[240].mxu1 }
 0x3f2   : > { %v4878_v44 = vmax.f32 %v3768_v56, %v4667_v47  ;;  %v3770_v9 = vpop.f32.mrb[241].mxu0  ;;  %v4669_v36 = vpop.f32.mrb[241].mxu1 }
 0x3f3   : > { %v4879_v48 = vmax.f32 %v3770_v9, %v4669_v36  ;;  %v3772_v6 = vpop.f32.mrb[242].mxu0  ;;  %v4671_v1 = vpop.f32.mrb[242].mxu1 }
 0x3f4   : > { %v4880_v8 = vmax.f32 %v3772_v6, %v4671_v1  ;;  %v3774_v16 = vpop.f32.mrb[243].mxu0  ;;  %v4673_v19 = vpop.f32.mrb[243].mxu1 }
 0x3f5   : > { %v4881_v10 = vmax.f32 %v3774_v16, %v4673_v19 }
 0x3f6   : > { %v16134_v5 = vpack.c.bf16 %v4880_v8, %v4878_v44 }
 0x3f7   : > { %v16136_v18 = vpack.c.bf16 %v4881_v10, %v4879_v48 }
 0x3f8   : > { %5070 = vrot.lane.b32.xlu0 %v16134_v5, %s12836_s27 }
 0x3f9   : > { %v3778_v15 = vpop.f32.mrb[244].mxu0  ;;  %v4677_v57 = vpop.f32.mrb[244].mxu1 }
 0x3fa   : > { %v4882_v39 = vmax.f32 %v3778_v15, %v4677_v57  ;;  %v3780_v55 = vpop.f32.mrb[245].mxu0  ;;  %v4679_v61 = vpop.f32.mrb[245].mxu1 }
 0x3fb   : > { %v4883_v34 = vmax.f32 %v3780_v55, %v4679_v61  ;;  %v3782_v51 = vpop.f32.mrb[246].mxu0  ;;  %v4681_v49 = vpop.f32.mrb[246].mxu1 }
 0x3fc   : > { %v4884_v25 = vmax.f32 %v3782_v51, %v4681_v49  ;;  %v3784_v24 = vpop.f32.mrb[247].mxu0  ;;  %v4683_v37 = vpop.f32.mrb[247].mxu1 }
 0x3fd   : > { %v4885_v58 = vmax.f32 %v3784_v24, %v4683_v37 }
 0x3fe   : > { %v16140_v23 = vpack.c.bf16 %v4884_v25, %v4882_v39 }
 0x3ff   : > { %v16142_v27 = vpack.c.bf16 %v4885_v58, %v4883_v34 }
 0x400   : > { %5074 = vrot.lane.b32.xlu1 %v16140_v23, %s12836_s27 }
 0x401   : > { %v3788_v11 = vpop.f32.mrb[248].mxu0  ;;  %v4687_v41 = vpop.f32.mrb[248].mxu1 }
 0x402   : > { %v4886_v45 = vmax.f32 %v3788_v11, %v4687_v41  ;;  %v3790_v26 = vpop.f32.mrb[249].mxu0  ;;  %v4689_v38 = vpop.f32.mrb[249].mxu1 }
 0x403   : > { %v4887_v12 = vmax.f32 %v3790_v26, %v4689_v38  ;;  %v3792_v20 = vpop.f32.mrb[250].mxu0  ;;  %v4691_v2 = vpop.f32.mrb[250].mxu1 }
 0x404   : > { %v4888_v0 = vmax.f32 %v3792_v20, %v4691_v2  ;;  %v3794_v3 = vpop.f32.mrb[251].mxu0  ;;  %v4693_v13 = vpop.f32.mrb[251].mxu1 }
 0x405   : > { %v4889_v28 = vmax.f32 %v3794_v3, %v4693_v13 }
 0x406   : > { %v16146_v52 = vpack.c.bf16 %v4888_v0, %v4886_v45 }
 0x407   : > { %v16148_v53 = vpack.c.bf16 %v4889_v28, %v4887_v12 }
 0x408   : > { %5078 = vrot.lane.b32.xlu0 %v16146_v52, %s12836_s27 }
 0x409   : > { %v3798_v42 = vpop.f32.mrb[252].mxu0  ;;  %v4697_v14 = vpop.f32.mrb[252].mxu1 }
 0x40a   : > { %v4890_v21 = vmax.f32 %v3798_v42, %v4697_v14  ;;  %v3800_v4 = vpop.f32.mrb[253].mxu0  ;;  %v4699_v50 = vpop.f32.mrb[253].mxu1 }
 0x40b   : > { %v4891_v56 = vmax.f32 %v3800_v4, %v4699_v50  ;;  %v3802_v47 = vpop.f32.mrb[254].mxu0  ;;  %v4701_v44 = vpop.f32.mrb[254].mxu1 }
 0x40c   : > { %v4892_v9 = vmax.f32 %v3802_v47, %v4701_v44  ;;  %v3804_v36 = vpop.f32.mrb[255].mxu0  ;;  %v4703_v48 = vpop.f32.mrb[255].mxu1 }
 0x40d   : > { %v4893_v6 = vmax.f32 %v3804_v36, %v4703_v48 }
 0x40e   : > { %v16152_v1 = vpack.c.bf16 %v4892_v9, %v4890_v21 }
 0x40f   : > { %v16154_v8 = vpack.c.bf16 %v4893_v6, %v4891_v56 }
 0x410   : > { %5082 = vrot.lane.b32.xlu1 %v16152_v1, %s12836_s27 }
 0x411   : > { %v3808_v16 = vpop.f32.mrb[0].mxu0  ;;  %v4707_v19 = vpop.f32.mrb[0].mxu1 }
 0x412   : > { %v4894_v10 = vmax.f32 %v3808_v16, %v4707_v19  ;;  %v3810_v15 = vpop.f32.mrb[1].mxu0  ;;  %v4709_v57 = vpop.f32.mrb[1].mxu1 }
 0x413   : > { %v4895_v39 = vmax.f32 %v3810_v15, %v4709_v57  ;;  %v3812_v55 = vpop.f32.mrb[2].mxu0  ;;  %v4711_v61 = vpop.f32.mrb[2].mxu1 }
 0x414   : > { %v4896_v34 = vmax.f32 %v3812_v55, %v4711_v61  ;;  %v3814_v51 = vpop.f32.mrb[3].mxu0  ;;  %v4713_v49 = vpop.f32.mrb[3].mxu1 }
 0x415   : > { %v4897_v25 = vmax.f32 %v3814_v51, %v4713_v49 }
 0x416   : > { %v16158_v24 = vpack.c.bf16 %v4896_v34, %v4894_v10 }
 0x417   : > { %v16160_v37 = vpack.c.bf16 %v4897_v25, %v4895_v39 }
 0x418   : > { %5086 = vrot.lane.b32.xlu0 %v16158_v24, %s12836_s27 }
 0x419   : > { %v3818_v58 = vpop.f32.mrb[4].mxu0  ;;  %v4717_v11 = vpop.f32.mrb[4].mxu1 }
 0x41a   : > { %v4898_v41 = vmax.f32 %v3818_v58, %v4717_v11  ;;  %v3820_v45 = vpop.f32.mrb[5].mxu0  ;;  %v4719_v26 = vpop.f32.mrb[5].mxu1 }
 0x41b   : > { %v4899_v38 = vmax.f32 %v3820_v45, %v4719_v26  ;;  %v3822_v12 = vpop.f32.mrb[6].mxu0  ;;  %v4721_v20 = vpop.f32.mrb[6].mxu1 }
 0x41c   : > { %v4900_v2 = vmax.f32 %v3822_v12, %v4721_v20  ;;  %v3824_v0 = vpop.f32.mrb[7].mxu0  ;;  %v4723_v3 = vpop.f32.mrb[7].mxu1 }
 0x41d   : > { %v4901_v13 = vmax.f32 %v3824_v0, %v4723_v3 }
 0x41e   : > { %v16164_v28 = vpack.c.bf16 %v4900_v2, %v4898_v41 }
 0x41f   : > { %v16166_v42 = vpack.c.bf16 %v4901_v13, %v4899_v38 }
 0x420   : > { %5090 = vrot.lane.b32.xlu1 %v16164_v28, %s12836_s27 }
 0x421   : > { %v3828_v14 = vpop.f32.mrb[8].mxu0  ;;  %v4727_v21 = vpop.f32.mrb[8].mxu1 }
 0x422   : > { %v4902_v4 = vmax.f32 %v3828_v14, %v4727_v21  ;;  %v3830_v50 = vpop.f32.mrb[9].mxu0  ;;  %v4729_v56 = vpop.f32.mrb[9].mxu1 }
 0x423   : > { %v4903_v47 = vmax.f32 %v3830_v50, %v4729_v56  ;;  %v3832_v44 = vpop.f32.mrb[10].mxu0  ;;  %v4731_v9 = vpop.f32.mrb[10].mxu1 }
 0x424   : > { %v4904_v36 = vmax.f32 %v3832_v44, %v4731_v9  ;;  %v3834_v48 = vpop.f32.mrb[11].mxu0  ;;  %v4733_v6 = vpop.f32.mrb[11].mxu1 }
 0x425   : > { %v4905_v16 = vmax.f32 %v3834_v48, %v4733_v6 }
 0x426   : > { %v16170_v19 = vpack.c.bf16 %v4904_v36, %v4902_v4 }
 0x427   : > { %v16172_v10 = vpack.c.bf16 %v4905_v16, %v4903_v47 }
 0x428   : > { %5094 = vrot.lane.b32.xlu0 %v16170_v19, %s12836_s27 }
 0x429   : > { %v3838_v15 = vpop.f32.mrb[12].mxu0  ;;  %v4737_v57 = vpop.f32.mrb[12].mxu1 }
 0x42a   : > { %v4906_v39 = vmax.f32 %v3838_v15, %v4737_v57  ;;  %v3840_v55 = vpop.f32.mrb[13].mxu0  ;;  %v4739_v61 = vpop.f32.mrb[13].mxu1  ;;  %v12552_v15 = vld [vmem:[%s18089_s5 + $0x180] ss:$12 sps:$4 sm:$0xff]   ;;  %v12585_v57 = vld [vmem:[%s18089_s5 + $0x188] ss:$12 sps:$4 sm:$0xff]  }
 0x42b   : > { %v4907_v34 = vmax.f32 %v3840_v55, %v4739_v61  ;;  %v3842_v51 = vpop.f32.mrb[14].mxu0  ;;  %v4741_v49 = vpop.f32.mrb[14].mxu1 }
 0x42c   : > { %v4908_v25 = vmax.f32 %v3842_v51, %v4741_v49  ;;  %v3844_v58 = vpop.f32.mrb[15].mxu0  ;;  %v4743_v11 = vpop.f32.mrb[15].mxu1 }
 0x42d   : > { %v4909_v41 = vmax.f32 %v3844_v58, %v4743_v11 }
 0x42e   : > { %v16176_v45 = vpack.c.bf16 %v4908_v25, %v4906_v39 }
 0x42f   : > { %v16178_v26 = vpack.c.bf16 %v4909_v41, %v4907_v34  ;;  %v12557_v34 = vld [vmem:[%s18089_s5 + $0x19c] ss:$12 sps:$4 sm:$0xff]  }
 0x430   : > { %5098 = vrot.lane.b32.xlu1 %v16176_v45, %s12836_s27 }
 0x431   : > { %v3848_v38 = vpop.f32.mrb[16].mxu0  ;;  %v4747_v12 = vpop.f32.mrb[16].mxu1 }
 0x432   : > { %v4910_v20 = vmax.f32 %v3848_v38, %v4747_v12  ;;  %v3850_v2 = vpop.f32.mrb[17].mxu0  ;;  %v4749_v0 = vpop.f32.mrb[17].mxu1  ;;  %v12586_v38 = vld [vmem:[%s18089_s5 + $0x1a0] ss:$12 sps:$4 sm:$0xff]  }
 0x433   : > { %v4911_v3 = vmax.f32 %v3850_v2, %v4749_v0  ;;  %v3852_v13 = vpop.f32.mrb[18].mxu0  ;;  %v4751_v14 = vpop.f32.mrb[18].mxu1 }
 0x434   : > { %v4912_v21 = vmax.f32 %v3852_v13, %v4751_v14  ;;  %v3854_v4 = vpop.f32.mrb[19].mxu0  ;;  %v4753_v50 = vpop.f32.mrb[19].mxu1 }
 0x435   : > { %v4913_v56 = vmax.f32 %v3854_v4, %v4753_v50  ;;  %v12590_v4 = vld [vmem:[%s18089_s5 + $0x1b8] ss:$12 sps:$4 sm:$0xff]  }
 0x436   : > { %v16182_v47 = vpack.c.bf16 %v4912_v21, %v4910_v20  ;;  %v12560_v20 = vld [vmem:[%s18089_s5 + $0x1b4] ss:$12 sps:$4 sm:$0xff]   ;;  %v12558_v21 = vld [vmem:[%s18089_s5 + $0x1b0] ss:$12 sps:$4 sm:$0xff]  }
 0x437   : > { %v16184_v44 = vpack.c.bf16 %v4913_v56, %v4911_v3 }
 0x438   : > { %5102 = vrot.lane.b32.xlu0 %v16182_v47, %s12836_s27 }
 0x439   : > { %v3858_v9 = vpop.f32.mrb[20].mxu0  ;;  %v4757_v36 = vpop.f32.mrb[20].mxu1 }
 0x43a   : > { %v4914_v48 = vmax.f32 %v3858_v9, %v4757_v36  ;;  %v4759_v6 = vpop.f32.mrb[21].mxu1  ;;  %v16188_v16 = vpop.permute.xlu0 %5046  ;;  %v12563_v36 = vld [vmem:[%s18089_s5 + $0x1cc] ss:$12 sps:$4 sm:$0xff]  }
 0x43b   : > { %v3860_v39 = vpop.f32.mrb[21].mxu0  ;;  %v4761_v55 = vpop.f32.mrb[22].mxu1  ;;  %v5297_v61 = vsel %vm5134_vm3, %v16084_v29, %v16188_v16  ;;  %v12555_v29 = vld [vmem:[%s18089_s5 + $0x198] ss:$12 sps:$4 sm:$0xff]  }
 0x43c   : > { %v4915_v51 = vmax.f32 %v3860_v39, %v4759_v6  ;;  %v3862_v49 = vpop.f32.mrb[22].mxu0  ;;  %v4763_v25 = vpop.f32.mrb[23].mxu1  ;;  %6367 = vmatprep.mubr.bf16.mxu0 %v5297_v61  ;;  %7126 = vmatprep.mubr.bf16.mxu1 %v5297_v61  ;;  %v12591_v61 = vld [vmem:[%s18089_s5 + $0x1d0] ss:$12 sps:$4 sm:$0xff]  }
 0x43d   : > { %v4916_v58 = vmax.f32 %v3862_v49, %v4761_v55  ;;  %v3864_v11 = vpop.f32.mrb[23].mxu0  ;;  %6368 = vmatmul.mubr.bf16.vlgmr.msra.gmra.mrb[56].mxu0 %v16078_v7  ;;  %7127 = vmatmul.mubr.bf16.vlgmr.msra.gmra.mrb[56].mxu1 %v16078_v7 }
 0x43e   : > { %v4917_v41 = vmax.f32 %v3864_v11, %v4763_v25  ;;  %6589 = vmatpush1.bf16.msra.mxu0 %v12552_v15  ;;  %7304 = vmatpush1.bf16.msra.mxu1 %v12585_v57 }
 0x43f   : > { %v16210_v12 = vpack.c.bf16 %v4916_v58, %v4914_v48  ;;  %6590 = vmatprep.subr.bf16.mxu0 %v12557_v34  ;;  %7305 = vmatprep.subr.bf16.mxu1 %v19095_v17 }
 0x440   : > { %v16216_v7 = vpack.c.bf16 %v4917_v41, %v4915_v51  ;;  %v12566_v51 = vld [vmem:[%s18089_s5 + $0x1e4] ss:$12 sps:$4 sm:$0xff]  }
 0x441   : > { %5106 = vrot.lane.b32.xlu1 %v16210_v12, %s12836_s27  ;;  %v3868_v2 = vpop.f32.mrb[24].mxu0  ;;  %v4767_v0 = vpop.f32.mrb[24].mxu1 }
 0x442   : > { %v4918_v3 = vmax.f32 %v3868_v2, %v4767_v0  ;;  %v4769_v13 = vpop.f32.mrb[25].mxu1  ;;  %v16220_v14 = vpop.permute.xlu0 %5050  ;;  %6591 = vmatpush1.bf16.msra.mxu0 %v12555_v29  ;;  %7306 = vmatpush1.bf16.msra.mxu1 %v12586_v38  ;;  %v12564_v29 = vld [vmem:[%s18089_s5 + $0x1e0] ss:$12 sps:$4 sm:$0xff]   ;;  %v12592_v38 = vld [vmem:[%s18089_s5 + $0x1e8] ss:$12 sps:$4 sm:$0xff]  }
 0x443   : > { %v3870_v50 = vpop.f32.mrb[25].mxu0  ;;  %v4771_v56 = vpop.f32.mrb[26].mxu1  ;;  %v5301_v9 = vsel %vm5134_vm3, %v16096_v60, %v16220_v14  ;;  %6592 = vmatprep.subr.bf16.mxu0 %v12560_v20  ;;  %7307 = vmatprep.subr.bf16.mxu1 %v19095_v17  ;;  %v12561_v60 = vld [vmem:[%s18089_s5 + $0x1c8] ss:$12 sps:$4 sm:$0xff]  }
 0x444   : > { %v4919_v48 = vmax.f32 %v3870_v50, %v4769_v13  ;;  %v3872_v6 = vpop.f32.mrb[26].mxu0  ;;  %v4773_v15 = vpop.f32.mrb[27].mxu1  ;;  %6377 = vmatprep.mubr.bf16.mxu0 %v5301_v9  ;;  %7134 = vmatprep.mubr.bf16.mxu1 %v5301_v9 }
 0x445   : > { %v4920_v57 = vmax.f32 %v3872_v6, %v4771_v56  ;;  %v3874_v39 = vpop.f32.mrb[27].mxu0  ;;  %6378 = vmatmul.mubr.bf16.gmra.mrb[60].mxu0 %v16090_v31  ;;  %7135 = vmatmul.mubr.bf16.gmra.mrb[60].mxu1 %v16090_v31 }
 0x446   : > { %v4921_v55 = vmax.f32 %v3874_v39, %v4773_v15  ;;  %6593 = vmatpush1.bf16.msra.mxu0 %v12558_v21  ;;  %7308 = vmatpush1.bf16.msra.mxu1 %v12590_v4  ;;  %v12572_v15 = vld [vmem:[%s18089_s5 + $0x214] ss:$12 sps:$4 sm:$0xff]  }
 0x447   : > { %v16243_v34 = vpack.c.bf16 %v4920_v57, %v4918_v3  ;;  %6594 = vmatprep.subr.bf16.mxu0 %v12563_v36  ;;  %7309 = vmatprep.subr.bf16.mxu1 %v19095_v17  ;;  %v12569_v3 = vld [vmem:[%s18089_s5 + $0x1fc] ss:$12 sps:$4 sm:$0xff]   ;;  %v12567_v36 = vld [vmem:[%s18089_s5 + $0x1f8] ss:$12 sps:$4 sm:$0xff]  }
 0x448   : > { %v16249_v31 = vpack.c.bf16 %v4921_v55, %v4919_v48  ;;  %v12596_v48 = vld [vmem:[%s18089_s5 + $0x200] ss:$12 sps:$4 sm:$0xff]  }
 0x449   : > { %5110 = vrot.lane.b32.xlu0 %v16243_v34, %s12836_s27  ;;  %v3878_v49 = vpop.f32.mrb[28].mxu0  ;;  %v4777_v25 = vpop.f32.mrb[28].mxu1 }
 0x44a   : > { %v4922_v58 = vmax.f32 %v3878_v49, %v4777_v25  ;;  %v4779_v11 = vpop.f32.mrb[29].mxu1  ;;  %v16253_v41 = vpop.permute.xlu1 %5054  ;;  %6595 = vmatpush1.bf16.msra.mxu0 %v12561_v60  ;;  %7310 = vmatpush1.bf16.msra.mxu1 %v12591_v61  ;;  %v12597_v49 = vld [vmem:[%s18089_s5 + $0x218] ss:$12 sps:$4 sm:$0xff]  }
 0x44b   : > { %v3880_v20 = vpop.f32.mrb[29].mxu0  ;;  %v4781_v2 = vpop.f32.mrb[30].mxu1  ;;  %v5305_v0 = vsel %vm5134_vm3, %v16100_v35, %v16253_v41  ;;  %6596 = vmatprep.subr.bf16.mxu0 %v12566_v51  ;;  %7311 = vmatprep.subr.bf16.mxu1 %v19095_v17  ;;  %v12570_v51 = vld [vmem:[%s18089_s5 + $0x210] ss:$12 sps:$4 sm:$0xff]  }
 0x44c   : > { %v4923_v13 = vmax.f32 %v3880_v20, %v4779_v11  ;;  %v3882_v21 = vpop.f32.mrb[30].mxu0  ;;  %v4783_v4 = vpop.f32.mrb[31].mxu1  ;;  %6387 = vmatprep.mubr.bf16.mxu0 %v5305_v0  ;;  %7142 = vmatprep.mubr.bf16.mxu1 %v5305_v0 }
 0x44d   : > { %v4924_v50 = vmax.f32 %v3882_v21, %v4781_v2  ;;  %v3884_v56 = vpop.f32.mrb[31].mxu0  ;;  %6388 = vmatmul.mubr.bf16.gmra.mrb[64].mxu0 %v16098_v46  ;;  %7143 = vmatmul.mubr.bf16.gmra.mrb[64].mxu1 %v16098_v46  ;;  %v12573_v21 = vld [vmem:[%s18089_s5 + $0x228] ss:$12 sps:$4 sm:$0xff]  }
 0x44e   : > { %v4925_v9 = vmax.f32 %v3884_v56, %v4783_v4  ;;  %6597 = vmatpush1.bf16.msra.mxu0 %v12564_v29  ;;  %7312 = vmatpush1.bf16.msra.mxu1 %v12592_v38  ;;  %v12575_v29 = vld [vmem:[%s18089_s5 + $0x22c] ss:$12 sps:$4 sm:$0xff]   ;;  %v12598_v4 = vld [vmem:[%s18089_s5 + $0x230] ss:$12 sps:$4 sm:$0xff]  }
 0x44f   : > { %v16276_v6 = vpack.c.bf16 %v4924_v50, %v4922_v58  ;;  %6598 = vmatprep.subr.bf16.mxu0 %v12569_v3  ;;  %7313 = vmatprep.subr.bf16.mxu1 %v19095_v17  ;;  %v12578_v56 = vld [vmem:[%s18089_s5 + $0x244] ss:$12 sps:$4 sm:$0xff]  }
 0x450   : > { %v16282_v46 = vpack.c.bf16 %v4925_v9, %v4923_v13 }
 0x451   : > { %5114 = vrot.lane.b32.xlu1 %v16276_v6, %s12836_s27  ;;  %v3888_v57 = vpop.f32.mrb[32].mxu0  ;;  %v4787_v39 = vpop.f32.mrb[32].mxu1 }
 0x452   : > { %v4926_v55 = vmax.f32 %v3888_v57, %v4787_v39  ;;  %v4789_v60 = vpop.f32.mrb[33].mxu1  ;;  %v16286_v61 = vpop.permute.xlu1 %5058  ;;  %6599 = vmatpush1.bf16.msra.mxu0 %v12567_v36  ;;  %7314 = vmatpush1.bf16.msra.mxu1 %v12596_v48  ;;  %v12576_v39 = vld [vmem:[%s18089_s5 + $0x240] ss:$12 sps:$4 sm:$0xff]  }
 0x453   : > { %v3890_v25 = vpop.f32.mrb[33].mxu0  ;;  %v4791_v58 = vpop.f32.mrb[34].mxu1  ;;  %v5309_v11 = vsel %vm5134_vm3, %v16106_v43, %v16286_v61  ;;  %6600 = vmatprep.subr.bf16.mxu0 %v12572_v15  ;;  %7315 = vmatprep.subr.bf16.mxu1 %v19095_v17 }
 0x454   : > { %v4927_v38 = vmax.f32 %v3890_v25, %v4789_v60  ;;  %v3892_v20 = vpop.f32.mrb[34].mxu0  ;;  %v4793_v2 = vpop.f32.mrb[35].mxu1  ;;  %6397 = vmatprep.mubr.bf16.mxu0 %v5309_v11  ;;  %7150 = vmatprep.mubr.bf16.mxu1 %v5309_v11  ;;  %v12581_v25 = vld [vmem:[%s18089_s5 + $0x25c] ss:$12 sps:$4 sm:$0xff]  }
 0x455   : > { %v4928_v0 = vmax.f32 %v3892_v20, %v4791_v58  ;;  %v3894_v3 = vpop.f32.mrb[35].mxu0  ;;  %6398 = vmatmul.mubr.bf16.gmra.mrb[68].mxu0 %v16104_v40  ;;  %7151 = vmatmul.mubr.bf16.gmra.mrb[68].mxu1 %v16104_v40 }
 0x456   : > { %v4929_v13 = vmax.f32 %v3894_v3, %v4793_v2  ;;  %6601 = vmatpush1.bf16.msra.mxu0 %v12570_v51  ;;  %7316 = vmatpush1.bf16.msra.mxu1 %v12597_v49  ;;  %v12603_v3 = vld [vmem:[%s18089_s5 + $0x260] ss:$12 sps:$4 sm:$0xff]  }
 0x457   : > { %v16309_v50 = vpack.c.bf16 %v4928_v0, %v4926_v55  ;;  %6602 = vmatprep.subr.bf16.mxu0 %v12575_v29  ;;  %7317 = vmatprep.subr.bf16.mxu1 %v19095_v17  ;;  %v12602_v55 = vld [vmem:[%s18089_s5 + $0x248] ss:$12 sps:$4 sm:$0xff]   ;;  %v12579_v0 = vld [vmem:[%s18089_s5 + $0x258] ss:$12 sps:$4 sm:$0xff]  }
 0x458   : > { %v16315_v40 = vpack.c.bf16 %v4929_v13, %v4927_v38 }
 0x459   : > { %5118 = vrot.lane.b32.xlu0 %v16309_v50, %s12836_s27  ;;  %v3898_v9 = vpop.f32.mrb[36].mxu0  ;;  %v4797_v36 = vpop.f32.mrb[36].mxu1 }
 0x45a   : > { %v4930_v48 = vmax.f32 %v3898_v9, %v4797_v36  ;;  %v4799_v15 = vpop.f32.mrb[37].mxu1  ;;  %v16319_v57 = vpop.permute.xlu0 %5062  ;;  %6603 = vmatpush1.bf16.msra.mxu0 %v12573_v21  ;;  %7318 = vmatpush1.bf16.msra.mxu1 %v12598_v4  ;;  %v12584_v21 = vld [vmem:[%s18089_s5 + $0x274] ss:$12 sps:$4 sm:$0xff]  }
 0x45b   : > { %v3900_v60 = vpop.f32.mrb[37].mxu0  ;;  %v4801_v51 = vpop.f32.mrb[38].mxu1  ;;  %v5313_v49 = vsel %vm5134_vm3, %v16112_v32, %v16319_v57  ;;  %6604 = vmatprep.subr.bf16.mxu0 %v12578_v56  ;;  %7319 = vmatprep.subr.bf16.mxu1 %v19095_v17 }
 0x45c   : > { %v4931_v58 = vmax.f32 %v3900_v60, %v4799_v15  ;;  %v3902_v11 = vpop.f32.mrb[38].mxu0  ;;  %v4803_v29 = vpop.f32.mrb[39].mxu1  ;;  %6407 = vmatprep.mubr.bf16.mxu0 %v5313_v49  ;;  %7158 = vmatprep.mubr.bf16.mxu1 %v5313_v49 }
 0x45d   : > { %v4932_v38 = vmax.f32 %v3902_v11, %v4801_v51  ;;  %v3904_v20 = vpop.f32.mrb[39].mxu0  ;;  %6408 = vmatmul.mubr.bf16.gmra.mrb[72].mxu0 %v16110_v30  ;;  %7159 = vmatmul.mubr.bf16.gmra.mrb[72].mxu1 %v16110_v30 }
 0x45e   : > { %v4933_v2 = vmax.f32 %v3904_v20, %v4803_v29  ;;  %6605 = vmatpush1.bf16.msra.mxu0 %v12576_v39  ;;  %7320 = vmatpush1.bf16.msra.mxu1 %v12602_v55  ;;  %v12604_v55 = vld [vmem:[%s18089_s5 + $0x278] ss:$12 sps:$4 sm:$0xff]  }
 0x45f   : > { %v16342_v13 = vpack.c.bf16 %v4932_v38, %v4930_v48  ;;  %6606 = vmatprep.subr.bf16.mxu0 %v12581_v25  ;;  %7321 = vmatprep.subr.bf16.mxu1 %v19095_v17  ;;  %v12582_v48 = vld [vmem:[%s18089_s5 + $0x270] ss:$12 sps:$4 sm:$0xff]   ;;  %v12589_v25 = vld [vmem:[%s18089_s5 + $0x28c] ss:$12 sps:$4 sm:$0xff]  }
 0x460   : > { %v16348_v4 = vpack.c.bf16 %v4933_v2, %v4931_v58 }
 0x461   : > { %5122 = vrot.lane.b32.xlu1 %v16342_v13, %s12836_s27  ;;  %v3908_v56 = vpop.f32.mrb[40].mxu0  ;;  %v4807_v9 = vpop.f32.mrb[40].mxu1 }
 0x462   : > { %v4934_v36 = vmax.f32 %v3908_v56, %v4807_v9  ;;  %v4809_v15 = vpop.f32.mrb[41].mxu1  ;;  %v16352_v39 = vpop.permute.xlu1 %5066  ;;  %6607 = vmatpush1.bf16.msra.mxu0 %v12579_v0  ;;  %7322 = vmatpush1.bf16.msra.mxu1 %v12603_v3  ;;  %v12587_v0 = vld [vmem:[%s18089_s5 + $0x288] ss:$12 sps:$4 sm:$0xff]   ;;  %v12608_v3 = vld [vmem:[%s18089_s5 + $0x290] ss:$12 sps:$4 sm:$0xff]  }
 0x463   : > { %v3910_v60 = vpop.f32.mrb[41].mxu0  ;;  %v4811_v51 = vpop.f32.mrb[42].mxu1  ;;  %v5317_v49 = vsel %vm5134_vm3, %v16118_v33, %v16352_v39  ;;  %6608 = vmatprep.subr.bf16.mxu0 %v12584_v21  ;;  %7323 = vmatprep.subr.bf16.mxu1 %v19095_v17  ;;  %v12595_v56 = vld [vmem:[%s18089_s5 + $0x2a4] ss:$12 sps:$4 sm:$0xff]  }
 0x464   : > { %v4935_v58 = vmax.f32 %v3910_v60, %v4809_v15  ;;  %v3912_v11 = vpop.f32.mrb[42].mxu0  ;;  %v4813_v29 = vpop.f32.mrb[43].mxu1  ;;  %6417 = vmatprep.mubr.bf16.mxu0 %v5317_v49  ;;  %7166 = vmatprep.mubr.bf16.mxu1 %v5317_v49 }
 0x465   : > { %v4936_v38 = vmax.f32 %v3912_v11, %v4811_v51  ;;  %v3914_v20 = vpop.f32.mrb[43].mxu0  ;;  %6418 = vmatmul.mubr.bf16.gmra.mrb[76].mxu0 %v16116_v59  ;;  %7167 = vmatmul.mubr.bf16.gmra.mrb[76].mxu1 %v16116_v59  ;;  %v12601_v11 = vld [vmem:[%s18089_s5 + $0x2bc] ss:$12 sps:$4 sm:$0xff]  }
 0x466   : > { %v4937_v2 = vmax.f32 %v3914_v20, %v4813_v29  ;;  %6609 = vmatpush1.bf16.msra.mxu0 %v12582_v48  ;;  %7324 = vmatpush1.bf16.msra.mxu1 %v12604_v55  ;;  %v12609_v29 = vld [vmem:[%s18089_s5 + $0x2a8] ss:$12 sps:$4 sm:$0xff]  }
 0x467   : > { %v16375_v21 = vpack.c.bf16 %v4936_v38, %v4934_v36  ;;  %6610 = vmatprep.subr.bf16.mxu0 %v12589_v25  ;;  %7325 = vmatprep.subr.bf16.mxu1 %v19095_v17  ;;  %v12593_v36 = vld [vmem:[%s18089_s5 + $0x2a0] ss:$12 sps:$4 sm:$0xff]  }
 0x468   : > { %v16381_v9 = vpack.c.bf16 %v4937_v2, %v4935_v58 }
 0x469   : > { %5126 = vrot.lane.b32.xlu0 %v16375_v21, %s12836_s27  ;;  %v3918_v15 = vpop.f32.mrb[44].mxu0  ;;  %v4817_v48 = vpop.f32.mrb[44].mxu1 }
 0x46a   : > { %v4938_v55 = vmax.f32 %v3918_v15, %v4817_v48  ;;  %v4819_v60 = vpop.f32.mrb[45].mxu1  ;;  %v16385_v51 = vpop.permute.xlu0 %5070  ;;  %6611 = vmatpush1.bf16.msra.mxu0 %v12587_v0  ;;  %7326 = vmatpush1.bf16.msra.mxu1 %v12608_v3  ;;  %v12599_v15 = vld [vmem:[%s18089_s5 + $0x2b8] ss:$12 sps:$4 sm:$0xff]  }
 0x46b   : > { %v3920_v49 = vpop.f32.mrb[45].mxu0  ;;  %v4821_v25 = vpop.f32.mrb[46].mxu1  ;;  %v5321_v58 = vsel %vm5134_vm3, %v16124_v54, %v16385_v51  ;;  %6612 = vmatprep.subr.bf16.mxu0 %v12595_v56  ;;  %7327 = vmatprep.subr.bf16.mxu1 %v19095_v17 }
 0x46c   : > { %v4939_v38 = vmax.f32 %v3920_v49, %v4819_v60  ;;  %v3922_v20 = vpop.f32.mrb[46].mxu0  ;;  %v4823_v2 = vpop.f32.mrb[47].mxu1  ;;  %6427 = vmatprep.mubr.bf16.mxu0 %v5321_v58  ;;  %7174 = vmatprep.mubr.bf16.mxu1 %v5321_v58  ;;  %v12607_v60 = vld [vmem:[%s18089_s5 + $0x2d4] ss:$12 sps:$4 sm:$0xff]  }
 0x46d   : > { %v4940_v0 = vmax.f32 %v3922_v20, %v4821_v25  ;;  %5048 = vrot.lane.b32.xlu0 %v16100_v35, %s12836_s27  ;;  %v3924_v3 = vpop.f32.mrb[47].mxu0  ;;  %6428 = vmatmul.mubr.bf16.gmra.mrb[80].mxu0 %v16122_v22  ;;  %v12613_v35 = vld [vmem:[%s18089_s5 + $0x2c0] ss:$12 sps:$4 sm:$0xff]  }
 0x46e   : > { %v4941_v56 = vmax.f32 %v3924_v3, %v4823_v2  ;;  %7175 = vmatmul.mubr.bf16.gmra.mrb[80].mxu1 %v16122_v22  ;;  %6613 = vmatpush1.bf16.msra.mxu0 %v12593_v36 }
 0x46f   : > { %v16407_v48 = vpack.c.bf16 %v4940_v0, %v4938_v55  ;;  %6614 = vmatprep.subr.bf16.mxu0 %v12601_v11  ;;  %7328 = vmatpush1.bf16.msra.mxu1 %v12609_v29 }
 0x470   : > { %v16415_v49 = vpack.c.bf16 %v4941_v56, %v4939_v38  ;;  %7329 = vmatprep.subr.bf16.mxu1 %v19095_v17  ;;  %v12612_v56 = vld [vmem:[%s18089_s5 + $0x2ec] ss:$12 sps:$4 sm:$0xff]  }
 0x471   : > { %5052 = vrot.lane.b32.xlu0 %v16106_v43, %s12836_s27  ;;  %5130 = vrot.lane.b32.xlu1 %v16407_v48, %s12836_s27  ;;  %v3928_v55 = vpop.f32.mrb[48].mxu0  ;;  %v4827_v36 = vpop.f32.mrb[48].mxu1  ;;  %v12605_v43 = vld [vmem:[%s18089_s5 + $0x2d0] ss:$12 sps:$4 sm:$0xff]  }
 0x472   : > { %v4942_v25 = vmax.f32 %v3928_v55, %v4827_v36  ;;  %v4829_v58 = vpop.f32.mrb[49].mxu1  ;;  %v16422_v11 = vpop.permute.xlu1 %5074  ;;  %6615 = vmatpush1.bf16.msra.mxu0 %v12599_v15  ;;  %v12614_v15 = vld [vmem:[%s18089_s5 + $0x2d8] ss:$12 sps:$4 sm:$0xff]  }
 0x473   : > { %v3930_v29 = vpop.f32.mrb[49].mxu0  ;;  %v4831_v20 = vpop.f32.mrb[50].mxu1  ;;  %v5325_v38 = vsel %vm5134_vm3, %v16130_v63, %v16422_v11  ;;  %6616 = vmatprep.subr.bf16.mxu0 %v12607_v60  ;;  %7330 = vmatpush1.bf16.msra.mxu1 %v12613_v35 }
 0x474   : > { %v4943_v2 = vmax.f32 %v3930_v29, %v4829_v58  ;;  %v3932_v0 = vpop.f32.mrb[50].mxu0  ;;  %v4833_v3 = vpop.f32.mrb[51].mxu1  ;;  %6437 = vmatprep.mubr.bf16.mxu0 %v5325_v38  ;;  %7182 = vmatprep.mubr.bf16.mxu1 %v5325_v38  ;;  %v12610_v58 = vld [vmem:[%s18089_s5 + $0x2e8] ss:$12 sps:$4 sm:$0xff]  }
 0x475   : > { %v4944_v55 = vmax.f32 %v3932_v0, %v4831_v20  ;;  %5056 = vrot.lane.b32.xlu0 %v16112_v32, %s12836_s27  ;;  %5183 = vrot.lane.b32.xlu1 %v16110_v30, %s12837_s15  ;;  %v3934_v60 = vpop.f32.mrb[51].mxu0 }
 0x476   : > { %v4945_v35 = vmax.f32 %v3934_v60, %v4833_v3  ;;  %6438 = vmatmul.mubr.bf16.gmra.mrb[84].mxu0 %v16128_v62  ;;  %7183 = vmatmul.mubr.bf16.gmra.mrb[84].mxu1 %v16128_v62 }
 0x477   : > { %v16442_v36 = vpack.c.bf16 %v4944_v55, %v4942_v25  ;;  %6617 = vmatpush1.bf16.msra.mxu0 %v12605_v43  ;;  %7331 = vmatprep.subr.bf16.mxu1 %v19095_v17 }
 0x478   : > { %v16448_v29 = vpack.c.bf16 %v4945_v35, %v4943_v2  ;;  %6618 = vmatprep.subr.bf16.mxu0 %v12612_v56  ;;  %7332 = vmatpush1.bf16.msra.mxu1 %v12614_v15  ;;  %v12615_v56 = vld [vmem:[%s18089_s5 + $0x2f0] ss:$12 sps:$4 sm:$0xff]  }
 0x479   : > { %5060 = vrot.lane.b32.xlu0 %v16118_v33, %s12836_s27  ;;  %5187 = vrot.lane.b32.xlu1 %v16116_v59, %s12837_s15  ;;  %v3938_v30 = vpop.f32.mrb[52].mxu0  ;;  %v4837_v25 = vpop.f32.mrb[52].mxu1  ;;  %v12618_v59 = vld [vmem:[%s18089_s5 + $0x304] ss:$12 sps:$4 sm:$0xff]  }
 0x47a   : > { %v4946_v20 = vmax.f32 %v3938_v30, %v4837_v25  ;;  %v4839_v38 = vpop.f32.mrb[53].mxu1  ;;  %v16454_v43 = vpop.permute.xlu0 %5078  ;;  %7333 = vmatprep.subr.bf16.mxu1 %v19095_v17 }
 0x47b   : > { %v3940_v0 = vpop.f32.mrb[53].mxu0  ;;  %v4841_v3 = vpop.f32.mrb[54].mxu1  ;;  %v5329_v2 = vsel %vm5134_vm3, %v16136_v18, %v16454_v43  ;;  %6619 = vmatpush1.bf16.msra.mxu0 %v12610_v58 }
 0x47c   : > { %v4947_v15 = vmax.f32 %v3940_v0, %v4839_v38  ;;  %v3942_v55 = vpop.f32.mrb[54].mxu0  ;;  %v4843_v60 = vpop.f32.mrb[55].mxu1  ;;  %6447 = vmatprep.mubr.bf16.mxu0 %v5329_v2  ;;  %7190 = vmatprep.mubr.bf16.mxu1 %v5329_v2 }
 0x47d   : > { %v4948_v35 = vmax.f32 %v3942_v55, %v4841_v3  ;;  %5064 = vrot.lane.b32.xlu0 %v16124_v54, %s12836_s27  ;;  %5191 = vrot.lane.b32.xlu1 %v16122_v22, %s12837_s15  ;;  %v3944_v58 = vpop.f32.mrb[55].mxu0 }
 0x47e   : > { %v4949_v30 = vmax.f32 %v3944_v58, %v4843_v60  ;;  %6448 = vmatmul.mubr.bf16.gmra.mrb[88].mxu0 %v16134_v5  ;;  %7191 = vmatmul.mubr.bf16.gmra.mrb[88].mxu1 %v16134_v5  ;;  %v12633_v60 = vld [vmem:[%s18089_s5 + $0x37c] ss:$12 sps:$4 sm:$0xff]   ;;  %v12631_v58 = vld [vmem:[%s18089_s5 + $0x378] ss:$12 sps:$4 sm:$0xff]  }
 0x47f   : > { %v16472_v25 = vpack.c.bf16 %v4948_v35, %v4946_v20  ;;  %7334 = vmatpush1.bf16.msra.mxu1 %v12615_v56  ;;  %6841 = vmatprep.subr.bf16.mxu0 %v12618_v59 }
 0x480   : > { %v16474_v38 = vpack.c.bf16 %v4949_v30, %v4947_v15 }
 0x481   : > { %5068 = vrot.lane.b32.xlu0 %v16130_v63, %s12836_s27  ;;  %5195 = vrot.lane.b32.xlu1 %v16128_v62, %s12837_s15 }
 0x482   : > { %v16480_v0 = vpop.permute.xlu1 %5082 }
 0x483   : > { %v5333_v22 = vsel %vm5134_vm3, %v16142_v27, %v16480_v0 }
 0x484   : > { %6457 = vmatprep.mubr.bf16.mxu0 %v5333_v22  ;;  %7198 = vmatprep.mubr.bf16.mxu1 %v5333_v22 }
 0x485   : > { %5072 = vrot.lane.b32.xlu0 %v16136_v18, %s12836_s27  ;;  %5199 = vrot.lane.b32.xlu1 %v16134_v5, %s12837_s15 }
 0x486   : > { %6458 = vmatmul.mubr.bf16.gmra.mrb[92].mxu0 %v16140_v23  ;;  %7199 = vmatmul.mubr.bf16.gmra.mrb[92].mxu1 %v16140_v23 }
 0x489   : > { %5076 = vrot.lane.b32.xlu0 %v16142_v27, %s12836_s27  ;;  %5203 = vrot.lane.b32.xlu1 %v16140_v23, %s12837_s15 }
 0x48a   : > { %v16495_v62 = vpop.permute.xlu0 %5086 }
 0x48b   : > { %v5337_v20 = vsel %vm5134_vm3, %v16148_v53, %v16495_v62 }
 0x48c   : > { %6467 = vmatprep.mubr.bf16.mxu0 %v5337_v20  ;;  %7206 = vmatprep.mubr.bf16.mxu1 %v5337_v20 }
 0x48d   : > { %5080 = vrot.lane.b32.xlu0 %v16148_v53, %s12836_s27  ;;  %5207 = vrot.lane.b32.xlu1 %v16146_v52, %s12837_s15 }
 0x48e   : > { %6468 = vmatmul.mubr.bf16.gmra.mrb[96].mxu0 %v16146_v52  ;;  %7207 = vmatmul.mubr.bf16.gmra.mrb[96].mxu1 %v16146_v52 }
 0x491   : > { %5084 = vrot.lane.b32.xlu0 %v16154_v8, %s12836_s27  ;;  %5211 = vrot.lane.b32.xlu1 %v16152_v1, %s12837_s15 }
 0x492   : > { %v16510_v5 = vpop.permute.xlu1 %5090 }
 0x493   : > { %v5341_v23 = vsel %vm5134_vm3, %v16154_v8, %v16510_v5 }
 0x494   : > { %6477 = vmatprep.mubr.bf16.mxu0 %v5341_v23  ;;  %7214 = vmatprep.mubr.bf16.mxu1 %v5341_v23  ;;  %v12638_v23 = vld [vmem:[%s18089_s5 + $0x320] ss:$12 sps:$4 sm:$0xff]  }
 0x495   : > { %5088 = vrot.lane.b32.xlu0 %v16160_v37, %s12836_s27  ;;  %5215 = vrot.lane.b32.xlu1 %v16158_v24, %s12837_s15 }
 0x496   : > { %6478 = vmatmul.mubr.bf16.gmra.mrb[100].mxu0 %v16152_v1  ;;  %7215 = vmatmul.mubr.bf16.gmra.mrb[100].mxu1 %v16152_v1 }
 0x499   : > { %5092 = vrot.lane.b32.xlu0 %v16166_v42, %s12836_s27  ;;  %5219 = vrot.lane.b32.xlu1 %v16164_v28, %s12837_s15 }
 0x49a   : > { %v16525_v52 = vpop.permute.xlu0 %5094 }
 0x49b   : > { %v5345_v3 = vsel %vm5134_vm3, %v16160_v37, %v16525_v52 }
 0x49c   : > { %6487 = vmatprep.mubr.bf16.mxu0 %v5345_v3  ;;  %7222 = vmatprep.mubr.bf16.mxu1 %v5345_v3  ;;  %v12639_v3 = vld [vmem:[%s18089_s5 + $0x338] ss:$12 sps:$4 sm:$0xff]  }
 0x49d   : > { %5096 = vrot.lane.b32.xlu0 %v16172_v10, %s12836_s27  ;;  %5223 = vrot.lane.b32.xlu1 %v16170_v19, %s12837_s15 }
 0x49e   : > { %6488 = vmatmul.mubr.bf16.gmra.mrb[104].mxu0 %v16158_v24  ;;  %7223 = vmatmul.mubr.bf16.gmra.mrb[104].mxu1 %v16158_v24 }
 0x4a1   : > { %5100 = vrot.lane.b32.xlu0 %v16178_v26, %s12836_s27  ;;  %5227 = vrot.lane.b32.xlu1 %v16176_v45, %s12837_s15 }
 0x4a2   : > { %v16540_v1 = vpop.permute.xlu1 %5098 }
 0x4a3   : > { %v5349_v2 = vsel %vm5134_vm3, %v16166_v42, %v16540_v1 }
 0x4a4   : > { %6497 = vmatprep.mubr.bf16.mxu0 %v5349_v2  ;;  %7230 = vmatprep.mubr.bf16.mxu1 %v5349_v2 }
 0x4a5   : > { %5104 = vrot.lane.b32.xlu0 %v16184_v44, %s12836_s27  ;;  %5231 = vrot.lane.b32.xlu1 %v16182_v47, %s12837_s15 }
 0x4a6   : > { %6498 = vmatmul.mubr.bf16.gmra.mrb[108].mxu0 %v16164_v28  ;;  %7231 = vmatmul.mubr.bf16.gmra.mrb[108].mxu1 %v16164_v28 }
 0x4a9   : > { %5108 = vrot.lane.b32.xlu0 %v16216_v7, %s12836_s27  ;;  %5235 = vrot.lane.b32.xlu1 %v16210_v12, %s12837_s15 }
 0x4aa   : > { %v16555_v24 = vpop.permute.xlu0 %5102 }
 0x4ab   : > { %v5353_v56 = vsel %vm5134_vm3, %v16172_v10, %v16555_v24 }
 0x4ac   : > { %6507 = vmatprep.mubr.bf16.mxu0 %v5353_v56  ;;  %7238 = vmatprep.mubr.bf16.mxu1 %v5353_v56 }
 0x4ad   : > { %5112 = vrot.lane.b32.xlu0 %v16249_v31, %s12836_s27  ;;  %5239 = vrot.lane.b32.xlu1 %v16243_v34, %s12837_s15 }
 0x4ae   : > { %6508 = vmatmul.mubr.bf16.gmra.mrb[112].mxu0 %v16170_v19  ;;  %7239 = vmatmul.mubr.bf16.gmra.mrb[112].mxu1 %v16170_v19 }
 0x4b1   : > { %5116 = vrot.lane.b32.xlu0 %v16282_v46, %s12836_s27  ;;  %5243 = vrot.lane.b32.xlu1 %v16276_v6, %s12837_s15 }
 0x4b3   : > { %v16570_v28 = vpop.permute.xlu1 %5106 }
 0x4b4   : > { %v5357_v59 = vsel %vm5134_vm3, %v16178_v26, %v16570_v28 }
 0x4b5   : > { %6517 = vmatprep.mubr.bf16.mxu0 %v5357_v59  ;;  %7246 = vmatprep.mubr.bf16.mxu1 %v5357_v59 }
 0x4b6   : > { %5120 = vrot.lane.b32.xlu0 %v16315_v40, %s12836_s27  ;;  %5247 = vrot.lane.b32.xlu1 %v16309_v50, %s12837_s15 }
 0x4b7   : > { %6518 = vmatmul.mubr.bf16.gmra.mrb[116].mxu0 %v16176_v45  ;;  %7247 = vmatmul.mubr.bf16.gmra.mrb[116].mxu1 %v16176_v45 }
 0x4ba   : > { %5124 = vrot.lane.b32.xlu0 %v16348_v4, %s12836_s27  ;;  %5251 = vrot.lane.b32.xlu1 %v16342_v13, %s12837_s15 }
 0x4bb   : > { %v16585_v19 = vpop.permute.xlu0 %5110 }
 0x4bc   : > { %v5361_v15 = vsel %vm5134_vm3, %v16184_v44, %v16585_v19 }
 0x4bd   : > { %6527 = vmatprep.mubr.bf16.mxu0 %v5361_v15  ;;  %7254 = vmatprep.mubr.bf16.mxu1 %v5361_v15  ;;  %v12640_v15 = vld [vmem:[%s18089_s5 + $0x350] ss:$12 sps:$4 sm:$0xff]  }
 0x4be   : > { %5128 = vrot.lane.b32.xlu0 %v16381_v9, %s12836_s27  ;;  %5255 = vrot.lane.b32.xlu1 %v16375_v21, %s12837_s15 }
 0x4bf   : > { %6528 = vmatmul.mubr.bf16.gmra.mrb[120].mxu0 %v16182_v47  ;;  %7255 = vmatmul.mubr.bf16.gmra.mrb[120].mxu1 %v16182_v47 }
 0x4c2   : > { %5259 = vrot.lane.b32.xlu1 %v16407_v48, %s12837_s15  ;;  %5132 = vrot.lane.b32.xlu0 %v16415_v49, %s12836_s27 }
 0x4c3   : > { %v16600_v45 = vpop.permute.xlu1 %5114 }
 0x4c4   : > { %v5365_v55 = vsel %vm5134_vm3, %v16216_v7, %v16600_v45 }
 0x4c5   : > { %6537 = vmatprep.mubr.bf16.mxu0 %v5365_v55  ;;  %7262 = vmatprep.mubr.bf16.mxu1 %v5365_v55  ;;  %v12641_v55 = vld [vmem:[%s18089_s5 + $0x368] ss:$12 sps:$4 sm:$0xff]  }
 0x4c6   : > { %5185 = vrot.lane.b32.xlu0 %v16112_v32, %s12837_s15  ;;  %5263 = vrot.lane.b32.xlu1 %v16442_v36, %s12837_s15 }
 0x4c7   : > { %6538 = vmatmul.mubr.bf16.gmra.mrb[124].mxu0 %v16210_v12  ;;  %7263 = vmatmul.mubr.bf16.gmra.mrb[124].mxu1 %v16210_v12 }
 0x4ca   : > { %5193 = vrot.lane.b32.xlu0 %v16124_v54, %s12837_s15  ;;  %5267 = vrot.lane.b32.xlu1 %v16472_v25, %s12837_s15  ;;  %v12635_v25 = vld [vmem:[%s18089_s5 + $0x390] ss:$12 sps:$4 sm:$0xff]  }
 0x4cb   : > { %v16615_v47 = vpop.permute.xlu0 %5118 }
 0x4cc   : > { %v5369_v21 = vsel %vm5134_vm3, %v16249_v31, %v16615_v47 }
 0x4cd   : > { %6547 = vmatprep.mubr.bf16.mxu0 %v5369_v21  ;;  %7270 = vmatprep.mubr.bf16.mxu1 %v5369_v21 }
 0x4ce   : > { %5201 = vrot.lane.b32.xlu0 %v16136_v18, %s12837_s15  ;;  %5189 = vrot.lane.b32.xlu1 %v16118_v33, %s12837_s15 }
 0x4cf   : > { %6548 = vmatmul.mubr.bf16.gmra.mrb[128].mxu0 %v16243_v34  ;;  %7271 = vmatmul.mubr.bf16.gmra.mrb[128].mxu1 %v16243_v34  ;;  %v12619_v34 = vld [vmem:[%s18089_s5 + $0x318] ss:$12 sps:$4 sm:$0xff]  }
 0x4d2   : > { %5209 = vrot.lane.b32.xlu0 %v16148_v53, %s12837_s15  ;;  %5197 = vrot.lane.b32.xlu1 %v16130_v63, %s12837_s15 }
 0x4d3   : > { %v16630_v32 = vpop.permute.xlu1 %5122 }
 0x4d4   : > { %v5373_v54 = vsel %vm5134_vm3, %v16282_v46, %v16630_v32 }
 0x4d5   : > { %6557 = vmatprep.mubr.bf16.mxu0 %v5373_v54  ;;  %7278 = vmatprep.mubr.bf16.mxu1 %v5373_v54 }
 0x4d6   : > { %5217 = vrot.lane.b32.xlu0 %v16160_v37, %s12837_s15  ;;  %5205 = vrot.lane.b32.xlu1 %v16142_v27, %s12837_s15 }
 0x4d7   : > { %6558 = vmatmul.mubr.bf16.gmra.mrb[132].mxu0 %v16276_v6  ;;  %7279 = vmatmul.mubr.bf16.gmra.mrb[132].mxu1 %v16276_v6 }
 0x4da   : > { %5225 = vrot.lane.b32.xlu0 %v16172_v10, %s12837_s15  ;;  %5213 = vrot.lane.b32.xlu1 %v16154_v8, %s12837_s15  ;;  %v12616_v10 = vld [vmem:[%s18089_s5 + $0x300] ss:$12 sps:$4 sm:$0xff]  }
 0x4db   : > { %v16645_v33 = vpop.permute.xlu0 %5126 }
 0x4dc   : > { %v5377_v63 = vsel %vm5134_vm3, %v16315_v40, %v16645_v33 }
 0x4dd   : > { %6567 = vmatprep.mubr.bf16.mxu0 %v5377_v63  ;;  %7286 = vmatprep.mubr.bf16.mxu1 %v5377_v63 }
 0x4de   : > { %5233 = vrot.lane.b32.xlu0 %v16184_v44, %s12837_s15  ;;  %5221 = vrot.lane.b32.xlu1 %v16166_v42, %s12837_s15 }
 0x4df   : > { %6568 = vmatmul.mubr.bf16.gmra.mrb[136].mxu0 %v16309_v50  ;;  %7287 = vmatmul.mubr.bf16.gmra.mrb[136].mxu1 %v16309_v50  ;;  %v5049_v53 = vpop.permute.xlu0 %5048 }
 0x4e0   : > { %v5135_v44 = vsel %vm5134_vm3, %v16188_v16, %v5049_v53  ;;  %v12634_v16 = vld [vmem:[%s18089_s5 + $0x308] ss:$12 sps:$4 sm:$0xff]  }
 0x4e1   : > { %11342 = vmatprep.subr.bf16.mxu1 %v12634_v16 }
 0x4e2   : > { %5241 = vrot.lane.b32.xlu0 %v16249_v31, %s12837_s15  ;;  %5229 = vrot.lane.b32.xlu1 %v16178_v26, %s12837_s15  ;;  %v12621_v26 = vld [vmem:[%s18089_s5 + $0x31c] ss:$12 sps:$4 sm:$0xff]   ;;  %v12624_v31 = vld [vmem:[%s18089_s5 + $0x334] ss:$12 sps:$4 sm:$0xff]  }
 0x4e3   : > { %v16660_v18 = vpop.permute.xlu1 %5130  ;;  %v5053_v12 = vpop.permute.xlu0 %5052 }
 0x4e4   : > { %v5381_v27 = vsel %vm5134_vm3, %v16348_v4, %v16660_v18  ;;  %v5136_v50 = vsel %vm5134_vm3, %v16220_v14, %v5053_v12  ;;  %v12625_v14 = vld [vmem:[%s18089_s5 + $0x348] ss:$12 sps:$4 sm:$0xff]  }
 0x4e5   : > { %6577 = vmatprep.mubr.bf16.mxu0 %v5381_v27  ;;  %7294 = vmatprep.mubr.bf16.mxu1 %v5381_v27  ;;  %v12642_v27 = vld [vmem:[%s18089_s5 + $0x380] ss:$12 sps:$4 sm:$0xff]  }
 0x4e6   : > { %5249 = vrot.lane.b32.xlu0 %v16315_v40, %s12837_s15  ;;  %5237 = vrot.lane.b32.xlu1 %v16216_v7, %s12837_s15 }
 0x4e7   : > { %6578 = vmatmul.mubr.bf16.gmra.mrb[140].mxu0 %v16342_v13  ;;  %7295 = vmatmul.mubr.bf16.gmra.mrb[140].mxu1 %v16342_v13  ;;  %v16671_v8 = vpop.permute.xlu1 %5183  ;;  %v5057_v40 = vpop.permute.xlu0 %5056  ;;  %v12627_v13 = vld [vmem:[%s18089_s5 + $0x34c] ss:$12 sps:$4 sm:$0xff]  }
 0x4e8   : > { %v5385_v37 = vsel %vm3282_vm2, %v5049_v53, %v16671_v8  ;;  %v5137_v36 = vsel %vm5134_vm3, %v16253_v41, %v5057_v40  ;;  %v12637_v41 = vld [vmem:[%s18089_s5 + $0x394] ss:$12 sps:$4 sm:$0xff]   ;;  %v12643_v53 = vld [vmem:[%s18089_s5 + $0x398] ss:$12 sps:$4 sm:$0xff]  }
 0x4e9   : > { %6620 = vmatprep.mubr.bf16.mxu0 %v5385_v37  ;;  %7335 = vmatprep.mubr.bf16.mxu1 %v5385_v37 }
 0x4ea   : > { %5257 = vrot.lane.b32.xlu0 %v16381_v9, %s12837_s15  ;;  %5245 = vrot.lane.b32.xlu1 %v16282_v46, %s12837_s15  ;;  %v12622_v46 = vld [vmem:[%s18089_s5 + $0x330] ss:$12 sps:$4 sm:$0xff]  }
 0x4eb   : > { %v16679_v42 = vpop.permute.xlu1 %5187  ;;  %v12630_v9 = vld [vmem:[%s18089_s5 + $0x364] ss:$12 sps:$4 sm:$0xff]  }
 0x4ec   : > { %v5389_v7 = vsel %vm3282_vm2, %v5053_v12, %v16679_v42 }
 0x4ee   : > { %5265 = vrot.lane.b32.xlu0 %v16448_v29, %s12837_s15  ;;  %5253 = vrot.lane.b32.xlu1 %v16348_v4, %s12837_s15  ;;  %v5061_v29 = vpop.permute.xlu0 %5060 }
 0x4ef   : > { %6621 = vmatmul.mubr.bf16.vlgmr.msra.gmra.mrb[56].mxu0 %v5135_v44  ;;  %7336 = vmatmul.mubr.bf16.vlgmr.msra.gmra.mrb[56].mxu1 %v5135_v44  ;;  %v16706_v6 = vpop.permute.xlu1 %5191 }
 0x4f0   : > { %6630 = vmatprep.mubr.bf16.mxu0 %v5389_v7  ;;  %6842 = vmatpush1.bf16.msra.mxu0 %v12616_v10  ;;  %v5393_v4 = vsel %vm3282_vm2, %v5057_v40, %v16706_v6 }
 0x4f1   : > { %7343 = vmatprep.mubr.bf16.mxu1 %v5389_v7  ;;  %6843 = vmatprep.subr.bf16.mxu0 %v12621_v26 }
 0x4f2   : > { %5261 = vrot.lane.b32.xlu1 %v16415_v49, %s12837_s15  ;;  %11343 = vmatpush3.bf16.msra.mxu1 %v12634_v16  ;;  %v12628_v49 = vld [vmem:[%s18089_s5 + $0x360] ss:$12 sps:$4 sm:$0xff]   ;;  %v5065_v22 = vpop.permute.xlu0 %5064 }
 0x4f3   : > { %v16726_v48 = vpop.permute.xlu1 %5195  ;;  %11344 = vmatprep.subr.bf16.mxu1 %v12638_v23  ;;  %v5139_v2 = vsel %vm5134_vm3, %v16319_v57, %v5065_v22 }
 0x4f4   : > { %6844 = vmatpush1.bf16.msra.mxu0 %v12619_v34  ;;  %v5397_v35 = vsel %vm3282_vm2, %v5061_v29, %v16726_v48 }
 0x4f5   : > { %6845 = vmatprep.subr.bf16.mxu0 %v12624_v31 }
 0x4f6   : > { %5269 = vrot.lane.b32.xlu1 %v16474_v38, %s12837_s15  ;;  %v5138_v38 = vsel %vm5134_vm3, %v16286_v61, %v5061_v29  ;;  %11345 = vmatpush3.bf16.msra.mxu1 %v12638_v23  ;;  %v5069_v56 = vpop.permute.xlu0 %5068 }
 0x4f7   : > { %6631 = vmatmul.mubr.bf16.gmra.mrb[60].mxu0 %v5136_v50  ;;  %7344 = vmatmul.mubr.bf16.gmra.mrb[60].mxu1 %v5136_v50  ;;  %v16744_v30 = vpop.permute.xlu1 %5199  ;;  %v5140_v21 = vsel %vm5134_vm3, %v16352_v39, %v5069_v56 }
 0x4f8   : > { %6640 = vmatprep.mubr.bf16.mxu0 %v5393_v4  ;;  %7351 = vmatprep.mubr.bf16.mxu1 %v5393_v4  ;;  %v5401_v20 = vsel %vm3282_vm2, %v5065_v22, %v16744_v30 }
 0x4f9   : > { %6846 = vmatpush1.bf16.msra.mxu0 %v12622_v46  ;;  %11346 = vmatprep.subr.bf16.mxu1 %v12639_v3 }
 0x4fa   : > { %6847 = vmatprep.subr.bf16.mxu0 %v12627_v13  ;;  %11347 = vmatpush3.bf16.msra.mxu1 %v12639_v3  ;;  %v5073_v54 = vpop.permute.xlu0 %5072 }
 0x4fb   : > { %v16759_v61 = vpop.permute.xlu1 %5203  ;;  %11348 = vmatprep.subr.bf16.mxu1 %v12640_v15  ;;  %v5141_v37 = vsel %vm5134_vm3, %v16385_v51, %v5073_v54 }
 0x4fc   : > { %v5405_v59 = vsel %vm3282_vm2, %v5069_v56, %v16759_v61 }
 0x4fd   : > { %6848 = vmatpush1.bf16.msra.mxu0 %v12625_v14 }
 0x4fe   : > { %6849 = vmatprep.subr.bf16.mxu0 %v12630_v9  ;;  %11349 = vmatpush3.bf16.msra.mxu1 %v12640_v15  ;;  %v5077_v10 = vpop.permute.xlu0 %5076 }
 0x4ff   : > { %6641 = vmatmul.mubr.bf16.gmra.mrb[64].mxu0 %v5137_v36  ;;  %7352 = vmatmul.mubr.bf16.gmra.mrb[64].mxu1 %v5137_v36  ;;  %v16771_v57 = vpop.permute.xlu1 %5207  ;;  %v5142_v12 = vsel %vm5134_vm3, %v16422_v11, %v5077_v10 }
 0x500   : > { %6650 = vmatprep.mubr.bf16.mxu0 %v5397_v35  ;;  %7359 = vmatprep.mubr.bf16.mxu1 %v5397_v35  ;;  %v5409_v63 = vsel %vm3282_vm2, %v5073_v54, %v16771_v57 }
 0x501   : > { %6850 = vmatpush1.bf16.msra.mxu0 %v12628_v49  ;;  %11350 = vmatprep.subr.bf16.mxu1 %v12641_v55 }
 0x502   : > { %6851 = vmatprep.subr.bf16.mxu0 %v12633_v60  ;;  %11351 = vmatpush3.bf16.msra.mxu1 %v12641_v55  ;;  %v5081_v7 = vpop.permute.xlu0 %5080  ;;  %v12646_v60 = vld [vmem:[%s18091_s7 + $0x164] ss:$8 sps:$4 sm:$0xff]  }
 0x503   : > { %11352 = vmatprep.subr.bf16.mxu1 %v12642_v27  ;;  %v16783_v39 = vpop.permute.xlu1 %5211  ;;  %v5143_v16 = vsel %vm5134_vm3, %v16454_v43, %v5081_v7 }
 0x504   : > { %v5413_v26 = vsel %vm3282_vm2, %v5077_v10, %v16783_v39 }
 0x505   : > { %6852 = vmatpush1.bf16.msra.mxu0 %v12631_v58 }
 0x506   : > { %6853 = vmatprep.subr.bf16.mxu0 %v12637_v41  ;;  %11353 = vmatpush3.bf16.msra.mxu1 %v12642_v27  ;;  %v5085_v31 = vpop.permute.xlu0 %5084 }
 0x507   : > { %6651 = vmatmul.mubr.bf16.gmra.mrb[68].mxu0 %v5138_v38  ;;  %7360 = vmatmul.mubr.bf16.gmra.mrb[68].mxu1 %v5138_v38  ;;  %v16789_v44 = vpop.permute.xlu1 %5215  ;;  %v5144_v50 = vsel %vm5134_vm3, %v16480_v0, %v5085_v31 }
 0x508   : > { %6660 = vmatprep.mubr.bf16.mxu0 %v5401_v20  ;;  %7367 = vmatprep.mubr.bf16.mxu1 %v5401_v20  ;;  %v5417_v51 = vsel %vm3282_vm2, %v5081_v7, %v16789_v44 }
 0x509   : > { %6854 = vmatpush1.bf16.msra.mxu0 %v12635_v25  ;;  %11354 = vmatprep.subr.bf16.mxu1 %v12643_v53 }
 0x50a   : > { %11355 = vmatpush3.bf16.msra.mxu1 %v12643_v53  ;;  %v5089_v40 = vpop.permute.xlu0 %5088  ;;  %9005 = vmatprep.subr.bf16.mxu0 %v12646_v60  ;;  %v12655_v60 = vld [vmem:[%s18091_s7 + $0x194] ss:$8 sps:$4 sm:$0xff]  }
 0x50b   : > { %v16795_v34 = vpop.permute.xlu1 %5219  ;;  %v5145_v4 = vsel %vm5134_vm3, %v16495_v62, %v5089_v40 }
 0x50c   : > { %v5421_v46 = vsel %vm3282_vm2, %v5085_v31, %v16795_v34 }
 0x50e   : > { %v5093_v14 = vpop.permute.xlu0 %5092 }
 0x50f   : > { %6661 = vmatmul.mubr.bf16.gmra.mrb[72].mxu0 %v5139_v2  ;;  %7368 = vmatmul.mubr.bf16.gmra.mrb[72].mxu1 %v5139_v2  ;;  %v16801_v11 = vpop.permute.xlu1 %5223  ;;  %v5146_v49 = vsel %vm5134_vm3, %v16510_v5, %v5093_v14 }
 0x510   : > { %6670 = vmatprep.mubr.bf16.mxu0 %v5405_v59  ;;  %7375 = vmatprep.mubr.bf16.mxu1 %v5405_v59  ;;  %v5425_v13 = vsel %vm3282_vm2, %v5089_v40, %v16801_v11 }
 0x512   : > { %v5097_v36 = vpop.permute.xlu0 %5096 }
 0x513   : > { %v16807_v43 = vpop.permute.xlu1 %5227  ;;  %v5147_v35 = vsel %vm5134_vm3, %v16525_v52, %v5097_v36 }
 0x514   : > { %v5429_v9 = vsel %vm3282_vm2, %v5093_v14, %v16807_v43  ;;  %v12652_v14 = vld [vmem:[%s18091_s7 + $0x184] ss:$8 sps:$4 sm:$0xff]  }
 0x516   : > { %v5101_v58 = vpop.permute.xlu0 %5100 }
 0x517   : > { %6671 = vmatmul.mubr.bf16.gmra.mrb[76].mxu0 %v5140_v21  ;;  %7376 = vmatmul.mubr.bf16.gmra.mrb[76].mxu1 %v5140_v21  ;;  %v16813_v0 = vpop.permute.xlu1 %5231  ;;  %v5148_v25 = vsel %vm5134_vm3, %v16540_v1, %v5101_v58 }
 0x518   : > { %6680 = vmatprep.mubr.bf16.mxu0 %v5409_v63  ;;  %7383 = vmatprep.mubr.bf16.mxu1 %v5409_v63  ;;  %v5433_v29 = vsel %vm3282_vm2, %v5097_v36, %v16813_v0  ;;  %v12670_v36 = vld [vmem:[%s18091_s7 + $0x4] ss:$8 sps:$4 sm:$0xff]  }
 0x519   : > { %8250 = vmatprep.subr.bf16.mxu1 %v12670_v36 }
 0x51a   : > { %v5105_v38 = vpop.permute.xlu0 %5104 }
 0x51b   : > { %v16819_v62 = vpop.permute.xlu1 %5235  ;;  %v5149_v20 = vsel %vm5134_vm3, %v16555_v24, %v5105_v38 }
 0x51c   : > { %v5437_v5 = vsel %vm3282_vm2, %v5101_v58, %v16819_v62 }
 0x51e   : > { %v5109_v23 = vpop.permute.xlu0 %5108 }
 0x51f   : > { %6681 = vmatmul.mubr.bf16.gmra.mrb[80].mxu0 %v5141_v37  ;;  %7384 = vmatmul.mubr.bf16.gmra.mrb[80].mxu1 %v5141_v37  ;;  %v16828_v41 = vpop.permute.xlu1 %5239  ;;  %v5150_v2 = vsel %vm5134_vm3, %v16570_v28, %v5109_v23 }
 0x520   : > { %6690 = vmatprep.mubr.bf16.mxu0 %v5413_v26  ;;  %7391 = vmatprep.mubr.bf16.mxu1 %v5413_v26  ;;  %v5441_v52 = vsel %vm3282_vm2, %v5105_v38, %v16828_v41  ;;  %v12676_v38 = vld [vmem:[%s18091_s7 + $0x14] ss:$8 sps:$4 sm:$0xff]  }
 0x522   : > { %v5113_v56 = vpop.permute.xlu0 %5112 }
 0x523   : > { %v16834_v22 = vpop.permute.xlu1 %5243  ;;  %v5151_v15 = vsel %vm5134_vm3, %v16585_v19, %v5113_v56 }
 0x524   : > { %v5445_v3 = vsel %vm3282_vm2, %v5109_v23, %v16834_v22 }
 0x526   : > { %v5117_v55 = vpop.permute.xlu0 %5116 }
 0x527   : > { %6691 = vmatmul.mubr.bf16.gmra.mrb[84].mxu0 %v5142_v12  ;;  %7392 = vmatmul.mubr.bf16.gmra.mrb[84].mxu1 %v5142_v12  ;;  %v5152_v54 = vsel %vm5134_vm3, %v16600_v45, %v5117_v55 }
 0x528   : > { %6700 = vmatprep.mubr.bf16.mxu0 %v5417_v51  ;;  %7399 = vmatprep.mubr.bf16.mxu1 %v5417_v51  ;;  %v16840_v1 = vpop.permute.xlu1 %5247 }
 0x529   : > { %v5449_v59 = vsel %vm3282_vm2, %v5113_v56, %v16840_v1  ;;  %v12679_v56 = vld [vmem:[%s18091_s7 + $0x24] ss:$8 sps:$4 sm:$0xff]  }
 0x52a   : > { %v5121_v63 = vpop.permute.xlu0 %5120 }
 0x52b   : > { %v5153_v53 = vsel %vm5134_vm3, %v16615_v47, %v5121_v63 }
 0x52c   : > { %v16846_v24 = vpop.permute.xlu1 %5251 }
 0x52d   : > { %v5453_v21 = vsel %vm3282_vm2, %v5117_v55, %v16846_v24 }
 0x52e   : > { %v5125_v37 = vpop.permute.xlu0 %5124 }
 0x52f   : > { %6701 = vmatmul.mubr.bf16.gmra.mrb[88].mxu0 %v5143_v16  ;;  %7400 = vmatmul.mubr.bf16.gmra.mrb[88].mxu1 %v5143_v16  ;;  %v5154_v26 = vsel %vm5134_vm3, %v16630_v32, %v5125_v37 }
 0x530   : > { %6710 = vmatprep.mubr.bf16.mxu0 %v5421_v46  ;;  %7407 = vmatprep.mubr.bf16.mxu1 %v5421_v46  ;;  %v16852_v28 = vpop.permute.xlu1 %5255 }
 0x531   : > { %v5457_v27 = vsel %vm3282_vm2, %v5121_v63, %v16852_v28 }
 0x532   : > { %v5129_v12 = vpop.permute.xlu0 %5128 }
 0x533   : > { %v5155_v51 = vsel %vm5134_vm3, %v16645_v33, %v5129_v12 }
 0x534   : > { %v16858_v19 = vpop.permute.xlu1 %5259 }
 0x535   : > { %v5461_v10 = vsel %vm3282_vm2, %v5125_v37, %v16858_v19 }
 0x536   : > { %v5133_v16 = vpop.permute.xlu0 %5132 }
 0x537   : > { %6711 = vmatmul.mubr.bf16.gmra.mrb[92].mxu0 %v5144_v50  ;;  %7408 = vmatmul.mubr.bf16.gmra.mrb[92].mxu1 %v5144_v50  ;;  %v5156_v46 = vsel %vm5134_vm3, %v16660_v18, %v5133_v16  ;;  %v12649_v18 = vld [vmem:[%s18091_s7 + $0x174] ss:$8 sps:$4 sm:$0xff]  }
 0x538   : > { %6720 = vmatprep.mubr.bf16.mxu0 %v5425_v13  ;;  %7415 = vmatprep.mubr.bf16.mxu1 %v5425_v13  ;;  %v16864_v45 = vpop.permute.xlu1 %5263  ;;  %v12644_v13 = vld [vmem:[%s18091_s7 + $0x160] ss:$8 sps:$4 sm:$0xff]  }
 0x539   : > { %v5465_v7 = vsel %vm3282_vm2, %v5129_v12, %v16864_v45  ;;  %v12688_v12 = vld [vmem:[%s18091_s7 + $0x44] ss:$8 sps:$4 sm:$0xff]  }
 0x53a   : > { %v5186_v32 = vpop.permute.xlu0 %5185 }
 0x53b   : > { %v5272_v50 = vsel %vm3282_vm2, %v16671_v8, %v5186_v32 }
 0x53c   : > { %v16870_v47 = vpop.permute.xlu1 %5267 }
 0x53d   : > { %v5469_v31 = vsel %vm3282_vm2, %v5133_v16, %v16870_v47 }
 0x53e   : > { %v5194_v40 = vpop.permute.xlu0 %5193 }
 0x53f   : > { %6721 = vmatmul.mubr.bf16.gmra.mrb[96].mxu0 %v5145_v4  ;;  %7416 = vmatmul.mubr.bf16.gmra.mrb[96].mxu1 %v5145_v4  ;;  %v5274_v8 = vsel %vm3282_vm2, %v16706_v6, %v5194_v40 }
 0x540   : > { %6730 = vmatprep.mubr.bf16.mxu0 %v5429_v9  ;;  %7423 = vmatprep.mubr.bf16.mxu1 %v5429_v9  ;;  %v5190_v33 = vpop.permute.xlu1 %5189 }
 0x541   : > { %v5273_v4 = vsel %vm3282_vm2, %v16679_v42, %v5190_v33  ;;  %v12647_v42 = vld [vmem:[%s18091_s7 + $0x170] ss:$8 sps:$4 sm:$0xff]   ;;  %v12691_v33 = vld [vmem:[%s18091_s7 + $0x204] ss:$8 sps:$4 sm:$0xff]  }
 0x542   : > { %v5202_v6 = vpop.permute.xlu0 %5201 }
 0x543   : > { %v16918_v58 = vsel %vm3282_vm2, %v16744_v30, %v5202_v6  ;;  %v12658_v30 = vld [vmem:[%s18091_s7 + $0x1a4] ss:$8 sps:$4 sm:$0xff]   ;;  %v12695_v6 = vld [vmem:[%s18091_s7 + $0x60] ss:$8 sps:$4 sm:$0xff]  }
 0x544   : > { %v5198_v9 = vpop.permute.xlu1 %5197 }
 0x547   : > { %6731 = vmatmul.mubr.bf16.gmra.mrb[100].mxu0 %v5146_v49  ;;  %7424 = vmatmul.mubr.bf16.gmra.mrb[100].mxu1 %v5146_v49  ;;  %v12650_v49 = vld [vmem:[%s18091_s7 + $0x180] ss:$8 sps:$4 sm:$0xff]  }
 0x548   : > { %6740 = vmatprep.mubr.bf16.mxu0 %v5433_v29  ;;  %7431 = vmatprep.mubr.bf16.mxu1 %v5433_v29  ;;  %v5275_v29 = vsel %vm3282_vm2, %v16726_v48, %v5198_v9  ;;  %v12653_v48 = vld [vmem:[%s18091_s7 + $0x190] ss:$8 sps:$4 sm:$0xff]  }
 0x54f   : > { %6741 = vmatmul.mubr.bf16.gmra.mrb[104].mxu0 %v5147_v35  ;;  %7432 = vmatmul.mubr.bf16.gmra.mrb[104].mxu1 %v5147_v35  ;;  %v12668_v35 = vld [vmem:[%s18091_s7] ss:$8 sps:$4 sm:$0xff]  }
 0x550   : > { %6750 = vmatprep.mubr.bf16.mxu0 %v5437_v5  ;;  %7439 = vmatprep.mubr.bf16.mxu1 %v5437_v5  ;;  %v5206_v5 = vpop.permute.xlu1 %5205 }
 0x551   : > { %v16942_v23 = vsel %vm3282_vm2, %v16759_v61, %v5206_v5  ;;  %v12677_v61 = vld [vmem:[%s18091_s7 + $0x20] ss:$8 sps:$4 sm:$0xff]  }
 0x557   : > { %6751 = vmatmul.mubr.bf16.gmra.mrb[108].mxu0 %v5148_v25  ;;  %7440 = vmatmul.mubr.bf16.gmra.mrb[108].mxu1 %v5148_v25  ;;  %v12674_v25 = vld [vmem:[%s18091_s7 + $0x10] ss:$8 sps:$4 sm:$0xff]  }
 0x558   : > { %6760 = vmatprep.mubr.bf16.mxu0 %v5441_v52  ;;  %7447 = vmatprep.mubr.bf16.mxu1 %v5441_v52  ;;  %v5210_v52 = vpop.permute.xlu0 %5209 }
 0x55c   : > { %v5218_v55 = vpop.permute.xlu0 %5217 }
 0x55d   : > { %v16987_v37 = vsel %vm3282_vm2, %v16789_v44, %v5218_v55  ;;  %v12673_v44 = vld [vmem:[%s18091_s7 + $0x1e4] ss:$8 sps:$4 sm:$0xff]   ;;  %v12710_v55 = vld [vmem:[%s18091_s7 + $0x90] ss:$8 sps:$4 sm:$0xff]  }
 0x55f   : > { %6761 = vmatmul.mubr.bf16.gmra.mrb[112].mxu0 %v5149_v20  ;;  %7448 = vmatmul.mubr.bf16.gmra.mrb[112].mxu1 %v5149_v20  ;;  %v12656_v20 = vld [vmem:[%s18091_s7 + $0x1a0] ss:$8 sps:$4 sm:$0xff]  }
 0x560   : > { %6770 = vmatprep.mubr.bf16.mxu0 %v5445_v3  ;;  %7455 = vmatprep.mubr.bf16.mxu1 %v5445_v3  ;;  %v12661_v3 = vld [vmem:[%s18091_s7 + $0x1b4] ss:$8 sps:$4 sm:$0xff]  }
 0x567   : > { %6771 = vmatmul.mubr.bf16.gmra.mrb[116].mxu0 %v5150_v2  ;;  %7456 = vmatmul.mubr.bf16.gmra.mrb[116].mxu1 %v5150_v2  ;;  %v16949_v2 = vsel %vm3282_vm2, %v16771_v57, %v5210_v52  ;;  %v12659_v57 = vld [vmem:[%s18091_s7 + $0x1b0] ss:$8 sps:$4 sm:$0xff]  }
 0x568   : > { %6780 = vmatprep.mubr.bf16.mxu0 %v5449_v59  ;;  %7463 = vmatprep.mubr.bf16.mxu1 %v5449_v59  ;;  %v12664_v59 = vld [vmem:[%s18091_s7 + $0x1c4] ss:$8 sps:$4 sm:$0xff]  }
 0x56f   : > { %6781 = vmatmul.mubr.bf16.gmra.mrb[120].mxu0 %v5151_v15  ;;  %7464 = vmatmul.mubr.bf16.gmra.mrb[120].mxu1 %v5151_v15  ;;  %v5214_v15 = vpop.permute.xlu1 %5213 }
 0x570   : > { %6790 = vmatprep.mubr.bf16.mxu0 %v5453_v21  ;;  %7471 = vmatprep.mubr.bf16.mxu1 %v5453_v21  ;;  %v12662_v21 = vld [vmem:[%s18091_s7 + $0x1c0] ss:$8 sps:$4 sm:$0xff]   ;;  %v16977_v63 = vsel %vm3282_vm2, %v16783_v39, %v5214_v15  ;;  %v12665_v39 = vld [vmem:[%s18091_s7 + $0x1d0] ss:$8 sps:$4 sm:$0xff]  }
 0x577   : > { %6791 = vmatmul.mubr.bf16.gmra.mrb[124].mxu0 %v5152_v54  ;;  %7472 = vmatmul.mubr.bf16.gmra.mrb[124].mxu1 %v5152_v54  ;;  %v12685_v54 = vld [vmem:[%s18091_s7 + $0x34] ss:$8 sps:$4 sm:$0xff]  }
 0x578   : > { %6800 = vmatprep.mubr.bf16.mxu0 %v5457_v27  ;;  %7479 = vmatprep.mubr.bf16.mxu1 %v5457_v27  ;;  %v12667_v27 = vld [vmem:[%s18091_s7 + $0x1d4] ss:$8 sps:$4 sm:$0xff]  }
 0x57f   : > { %6801 = vmatmul.mubr.bf16.gmra.mrb[128].mxu0 %v5153_v53  ;;  %7480 = vmatmul.mubr.bf16.gmra.mrb[128].mxu1 %v5153_v53  ;;  %v12683_v53 = vld [vmem:[%s18091_s7 + $0x30] ss:$8 sps:$4 sm:$0xff]  }
 0x580   : > { %6810 = vmatprep.mubr.bf16.mxu0 %v5461_v10  ;;  %7487 = vmatprep.mubr.bf16.mxu1 %v5461_v10  ;;  %v5222_v10 = vpop.permute.xlu1 %5221 }
 0x581   : > { %v17012_v16 = vsel %vm3282_vm2, %v16795_v34, %v5222_v10  ;;  %v12692_v34 = vld [vmem:[%s18091_s7 + $0x50] ss:$8 sps:$4 sm:$0xff]   ;;  %v12713_v10 = vld [vmem:[%s18091_s7 + $0xa0] ss:$8 sps:$4 sm:$0xff]  }
 0x584   : > { %v5230_v40 = vpop.permute.xlu1 %5229 }
 0x585   : > { %v17052_v9 = vsel %vm3282_vm2, %v16807_v43, %v5230_v40  ;;  %v12698_v43 = vld [vmem:[%s18091_s7 + $0x210] ss:$8 sps:$4 sm:$0xff]  }
 0x587   : > { %6811 = vmatmul.mubr.bf16.gmra.mrb[132].mxu0 %v5154_v26  ;;  %7488 = vmatmul.mubr.bf16.gmra.mrb[132].mxu1 %v5154_v26  ;;  %v12686_v26 = vld [vmem:[%s18091_s7 + $0x40] ss:$8 sps:$4 sm:$0xff]  }
 0x588   : > { %6820 = vmatprep.mubr.bf16.mxu0 %v5465_v7  ;;  %7495 = vmatprep.mubr.bf16.mxu1 %v5465_v7  ;;  %v5226_v7 = vpop.permute.xlu0 %5225 }
 0x589   : > { %v17019_v32 = vsel %vm3282_vm2, %v16801_v11, %v5226_v7  ;;  %v12680_v11 = vld [vmem:[%s18091_s7 + $0x1f0] ss:$8 sps:$4 sm:$0xff]  }
 0x58f   : > { %6821 = vmatmul.mubr.bf16.gmra.mrb[136].mxu0 %v5155_v51  ;;  %7496 = vmatmul.mubr.bf16.gmra.mrb[136].mxu1 %v5155_v51  ;;  %v12671_v51 = vld [vmem:[%s18091_s7 + $0x1e0] ss:$8 sps:$4 sm:$0xff]  }
 0x590   : > { %6830 = vmatprep.mubr.bf16.mxu0 %v5469_v31  ;;  %7503 = vmatprep.mubr.bf16.mxu1 %v5469_v31  ;;  %v12682_v31 = vld [vmem:[%s18091_s7 + $0x1f4] ss:$8 sps:$4 sm:$0xff]  }
 0x597   : > { %6831 = vmatmul.mubr.bf16.gmra.mrb[140].mxu0 %v5156_v46  ;;  %7504 = vmatmul.mubr.bf16.gmra.mrb[140].mxu1 %v5156_v46  ;;  %v12694_v46 = vld [vmem:[%s18091_s7 + $0x54] ss:$8 sps:$4 sm:$0xff]  }
 0x598   : > { %11356 = vmatprep.mubr.msk.bf16.mxu1 %vm6268_vm4, %v5272_v50  ;;  %6873 = vmatprep.mubr.bf16.mxu0 %v19095_v17 }
 0x59f   : > { %10950 = vmatmul.mubr.msk.bf16.vlgmr.msra.gmra.mrb[56].mxu0 %vm6268_vm4, %v5272_v50  ;;  %11357 = vmatmul.mubr.msk.bf16.vlgmr.msra.gmra.mrb[144].mxu1 %vm6268_vm4, %v5273_v4 }
 0x5a0   : > { %11360 = vmatprep.mubr.msk.bf16.mxu1 %vm6268_vm4, %v5274_v8  ;;  %6883 = vmatprep.mubr.bf16.mxu0 %v19095_v17 }
 0x5a1   : > { %9006 = vmatpush1.bf16.msra.mxu0 %v12644_v13  ;;  %8251 = vmatpush1.bf16.msra.mxu1 %v12668_v35 }
 0x5a2   : > { %9007 = vmatprep.subr.bf16.mxu0 %v12649_v18  ;;  %8252 = vmatprep.subr.bf16.mxu1 %v12676_v38  ;;  %v12707_v38 = vld [vmem:[%s18091_s7 + $0x220] ss:$8 sps:$4 sm:$0xff]  }
 0x5a5   : > { %9008 = vmatpush1.bf16.msra.mxu0 %v12647_v42  ;;  %8253 = vmatpush1.bf16.msra.mxu1 %v12674_v25  ;;  %v12689_v42 = vld [vmem:[%s18091_s7 + $0x200] ss:$8 sps:$4 sm:$0xff]   ;;  %v12701_v25 = vld [vmem:[%s18091_s7 + $0x70] ss:$8 sps:$4 sm:$0xff]  }
 0x5a6   : > { %9009 = vmatprep.subr.bf16.mxu0 %v12652_v14  ;;  %8254 = vmatprep.subr.bf16.mxu1 %v12679_v56  ;;  %v12697_v14 = vld [vmem:[%s18091_s7 + $0x64] ss:$8 sps:$4 sm:$0xff]  }
 0x5a7   : > { %10951 = vmatmul.mubr.msk.bf16.gmra.mrb[60].mxu0 %vm6268_vm4, %v5273_v4  ;;  %11361 = vmatmul.mubr.msk.bf16.gmra.mrb[148].mxu1 %vm6268_vm4, %v5275_v29  ;;  %v5234_v4 = vpop.permute.xlu0 %5233 }
 0x5a8   : > { %11364 = vmatprep.mubr.msk.bf16.mxu1 %vm6268_vm4, %v16918_v58  ;;  %6893 = vmatprep.mubr.bf16.mxu0 %v19095_v17  ;;  %v17062_v36 = vsel %vm3282_vm2, %v16813_v0, %v5234_v4  ;;  %v5238_v0 = vpop.permute.xlu1 %5237  ;;  %v12725_v4 = vld [vmem:[%s18091_s7 + $0x240] ss:$8 sps:$4 sm:$0xff]  }
 0x5a9   : > { %9010 = vmatpush1.bf16.msra.mxu0 %v12650_v49  ;;  %8255 = vmatpush1.bf16.msra.mxu1 %v12677_v61  ;;  %v12700_v49 = vld [vmem:[%s18091_s7 + $0x214] ss:$8 sps:$4 sm:$0xff]   ;;  %v17083_v5 = vsel %vm3282_vm2, %v16819_v62, %v5238_v0  ;;  %v12706_v62 = vld [vmem:[%s18091_s7 + $0x84] ss:$8 sps:$4 sm:$0xff]  }
 0x5aa   : > { %9011 = vmatprep.subr.bf16.mxu0 %v12655_v60  ;;  %8256 = vmatprep.subr.bf16.mxu1 %v12685_v54 }
 0x5ab   : > { %v5242_v35 = vpop.permute.xlu0 %5241 }
 0x5ac   : > { %v17093_v52 = vsel %vm3282_vm2, %v16828_v41, %v5242_v35 }
 0x5ad   : > { %9012 = vmatpush1.bf16.msra.mxu0 %v12653_v48  ;;  %8257 = vmatpush1.bf16.msra.mxu1 %v12683_v53 }
 0x5ae   : > { %9013 = vmatprep.subr.bf16.mxu0 %v12658_v30  ;;  %8258 = vmatprep.subr.bf16.mxu1 %v12688_v12  ;;  %v12703_v30 = vld [vmem:[%s18091_s7 + $0x74] ss:$8 sps:$4 sm:$0xff]  }
 0x5af   : > { %10952 = vmatmul.mubr.msk.bf16.gmra.mrb[64].mxu0 %vm6268_vm4, %v5274_v8  ;;  %11365 = vmatmul.mubr.msk.bf16.gmra.mrb[152].mxu1 %vm6268_vm4, %v16942_v23  ;;  %v5250_v61 = vpop.permute.xlu0 %5249  ;;  %v12718_v12 = vld [vmem:[%s18091_s7 + $0x234] ss:$8 sps:$4 sm:$0xff]  }
 0x5b0   : > { %11368 = vmatprep.mubr.msk.bf16.mxu1 %vm6268_vm4, %v16949_v2  ;;  %6903 = vmatprep.mubr.bf16.mxu0 %v19095_v17 }
 0x5b1   : > { %9014 = vmatpush1.bf16.msra.mxu0 %v12656_v20  ;;  %8259 = vmatpush1.bf16.msra.mxu1 %v12686_v26  ;;  %v12709_v20 = vld [vmem:[%s18091_s7 + $0x224] ss:$8 sps:$4 sm:$0xff]   ;;  %v12716_v26 = vld [vmem:[%s18091_s7 + $0x230] ss:$8 sps:$4 sm:$0xff]  }
 0x5b2   : > { %9015 = vmatprep.subr.bf16.mxu0 %v12661_v3  ;;  %8260 = vmatprep.subr.bf16.mxu1 %v12694_v46  ;;  %v5246_v3 = vpop.permute.xlu1 %5245 }
 0x5b3   : > { %v17120_v15 = vsel %vm3282_vm2, %v16834_v22, %v5246_v3  ;;  %v5258_v53 = vpop.permute.xlu0 %5257 }
 0x5b4   : > { %v17158_v7 = vsel %vm3282_vm2, %v16852_v28, %v5258_v53 }
 0x5b5   : > { %9016 = vmatpush1.bf16.msra.mxu0 %v12659_v57  ;;  %8261 = vmatpush1.bf16.msra.mxu1 %v12692_v34 }
 0x5b6   : > { %9017 = vmatprep.subr.bf16.mxu0 %v12664_v59  ;;  %8262 = vmatprep.subr.bf16.mxu1 %v12697_v14  ;;  %v12712_v59 = vld [vmem:[%s18091_s7 + $0x94] ss:$8 sps:$4 sm:$0xff]   ;;  %v5254_v54 = vpop.permute.xlu1 %5253 }
 0x5b7   : > { %10953 = vmatmul.mubr.msk.bf16.gmra.mrb[68].mxu0 %vm6268_vm4, %v5275_v29  ;;  %11369 = vmatmul.mubr.msk.bf16.gmra.mrb[156].mxu1 %vm6268_vm4, %v16977_v63  ;;  %v5266_v34 = vpop.permute.xlu0 %5265 }
 0x5b8   : > { %11372 = vmatprep.mubr.msk.bf16.mxu1 %vm6268_vm4, %v16987_v37  ;;  %6913 = vmatprep.mubr.bf16.mxu0 %v19095_v17 }
 0x5b9   : > { %9018 = vmatpush1.bf16.msra.mxu0 %v12662_v21  ;;  %8263 = vmatpush1.bf16.msra.mxu1 %v12695_v6  ;;  %v17127_v21 = vsel %vm3282_vm2, %v16840_v1, %v5250_v61 }
 0x5ba   : > { %9019 = vmatprep.subr.bf16.mxu0 %v12667_v27  ;;  %8264 = vmatprep.subr.bf16.mxu1 %v12703_v30 }
 0x5bd   : > { %9020 = vmatpush1.bf16.msra.mxu0 %v12665_v39  ;;  %8265 = vmatpush1.bf16.msra.mxu1 %v12701_v25  ;;  %v12734_v25 = vld [vmem:[%s18091_s7 + $0x250] ss:$8 sps:$4 sm:$0xff]  }
 0x5be   : > { %9021 = vmatprep.subr.bf16.mxu0 %v12673_v44  ;;  %8266 = vmatprep.subr.bf16.mxu1 %v12706_v62  ;;  %v17145_v44 = vsel %vm3282_vm2, %v16846_v24, %v5254_v54 }
 0x5bf   : > { %10954 = vmatmul.mubr.msk.bf16.gmra.mrb[72].mxu0 %vm6268_vm4, %v16918_v58  ;;  %11373 = vmatmul.mubr.msk.bf16.gmra.mrb[160].mxu1 %vm6268_vm4, %v17012_v16 }
 0x5c0   : > { %11376 = vmatprep.mubr.msk.bf16.mxu1 %vm6268_vm4, %v17019_v32  ;;  %6923 = vmatprep.mubr.bf16.mxu0 %v19095_v17 }
 0x5c1   : > { %9022 = vmatpush1.bf16.msra.mxu0 %v12671_v51  ;;  %v5262_v51 = vpop.permute.xlu1 %5261 }
 0x5c2   : > { %v17037_v50 = vpop.f32.mrb[56].mxu1  ;;  %9023 = vmatprep.subr.bf16.mxu0 %v12682_v31  ;;  %v12721_v31 = vld [vmem:[%s18091_s7 + $0xb4] ss:$8 sps:$4 sm:$0xff]   ;;  %v17182_v40 = vsel %vm3282_vm2, %v16858_v19, %v5262_v51 }
 0x5c3   : > { %v7339_v13 = vpop.f32.mrb[57].mxu1 }
 0x5c4   : > { %v17042_v18 = vpop.f32.mrb[58].mxu1  ;;  %v12722_v13 = vld [vmem:[%s18091_s7 + $0xc0] ss:$8 sps:$4 sm:$0xff]  }
 0x5c5   : > { %v7342_v8 = vpop.f32.mrb[59].mxu1  ;;  %9024 = vmatpush1.bf16.msra.mxu0 %v12680_v11  ;;  %v5270_v14 = vpop.permute.xlu1 %5269 }
 0x5c6   : > { %9025 = vmatprep.subr.bf16.mxu0 %v12691_v33  ;;  %v12724_v33 = vld [vmem:[%s18091_s7 + $0xc4] ss:$8 sps:$4 sm:$0xff]   ;;  %v17216_v0 = vsel %vm3282_vm2, %v16870_v47, %v5270_v14  ;;  %v12731_v47 = vld [vmem:[%s18091_s7 + $0xe0] ss:$8 sps:$4 sm:$0xff]  }
 0x5c7   : > { %10955 = vmatmul.mubr.msk.bf16.gmra.mrb[76].mxu0 %vm6268_vm4, %v16942_v23  ;;  %11377 = vmatmul.mubr.msk.bf16.gmra.mrb[164].mxu1 %vm6268_vm4, %v17052_v9  ;;  %v12704_v23 = vld [vmem:[%s18091_s7 + $0x80] ss:$8 sps:$4 sm:$0xff]   ;;  %v12727_v8 = vld [vmem:[%s18091_s7 + $0x244] ss:$8 sps:$4 sm:$0xff]  }
 0x5c8   : > { %11380 = vmatprep.mubr.msk.bf16.mxu1 %vm6268_vm4, %v17062_v36  ;;  %6933 = vmatprep.mubr.bf16.mxu0 %v19095_v17 }
 0x5c9   : > { %9026 = vmatpush1.bf16.msra.mxu0 %v12689_v42  ;;  %8267 = vmatpush1.bf16.msra.mxu1 %v12704_v23  ;;  %v17195_v42 = vsel %vm3282_vm2, %v16864_v45, %v5266_v34  ;;  %v12739_v23 = vld [vmem:[%s18091_s7 + $0xf4] ss:$8 sps:$4 sm:$0xff]  }
 0x5ca   : > { %v17074_v29 = vpop.f32.mrb[60].mxu1  ;;  %9027 = vmatprep.subr.bf16.mxu0 %v12700_v49  ;;  %8268 = vmatprep.subr.bf16.mxu1 %v12712_v59 }
 0x5cb   : > { %v7347_v60 = vpop.f32.mrb[61].mxu1 }
 0x5cc   : > { %v17076_v58 = vpop.f32.mrb[62].mxu1 }
 0x5cd   : > { %v7350_v48 = vpop.f32.mrb[63].mxu1  ;;  %9028 = vmatpush1.bf16.msra.mxu0 %v12698_v43  ;;  %8269 = vmatpush1.bf16.msra.mxu1 %v12710_v55  ;;  %v12730_v43 = vld [vmem:[%s18091_s7 + $0xd4] ss:$8 sps:$4 sm:$0xff]   ;;  %v12745_v55 = vld [vmem:[%s18091_s7 + $0x264] ss:$8 sps:$4 sm:$0xff]  }
 0x5ce   : > { %9029 = vmatprep.subr.bf16.mxu0 %v12709_v20  ;;  %v12737_v20 = vld [vmem:[%s18091_s7 + $0xf0] ss:$8 sps:$4 sm:$0xff]  }
 0x5cf   : > { %10956 = vmatmul.mubr.msk.bf16.gmra.mrb[80].mxu0 %vm6268_vm4, %v16949_v2  ;;  %11381 = vmatmul.mubr.msk.bf16.gmra.mrb[168].mxu1 %vm6268_vm4, %v17083_v5 }
 0x5d0   : > { %11384 = vmatprep.mubr.msk.bf16.mxu1 %vm6268_vm4, %v17093_v52  ;;  %6943 = vmatprep.mubr.bf16.mxu0 %v19095_v17 }
 0x5d1   : > { %9030 = vmatpush1.bf16.msra.mxu0 %v12707_v38  ;;  %v12736_v38 = vld [vmem:[%s18091_s7 + $0x254] ss:$8 sps:$4 sm:$0xff]  }
 0x5d2   : > { %v17108_v41 = vpop.f32.mrb[64].mxu1  ;;  %9031 = vmatprep.subr.bf16.mxu0 %v12718_v12 }
 0x5d3   : > { %v7355_v2 = vpop.f32.mrb[65].mxu1 }
 0x5d4   : > { %v17113_v56 = vpop.f32.mrb[66].mxu1 }
 0x5d5   : > { %v7358_v57 = vpop.f32.mrb[67].mxu1  ;;  %9032 = vmatpush1.bf16.msra.mxu0 %v12716_v26 }
 0x5d6   : > { %9033 = vmatprep.subr.bf16.mxu0 %v12727_v8  ;;  %v12742_v57 = vld [vmem:[%s18091_s7 + $0x104] ss:$8 sps:$4 sm:$0xff]  }
 0x5d7   : > { %10957 = vmatmul.mubr.msk.bf16.gmra.mrb[84].mxu0 %vm6268_vm4, %v16977_v63  ;;  %11385 = vmatmul.mubr.msk.bf16.gmra.mrb[172].mxu1 %vm6268_vm4, %v17120_v15  ;;  %v12715_v63 = vld [vmem:[%s18091_s7 + $0xa4] ss:$8 sps:$4 sm:$0xff]  }
 0x5d8   : > { %11388 = vmatprep.mubr.msk.bf16.mxu1 %vm6268_vm4, %v17127_v21  ;;  %6953 = vmatprep.mubr.bf16.mxu0 %v19095_v17 }
 0x5d9   : > { %8270 = vmatprep.subr.bf16.mxu1 %v12715_v63  ;;  %9034 = vmatpush1.bf16.msra.mxu0 %v12725_v4 }
 0x5da   : > { %v17136_v22 = vpop.f32.mrb[68].mxu1  ;;  %8271 = vmatpush1.bf16.msra.mxu1 %v12713_v10  ;;  %9035 = vmatprep.subr.bf16.mxu0 %v12736_v38 }
 0x5db   : > { %v7363_v27 = vpop.f32.mrb[69].mxu1  ;;  %8272 = vmatprep.subr.bf16.mxu1 %v12721_v31 }
 0x5dc   : > { %v17138_v1 = vpop.f32.mrb[70].mxu1 }
 0x5dd   : > { %v7366_v39 = vpop.f32.mrb[71].mxu1  ;;  %9036 = vmatpush1.bf16.msra.mxu0 %v12734_v25 }
 0x5de   : > { %9250 = vmatprep.subr.bf16.mxu0 %v12745_v55 }
 0x5df   : > { %10958 = vmatmul.mubr.msk.bf16.gmra.mrb[88].mxu0 %vm6268_vm4, %v16987_v37  ;;  %11389 = vmatmul.mubr.msk.bf16.gmra.mrb[176].mxu1 %vm6268_vm4, %v17145_v44  ;;  %v12719_v37 = vld [vmem:[%s18091_s7 + $0xb0] ss:$8 sps:$4 sm:$0xff]  }
 0x5e0   : > { %11392 = vmatprep.mubr.msk.bf16.mxu1 %vm6268_vm4, %v17158_v7  ;;  %6963 = vmatprep.mubr.bf16.mxu0 %v19095_v17 }
 0x5e1   : > { %8273 = vmatpush1.bf16.msra.mxu1 %v12719_v37 }
 0x5e2   : > { %v17167_v24 = vpop.f32.mrb[72].mxu1  ;;  %8274 = vmatprep.subr.bf16.mxu1 %v12724_v33 }
 0x5e3   : > { %v7371_v28 = vpop.f32.mrb[73].mxu1 }
 0x5e4   : > { %v17175_v46 = vpop.f32.mrb[74].mxu1 }
 0x5e5   : > { %v7374_v11 = vpop.f32.mrb[75].mxu1  ;;  %8275 = vmatpush1.bf16.msra.mxu1 %v12722_v13 }
 0x5e6   : > { %8276 = vmatprep.subr.bf16.mxu1 %v12730_v43 }
 0x5e7   : > { %10959 = vmatmul.mubr.msk.bf16.gmra.mrb[92].mxu0 %vm6268_vm4, %v17012_v16  ;;  %11393 = vmatmul.mubr.msk.bf16.gmra.mrb[180].mxu1 %vm6268_vm4, %v17182_v40  ;;  %v12728_v16 = vld [vmem:[%s18091_s7 + $0xd0] ss:$8 sps:$4 sm:$0xff]  }
 0x5e8   : > { %11396 = vmatprep.mubr.msk.bf16.mxu1 %vm6268_vm4, %v17195_v42  ;;  %6973 = vmatprep.mubr.bf16.mxu0 %v19095_v17 }
 0x5e9   : > { %8277 = vmatpush1.bf16.msra.mxu1 %v12728_v16 }
 0x5ea   : > { %v17204_v19 = vpop.f32.mrb[76].mxu1 }
 0x5eb   : > { %v7379_v45 = vpop.f32.mrb[77].mxu1 }
 0x5ec   : > { %v17206_v6 = vpop.f32.mrb[78].mxu1 }
 0x5ed   : > { %v7382_v49 = vpop.f32.mrb[79].mxu1 }
 0x5ef   : > { %10960 = vmatmul.mubr.msk.bf16.gmra.mrb[96].mxu0 %vm6268_vm4, %v17019_v32  ;;  %11397 = vmatmul.mubr.msk.bf16.gmra.mrb[184].mxu1 %vm6268_vm4, %v17216_v0  ;;  %v12733_v32 = vld [vmem:[%s18091_s7 + $0xe4] ss:$8 sps:$4 sm:$0xff]  }
 0x5f0   : > { %6983 = vmatprep.mubr.bf16.mxu0 %v19095_v17  ;;  %8278 = vmatprep.subr.bf16.mxu1 %v12733_v32 }
 0x5f1   : > { %8279 = vmatpush1.bf16.msra.mxu1 %v12731_v47 }
 0x5f2   : > { %v17223_v60 = vpop.f32.mrb[80].mxu1  ;;  %8280 = vmatprep.subr.bf16.mxu1 %v12739_v23 }
 0x5f3   : > { %v7387_v35 = vpop.f32.mrb[81].mxu1 }
 0x5f4   : > { %v17225_v48 = vpop.f32.mrb[82].mxu1 }
 0x5f5   : > { %v7390_v30 = vpop.f32.mrb[83].mxu1  ;;  %8281 = vmatpush1.bf16.msra.mxu1 %v12737_v20 }
 0x5f6   : > { %8495 = vmatprep.subr.bf16.mxu1 %v12742_v57 }
 0x5f7   : > { %10961 = vmatmul.mubr.msk.bf16.gmra.mrb[100].mxu0 %vm6268_vm4, %v17052_v9 }
 0x5f8   : > { %6993 = vmatprep.mubr.bf16.mxu0 %v19095_v17 }
 0x5fa   : > { %v17242_v62 = vpop.f32.mrb[84].mxu1 }
 0x5fb   : > { %v7395_v3 = vpop.f32.mrb[85].mxu1 }
 0x5fc   : > { %v17250_v2 = vpop.f32.mrb[86].mxu1 }
 0x5fd   : > { %v7398_v9 = vpop.f32.mrb[87].mxu1 }
 0x5ff   : > { %10962 = vmatmul.mubr.msk.bf16.gmra.mrb[104].mxu0 %vm6268_vm4, %v17062_v36 }
 0x600   : > { %7003 = vmatprep.mubr.bf16.mxu0 %v19095_v17 }
 0x602   : > { %v17255_v61 = vpop.f32.mrb[88].mxu1 }
 0x603   : > { %v7403_v59 = vpop.f32.mrb[89].mxu1 }
 0x604   : > { %v17263_v54 = vpop.f32.mrb[90].mxu1 }
 0x605   : > { %v7406_v27 = vpop.f32.mrb[91].mxu1 }
 0x607   : > { %10963 = vmatmul.mubr.msk.bf16.gmra.mrb[108].mxu0 %vm6268_vm4, %v17083_v5 }
 0x608   : > { %7013 = vmatprep.mubr.bf16.mxu0 %v19095_v17 }
 0x60a   : > { %v17268_v36 = vpop.f32.mrb[92].mxu1 }
 0x60b   : > { %v7411_v53 = vpop.f32.mrb[93].mxu1 }
 0x60c   : > { %v17270_v39 = vpop.f32.mrb[94].mxu1 }
 0x60d   : > { %v7414_v63 = vpop.f32.mrb[95].mxu1 }
 0x60f   : > { %10964 = vmatmul.mubr.msk.bf16.gmra.mrb[112].mxu0 %vm6268_vm4, %v17093_v52 }
 0x610   : > { %7023 = vmatprep.mubr.bf16.mxu0 %v19095_v17 }
 0x612   : > { %v17275_v10 = vpop.f32.mrb[96].mxu1 }
 0x613   : > { %v7419_v26 = vpop.f32.mrb[97].mxu1 }
 0x614   : > { %v17277_v12 = vpop.f32.mrb[98].mxu1 }
 0x615   : > { %v7422_v51 = vpop.f32.mrb[99].mxu1 }
 0x617   : > { %10965 = vmatmul.mubr.msk.bf16.gmra.mrb[116].mxu0 %vm6268_vm4, %v17120_v15 }
 0x618   : > { %7033 = vmatprep.mubr.bf16.mxu0 %v19095_v17 }
 0x61a   : > { %v17282_v5 = vpop.f32.mrb[100].mxu1 }
 0x61b   : > { %v7427_v28 = vpop.f32.mrb[101].mxu1 }
 0x61c   : > { %v17284_v37 = vpop.f32.mrb[102].mxu1  ;;  %v5627_v28 = vld [vmem:[%s18090_s6] sm:$0x7] }
 0x61d   : > { %v7430_v31 = vpop.f32.mrb[103].mxu1 }
 0x61f   : > { %10966 = vmatmul.mubr.msk.bf16.gmra.mrb[120].mxu0 %vm6268_vm4, %v17127_v21 }
 0x620   : > { %7043 = vmatprep.mubr.bf16.mxu0 %v19095_v17 }
 0x622   : > { %v17289_v52 = vpop.f32.mrb[104].mxu1 }
 0x623   : > { %v7435_v34 = vpop.f32.mrb[105].mxu1 }
 0x624   : > { %v17291_v11 = vpop.f32.mrb[106].mxu1 }
 0x625   : > { %v7438_v33 = vpop.f32.mrb[107].mxu1 }
 0x627   : > { %10967 = vmatmul.mubr.msk.bf16.gmra.mrb[124].mxu0 %vm6268_vm4, %v17145_v44 }
 0x628   : > { %7053 = vmatprep.mubr.bf16.mxu0 %v19095_v17 }
 0x62a   : > { %v17296_v15 = vpop.f32.mrb[108].mxu1 }
 0x62b   : > { %v7443_v13 = vpop.f32.mrb[109].mxu1 }
 0x62c   : > { %v17298_v4 = vpop.f32.mrb[110].mxu1  ;;  %v19102_v13 = vld [vmem:[#allocation2_spill] sm:$0xff] }
 0x62d   : > { %v7446_v8 = vpop.f32.mrb[111].mxu1 }
 0x62e   : > { %v19103_v8 = vsub.s32 2, %v19102_v13 }
 0x62f   : > { %10968 = vmatmul.mubr.msk.bf16.gmra.mrb[128].mxu0 %vm6268_vm4, %v17158_v7 }
 0x630   : > { %7063 = vmatprep.mubr.bf16.mxu0 %v19095_v17 }
 0x632   : > { %v17303_v21 = vpop.f32.mrb[112].mxu1 }
 0x633   : > { %v7451_v14 = vpop.f32.mrb[113].mxu1 }
 0x634   : > { %v17305_v45 = vpop.f32.mrb[114].mxu1  ;;  %v17348_v14 = vrot.slane %v5627_v28, %v19103_v8 }
 0x635   : > { %v7454_v49 = vpop.f32.mrb[115].mxu1 }
 0x636   : > { %v19104_v49 = vsub.s32 0, %v19102_v13 }
 0x637   : > { %10969 = vmatmul.mubr.msk.bf16.gmra.mrb[132].mxu0 %vm6268_vm4, %v17182_v40 }
 0x638   : > { %7073 = vmatprep.mubr.bf16.mxu0 %v19095_v17 }
 0x63a   : > { %v17310_v44 = vpop.f32.mrb[116].mxu1 }
 0x63b   : > { %v7459_v16 = vpop.f32.mrb[117].mxu1 }
 0x63c   : > { %v17312_v43 = vpop.f32.mrb[118].mxu1  ;;  %v17352_v16 = vrot.slane %v5627_v28, %v19104_v49 }
 0x63d   : > { %v7462_v35 = vpop.f32.mrb[119].mxu1 }
 0x63e   : > { %v19105_v35 = vsub.s32 1, %v19102_v13 }
 0x63f   : > { %10970 = vmatmul.mubr.msk.bf16.gmra.mrb[136].mxu0 %vm6268_vm4, %v17195_v42 }
 0x640   : > { %7083 = vmatprep.mubr.bf16.mxu0 %v19095_v17 }
 0x642   : > { %v17317_v7 = vpop.f32.mrb[120].mxu1 }
 0x643   : > { %v7467_v30 = vpop.f32.mrb[121].mxu1 }
 0x644   : > { %v17319_v47 = vpop.f32.mrb[122].mxu1  ;;  %v17356_v30 = vrot.slane %v5627_v28, %v19105_v35  ;;  %v11497_v28 = vadd.f32 %v17042_v18, %v17348_v14 }
 0x645   : > { %v7470_v32 = vpop.f32.mrb[123].mxu1 }
 0x646   : > { %v11498_v32 = vadd.f32 %v17074_v29, %v17348_v14 }
 0x647   : > { %10971 = vmatmul.mubr.msk.bf16.gmra.mrb[140].mxu0 %vm6268_vm4, %v17216_v0 }
 0x64a   : > { %v17323_v40 = vpop.f32.mrb[124].mxu1 }
 0x64b   : > { %v7475_v25 = vpop.f32.mrb[125].mxu1 }
 0x64c   : > { %v17325_v38 = vpop.f32.mrb[126].mxu1  ;;  %v11496_v25 = vadd.f32 %v17037_v50, %v17348_v14 }
 0x64d   : > { %v7478_v20 = vpop.f32.mrb[127].mxu1 }
 0x652   : > { %v17327_v23 = vpop.f32.mrb[128].mxu1 }
 0x653   : > { %v7483_v42 = vpop.f32.mrb[129].mxu1 }
 0x654   : > { %v17329_v3 = vpop.f32.mrb[130].mxu1 }
 0x655   : > { %v7486_v9 = vpop.f32.mrb[131].mxu1 }
 0x656   : > { %v11499_v9 = vadd.f32 %v17076_v58, %v17348_v14 }
 0x65a   : > { %v17331_v57 = vpop.f32.mrb[132].mxu1 }
 0x65b   : > { %v7491_v59 = vpop.f32.mrb[133].mxu1 }
 0x65c   : > { %v17333_v55 = vpop.f32.mrb[134].mxu1 }
 0x65d   : > { %v7494_v27 = vpop.f32.mrb[135].mxu1 }
 0x662   : > { %v17335_v53 = vpop.f32.mrb[136].mxu1 }
 0x663   : > { %19098 = vst [vmem:[#allocation130_spill] sm:$0xff] %v17335_v53  ;;  %v7499_v0 = vpop.f32.mrb[137].mxu1 }
 0x664   : > { %v17337_v63 = vpop.f32.mrb[138].mxu1 }
 0x665   : > { %19099 = vst [vmem:[#allocation128_spill] sm:$0xff] %v17337_v63  ;;  %v7502_v26 = vpop.f32.mrb[139].mxu1 }
 0x66a   : > { %v17339_v51 = vpop.f32.mrb[140].mxu1 }
 0x66b   : > { %19100 = vst [vmem:[#allocation134_spill] sm:$0xff] %v17339_v51  ;;  %v7507_v31 = vpop.f32.mrb[141].mxu1 }
 0x66c   : > { %v17344_v34 = vpop.f32.mrb[142].mxu1 }
 0x66d   : > { %19101 = vst [vmem:[#allocation129_spill] sm:$0xff] %v17344_v34  ;;  %v7510_v33 = vpop.f32.mrb[143].mxu1 }
 0x672   : > { %v6875_v20 = vpop.f32.mrb[56].mxu0  ;;  %v11358_v42 = vpop.f32.mrb[144].mxu1 }
 0x673   : > { %v11408_v59 = vadd.f32 %v6875_v20, %v17352_v16  ;;  %v7555_v27 = vadd.f32 %v11498_v32, %v11358_v42  ;;  %v6877_v0 = vpop.f32.mrb[57].mxu0  ;;  %v7546_v26 = vpop.f32.mrb[145].mxu1 }
 0x674   : > { %v11409_v31 = vadd.f32 %v6877_v0, %v17356_v30  ;;  %v7547_v33 = vadd.f32 %v11496_v25, %v7546_v26  ;;  %v6879_v29 = vpop.f32.mrb[58].mxu0  ;;  %v11359_v13 = vpop.f32.mrb[146].mxu1  ;;  %v11502_v25 = vadd.f32 %v17136_v22, %v17348_v14  ;;  %v11503_v22 = vadd.f32 %v17138_v1, %v17348_v14 }
 0x675   : > { %v11410_v50 = vadd.f32 %v6879_v29, %v17352_v16  ;;  %v7558_v8 = vadd.f32 %v11499_v9, %v11359_v13  ;;  %v6881_v49 = vpop.f32.mrb[59].mxu0  ;;  %v7549_v35 = vpop.f32.mrb[147].mxu1  ;;  %v7721_v20 = vmax.f32 %v11408_v59, 0.0  ;;  %v7729_v32 = vmax.f32 %v7555_v27, 0.0 }
 0x676   : > { %v11411_v58 = vadd.f32 %v6881_v49, %v17356_v30  ;;  %v7550_v17 = vadd.f32 %v11497_v28, %v7549_v35  ;;  %v7722_v34 = vmax.f32 %v11409_v31, 0.0  ;;  %v7723_v53 = vmax.f32 %v7547_v33, 0.0  ;;  %v12740_v28 = vld [vmem:[%s18091_s7 + $0x100] ss:$8 sps:$4 sm:$0xff]  }
 0x677   : > { %v7724_v42 = vmax.f32 %v11410_v50, 0.0  ;;  %v7732_v63 = vmax.f32 %v7558_v8, 0.0  ;;  %v11500_v9 = vadd.f32 %v17108_v41, %v17348_v14  ;;  %v11501_v33 = vadd.f32 %v17113_v56, %v17348_v14  ;;  %v12746_v56 = vld [vmem:[%s18091_s7 + $0x110] ss:$8 sps:$4 sm:$0xff]  }
 0x678   : > { %v7725_v18 = vmax.f32 %v11411_v58, 0.0  ;;  %v7726_v51 = vmax.f32 %v7550_v17, 0.0  ;;  %v12743_v17 = vld [vmem:[%s18091_s7 + $0x260] ss:$8 sps:$4 sm:$0xff]  }
 0x679   : > { %v7853_v0 = vpack.c.bf16 %v7724_v42, %v7721_v20  ;;  %v17372_v26 = vpack.c.bf16 %v7732_v63, %v7729_v32 }
 0x67a   : > { %v7854_v29 = vpack.c.bf16 %v7725_v18, %v7722_v34  ;;  %v17376_v13 = vpack.c.bf16 %v7726_v51, %v7723_v53  ;;  %v6885_v59 = vpop.f32.mrb[60].mxu0  ;;  %v11362_v27 = vpop.f32.mrb[148].mxu1  ;;  %v12748_v53 = vld [vmem:[%s18091_s7 + $0x114] ss:$8 sps:$4 sm:$0xff]  }
 0x67b   : > { %v11412_v63 = vadd.f32 %v6885_v59, %v17352_v16  ;;  %v7571_v31 = vadd.f32 %v11502_v25, %v11362_v27  ;;  %v6887_v41 = vpop.f32.mrb[61].mxu0  ;;  %v7562_v34 = vpop.f32.mrb[149].mxu1  ;;  %v12751_v51 = vld [vmem:[%s18091_s7 + $0x274] ss:$8 sps:$4 sm:$0xff]   ;;  %v12749_v25 = vld [vmem:[%s18091_s7 + $0x270] ss:$8 sps:$4 sm:$0xff]  }
 0x67c   : > { %v11413_v50 = vadd.f32 %v6887_v41, %v17356_v30  ;;  %v7563_v8 = vadd.f32 %v11500_v9, %v7562_v34  ;;  %v6889_v1 = vpop.f32.mrb[62].mxu0  ;;  %v11363_v49 = vpop.f32.mrb[150].mxu1  ;;  %8282 = vmatprep.mubr.bf16.mxu1 %v7854_v29  ;;  %9037 = vmatprep.mubr.bf16.mxu0 %v7854_v29  ;;  %v12754_v9 = vld [vmem:[%s18091_s7 + $0x124] ss:$8 sps:$4 sm:$0xff]  }
 0x67d   : > { %v11414_v35 = vadd.f32 %v6889_v1, %v17352_v16  ;;  %v7574_v58 = vadd.f32 %v11503_v22, %v11363_v49  ;;  %v6891_v20 = vpop.f32.mrb[63].mxu0  ;;  %v7565_v32 = vpop.f32.mrb[151].mxu1  ;;  %8283 = vmatmul.mubr.bf16.vlgmr.msra.gmra.mrb[188].mxu1 %v7853_v0  ;;  %9038 = vmatmul.mubr.bf16.vlgmr.msra.gmra.mrb[144].mxu0 %v7853_v0  ;;  %v7727_v29 = vmax.f32 %v11412_v63, 0.0  ;;  %v7741_v59 = vmax.f32 %v7571_v31, 0.0 }
 0x67e   : > { %v11415_v42 = vadd.f32 %v6891_v20, %v17356_v30  ;;  %v7566_v18 = vadd.f32 %v11501_v33, %v7565_v32  ;;  %8496 = vmatpush1.bf16.msra.mxu1 %v12740_v28  ;;  %9251 = vmatpush1.bf16.msra.mxu0 %v12743_v17  ;;  %v12757_v28 = vld [vmem:[%s18091_s7 + $0x284] ss:$8 sps:$4 sm:$0xff]   ;;  %v7728_v17 = vmax.f32 %v11413_v50, 0.0  ;;  %v7735_v22 = vmax.f32 %v7563_v8, 0.0  ;;  %v12752_v50 = vld [vmem:[%s18091_s7 + $0x120] ss:$8 sps:$4 sm:$0xff]  }
 0x67f   : > { %v7730_v0 = vmax.f32 %v11414_v35, 0.0  ;;  %v7744_v27 = vmax.f32 %v7574_v58, 0.0  ;;  %8497 = vmatprep.subr.bf16.mxu1 %v12748_v53  ;;  %9252 = vmatprep.subr.bf16.mxu0 %v12751_v51  ;;  %v11506_v33 = vadd.f32 %v17204_v19, %v17348_v14  ;;  %v11504_v63 = vadd.f32 %v17167_v24, %v17348_v14  ;;  %v12755_v19 = vld [vmem:[%s18091_s7 + $0x280] ss:$8 sps:$4 sm:$0xff]  }
 0x680   : > { %v7731_v41 = vmax.f32 %v11415_v42, 0.0  ;;  %v7738_v34 = vmax.f32 %v7566_v18, 0.0  ;;  %v11507_v8 = vadd.f32 %v17206_v6, %v17348_v14  ;;  %v12760_v42 = vld [vmem:[%s18091_s7 + $0x134] ss:$8 sps:$4 sm:$0xff]  }
 0x681   : > { %v7856_v1 = vpack.c.bf16 %v7730_v0, %v7727_v29  ;;  %v17412_v49 = vpack.c.bf16 %v7744_v27, %v7741_v59  ;;  %v12763_v18 = vld [vmem:[%s18091_s7 + $0x294] ss:$8 sps:$4 sm:$0xff]  }
 0x682   : > { %v7857_v31 = vpack.c.bf16 %v7731_v41, %v7728_v17  ;;  %v17416_v53 = vpack.c.bf16 %v7738_v34, %v7735_v22  ;;  %v6895_v51 = vpop.f32.mrb[64].mxu0  ;;  %v11366_v35 = vpop.f32.mrb[152].mxu1  ;;  %8498 = vmatpush1.bf16.msra.mxu1 %v12746_v56  ;;  %9253 = vmatpush1.bf16.msra.mxu0 %v12749_v25  ;;  %v11505_v56 = vadd.f32 %v17175_v46, %v17348_v14  ;;  %v12758_v46 = vld [vmem:[%s18091_s7 + $0x130] ss:$8 sps:$4 sm:$0xff]   ;;  %v12766_v34 = vld [vmem:[%s18091_s7 + $0x144] ss:$8 sps:$4 sm:$0xff]  }
 0x683   : > { %v11416_v24 = vadd.f32 %v6895_v51, %v17352_v16  ;;  %v7587_v58 = vadd.f32 %v11506_v33, %v11366_v35  ;;  %v6897_v20 = vpop.f32.mrb[65].mxu0  ;;  %v7578_v32 = vpop.f32.mrb[153].mxu1  ;;  %8499 = vmatprep.subr.bf16.mxu1 %v12754_v9  ;;  %9254 = vmatprep.subr.bf16.mxu0 %v12757_v28  ;;  %v12761_v41 = vld [vmem:[%s18091_s7 + $0x290] ss:$8 sps:$4 sm:$0xff]   ;;  %v12769_v51 = vld [vmem:[%s18091_s7 + $0x2a4] ss:$8 sps:$4 sm:$0xff]  }
 0x684   : > { %v11417_v6 = vadd.f32 %v6897_v20, %v17356_v30  ;;  %v7579_v25 = vadd.f32 %v11504_v63, %v7578_v32  ;;  %v6899_v29 = vpop.f32.mrb[66].mxu0  ;;  %v11367_v59 = vpop.f32.mrb[154].mxu1  ;;  %8292 = vmatprep.mubr.bf16.mxu1 %v7857_v31  ;;  %9047 = vmatprep.mubr.bf16.mxu0 %v7857_v31  ;;  %v11510_v20 = vadd.f32 %v17242_v62, %v17348_v14  ;;  %v12767_v62 = vld [vmem:[%s18091_s7 + $0x2a0] ss:$8 sps:$4 sm:$0xff]  }
 0x685   : > { %v11418_v9 = vadd.f32 %v6899_v29, %v17352_v16  ;;  %v7590_v0 = vadd.f32 %v11507_v8, %v11367_v59  ;;  %v6901_v27 = vpop.f32.mrb[67].mxu0  ;;  %v7581_v28 = vpop.f32.mrb[155].mxu1  ;;  %8293 = vmatmul.mubr.bf16.gmra.mrb[192].mxu1 %v7856_v1  ;;  %9048 = vmatmul.mubr.bf16.gmra.mrb[148].mxu0 %v7856_v1  ;;  %v7733_v33 = vmax.f32 %v11416_v24, 0.0  ;;  %v7753_v63 = vmax.f32 %v7587_v58, 0.0 }
 0x686   : > { %v11419_v17 = vadd.f32 %v6901_v27, %v17356_v30  ;;  %v7582_v22 = vadd.f32 %v11505_v56, %v7581_v28  ;;  %8500 = vmatpush1.bf16.msra.mxu1 %v12752_v50  ;;  %9255 = vmatpush1.bf16.msra.mxu0 %v12755_v19  ;;  %v7734_v35 = vmax.f32 %v11417_v6, 0.0  ;;  %v7747_v50 = vmax.f32 %v7579_v25, 0.0  ;;  %v12764_v6 = vld [vmem:[%s18091_s7 + $0x140] ss:$8 sps:$4 sm:$0xff]  }
 0x687   : > { %v7736_v1 = vmax.f32 %v11418_v9, 0.0  ;;  %v7756_v31 = vmax.f32 %v7590_v0, 0.0  ;;  %8501 = vmatprep.subr.bf16.mxu1 %v12760_v42  ;;  %9256 = vmatprep.subr.bf16.mxu0 %v12763_v18  ;;  %v11508_v24 = vadd.f32 %v17223_v60, %v17348_v14  ;;  %v11511_v25 = vadd.f32 %v17250_v2, %v17348_v14 }
 0x688   : > { %v7737_v19 = vmax.f32 %v11419_v17, 0.0  ;;  %v7750_v8 = vmax.f32 %v7582_v22, 0.0  ;;  %v11509_v27 = vadd.f32 %v17225_v48, %v17348_v14 }
 0x689   : > { %v7859_v32 = vpack.c.bf16 %v7736_v1, %v7733_v33  ;;  %v17452_v56 = vpack.c.bf16 %v7756_v31, %v7753_v63 }
 0x68a   : > { %v7860_v58 = vpack.c.bf16 %v7737_v19, %v7734_v35  ;;  %v17456_v42 = vpack.c.bf16 %v7750_v8, %v7747_v50  ;;  %v6905_v18 = vpop.f32.mrb[68].mxu0  ;;  %v11370_v29 = vpop.f32.mrb[156].mxu1  ;;  %8502 = vmatpush1.bf16.msra.mxu1 %v12758_v46  ;;  %9257 = vmatpush1.bf16.msra.mxu0 %v12761_v41 }
 0x68b   : > { %v11420_v60 = vadd.f32 %v6905_v18, %v17352_v16  ;;  %v7603_v59 = vadd.f32 %v11510_v20, %v11370_v29  ;;  %v6907_v9 = vpop.f32.mrb[69].mxu0  ;;  %v7594_v0 = vpop.f32.mrb[157].mxu1  ;;  %8503 = vmatprep.subr.bf16.mxu1 %v12766_v34  ;;  %9258 = vmatprep.subr.bf16.mxu0 %v12769_v51 }
 0x68c   : > { %v11421_v28 = vadd.f32 %v6907_v9, %v17356_v30  ;;  %v7595_v17 = vadd.f32 %v11508_v24, %v7594_v0  ;;  %v6909_v22 = vpop.f32.mrb[70].mxu0  ;;  %v11371_v46 = vpop.f32.mrb[158].mxu1  ;;  %8302 = vmatprep.mubr.bf16.mxu1 %v7860_v58  ;;  %9057 = vmatprep.mubr.bf16.mxu0 %v7860_v58  ;;  %v11514_v24 = vadd.f32 %v17268_v36, %v17348_v14 }
 0x68d   : > { %v11422_v41 = vadd.f32 %v6909_v22, %v17352_v16  ;;  %v7606_v2 = vadd.f32 %v11511_v25, %v11371_v46  ;;  %v6911_v33 = vpop.f32.mrb[71].mxu0  ;;  %v7597_v63 = vpop.f32.mrb[159].mxu1  ;;  %8303 = vmatmul.mubr.bf16.gmra.mrb[196].mxu1 %v7859_v32  ;;  %9058 = vmatmul.mubr.bf16.gmra.mrb[152].mxu0 %v7859_v32  ;;  %v7739_v48 = vmax.f32 %v11420_v60, 0.0  ;;  %v7765_v31 = vmax.f32 %v7603_v59, 0.0  ;;  %v12770_v60 = vld [vmem:[%s18091_s7 + $0x150] ss:$8 sps:$4 sm:$0xff]  }
 0x68e   : > { %v11423_v34 = vadd.f32 %v6911_v33, %v17356_v30  ;;  %v7598_v1 = vadd.f32 %v11509_v27, %v7597_v63  ;;  %8504 = vmatpush1.bf16.msra.mxu1 %v12764_v6  ;;  %9259 = vmatpush1.bf16.msra.mxu0 %v12767_v62  ;;  %v7740_v50 = vmax.f32 %v11421_v28, 0.0  ;;  %v7759_v19 = vmax.f32 %v7595_v17, 0.0  ;;  %v12772_v59 = vld [vmem:[%s18091_s7 + $0x154] ss:$8 sps:$4 sm:$0xff]   ;;  %v12773_v28 = vld [vmem:[%s18091_s7 + $0x2b0] ss:$8 sps:$4 sm:$0xff]  }
 0x68f   : > { %v7742_v51 = vmax.f32 %v11422_v41, 0.0  ;;  %v7768_v35 = vmax.f32 %v7606_v2, 0.0  ;;  %v11512_v32 = vadd.f32 %v17255_v61, %v17348_v14  ;;  %v11515_v36 = vadd.f32 %v17270_v39, %v17348_v14  ;;  %v12775_v17 = vld [vmem:[%s18091_s7 + $0x2b4] ss:$8 sps:$4 sm:$0xff]   ;;  %8505 = vmatprep.subr.bf16.mxu1 %v12772_v59 }
 0x690   : > { %v7743_v8 = vmax.f32 %v11423_v34, 0.0  ;;  %v7762_v20 = vmax.f32 %v7598_v1, 0.0  ;;  %v11513_v22 = vadd.f32 %v17263_v54, %v17348_v14  ;;  %9260 = vmatprep.subr.bf16.mxu0 %v12775_v17 }
 0x691   : > { %v7862_v58 = vpack.c.bf16 %v7742_v51, %v7739_v48  ;;  %v17474_v18 = vpack.c.bf16 %v7768_v35, %v7765_v31 }
 0x692   : > { %v7863_v29 = vpack.c.bf16 %v7743_v8, %v7740_v50  ;;  %v17478_v6 = vpack.c.bf16 %v7762_v20, %v7759_v19  ;;  %v6915_v62 = vpop.f32.mrb[72].mxu0  ;;  %v11374_v25 = vpop.f32.mrb[160].mxu1  ;;  %8506 = vmatpush1.bf16.msra.mxu1 %v12770_v60  ;;  %9261 = vmatpush1.bf16.msra.mxu0 %v12773_v28  ;;  %v11519_v60 = vadd.f32 %v17284_v37, %v17348_v14 }
 0x693   : > { %v11424_v9 = vadd.f32 %v6915_v62, %v17352_v16  ;;  %v7619_v0 = vadd.f32 %v11514_v24, %v11374_v25  ;;  %v6917_v61 = vpop.f32.mrb[73].mxu0  ;;  %v7610_v27 = vpop.f32.mrb[161].mxu1  ;;  %v11516_v62 = vadd.f32 %v17275_v10, %v17348_v14 }
 0x694   : > { %v11425_v46 = vadd.f32 %v6917_v61, %v17356_v30  ;;  %v7611_v41 = vadd.f32 %v11512_v32, %v7610_v27  ;;  %v6919_v39 = vpop.f32.mrb[74].mxu0  ;;  %v11375_v2 = vpop.f32.mrb[162].mxu1  ;;  %8312 = vmatprep.mubr.bf16.mxu1 %v7863_v29  ;;  %9067 = vmatprep.mubr.bf16.mxu0 %v7863_v29  ;;  %v11518_v32 = vadd.f32 %v17282_v5, %v17348_v14 }
 0x695   : > { %v11426_v33 = vadd.f32 %v6919_v39, %v17352_v16  ;;  %v7622_v63 = vadd.f32 %v11515_v36, %v11375_v2  ;;  %v6921_v34 = vpop.f32.mrb[75].mxu0  ;;  %v7613_v1 = vpop.f32.mrb[163].mxu1  ;;  %8313 = vmatmul.mubr.bf16.gmra.mrb[200].mxu1 %v7862_v58  ;;  %9068 = vmatmul.mubr.bf16.gmra.mrb[156].mxu0 %v7862_v58  ;;  %v7745_v54 = vmax.f32 %v11424_v9, 0.0  ;;  %v7777_v51 = vmax.f32 %v7619_v0, 0.0 }
 0x696   : > { %v11427_v48 = vadd.f32 %v6921_v34, %v17356_v30  ;;  %v7614_v31 = vadd.f32 %v11513_v22, %v7613_v1  ;;  %v7746_v19 = vmax.f32 %v11425_v46, 0.0  ;;  %v7771_v8 = vmax.f32 %v7611_v41, 0.0 }
 0x697   : > { %v7748_v35 = vmax.f32 %v11426_v33, 0.0  ;;  %v7780_v50 = vmax.f32 %v7622_v63, 0.0  ;;  %v11517_v5 = vadd.f32 %v17277_v12, %v17348_v14 }
 0x698   : > { %v7749_v20 = vmax.f32 %v11427_v48, 0.0  ;;  %v7774_v24 = vmax.f32 %v7614_v31, 0.0 }
 0x699   : > { %v7865_v29 = vpack.c.bf16 %v7748_v35, %v7745_v54  ;;  %v17502_v58 = vpack.c.bf16 %v7780_v50, %v7777_v51  ;;  %v11522_v50 = vadd.f32 %v17296_v15, %v17348_v14  ;;  %v11521_v15 = vadd.f32 %v17291_v11, %v17348_v14 }
 0x69a   : > { %v7866_v25 = vpack.c.bf16 %v7749_v20, %v7746_v19  ;;  %v17506_v59 = vpack.c.bf16 %v7774_v24, %v7771_v8  ;;  %v6925_v36 = vpop.f32.mrb[76].mxu0  ;;  %v11378_v9 = vpop.f32.mrb[164].mxu1  ;;  %v11520_v20 = vadd.f32 %v17289_v52, %v17348_v14 }
 0x69b   : > { %v11428_v0 = vadd.f32 %v6925_v36, %v17352_v16  ;;  %v7635_v61 = vadd.f32 %v11518_v32, %v11378_v9  ;;  %v6927_v27 = vpop.f32.mrb[77].mxu0  ;;  %v7626_v28 = vpop.f32.mrb[165].mxu1 }
 0x69c   : > { %v11429_v17 = vadd.f32 %v6927_v27, %v17356_v30  ;;  %v7627_v22 = vadd.f32 %v11516_v62, %v7626_v28  ;;  %v6929_v10 = vpop.f32.mrb[78].mxu0  ;;  %v11379_v46 = vpop.f32.mrb[166].mxu1  ;;  %8322 = vmatprep.mubr.bf16.mxu1 %v7866_v25  ;;  %9077 = vmatprep.mubr.bf16.mxu0 %v7866_v25  ;;  %v11523_v25 = vadd.f32 %v17298_v4, %v17348_v14 }
 0x69d   : > { %v11430_v41 = vadd.f32 %v6929_v10, %v17352_v16  ;;  %v7638_v39 = vadd.f32 %v11519_v60, %v11379_v46  ;;  %v6931_v2 = vpop.f32.mrb[79].mxu0  ;;  %v7629_v37 = vpop.f32.mrb[167].mxu1  ;;  %8323 = vmatmul.mubr.bf16.gmra.mrb[204].mxu1 %v7865_v29  ;;  %9078 = vmatmul.mubr.bf16.gmra.mrb[160].mxu0 %v7865_v29  ;;  %v7751_v34 = vmax.f32 %v11428_v0, 0.0  ;;  %v7789_v1 = vmax.f32 %v7635_v61, 0.0 }
 0x69e   : > { %v11431_v33 = vadd.f32 %v6931_v2, %v17356_v30  ;;  %v7630_v63 = vadd.f32 %v11517_v5, %v7629_v37  ;;  %v7752_v31 = vmax.f32 %v11429_v17, 0.0  ;;  %v7783_v54 = vmax.f32 %v7627_v22, 0.0 }
 0x69f   : > { %v7754_v12 = vmax.f32 %v11430_v41, 0.0  ;;  %v7792_v48 = vmax.f32 %v7638_v39, 0.0 }
 0x6a0   : > { %v7755_v51 = vmax.f32 %v11431_v33, 0.0  ;;  %v7786_v35 = vmax.f32 %v7630_v63, 0.0 }
 0x6a1   : > { %v7868_v19 = vpack.c.bf16 %v7754_v12, %v7751_v34  ;;  %v17518_v8 = vpack.c.bf16 %v7792_v48, %v7789_v1  ;;  %v11526_v1 = vadd.f32 %v17310_v44, %v17348_v14  ;;  %v11525_v44 = vadd.f32 %v17305_v45, %v17348_v14 }
 0x6a2   : > { %v7869_v24 = vpack.c.bf16 %v7755_v51, %v7752_v31  ;;  %v17522_v32 = vpack.c.bf16 %v7786_v35, %v7783_v54  ;;  %v6935_v29 = vpop.f32.mrb[80].mxu0  ;;  %v11382_v62 = vpop.f32.mrb[168].mxu1  ;;  %v11524_v31 = vadd.f32 %v17303_v21, %v17348_v14 }
 0x6a3   : > { %v11432_v36 = vadd.f32 %v6935_v29, %v17352_v16  ;;  %v7651_v9 = vadd.f32 %v11522_v50, %v11382_v62  ;;  %v6937_v60 = vpop.f32.mrb[81].mxu0  ;;  %v7642_v0 = vpop.f32.mrb[169].mxu1 }
 0x6a4   : > { %v11433_v61 = vadd.f32 %v6937_v60, %v17356_v30  ;;  %v7643_v27 = vadd.f32 %v11520_v20, %v7642_v0  ;;  %v6939_v52 = vpop.f32.mrb[82].mxu0  ;;  %v11383_v28 = vpop.f32.mrb[170].mxu1  ;;  %8332 = vmatprep.mubr.bf16.mxu1 %v7869_v24  ;;  %9087 = vmatprep.mubr.bf16.mxu0 %v7869_v24 }
 0x6a5   : > { %v11434_v5 = vadd.f32 %v6939_v52, %v17352_v16  ;;  %v7654_v17 = vadd.f32 %v11523_v25, %v11383_v28  ;;  %v6941_v22 = vpop.f32.mrb[83].mxu0  ;;  %v7645_v4 = vpop.f32.mrb[171].mxu1  ;;  %8333 = vmatmul.mubr.bf16.gmra.mrb[208].mxu1 %v7868_v19  ;;  %9088 = vmatmul.mubr.bf16.gmra.mrb[164].mxu0 %v7868_v19  ;;  %v7757_v41 = vmax.f32 %v11432_v36, 0.0  ;;  %v7801_v39 = vmax.f32 %v7651_v9, 0.0 }
 0x6a6   : > { %v11435_v10 = vadd.f32 %v6941_v22, %v17356_v30  ;;  %v7646_v46 = vadd.f32 %v11521_v15, %v7645_v4  ;;  %v7758_v37 = vmax.f32 %v11433_v61, 0.0  ;;  %v7795_v33 = vmax.f32 %v7643_v27, 0.0 }
 0x6a7   : > { %v7760_v11 = vmax.f32 %v11434_v5, 0.0  ;;  %v7804_v2 = vmax.f32 %v7654_v17, 0.0  ;;  %v11527_v19 = vadd.f32 %v17312_v43, %v17348_v14 }
 0x6a8   : > { %v7761_v63 = vmax.f32 %v11435_v10, 0.0  ;;  %v7798_v34 = vmax.f32 %v7646_v46, 0.0  ;;  %v11530_v46 = vadd.f32 %v17323_v40, %v17348_v14  ;;  %v11529_v40 = vadd.f32 %v17319_v47, %v17348_v14 }
 0x6a9   : > { %v7871_v12 = vpack.c.bf16 %v7760_v11, %v7757_v41  ;;  %v17534_v48 = vpack.c.bf16 %v7804_v2, %v7801_v39  ;;  %v11528_v11 = vadd.f32 %v17317_v7, %v17348_v14 }
 0x6aa   : > { %v7872_v54 = vpack.c.bf16 %v7761_v63, %v7758_v37  ;;  %v17538_v51 = vpack.c.bf16 %v7798_v34, %v7795_v33  ;;  %v6945_v35 = vpop.f32.mrb[84].mxu0  ;;  %v11386_v50 = vpop.f32.mrb[172].mxu1  ;;  %v11531_v34 = vadd.f32 %v17325_v38, %v17348_v14 }
 0x6ab   : > { %v11436_v20 = vadd.f32 %v6945_v35, %v17352_v16  ;;  %v7667_v24 = vadd.f32 %v11526_v1, %v11386_v50  ;;  %v6947_v29 = vpop.f32.mrb[85].mxu0  ;;  %v7658_v62 = vpop.f32.mrb[173].mxu1 }
 0x6ac   : > { %v11437_v25 = vadd.f32 %v6947_v29, %v17356_v30  ;;  %v7659_v36 = vadd.f32 %v11524_v31, %v7658_v62  ;;  %v6949_v21 = vpop.f32.mrb[86].mxu0  ;;  %v11387_v9 = vpop.f32.mrb[174].mxu1  ;;  %8342 = vmatprep.mubr.bf16.mxu1 %v7872_v54  ;;  %9097 = vmatprep.mubr.bf16.mxu0 %v7872_v54 }
 0x6ad   : > { %v11438_v60 = vadd.f32 %v6949_v21, %v17352_v16  ;;  %v7670_v0 = vadd.f32 %v11527_v19, %v11387_v9  ;;  %v6951_v15 = vpop.f32.mrb[87].mxu0  ;;  %v7661_v43 = vpop.f32.mrb[175].mxu1  ;;  %8343 = vmatmul.mubr.bf16.gmra.mrb[212].mxu1 %v7871_v12  ;;  %9098 = vmatmul.mubr.bf16.gmra.mrb[168].mxu0 %v7871_v12  ;;  %v7763_v52 = vmax.f32 %v11436_v20, 0.0  ;;  %v7813_v28 = vmax.f32 %v7667_v24, 0.0 }
 0x6ae   : > { %v11439_v61 = vadd.f32 %v6951_v15, %v17356_v30  ;;  %v7662_v27 = vadd.f32 %v11525_v44, %v7661_v43  ;;  %v7764_v17 = vmax.f32 %v11437_v25, 0.0  ;;  %v7807_v22 = vmax.f32 %v7659_v36, 0.0 }
 0x6af   : > { %v7766_v45 = vmax.f32 %v11438_v60, 0.0  ;;  %v7816_v5 = vmax.f32 %v7670_v0, 0.0  ;;  %v11534_v43 = vadd.f32 %v17331_v57, %v17348_v14  ;;  %v11533_v57 = vadd.f32 %v17329_v3, %v17348_v14 }
 0x6b0   : > { %v7767_v4 = vmax.f32 %v11439_v61, 0.0  ;;  %v7810_v10 = vmax.f32 %v7662_v27, 0.0 }
 0x6b1   : > { %v7874_v41 = vpack.c.bf16 %v7766_v45, %v7763_v52  ;;  %v17550_v39 = vpack.c.bf16 %v7816_v5, %v7813_v28  ;;  %v11532_v52 = vadd.f32 %v17327_v23, %v17348_v14 }
 0x6b2   : > { %v7875_v2 = vpack.c.bf16 %v7767_v4, %v7764_v17  ;;  %v17554_v37 = vpack.c.bf16 %v7810_v10, %v7807_v22  ;;  %v6955_v33 = vpop.f32.mrb[88].mxu0  ;;  %v11390_v63 = vpop.f32.mrb[176].mxu1  ;;  %v11535_v22 = vadd.f32 %v17333_v55, %v17348_v14 }
 0x6b3   : > { %v11440_v1 = vadd.f32 %v6955_v33, %v17352_v16  ;;  %v7683_v12 = vadd.f32 %v11530_v46, %v11390_v63  ;;  %v6957_v31 = vpop.f32.mrb[89].mxu0  ;;  %v7674_v54 = vpop.f32.mrb[177].mxu1 }
 0x6b4   : > { %v11441_v35 = vadd.f32 %v6957_v31, %v17356_v30  ;;  %v7675_v50 = vadd.f32 %v11528_v11, %v7674_v54  ;;  %v6959_v7 = vpop.f32.mrb[90].mxu0  ;;  %v11391_v19 = vpop.f32.mrb[178].mxu1  ;;  %8352 = vmatprep.mubr.bf16.mxu1 %v7875_v2  ;;  %9107 = vmatprep.mubr.bf16.mxu0 %v7875_v2 }
 0x6b5   : > { %v11442_v20 = vadd.f32 %v6959_v7, %v17352_v16  ;;  %v7686_v24 = vadd.f32 %v11531_v34, %v11391_v19  ;;  %v6961_v29 = vpop.f32.mrb[91].mxu0  ;;  %v7677_v38 = vpop.f32.mrb[179].mxu1  ;;  %8353 = vmatmul.mubr.bf16.gmra.mrb[216].mxu1 %v7874_v41  ;;  %9108 = vmatmul.mubr.bf16.gmra.mrb[172].mxu0 %v7874_v41  ;;  %v7769_v25 = vmax.f32 %v11440_v1, 0.0  ;;  %v7825_v36 = vmax.f32 %v7683_v12, 0.0 }
 0x6b6   : > { %v11443_v62 = vadd.f32 %v6961_v29, %v17356_v30  ;;  %v7678_v44 = vadd.f32 %v11529_v40, %v7677_v38  ;;  %v7770_v9 = vmax.f32 %v11441_v35, 0.0  ;;  %v7819_v60 = vmax.f32 %v7675_v50, 0.0 }
 0x6b7   : > { %v7772_v47 = vmax.f32 %v11442_v20, 0.0  ;;  %v7828_v21 = vmax.f32 %v7686_v24, 0.0  ;;  %v19106_v24 = vld [vmem:[#allocation134_spill] sm:$0xff] }
 0x6b8   : > { %v7773_v0 = vmax.f32 %v11443_v62, 0.0  ;;  %v7822_v15 = vmax.f32 %v7678_v44, 0.0  ;;  %v11538_v29 = vadd.f32 %v19106_v24, %v17348_v14  ;;  %v19107_v44 = vld [vmem:[#allocation130_spill] sm:$0xff] }
 0x6b9   : > { %v7877_v61 = vpack.c.bf16 %v7772_v47, %v7769_v25  ;;  %v17566_v27 = vpack.c.bf16 %v7828_v21, %v7825_v36  ;;  %v11536_v25 = vadd.f32 %v19107_v44, %v17348_v14 }
 0x6ba   : > { %v7878_v28 = vpack.c.bf16 %v7773_v0, %v7770_v9  ;;  %v17570_v45 = vpack.c.bf16 %v7822_v15, %v7819_v60  ;;  %v6965_v5 = vpop.f32.mrb[92].mxu0  ;;  %v11394_v17 = vpop.f32.mrb[180].mxu1  ;;  %v19108_v60 = vld [vmem:[#allocation129_spill] sm:$0xff] }
 0x6bb   : > { %v11444_v4 = vadd.f32 %v6965_v5, %v17352_v16  ;;  %v7699_v10 = vadd.f32 %v11534_v43, %v11394_v17  ;;  %v6967_v46 = vpop.f32.mrb[93].mxu0  ;;  %v7690_v41 = vpop.f32.mrb[181].mxu1  ;;  %v11539_v0 = vadd.f32 %v19108_v60, %v17348_v14 }
 0x6bc   : > { %v11445_v11 = vadd.f32 %v6967_v46, %v17356_v30  ;;  %v7691_v2 = vadd.f32 %v11532_v52, %v7690_v41  ;;  %v6969_v23 = vpop.f32.mrb[94].mxu0  ;;  %v11395_v33 = vpop.f32.mrb[182].mxu1  ;;  %8362 = vmatprep.mubr.bf16.mxu1 %v7878_v28  ;;  %9117 = vmatprep.mubr.bf16.mxu0 %v7878_v28  ;;  %v19109_v28 = vld [vmem:[#allocation128_spill] sm:$0xff] }
 0x6bd   : > { %v11446_v63 = vadd.f32 %v6969_v23, %v17352_v16  ;;  %v7702_v34 = vadd.f32 %v11535_v22, %v11395_v33  ;;  %v6971_v1 = vpop.f32.mrb[95].mxu0  ;;  %v7693_v55 = vpop.f32.mrb[183].mxu1  ;;  %8363 = vmatmul.mubr.bf16.gmra.mrb[220].mxu1 %v7877_v61  ;;  %9118 = vmatmul.mubr.bf16.gmra.mrb[176].mxu0 %v7877_v61  ;;  %v7775_v54 = vmax.f32 %v11444_v4, 0.0  ;;  %v7837_v40 = vmax.f32 %v7699_v10, 0.0 }
 0x6be   : > { %v11447_v12 = vadd.f32 %v6971_v1, %v17356_v30  ;;  %v7694_v31 = vadd.f32 %v11533_v57, %v7693_v55  ;;  %v7776_v50 = vmax.f32 %v11445_v11, 0.0  ;;  %v7831_v7 = vmax.f32 %v7691_v2, 0.0 }
 0x6bf   : > { %v7778_v3 = vmax.f32 %v11446_v63, 0.0  ;;  %v7840_v35 = vmax.f32 %v7702_v34, 0.0  ;;  %v11537_v5 = vadd.f32 %v19109_v28, %v17348_v14 }
 0x6c0   : > { %v7779_v19 = vmax.f32 %v11447_v12, 0.0  ;;  %v7834_v20 = vmax.f32 %v7694_v31, 0.0 }
 0x6c1   : > { %v7880_v38 = vpack.c.bf16 %v7778_v3, %v7775_v54  ;;  %v17582_v62 = vpack.c.bf16 %v7840_v35, %v7837_v40 }
 0x6c2   : > { %v7881_v36 = vpack.c.bf16 %v7779_v19, %v7776_v50  ;;  %v17586_v47 = vpack.c.bf16 %v7834_v20, %v7831_v7  ;;  %v6975_v21 = vpop.f32.mrb[96].mxu0  ;;  %v11398_v9 = vpop.f32.mrb[184].mxu1 }
 0x6c3   : > { %v11448_v15 = vadd.f32 %v6975_v21, %v17352_v16  ;;  %v7715_v43 = vadd.f32 %v11538_v29, %v11398_v9  ;;  %v6977_v61 = vpop.f32.mrb[97].mxu0  ;;  %v7706_v52 = vpop.f32.mrb[185].mxu1 }
 0x6c4   : > { %v11449_v17 = vadd.f32 %v6977_v61, %v17356_v30  ;;  %v7707_v22 = vadd.f32 %v11536_v25, %v7706_v52  ;;  %v6979_v4 = vpop.f32.mrb[98].mxu0  ;;  %v11399_v10 = vpop.f32.mrb[186].mxu1  ;;  %8372 = vmatprep.mubr.bf16.mxu1 %v7881_v36  ;;  %9127 = vmatprep.mubr.bf16.mxu0 %v7881_v36 }
 0x6c5   : > { %v11450_v46 = vadd.f32 %v6979_v4, %v17352_v16  ;;  %v7718_v41 = vadd.f32 %v11539_v0, %v11399_v10  ;;  %v6981_v57 = vpop.f32.mrb[99].mxu0  ;;  %v7709_v11 = vpop.f32.mrb[187].mxu1  ;;  %8373 = vmatmul.mubr.bf16.gmra.mrb[224].mxu1 %v7880_v38  ;;  %9128 = vmatmul.mubr.bf16.gmra.mrb[180].mxu0 %v7880_v38  ;;  %v7781_v33 = vmax.f32 %v11448_v15, 0.0  ;;  %v7849_v63 = vmax.f32 %v7715_v43, 0.0 }
 0x6c6   : > { %v11451_v2 = vadd.f32 %v6981_v57, %v17356_v30  ;;  %v7710_v23 = vadd.f32 %v11537_v5, %v7709_v11  ;;  %v7782_v1 = vmax.f32 %v11449_v17, 0.0  ;;  %v7843_v55 = vmax.f32 %v7707_v22, 0.0 }
 0x6c7   : > { %v7784_v14 = vmax.f32 %v11450_v46, 0.0  ;;  %v7852_v34 = vmax.f32 %v7718_v41, 0.0 }
 0x6c8   : > { %v7785_v12 = vmax.f32 %v11451_v2, 0.0  ;;  %v7846_v31 = vmax.f32 %v7710_v23, 0.0 }
 0x6c9   : > { %v7883_v54 = vpack.c.bf16 %v7784_v14, %v7781_v33  ;;  %v17596_v40 = vpack.c.bf16 %v7852_v34, %v7849_v63 }
 0x6ca   : > { %v7884_v3 = vpack.c.bf16 %v7785_v12, %v7782_v1  ;;  %v17598_v35 = vpack.c.bf16 %v7846_v31, %v7843_v55  ;;  %v6985_v50 = vpop.f32.mrb[100].mxu0 }
 0x6cb   : > { %v11452_v7 = vadd.f32 %v6985_v50, %v17352_v16  ;;  %v6987_v19 = vpop.f32.mrb[101].mxu0 }
 0x6cc   : > { %v11453_v20 = vadd.f32 %v6987_v19, %v17356_v30  ;;  %v6989_v24 = vpop.f32.mrb[102].mxu0  ;;  %8382 = vmatprep.mubr.bf16.mxu1 %v7884_v3  ;;  %9137 = vmatprep.mubr.bf16.mxu0 %v7884_v3 }
 0x6cd   : > { %v11454_v29 = vadd.f32 %v6989_v24, %v17352_v16  ;;  %v6991_v38 = vpop.f32.mrb[103].mxu0  ;;  %8383 = vmatmul.mubr.bf16.gmra.mrb[228].mxu1 %v7883_v54  ;;  %9138 = vmatmul.mubr.bf16.gmra.mrb[184].mxu0 %v7883_v54  ;;  %v7787_v25 = vmax.f32 %v11452_v7, 0.0 }
 0x6ce   : > { %v11455_v44 = vadd.f32 %v6991_v38, %v17356_v30  ;;  %v7788_v21 = vmax.f32 %v11453_v20, 0.0 }
 0x6cf   : > { %v7790_v36 = vmax.f32 %v11454_v29, 0.0 }
 0x6d0   : > { %v7791_v9 = vmax.f32 %v11455_v44, 0.0 }
 0x6d1   : > { %v7886_v60 = vpack.c.bf16 %v7790_v36, %v7787_v25 }
 0x6d2   : > { %v7887_v0 = vpack.c.bf16 %v7791_v9, %v7788_v21  ;;  %v6995_v15 = vpop.f32.mrb[104].mxu0 }
 0x6d3   : > { %v11456_v43 = vadd.f32 %v6995_v15, %v17352_v16  ;;  %v6997_v61 = vpop.f32.mrb[105].mxu0 }
 0x6d4   : > { %v11457_v52 = vadd.f32 %v6997_v61, %v17356_v30  ;;  %v6999_v28 = vpop.f32.mrb[106].mxu0  ;;  %8392 = vmatprep.mubr.bf16.mxu1 %v7887_v0  ;;  %9147 = vmatprep.mubr.bf16.mxu0 %v7887_v0 }
 0x6d5   : > { %v11458_v5 = vadd.f32 %v6999_v28, %v17352_v16  ;;  %v7001_v17 = vpop.f32.mrb[107].mxu0  ;;  %8393 = vmatmul.mubr.bf16.gmra.mrb[232].mxu1 %v7886_v60  ;;  %9148 = vmatmul.mubr.bf16.gmra.mrb[188].mxu0 %v7886_v60  ;;  %v7793_v4 = vmax.f32 %v11456_v43, 0.0 }
 0x6d6   : > { %v11459_v22 = vadd.f32 %v7001_v17, %v17356_v30  ;;  %v7794_v46 = vmax.f32 %v11457_v52, 0.0 }
 0x6d7   : > { %v7796_v10 = vmax.f32 %v11458_v5, 0.0 }
 0x6d8   : > { %v7797_v41 = vmax.f32 %v11459_v22, 0.0 }
 0x6d9   : > { %v7889_v57 = vpack.c.bf16 %v7796_v10, %v7793_v4 }
 0x6da   : > { %v7890_v11 = vpack.c.bf16 %v7797_v41, %v7794_v46  ;;  %v7005_v2 = vpop.f32.mrb[108].mxu0 }
 0x6db   : > { %v11460_v23 = vadd.f32 %v7005_v2, %v17352_v16  ;;  %v7007_v33 = vpop.f32.mrb[109].mxu0 }
 0x6dc   : > { %v11461_v63 = vadd.f32 %v7007_v33, %v17356_v30  ;;  %v7009_v14 = vpop.f32.mrb[110].mxu0  ;;  %8402 = vmatprep.mubr.bf16.mxu1 %v7890_v11  ;;  %9157 = vmatprep.mubr.bf16.mxu0 %v7890_v11 }
 0x6dd   : > { %v11462_v34 = vadd.f32 %v7009_v14, %v17352_v16  ;;  %v7011_v1 = vpop.f32.mrb[111].mxu0  ;;  %8403 = vmatmul.mubr.bf16.gmra.mrb[236].mxu1 %v7889_v57  ;;  %9158 = vmatmul.mubr.bf16.gmra.mrb[192].mxu0 %v7889_v57  ;;  %v7799_v12 = vmax.f32 %v11460_v23, 0.0 }
 0x6de   : > { %v11463_v55 = vadd.f32 %v7011_v1, %v17356_v30  ;;  %v7800_v54 = vmax.f32 %v11461_v63, 0.0 }
 0x6df   : > { %v7802_v31 = vmax.f32 %v11462_v34, 0.0 }
 0x6e0   : > { %v7803_v3 = vmax.f32 %v11463_v55, 0.0 }
 0x6e1   : > { %v7892_v50 = vpack.c.bf16 %v7802_v31, %v7799_v12 }
 0x6e2   : > { %v7893_v7 = vpack.c.bf16 %v7803_v3, %v7800_v54  ;;  %v7015_v19 = vpop.f32.mrb[112].mxu0 }
 0x6e3   : > { %v11464_v20 = vadd.f32 %v7015_v19, %v17352_v16  ;;  %v7017_v24 = vpop.f32.mrb[113].mxu0 }
 0x6e4   : > { %v11465_v29 = vadd.f32 %v7017_v24, %v17356_v30  ;;  %v7019_v38 = vpop.f32.mrb[114].mxu0  ;;  %8412 = vmatprep.mubr.bf16.mxu1 %v7893_v7  ;;  %9167 = vmatprep.mubr.bf16.mxu0 %v7893_v7 }
 0x6e5   : > { %v11466_v44 = vadd.f32 %v7019_v38, %v17352_v16  ;;  %v7021_v25 = vpop.f32.mrb[115].mxu0  ;;  %8413 = vmatmul.mubr.bf16.gmra.mrb[240].mxu1 %v7892_v50  ;;  %9168 = vmatmul.mubr.bf16.gmra.mrb[196].mxu0 %v7892_v50  ;;  %v7805_v21 = vmax.f32 %v11464_v20, 0.0 }
 0x6e6   : > { %v11467_v36 = vadd.f32 %v7021_v25, %v17356_v30  ;;  %v7806_v60 = vmax.f32 %v11465_v29, 0.0 }
 0x6e7   : > { %v7808_v9 = vmax.f32 %v11466_v44, 0.0 }
 0x6e8   : > { %v7809_v0 = vmax.f32 %v11467_v36, 0.0 }
 0x6e9   : > { %v7895_v15 = vpack.c.bf16 %v7808_v9, %v7805_v21 }
 0x6ea   : > { %v7896_v43 = vpack.c.bf16 %v7809_v0, %v7806_v60  ;;  %v7025_v61 = vpop.f32.mrb[116].mxu0 }
 0x6eb   : > { %v11468_v52 = vadd.f32 %v7025_v61, %v17352_v16  ;;  %v7027_v28 = vpop.f32.mrb[117].mxu0 }
 0x6ec   : > { %v11469_v5 = vadd.f32 %v7027_v28, %v17356_v30  ;;  %v7029_v17 = vpop.f32.mrb[118].mxu0  ;;  %8422 = vmatprep.mubr.bf16.mxu1 %v7896_v43  ;;  %9177 = vmatprep.mubr.bf16.mxu0 %v7896_v43 }
 0x6ed   : > { %v11470_v22 = vadd.f32 %v7029_v17, %v17352_v16  ;;  %v7031_v4 = vpop.f32.mrb[119].mxu0  ;;  %8423 = vmatmul.mubr.bf16.gmra.mrb[244].mxu1 %v7895_v15  ;;  %9178 = vmatmul.mubr.bf16.gmra.mrb[200].mxu0 %v7895_v15  ;;  %v7811_v46 = vmax.f32 %v11468_v52, 0.0 }
 0x6ee   : > { %v11471_v10 = vadd.f32 %v7031_v4, %v17356_v30  ;;  %v7812_v57 = vmax.f32 %v11469_v5, 0.0 }
 0x6ef   : > { %v7814_v41 = vmax.f32 %v11470_v22, 0.0 }
 0x6f0   : > { %v7815_v11 = vmax.f32 %v11471_v10, 0.0 }
 0x6f1   : > { %v7898_v2 = vpack.c.bf16 %v7814_v41, %v7811_v46 }
 0x6f2   : > { %v7899_v23 = vpack.c.bf16 %v7815_v11, %v7812_v57  ;;  %v7035_v33 = vpop.f32.mrb[120].mxu0 }
 0x6f3   : > { %v11472_v63 = vadd.f32 %v7035_v33, %v17352_v16  ;;  %v7037_v14 = vpop.f32.mrb[121].mxu0 }
 0x6f4   : > { %v11473_v34 = vadd.f32 %v7037_v14, %v17356_v30  ;;  %v7039_v1 = vpop.f32.mrb[122].mxu0  ;;  %8432 = vmatprep.mubr.bf16.mxu1 %v7899_v23  ;;  %9187 = vmatprep.mubr.bf16.mxu0 %v7899_v23 }
 0x6f5   : > { %v11474_v55 = vadd.f32 %v7039_v1, %v17352_v16  ;;  %v7041_v12 = vpop.f32.mrb[123].mxu0  ;;  %8433 = vmatmul.mubr.bf16.gmra.mrb[248].mxu1 %v7898_v2  ;;  %9188 = vmatmul.mubr.bf16.gmra.mrb[204].mxu0 %v7898_v2  ;;  %v7817_v54 = vmax.f32 %v11472_v63, 0.0 }
 0x6f6   : > { %v11475_v31 = vadd.f32 %v7041_v12, %v17356_v30  ;;  %v7818_v50 = vmax.f32 %v11473_v34, 0.0 }
 0x6f7   : > { %v7820_v3 = vmax.f32 %v11474_v55, 0.0 }
 0x6f8   : > { %v7821_v7 = vmax.f32 %v11475_v31, 0.0 }
 0x6f9   : > { %v7901_v19 = vpack.c.bf16 %v7820_v3, %v7817_v54 }
 0x6fa   : > { %v7902_v20 = vpack.c.bf16 %v7821_v7, %v7818_v50  ;;  %v7045_v24 = vpop.f32.mrb[124].mxu0 }
 0x6fb   : > { %v11476_v29 = vadd.f32 %v7045_v24, %v17352_v16  ;;  %v7047_v38 = vpop.f32.mrb[125].mxu0 }
 0x6fc   : > { %v11477_v44 = vadd.f32 %v7047_v38, %v17356_v30  ;;  %v7049_v25 = vpop.f32.mrb[126].mxu0  ;;  %8442 = vmatprep.mubr.bf16.mxu1 %v7902_v20  ;;  %9197 = vmatprep.mubr.bf16.mxu0 %v7902_v20 }
 0x6fd   : > { %v11478_v36 = vadd.f32 %v7049_v25, %v17352_v16  ;;  %v7051_v21 = vpop.f32.mrb[127].mxu0  ;;  %8443 = vmatmul.mubr.bf16.gmra.mrb[252].mxu1 %v7901_v19  ;;  %9198 = vmatmul.mubr.bf16.gmra.mrb[208].mxu0 %v7901_v19  ;;  %v7823_v60 = vmax.f32 %v11476_v29, 0.0 }
 0x6fe   : > { %v11479_v9 = vadd.f32 %v7051_v21, %v17356_v30  ;;  %v7824_v15 = vmax.f32 %v11477_v44, 0.0 }
 0x6ff   : > { %v7826_v0 = vmax.f32 %v11478_v36, 0.0 }
 0x700   : > { %v7827_v43 = vmax.f32 %v11479_v9, 0.0 }
 0x701   : > { %v7904_v61 = vpack.c.bf16 %v7826_v0, %v7823_v60 }
 0x702   : > { %v7905_v52 = vpack.c.bf16 %v7827_v43, %v7824_v15  ;;  %v7055_v28 = vpop.f32.mrb[128].mxu0 }
 0x703   : > { %v11480_v5 = vadd.f32 %v7055_v28, %v17352_v16  ;;  %v7057_v17 = vpop.f32.mrb[129].mxu0 }
 0x704   : > { %v11481_v22 = vadd.f32 %v7057_v17, %v17356_v30  ;;  %v7059_v4 = vpop.f32.mrb[130].mxu0  ;;  %8452 = vmatprep.mubr.bf16.mxu1 %v7905_v52  ;;  %9207 = vmatprep.mubr.bf16.mxu0 %v7905_v52 }
 0x705   : > { %v11482_v10 = vadd.f32 %v7059_v4, %v17352_v16  ;;  %v7061_v46 = vpop.f32.mrb[131].mxu0  ;;  %8453 = vmatmul.mubr.bf16.gmra.mrb[0].mxu1 %v7904_v61  ;;  %9208 = vmatmul.mubr.bf16.gmra.mrb[212].mxu0 %v7904_v61  ;;  %v7829_v57 = vmax.f32 %v11480_v5, 0.0 }
 0x706   : > { %v11483_v41 = vadd.f32 %v7061_v46, %v17356_v30  ;;  %v7830_v2 = vmax.f32 %v11481_v22, 0.0 }
 0x707   : > { %v7832_v11 = vmax.f32 %v11482_v10, 0.0 }
 0x708   : > { %v7833_v23 = vmax.f32 %v11483_v41, 0.0 }
 0x709   : > { %v7907_v33 = vpack.c.bf16 %v7832_v11, %v7829_v57 }
 0x70a   : > { %v7908_v63 = vpack.c.bf16 %v7833_v23, %v7830_v2  ;;  %v7065_v14 = vpop.f32.mrb[132].mxu0 }
 0x70b   : > { %v11484_v34 = vadd.f32 %v7065_v14, %v17352_v16  ;;  %v7067_v1 = vpop.f32.mrb[133].mxu0 }
 0x70c   : > { %v11485_v55 = vadd.f32 %v7067_v1, %v17356_v30  ;;  %v7069_v12 = vpop.f32.mrb[134].mxu0  ;;  %8462 = vmatprep.mubr.bf16.mxu1 %v7908_v63  ;;  %9217 = vmatprep.mubr.bf16.mxu0 %v7908_v63  ;;  %v19110_v1 = vmov 0  }
 0x70d   : > { %v11486_v31 = vadd.f32 %v7069_v12, %v17352_v16  ;;  %v7071_v54 = vpop.f32.mrb[135].mxu0  ;;  %8463 = vmatmul.mubr.bf16.gmra.mrb[4].mxu1 %v7907_v33  ;;  %9218 = vmatmul.mubr.bf16.gmra.mrb[216].mxu0 %v7907_v33  ;;  %v7835_v50 = vmax.f32 %v11484_v34, 0.0 }
 0x70e   : > { %v11487_v3 = vadd.f32 %v7071_v54, %v17356_v30  ;;  %v7836_v19 = vmax.f32 %v11485_v55, 0.0  ;;  %v12784_v55 = vld [vmem:[%s18092_s8 + $0x60] sm:$0xff]  }
 0x70f   : > { %v7838_v7 = vmax.f32 %v11486_v31, 0.0  ;;  %v12785_v54 = vld [vmem:[%s18092_s8 + $0x20] sm:$0xff]  }
 0x710   : > { %v7839_v20 = vmax.f32 %v11487_v3, 0.0 }
 0x711   : > { %v7910_v24 = vpack.c.bf16 %v7838_v7, %v7835_v50 }
 0x712   : > { %v7911_v29 = vpack.c.bf16 %v7839_v20, %v7836_v19  ;;  %v7075_v38 = vpop.f32.mrb[136].mxu0 }
 0x713   : > { %v11488_v44 = vadd.f32 %v7075_v38, %v17352_v16  ;;  %v7077_v25 = vpop.f32.mrb[137].mxu0 }
 0x714   : > { %v11489_v36 = vadd.f32 %v7077_v25, %v17356_v30  ;;  %v7079_v21 = vpop.f32.mrb[138].mxu0  ;;  %8472 = vmatprep.mubr.bf16.mxu1 %v7911_v29  ;;  %9227 = vmatprep.mubr.bf16.mxu0 %v7911_v29 }
 0x715   : > { %v11490_v9 = vadd.f32 %v7079_v21, %v17352_v16  ;;  %v7081_v60 = vpop.f32.mrb[139].mxu0  ;;  %8473 = vmatmul.mubr.bf16.gmra.mrb[8].mxu1 %v7910_v24  ;;  %9228 = vmatmul.mubr.bf16.gmra.mrb[220].mxu0 %v7910_v24  ;;  %v7841_v15 = vmax.f32 %v11488_v44, 0.0 }
 0x716   : > { %v11491_v0 = vadd.f32 %v7081_v60, %v17356_v30  ;;  %v7842_v61 = vmax.f32 %v11489_v36, 0.0 }
 0x717   : > { %v7844_v43 = vmax.f32 %v11490_v9, 0.0 }
 0x718   : > { %v7845_v52 = vmax.f32 %v11491_v0, 0.0 }
 0x719   : > { %v7913_v28 = vpack.c.bf16 %v7844_v43, %v7841_v15 }
 0x71a   : > { %v7914_v5 = vpack.c.bf16 %v7845_v52, %v7842_v61  ;;  %v7085_v17 = vpop.f32.mrb[140].mxu0 }
 0x71b   : > { %v11492_v22 = vadd.f32 %v7085_v17, %v17352_v16  ;;  %v7087_v4 = vpop.f32.mrb[141].mxu0 }
 0x71c   : > { %v11493_v10 = vadd.f32 %v7087_v4, %v17356_v30  ;;  %v7089_v46 = vpop.f32.mrb[142].mxu0  ;;  %8482 = vmatprep.mubr.bf16.mxu1 %v7914_v5  ;;  %9237 = vmatprep.mubr.bf16.mxu0 %v7914_v5 }
 0x71d   : > { %v11494_v41 = vadd.f32 %v7089_v46, %v17352_v16  ;;  %v7091_v57 = vpop.f32.mrb[143].mxu0  ;;  %8483 = vmatmul.mubr.bf16.gmra.mrb[12].mxu1 %v7913_v28  ;;  %9238 = vmatmul.mubr.bf16.gmra.mrb[224].mxu0 %v7913_v28  ;;  %v7847_v2 = vmax.f32 %v11492_v22, 0.0  ;;  %v12776_v16 = vld [vmem:[%s18092_s8 + $0x40] sm:$0xff]  }
 0x71e   : > { %v11495_v11 = vadd.f32 %v7091_v57, %v17356_v30  ;;  %v7848_v33 = vmax.f32 %v11493_v10, 0.0  ;;  %v12777_v30 = vld [vmem:[%s18092_s8] sm:$0xff]   ;;  %11254 = vmatprep.subr.bf16.mxu1 %v12776_v16 }
 0x71f   : > { %v7850_v23 = vmax.f32 %v11494_v41, 0.0 }
 0x720   : > { %v7851_v63 = vmax.f32 %v11495_v11, 0.0 }
 0x721   : > { %v7916_v14 = vpack.c.bf16 %v7850_v23, %v7847_v2 }
 0x722   : > { %v7917_v34 = vpack.c.bf16 %v7851_v63, %v7848_v33 }
 0x724   : > { %8488 = vmatprep.mubr.bf16.mxu1 %v7917_v34  ;;  %9243 = vmatprep.mubr.bf16.mxu0 %v7917_v34  ;;  %v12786_v34 = vld [vmem:[%s18092_s8 + $0x68] sm:$0xff]  }
 0x725   : > { %8489 = vmatmul.mubr.bf16.gmra.mrb[16].mxu1 %v7916_v14  ;;  %9244 = vmatmul.mubr.bf16.gmra.mrb[228].mxu0 %v7916_v14 }
 0x726   : > { %8527 = vmatprep.mubr.bf16.mxu1 %v19110_v1  ;;  %9282 = vmatprep.mubr.bf16.mxu0 %v19110_v1 }
 0x72d   : > { %11038 = vmatmul.mubr.msk.bf16.vlgmr.msra.gmra.mrb[188].mxu1 %vm8183_vm5, %v17376_v13  ;;  %11148 = vmatmul.mubr.msk.bf16.vlgmr.msra.gmra.mrb[144].mxu0 %vm8183_vm5, %v17376_v13  ;;  %v12779_v13 = vld [vmem:[%s18092_s8 + $0x8] sm:$0xff]  }
 0x72e   : > { %8537 = vmatprep.mubr.bf16.mxu1 %v19110_v1  ;;  %9292 = vmatprep.mubr.bf16.mxu0 %v19110_v1 }
 0x72f   : > { %11255 = vmatpush3.bf16.msra.mxu1 %v12777_v30  ;;  %v12787_v30 = vld [vmem:[%s18092_s8 + $0x28] sm:$0xff]  }
 0x735   : > { %11039 = vmatmul.mubr.msk.bf16.gmra.mrb[192].mxu1 %vm8183_vm5, %v17372_v26  ;;  %11149 = vmatmul.mubr.msk.bf16.gmra.mrb[148].mxu0 %vm8183_vm5, %v17372_v26  ;;  %v12778_v26 = vld [vmem:[%s18092_s8 + $0x48] sm:$0xff]  }
 0x736   : > { %8547 = vmatprep.mubr.bf16.mxu1 %v19110_v1  ;;  %9302 = vmatprep.mubr.bf16.mxu0 %v19110_v1 }
 0x737   : > { %11256 = vmatprep.subr.bf16.mxu1 %v12778_v26 }
 0x738   : > { %11257 = vmatpush3.bf16.msra.mxu1 %v12779_v13 }
 0x73d   : > { %11040 = vmatmul.mubr.msk.bf16.gmra.mrb[196].mxu1 %vm8183_vm5, %v17416_v53  ;;  %11150 = vmatmul.mubr.msk.bf16.gmra.mrb[152].mxu0 %vm8183_vm5, %v17416_v53  ;;  %v12781_v53 = vld [vmem:[%s18092_s8 + $0x10] sm:$0xff]  }
 0x73e   : > { %8557 = vmatprep.mubr.bf16.mxu1 %v19110_v1  ;;  %9312 = vmatprep.mubr.bf16.mxu0 %v19110_v1 }
 0x745   : > { %11041 = vmatmul.mubr.msk.bf16.gmra.mrb[200].mxu1 %vm8183_vm5, %v17412_v49  ;;  %11151 = vmatmul.mubr.msk.bf16.gmra.mrb[156].mxu0 %vm8183_vm5, %v17412_v49  ;;  %v12780_v49 = vld [vmem:[%s18092_s8 + $0x50] sm:$0xff]  }
 0x746   : > { %8567 = vmatprep.mubr.bf16.mxu1 %v19110_v1  ;;  %9322 = vmatprep.mubr.bf16.mxu0 %v19110_v1 }
 0x747   : > { %11258 = vmatprep.subr.bf16.mxu1 %v12780_v49 }
 0x748   : > { %11259 = vmatpush3.bf16.msra.mxu1 %v12781_v53 }
 0x74d   : > { %11042 = vmatmul.mubr.msk.bf16.gmra.mrb[204].mxu1 %vm8183_vm5, %v17456_v42  ;;  %11152 = vmatmul.mubr.msk.bf16.gmra.mrb[160].mxu0 %vm8183_vm5, %v17456_v42  ;;  %v12783_v42 = vld [vmem:[%s18092_s8 + $0x18] sm:$0xff]  }
 0x74e   : > { %8577 = vmatprep.mubr.bf16.mxu1 %v19110_v1  ;;  %9332 = vmatprep.mubr.bf16.mxu0 %v19110_v1 }
 0x755   : > { %11043 = vmatmul.mubr.msk.bf16.gmra.mrb[208].mxu1 %vm8183_vm5, %v17452_v56  ;;  %11153 = vmatmul.mubr.msk.bf16.gmra.mrb[164].mxu0 %vm8183_vm5, %v17452_v56  ;;  %v12782_v56 = vld [vmem:[%s18092_s8 + $0x58] sm:$0xff]  }
 0x756   : > { %8587 = vmatprep.mubr.bf16.mxu1 %v19110_v1  ;;  %9342 = vmatprep.mubr.bf16.mxu0 %v19110_v1 }
 0x757   : > { %11260 = vmatprep.subr.bf16.mxu1 %v12782_v56 }
 0x758   : > { %11261 = vmatpush3.bf16.msra.mxu1 %v12783_v42 }
 0x759   : > { %11262 = vmatprep.subr.bf16.mxu1 %v12784_v55 }
 0x75c   : > { %11263 = vmatpush3.bf16.msra.mxu1 %v12785_v54 }
 0x75d   : > { %11044 = vmatmul.mubr.msk.bf16.gmra.mrb[212].mxu1 %vm8183_vm5, %v17478_v6  ;;  %11154 = vmatmul.mubr.msk.bf16.gmra.mrb[168].mxu0 %vm8183_vm5, %v17478_v6 }
 0x75e   : > { %8597 = vmatprep.mubr.bf16.mxu1 %v19110_v1  ;;  %9352 = vmatprep.mubr.bf16.mxu0 %v19110_v1 }
 0x75f   : > { %11264 = vmatprep.subr.bf16.mxu1 %v12786_v34 }
 0x760   : > { %11265 = vmatpush3.bf16.msra.mxu1 %v12787_v30 }
 0x765   : > { %11045 = vmatmul.mubr.msk.bf16.gmra.mrb[216].mxu1 %vm8183_vm5, %v17474_v18  ;;  %11155 = vmatmul.mubr.msk.bf16.gmra.mrb[172].mxu0 %vm8183_vm5, %v17474_v18 }
 0x766   : > { %8607 = vmatprep.mubr.bf16.mxu1 %v19110_v1  ;;  %9362 = vmatprep.mubr.bf16.mxu0 %v19110_v1 }
 0x76d   : > { %11046 = vmatmul.mubr.msk.bf16.gmra.mrb[220].mxu1 %vm8183_vm5, %v17506_v59  ;;  %11156 = vmatmul.mubr.msk.bf16.gmra.mrb[176].mxu0 %vm8183_vm5, %v17506_v59 }
 0x76e   : > { %8617 = vmatprep.mubr.bf16.mxu1 %v19110_v1  ;;  %9372 = vmatprep.mubr.bf16.mxu0 %v19110_v1 }
 0x775   : > { %11047 = vmatmul.mubr.msk.bf16.gmra.mrb[224].mxu1 %vm8183_vm5, %v17502_v58  ;;  %11157 = vmatmul.mubr.msk.bf16.gmra.mrb[180].mxu0 %vm8183_vm5, %v17502_v58 }
 0x776   : > { %8627 = vmatprep.mubr.bf16.mxu1 %v19110_v1  ;;  %9382 = vmatprep.mubr.bf16.mxu0 %v19110_v1 }
 0x77d   : > { %11048 = vmatmul.mubr.msk.bf16.gmra.mrb[228].mxu1 %vm8183_vm5, %v17522_v32  ;;  %11158 = vmatmul.mubr.msk.bf16.gmra.mrb[184].mxu0 %vm8183_vm5, %v17522_v32 }
 0x77e   : > { %8637 = vmatprep.mubr.bf16.mxu1 %v19110_v1  ;;  %9392 = vmatprep.mubr.bf16.mxu0 %v19110_v1 }
 0x785   : > { %11049 = vmatmul.mubr.msk.bf16.gmra.mrb[232].mxu1 %vm8183_vm5, %v17518_v8  ;;  %11159 = vmatmul.mubr.msk.bf16.gmra.mrb[188].mxu0 %vm8183_vm5, %v17518_v8 }
 0x786   : > { %8647 = vmatprep.mubr.bf16.mxu1 %v19110_v1  ;;  %9402 = vmatprep.mubr.bf16.mxu0 %v19110_v1 }
 0x78d   : > { %11050 = vmatmul.mubr.msk.bf16.gmra.mrb[236].mxu1 %vm8183_vm5, %v17538_v51  ;;  %11160 = vmatmul.mubr.msk.bf16.gmra.mrb[192].mxu0 %vm8183_vm5, %v17538_v51 }
 0x78e   : > { %8657 = vmatprep.mubr.bf16.mxu1 %v19110_v1  ;;  %9412 = vmatprep.mubr.bf16.mxu0 %v19110_v1 }
 0x795   : > { %11051 = vmatmul.mubr.msk.bf16.gmra.mrb[240].mxu1 %vm8183_vm5, %v17534_v48  ;;  %11161 = vmatmul.mubr.msk.bf16.gmra.mrb[196].mxu0 %vm8183_vm5, %v17534_v48 }
 0x796   : > { %8667 = vmatprep.mubr.bf16.mxu1 %v19110_v1  ;;  %9422 = vmatprep.mubr.bf16.mxu0 %v19110_v1 }
 0x79d   : > { %11052 = vmatmul.mubr.msk.bf16.gmra.mrb[244].mxu1 %vm8183_vm5, %v17554_v37  ;;  %11162 = vmatmul.mubr.msk.bf16.gmra.mrb[200].mxu0 %vm8183_vm5, %v17554_v37 }
 0x79e   : > { %8677 = vmatprep.mubr.bf16.mxu1 %v19110_v1  ;;  %9432 = vmatprep.mubr.bf16.mxu0 %v19110_v1 }
 0x7a5   : > { %11053 = vmatmul.mubr.msk.bf16.gmra.mrb[248].mxu1 %vm8183_vm5, %v17550_v39  ;;  %11163 = vmatmul.mubr.msk.bf16.gmra.mrb[204].mxu0 %vm8183_vm5, %v17550_v39 }
 0x7a6   : > { %8687 = vmatprep.mubr.bf16.mxu1 %v19110_v1  ;;  %9442 = vmatprep.mubr.bf16.mxu0 %v19110_v1 }
 0x7ad   : > { %11054 = vmatmul.mubr.msk.bf16.gmra.mrb[252].mxu1 %vm8183_vm5, %v17570_v45  ;;  %11164 = vmatmul.mubr.msk.bf16.gmra.mrb[208].mxu0 %vm8183_vm5, %v17570_v45 }
 0x7ae   : > { %8697 = vmatprep.mubr.bf16.mxu1 %v19110_v1  ;;  %9452 = vmatprep.mubr.bf16.mxu0 %v19110_v1 }
 0x7b5   : > { %11055 = vmatmul.mubr.msk.bf16.gmra.mrb[0].mxu1 %vm8183_vm5, %v17566_v27  ;;  %11165 = vmatmul.mubr.msk.bf16.gmra.mrb[212].mxu0 %vm8183_vm5, %v17566_v27 }
 0x7b6   : > { %8707 = vmatprep.mubr.bf16.mxu1 %v19110_v1  ;;  %9462 = vmatprep.mubr.bf16.mxu0 %v19110_v1 }
 0x7bd   : > { %11056 = vmatmul.mubr.msk.bf16.gmra.mrb[4].mxu1 %vm8183_vm5, %v17586_v47  ;;  %11166 = vmatmul.mubr.msk.bf16.gmra.mrb[216].mxu0 %vm8183_vm5, %v17586_v47 }
 0x7be   : > { %8717 = vmatprep.mubr.bf16.mxu1 %v19110_v1  ;;  %9472 = vmatprep.mubr.bf16.mxu0 %v19110_v1 }
 0x7c5   : > { %11057 = vmatmul.mubr.msk.bf16.gmra.mrb[8].mxu1 %vm8183_vm5, %v17582_v62  ;;  %11167 = vmatmul.mubr.msk.bf16.gmra.mrb[220].mxu0 %vm8183_vm5, %v17582_v62 }
 0x7c6   : > { %8727 = vmatprep.mubr.bf16.mxu1 %v19110_v1  ;;  %9482 = vmatprep.mubr.bf16.mxu0 %v19110_v1 }
 0x7cd   : > { %11058 = vmatmul.mubr.msk.bf16.gmra.mrb[20].mxu1 %vm8183_vm5, %v17598_v35  ;;  %11168 = vmatmul.mubr.msk.bf16.gmra.mrb[232].mxu0 %vm8183_vm5, %v17598_v35 }
 0x7ce   : > { %8733 = vmatprep.mubr.bf16.mxu1 %v19110_v1  ;;  %9488 = vmatprep.mubr.bf16.mxu0 %v19110_v1 }
 0x7d5   : > { %11059 = vmatmul.mubr.msk.bf16.gmra.mrb[24].mxu1 %vm8183_vm5, %v17596_v40  ;;  %11169 = vmatmul.mubr.msk.bf16.gmra.mrb[236].mxu0 %vm8183_vm5, %v17596_v40 }
 0x7f0   : > { %v8484_v18 = vpop.f32.mrb[12].mxu1  ;;  %v9239_v6 = vpop.f32.mrb[224].mxu0 }
 0x7f1   : > { %v8485_v58 = vpop.f32.mrb[13].mxu1  ;;  %v9240_v59 = vpop.f32.mrb[225].mxu0 }
 0x7f2   : > { %v8486_v8 = vpop.f32.mrb[14].mxu1  ;;  %v9241_v32 = vpop.f32.mrb[226].mxu0 }
 0x7f3   : > { %v8487_v48 = vpop.f32.mrb[15].mxu1  ;;  %v9242_v51 = vpop.f32.mrb[227].mxu0 }
 0x7f8   : > { %v8490_v39 = vpop.f32.mrb[16].mxu1  ;;  %v9245_v37 = vpop.f32.mrb[228].mxu0 }
 0x7f9   : > { %v8491_v27 = vpop.f32.mrb[17].mxu1  ;;  %v9246_v45 = vpop.f32.mrb[229].mxu0 }
 0x7fa   : > { %v8492_v62 = vpop.f32.mrb[18].mxu1  ;;  %v9247_v47 = vpop.f32.mrb[230].mxu0 }
 0x7fb   : > { %v8493_v40 = vpop.f32.mrb[19].mxu1  ;;  %v9248_v35 = vpop.f32.mrb[231].mxu0 }
 0x800   : > { %v8529_v12 = vpop.f32.mrb[188].mxu1  ;;  %v9284_v31 = vpop.f32.mrb[144].mxu0 }
 0x801   : > { %v9495_v3 = vmax.f32 %v8529_v12, %v9284_v31  ;;  %v8531_v50 = vpop.f32.mrb[189].mxu1  ;;  %v9286_v7 = vpop.f32.mrb[145].mxu0 }
 0x802   : > { %v9496_v19 = vmax.f32 %v8531_v50, %v9286_v7  ;;  %v8533_v20 = vpop.f32.mrb[190].mxu1  ;;  %v9288_v24 = vpop.f32.mrb[146].mxu0 }
 0x803   : > { %v9497_v29 = vmax.f32 %v8533_v20, %v9288_v24  ;;  %v8535_v38 = vpop.f32.mrb[191].mxu1  ;;  %v9290_v44 = vpop.f32.mrb[147].mxu0  ;;  %v12788_v24 = vld [vmem:[%s18092_s8 + $0x70] sm:$0xff]  }
 0x804   : > { %v9498_v25 = vmax.f32 %v8535_v38, %v9290_v44  ;;  %11266 = vmatprep.subr.bf16.mxu1 %v12788_v24 }
 0x808   : > { %v8539_v36 = vpop.f32.mrb[192].mxu1  ;;  %v9294_v21 = vpop.f32.mrb[148].mxu0 }
 0x809   : > { %v9499_v9 = vmax.f32 %v8539_v36, %v9294_v21  ;;  %v8541_v60 = vpop.f32.mrb[193].mxu1  ;;  %v9296_v0 = vpop.f32.mrb[149].mxu0 }
 0x80a   : > { %v9500_v15 = vmax.f32 %v8541_v60, %v9296_v0  ;;  %v8543_v43 = vpop.f32.mrb[194].mxu1  ;;  %v9298_v61 = vpop.f32.mrb[150].mxu0 }
 0x80b   : > { %v9501_v52 = vmax.f32 %v8543_v43, %v9298_v61  ;;  %v8545_v28 = vpop.f32.mrb[195].mxu1  ;;  %v9300_v5 = vpop.f32.mrb[151].mxu0 }
 0x80c   : > { %v9502_v17 = vmax.f32 %v8545_v28, %v9300_v5  ;;  %v12790_v5 = vld [vmem:[%s18092_s8 + $0x78] sm:$0xff]  }
 0x810   : > { %v8549_v22 = vpop.f32.mrb[196].mxu1  ;;  %v9304_v4 = vpop.f32.mrb[152].mxu0 }
 0x811   : > { %v9503_v10 = vmax.f32 %v8549_v22, %v9304_v4  ;;  %v8551_v46 = vpop.f32.mrb[197].mxu1  ;;  %v9306_v41 = vpop.f32.mrb[153].mxu0 }
 0x812   : > { %v9504_v57 = vmax.f32 %v8551_v46, %v9306_v41  ;;  %v8553_v11 = vpop.f32.mrb[198].mxu1  ;;  %v9308_v2 = vpop.f32.mrb[154].mxu0 }
 0x813   : > { %v17806_v23 = vmax.f32 %v9495_v3, %v9503_v10  ;;  %v9505_v33 = vmax.f32 %v8553_v11, %v9308_v2  ;;  %v8555_v63 = vpop.f32.mrb[199].mxu1  ;;  %v9310_v14 = vpop.f32.mrb[155].mxu0 }
 0x814   : > { %v17811_v1 = vmax.f32 %v9496_v19, %v9504_v57  ;;  %v9506_v16 = vmax.f32 %v8555_v63, %v9310_v14 }
 0x815   : > { %v17816_v26 = vmax.f32 %v9497_v29, %v9505_v33  ;;  %v12789_v29 = vld [vmem:[%s18092_s8 + $0x30] sm:$0xff]  }
 0x816   : > { %v17818_v13 = vmax.f32 %v9498_v25, %v9506_v16  ;;  %11267 = vmatpush3.bf16.msra.mxu1 %v12789_v29 }
 0x817   : > { %v9736_v49 = vpack.c.bf16 %v17816_v26, %v17806_v23  ;;  %11268 = vmatprep.subr.bf16.mxu1 %v12790_v5 }
 0x818   : > { %v8559_v53 = vpop.f32.mrb[200].mxu1  ;;  %v9314_v56 = vpop.f32.mrb[156].mxu0 }
 0x819   : > { %v9507_v42 = vmax.f32 %v8559_v53, %v9314_v56  ;;  %v8561_v18 = vpop.f32.mrb[201].mxu1  ;;  %v9316_v6 = vpop.f32.mrb[157].mxu0 }
 0x81a   : > { %v9508_v58 = vmax.f32 %v8561_v18, %v9316_v6  ;;  %v8563_v59 = vpop.f32.mrb[202].mxu1  ;;  %v9318_v8 = vpop.f32.mrb[158].mxu0 }
 0x81b   : > { %v17822_v32 = vmax.f32 %v9499_v9, %v9507_v42  ;;  %v9509_v48 = vmax.f32 %v8563_v59, %v9318_v8  ;;  %v8565_v51 = vpop.f32.mrb[203].mxu1  ;;  %v9320_v39 = vpop.f32.mrb[159].mxu0 }
 0x81c   : > { %v17824_v37 = vmax.f32 %v9500_v15, %v9508_v58  ;;  %v9510_v27 = vmax.f32 %v8565_v51, %v9320_v39 }
 0x81d   : > { %v17826_v45 = vmax.f32 %v9501_v52, %v9509_v48 }
 0x81e   : > { %v17828_v62 = vmax.f32 %v9502_v17, %v9510_v27  ;;  %v12791_v17 = vld [vmem:[%s18092_s8 + $0x38] sm:$0xff]  }
 0x81f   : > { %v9743_v47 = vpack.c.bf16 %v17826_v45, %v17822_v32  ;;  %11269 = vmatpush3.bf16.msra.mxu1 %v12791_v17  ;;  %v12802_v32 = vld [vmem:[%s18092_s8 + $0xe8] sm:$0xff]  }
 0x820   : > { %v8569_v40 = vpop.f32.mrb[204].mxu1  ;;  %v9324_v35 = vpop.f32.mrb[160].mxu0  ;;  %v12803_v45 = vld [vmem:[%s18092_s8 + $0xa8] sm:$0xff]  }
 0x821   : > { %v9511_v55 = vmax.f32 %v8569_v40, %v9324_v35  ;;  %v8571_v12 = vpop.f32.mrb[205].mxu1  ;;  %v9326_v31 = vpop.f32.mrb[161].mxu0 }
 0x822   : > { %v9512_v54 = vmax.f32 %v8571_v12, %v9326_v31  ;;  %v8573_v3 = vpop.f32.mrb[206].mxu1  ;;  %v9328_v50 = vpop.f32.mrb[162].mxu0 }
 0x823   : > { %v9513_v7 = vmax.f32 %v8573_v3, %v9328_v50  ;;  %v8575_v19 = vpop.f32.mrb[207].mxu1  ;;  %v9330_v20 = vpop.f32.mrb[163].mxu0 }
 0x824   : > { %v9514_v38 = vmax.f32 %v8575_v19, %v9330_v20 }
 0x828   : > { %v8579_v44 = vpop.f32.mrb[208].mxu1  ;;  %v9334_v25 = vpop.f32.mrb[164].mxu0 }
 0x829   : > { %v9515_v36 = vmax.f32 %v8579_v44, %v9334_v25  ;;  %v8581_v21 = vpop.f32.mrb[209].mxu1  ;;  %v9336_v9 = vpop.f32.mrb[165].mxu0 }
 0x82a   : > { %v9516_v60 = vmax.f32 %v8581_v21, %v9336_v9  ;;  %v8583_v0 = vpop.f32.mrb[210].mxu1  ;;  %v9338_v15 = vpop.f32.mrb[166].mxu0 }
 0x82b   : > { %v9517_v43 = vmax.f32 %v8583_v0, %v9338_v15  ;;  %v8585_v61 = vpop.f32.mrb[211].mxu1  ;;  %v9340_v52 = vpop.f32.mrb[167].mxu0 }
 0x82c   : > { %v9518_v28 = vmax.f32 %v8585_v61, %v9340_v52 }
 0x830   : > { %v8589_v22 = vpop.f32.mrb[212].mxu1  ;;  %v9344_v4 = vpop.f32.mrb[168].mxu0 }
 0x831   : > { %v9519_v10 = vmax.f32 %v8589_v22, %v9344_v4  ;;  %v8591_v46 = vpop.f32.mrb[213].mxu1  ;;  %v9346_v41 = vpop.f32.mrb[169].mxu0 }
 0x832   : > { %v9520_v57 = vmax.f32 %v8591_v46, %v9346_v41  ;;  %v8593_v11 = vpop.f32.mrb[214].mxu1  ;;  %v9348_v2 = vpop.f32.mrb[170].mxu0 }
 0x833   : > { %v9583_v33 = vmax.f32 %v9511_v55, %v9519_v10  ;;  %v9521_v63 = vmax.f32 %v8593_v11, %v9348_v2  ;;  %v8595_v14 = vpop.f32.mrb[215].mxu1  ;;  %v9350_v34 = vpop.f32.mrb[171].mxu0 }
 0x834   : > { %v17844_v16 = vmax.f32 %v9512_v54, %v9520_v57  ;;  %v9522_v30 = vmax.f32 %v8595_v14, %v9350_v34 }
 0x835   : > { %v9585_v53 = vmax.f32 %v9513_v7, %v9521_v63 }
 0x836   : > { %v17846_v56 = vmax.f32 %v9514_v38, %v9522_v30 }
 0x837   : > { %v12186_v42 = vpack.i.bf16 %v9585_v53, %v9583_v33 }
 0x838   : > { %v8599_v18 = vpop.f32.mrb[216].mxu1  ;;  %v9354_v6 = vpop.f32.mrb[172].mxu0  ;;  %v12201_v58 = vpack.i.bf16 %v17846_v56, %v17844_v16 }
 0x839   : > { %v9523_v59 = vmax.f32 %v8599_v18, %v9354_v6  ;;  %v9356_v8 = vpop.f32.mrb[173].mxu0  ;;  %12187 = vrot.lane.b32.xlu0 %v12186_v42, %s12837_s15  ;;  %v8601_v48 = vpop.f32.mrb[217].mxu1 }
 0x83a   : > { %v9524_v51 = vmax.f32 %v8601_v48, %v9356_v8  ;;  %v8603_v39 = vpop.f32.mrb[218].mxu1  ;;  %v9358_v27 = vpop.f32.mrb[174].mxu0  ;;  %v12792_v8 = vld [vmem:[%s18092_s8 + $0xc0] sm:$0xff]  }
 0x83b   : > { %v9587_v40 = vmax.f32 %v9515_v36, %v9523_v59  ;;  %v9525_v35 = vmax.f32 %v8603_v39, %v9358_v27  ;;  %v8605_v55 = vpop.f32.mrb[219].mxu1  ;;  %v9360_v12 = vpop.f32.mrb[175].mxu0  ;;  %11282 = vmatprep.subr.bf16.mxu1 %v12792_v8 }
 0x83c   : > { %v17851_v31 = vmax.f32 %v9516_v60, %v9524_v51  ;;  %v9526_v54 = vmax.f32 %v8605_v55, %v9360_v12 }
 0x83d   : > { %v9589_v3 = vmax.f32 %v9517_v43, %v9525_v35 }
 0x83e   : > { %v17853_v50 = vmax.f32 %v9518_v28, %v9526_v54 }
 0x83f   : > { %v12191_v7 = vpack.i.bf16 %v9589_v3, %v9587_v40 }
 0x840   : > { %v8609_v19 = vpop.f32.mrb[220].mxu1  ;;  %v9364_v20 = vpop.f32.mrb[176].mxu0  ;;  %v12226_v24 = vpack.i.bf16 %v17853_v50, %v17851_v31 }
 0x841   : > { %v9527_v29 = vmax.f32 %v8609_v19, %v9364_v20  ;;  %v9366_v38 = vpop.f32.mrb[177].mxu0  ;;  %12192 = vrot.lane.b32.xlu1 %v12191_v7, %s12837_s15  ;;  %v8611_v44 = vpop.f32.mrb[221].mxu1 }
 0x842   : > { %v9528_v25 = vmax.f32 %v8611_v44, %v9366_v38  ;;  %v8613_v36 = vpop.f32.mrb[222].mxu1  ;;  %v9368_v21 = vpop.f32.mrb[178].mxu0 }
 0x843   : > { %v9529_v9 = vmax.f32 %v8613_v36, %v9368_v21  ;;  %v8615_v60 = vpop.f32.mrb[223].mxu1  ;;  %v9370_v0 = vpop.f32.mrb[179].mxu0 }
 0x844   : > { %v9530_v15 = vmax.f32 %v8615_v60, %v9370_v0 }
 0x848   : > { %v8619_v43 = vpop.f32.mrb[224].mxu1  ;;  %v9374_v61 = vpop.f32.mrb[180].mxu0 }
 0x849   : > { %v9531_v52 = vmax.f32 %v8619_v43, %v9374_v61  ;;  %v8621_v28 = vpop.f32.mrb[225].mxu1  ;;  %v9376_v5 = vpop.f32.mrb[181].mxu0 }
 0x84a   : > { %v9532_v17 = vmax.f32 %v8621_v28, %v9376_v5  ;;  %v8623_v22 = vpop.f32.mrb[226].mxu1  ;;  %v9378_v4 = vpop.f32.mrb[182].mxu0 }
 0x84b   : > { %v9533_v10 = vmax.f32 %v8623_v22, %v9378_v4  ;;  %v8625_v46 = vpop.f32.mrb[227].mxu1  ;;  %v9380_v41 = vpop.f32.mrb[183].mxu0 }
 0x84c   : > { %v9534_v57 = vmax.f32 %v8625_v46, %v9380_v41 }
 0x850   : > { %v8629_v11 = vpop.f32.mrb[228].mxu1  ;;  %v9384_v2 = vpop.f32.mrb[184].mxu0 }
 0x851   : > { %v9535_v33 = vmax.f32 %v8629_v11, %v9384_v2  ;;  %v8631_v63 = vpop.f32.mrb[229].mxu1  ;;  %v9386_v14 = vpop.f32.mrb[185].mxu0 }
 0x852   : > { %v9536_v34 = vmax.f32 %v8631_v63, %v9386_v14  ;;  %v8633_v30 = vpop.f32.mrb[230].mxu1  ;;  %v9388_v53 = vpop.f32.mrb[186].mxu0 }
 0x853   : > { %v9591_v42 = vmax.f32 %v9527_v29, %v9535_v33  ;;  %v9537_v18 = vmax.f32 %v8633_v30, %v9388_v53  ;;  %v8635_v6 = vpop.f32.mrb[231].mxu1  ;;  %v9390_v59 = vpop.f32.mrb[187].mxu0 }
 0x854   : > { %v9592_v48 = vmax.f32 %v9528_v25, %v9536_v34  ;;  %v9538_v51 = vmax.f32 %v8635_v6, %v9390_v59 }
 0x855   : > { %v9593_v39 = vmax.f32 %v9529_v9, %v9537_v18 }
 0x856   : > { %v9594_v27 = vmax.f32 %v9530_v15, %v9538_v51  ;;  %v12196_v40 = vpack.i.bf16 %v9592_v48, %v9591_v42 }
 0x858   : > { %v9394_v35 = vpop.f32.mrb[188].mxu0  ;;  %12197 = vrot.lane.b32.xlu0 %v12196_v40, %s12838_s17  ;;  %v8639_v55 = vpop.f32.mrb[232].mxu1  ;;  %v12206_v12 = vpack.i.bf16 %v9594_v27, %v9593_v39 }
 0x859   : > { %v9539_v54 = vmax.f32 %v8639_v55, %v9394_v35  ;;  %v8641_v3 = vpop.f32.mrb[233].mxu1  ;;  %v9396_v7 = vpop.f32.mrb[189].mxu0 }
 0x85a   : > { %v9540_v19 = vmax.f32 %v8641_v3, %v9396_v7  ;;  %v9398_v20 = vpop.f32.mrb[190].mxu0  ;;  %12207 = vrot.lane.b32.xlu1 %v12206_v12, %s12838_s17  ;;  %v8643_v29 = vpop.f32.mrb[234].mxu1 }
 0x85b   : > { %v9595_v38 = vmax.f32 %v9531_v52, %v9539_v54  ;;  %v9541_v44 = vmax.f32 %v8643_v29, %v9398_v20  ;;  %v8645_v25 = vpop.f32.mrb[235].mxu1  ;;  %v9400_v36 = vpop.f32.mrb[191].mxu0 }
 0x85c   : > { %v9596_v21 = vmax.f32 %v9532_v17, %v9540_v19  ;;  %v9542_v9 = vmax.f32 %v8645_v25, %v9400_v36  ;;  %12202 = vrot.lane.b32.xlu0 %v12201_v58, %s12837_s15 }
 0x85d   : > { %v17867_v60 = vmax.f32 %v9533_v10, %v9541_v44 }
 0x85e   : > { %v17869_v0 = vmax.f32 %v9534_v57, %v9542_v9  ;;  %v12216_v15 = vpack.i.bf16 %v9596_v21, %v9595_v38 }
 0x860   : > { %v9404_v43 = vpop.f32.mrb[192].mxu0  ;;  %12217 = vrot.lane.b32.xlu0 %v12216_v15, %s12838_s17  ;;  %v8649_v61 = vpop.f32.mrb[236].mxu1  ;;  %v12221_v52 = vpack.i.bf16 %v17869_v0, %v17867_v60 }
 0x861   : > { %v9543_v28 = vmax.f32 %v8649_v61, %v9404_v43  ;;  %v8651_v5 = vpop.f32.mrb[237].mxu1  ;;  %v9406_v17 = vpop.f32.mrb[193].mxu0 }
 0x862   : > { %v9544_v22 = vmax.f32 %v8651_v5, %v9406_v17  ;;  %v8653_v4 = vpop.f32.mrb[238].mxu1  ;;  %v9408_v46 = vpop.f32.mrb[194].mxu0 }
 0x863   : > { %v9545_v16 = vmax.f32 %v8653_v4, %v9408_v46  ;;  %v8655_v56 = vpop.f32.mrb[239].mxu1  ;;  %v9410_v58 = vpop.f32.mrb[195].mxu0 }
 0x864   : > { %v9546_v10 = vmax.f32 %v8655_v56, %v9410_v58  ;;  %12227 = vrot.lane.b32.xlu0 %v12226_v24, %s12837_s15  ;;  %s12839_s15 = smov 96  }
 0x868   : > { %v8659_v41 = vpop.f32.mrb[240].mxu1  ;;  %v9414_v57 = vpop.f32.mrb[196].mxu0 }
 0x869   : > { %v9547_v11 = vmax.f32 %v8659_v41, %v9414_v57  ;;  %v8661_v2 = vpop.f32.mrb[241].mxu1  ;;  %v9416_v33 = vpop.f32.mrb[197].mxu0 }
 0x86a   : > { %v9548_v63 = vmax.f32 %v8661_v2, %v9416_v33  ;;  %v8663_v14 = vpop.f32.mrb[242].mxu1  ;;  %v9418_v34 = vpop.f32.mrb[198].mxu0 }
 0x86b   : > { %v9549_v30 = vmax.f32 %v8663_v14, %v9418_v34  ;;  %v8665_v53 = vpop.f32.mrb[243].mxu1  ;;  %v9420_v42 = vpop.f32.mrb[199].mxu0 }
 0x86c   : > { %v9550_v18 = vmax.f32 %v8665_v53, %v9420_v42 }
 0x870   : > { %v8669_v6 = vpop.f32.mrb[244].mxu1  ;;  %v9424_v59 = vpop.f32.mrb[200].mxu0 }
 0x871   : > { %v9551_v8 = vmax.f32 %v8669_v6, %v9424_v59  ;;  %v8671_v48 = vpop.f32.mrb[245].mxu1  ;;  %v9426_v51 = vpop.f32.mrb[201].mxu0 }
 0x872   : > { %v9552_v39 = vmax.f32 %v8671_v48, %v9426_v51  ;;  %v8673_v31 = vpop.f32.mrb[246].mxu1  ;;  %v9428_v50 = vpop.f32.mrb[202].mxu0 }
 0x873   : > { %v9599_v24 = vmax.f32 %v9543_v28, %v9551_v8  ;;  %v9553_v27 = vmax.f32 %v8673_v31, %v9428_v50  ;;  %v8675_v40 = vpop.f32.mrb[247].mxu1  ;;  %v9430_v35 = vpop.f32.mrb[203].mxu0 }
 0x874   : > { %v9600_v55 = vmax.f32 %v9544_v22, %v9552_v39  ;;  %v9554_v12 = vmax.f32 %v8675_v40, %v9430_v35 }
 0x875   : > { %v9601_v54 = vmax.f32 %v9545_v16, %v9553_v27 }
 0x876   : > { %v9602_v3 = vmax.f32 %v9546_v10, %v9554_v12 }
 0x877   : > { %v12211_v7 = vpack.i.bf16 %v9601_v54, %v9599_v24 }
 0x878   : > { %v12236_v19 = vpack.i.bf16 %v9602_v3, %v9600_v55  ;;  %v8679_v20 = vpop.f32.mrb[248].mxu1  ;;  %v9434_v29 = vpop.f32.mrb[204].mxu0 }
 0x879   : > { %v9555_v38 = vmax.f32 %v8679_v20, %v9434_v29  ;;  %v9436_v44 = vpop.f32.mrb[205].mxu0  ;;  %12212 = vrot.lane.b32.xlu1 %v12211_v7, %s12839_s15  ;;  %v8681_v25 = vpop.f32.mrb[249].mxu1 }
 0x87a   : > { %v9556_v36 = vmax.f32 %v8681_v25, %v9436_v44  ;;  %v9438_v21 = vpop.f32.mrb[206].mxu0  ;;  %12237 = vrot.lane.b32.xlu0 %v12236_v19, %s12839_s15  ;;  %v8683_v9 = vpop.f32.mrb[250].mxu1 }
 0x87b   : > { %v9603_v60 = vmax.f32 %v9547_v11, %v9555_v38  ;;  %v9557_v0 = vmax.f32 %v8683_v9, %v9438_v21  ;;  %v8685_v15 = vpop.f32.mrb[251].mxu1  ;;  %v9440_v43 = vpop.f32.mrb[207].mxu0 }
 0x87c   : > { %v9604_v61 = vmax.f32 %v9548_v63, %v9556_v36  ;;  %v9558_v28 = vmax.f32 %v8685_v15, %v9440_v43 }
 0x87d   : > { %v9605_v5 = vmax.f32 %v9549_v30, %v9557_v0  ;;  %12222 = vrot.lane.b32.xlu1 %v12221_v52, %s12838_s17 }
 0x87e   : > { %v9606_v17 = vmax.f32 %v9550_v18, %v9558_v28 }
 0x87f   : > { %v12231_v22 = vpack.i.bf16 %v9605_v5, %v9603_v60 }
 0x880   : > { %v12241_v4 = vpack.i.bf16 %v9606_v17, %v9604_v61  ;;  %v8689_v46 = vpop.f32.mrb[252].mxu1  ;;  %v9444_v16 = vpop.f32.mrb[208].mxu0 }
 0x881   : > { %v9559_v56 = vmax.f32 %v8689_v46, %v9444_v16  ;;  %v9446_v58 = vpop.f32.mrb[209].mxu0  ;;  %12232 = vrot.lane.b32.xlu1 %v12231_v22, %s12839_s15  ;;  %v8691_v10 = vpop.f32.mrb[253].mxu1 }
 0x882   : > { %v9560_v41 = vmax.f32 %v8691_v10, %v9446_v58  ;;  %v8693_v57 = vpop.f32.mrb[254].mxu1  ;;  %v9448_v11 = vpop.f32.mrb[210].mxu0 }
 0x883   : > { %v9561_v2 = vmax.f32 %v8693_v57, %v9448_v11  ;;  %v8695_v33 = vpop.f32.mrb[255].mxu1  ;;  %v9450_v63 = vpop.f32.mrb[211].mxu0 }
 0x884   : > { %v9562_v14 = vmax.f32 %v8695_v33, %v9450_v63 }
 0x885   : > { %12242 = vrot.lane.b32.xlu1 %v12241_v4, %s12839_s15 }
 0x888   : > { %v8699_v52 = vpop.f32.mrb[0].mxu1  ;;  %v9454_v34 = vpop.f32.mrb[212].mxu0 }
 0x889   : > { %v9563_v30 = vmax.f32 %v8699_v52, %v9454_v34  ;;  %v8701_v53 = vpop.f32.mrb[1].mxu1  ;;  %v9456_v42 = vpop.f32.mrb[213].mxu0 }
 0x88a   : > { %v9564_v18 = vmax.f32 %v8701_v53, %v9456_v42  ;;  %v8703_v6 = vpop.f32.mrb[2].mxu1  ;;  %v9458_v59 = vpop.f32.mrb[214].mxu0 }
 0x88b   : > { %v9565_v8 = vmax.f32 %v8703_v6, %v9458_v59  ;;  %v8705_v48 = vpop.f32.mrb[3].mxu1  ;;  %v9460_v51 = vpop.f32.mrb[215].mxu0 }
 0x88c   : > { %v9566_v39 = vmax.f32 %v8705_v48, %v9460_v51 }
 0x890   : > { %v8709_v31 = vpop.f32.mrb[4].mxu1  ;;  %v9464_v50 = vpop.f32.mrb[216].mxu0 }
 0x891   : > { %v9567_v24 = vmax.f32 %v8709_v31, %v9464_v50  ;;  %v8711_v27 = vpop.f32.mrb[5].mxu1  ;;  %v9466_v40 = vpop.f32.mrb[217].mxu0 }
 0x892   : > { %v9568_v35 = vmax.f32 %v8711_v27, %v9466_v40  ;;  %v8713_v55 = vpop.f32.mrb[6].mxu1  ;;  %v9468_v12 = vpop.f32.mrb[218].mxu0  ;;  %v12793_v40 = vld [vmem:[%s18092_s8 + $0x80] sm:$0xff]  }
 0x893   : > { %v17883_v54 = vmax.f32 %v9559_v56, %v9567_v24  ;;  %v9569_v3 = vmax.f32 %v8713_v55, %v9468_v12  ;;  %v8715_v7 = vpop.f32.mrb[7].mxu1  ;;  %v9470_v19 = vpop.f32.mrb[219].mxu0 }
 0x894   : > { %v17885_v20 = vmax.f32 %v9560_v41, %v9568_v35  ;;  %v9570_v29 = vmax.f32 %v8715_v7, %v9470_v19  ;;  %v12794_v35 = vld [vmem:[%s18092_s8 + $0xc8] sm:$0xff]   ;;  %v12797_v7 = vld [vmem:[%s18092_s8 + $0x90] sm:$0xff]   ;;  %v12798_v19 = vld [vmem:[%s18092_s8 + $0xd8] sm:$0xff]  }
 0x895   : > { %v17887_v38 = vmax.f32 %v9561_v2, %v9569_v3  ;;  %v12796_v3 = vld [vmem:[%s18092_s8 + $0xd0] sm:$0xff]  }
 0x896   : > { %v17889_v44 = vmax.f32 %v9562_v14, %v9570_v29  ;;  %v12801_v29 = vld [vmem:[%s18092_s8 + $0xa0] sm:$0xff]  }
 0x897   : > { %v9741_v25 = vpack.c.bf16 %v17887_v38, %v17883_v54  ;;  %v12818_v54 = vld [vmem:[%s18092_s8 + $0x168] sm:$0xff]  }
 0x898   : > { %v9742_v36 = vpack.c.bf16 %v17889_v44, %v17885_v20  ;;  %v8719_v21 = vpop.f32.mrb[8].mxu1  ;;  %v9474_v9 = vpop.f32.mrb[220].mxu0  ;;  %v12819_v38 = vld [vmem:[%s18092_s8 + $0x128] sm:$0xff]   ;;  %v11170_v20 = vld [vmem:[%s18093_s9] ss:$0 sm:$0xff] }
 0x899   : > { %v9571_v60 = vmax.f32 %v8719_v21, %v9474_v9  ;;  %v8721_v0 = vpop.f32.mrb[9].mxu1  ;;  %v9476_v15 = vpop.f32.mrb[221].mxu0  ;;  %v12805_v21 = vld [vmem:[%s18092_s8 + $0xb0] sm:$0xff]   ;;  %v12806_v9 = vld [vmem:[%s18092_s8 + $0xf8] sm:$0xff]  }
 0x89a   : > { %v9572_v43 = vmax.f32 %v8721_v0, %v9476_v15  ;;  %v8723_v61 = vpop.f32.mrb[10].mxu1  ;;  %v9478_v28 = vpop.f32.mrb[222].mxu0  ;;  %v12807_v0 = vld [vmem:[%s18092_s8 + $0xb8] sm:$0xff]   ;;  %v12808_v15 = vld [vmem:[%s18092_s8 + $0x140] sm:$0xff]  }
 0x89b   : > { %v17895_v5 = vmax.f32 %v9563_v30, %v9571_v60  ;;  %v9573_v17 = vmax.f32 %v8723_v61, %v9478_v28  ;;  %v8725_v22 = vpop.f32.mrb[11].mxu1  ;;  %v9480_v4 = vpop.f32.mrb[223].mxu0 }
 0x89c   : > { %v17897_v46 = vmax.f32 %v9564_v18, %v9572_v43  ;;  %v9574_v16 = vmax.f32 %v8725_v22, %v9480_v4 }
 0x89d   : > { %v17899_v56 = vmax.f32 %v9565_v8, %v9573_v17 }
 0x89e   : > { %v17901_v58 = vmax.f32 %v9566_v39, %v9574_v16 }
 0x89f   : > { %v9748_v10 = vpack.c.bf16 %v17899_v56, %v17895_v5 }
 0x8a0   : > { %v9749_v41 = vpack.c.bf16 %v17901_v58, %v17897_v46  ;;  %v8729_v57 = vpop.f32.mrb[20].mxu1  ;;  %v9484_v11 = vpop.f32.mrb[232].mxu0 }
 0x8a1   : > { %v8730_v2 = vpop.f32.mrb[21].mxu1  ;;  %v9485_v33 = vpop.f32.mrb[233].mxu0 }
 0x8a2   : > { %v8731_v63 = vpop.f32.mrb[22].mxu1  ;;  %v9486_v14 = vpop.f32.mrb[234].mxu0 }
 0x8a3   : > { %v8732_v52 = vpop.f32.mrb[23].mxu1  ;;  %v9487_v34 = vpop.f32.mrb[235].mxu0 }
 0x8a8   : > { %v8735_v30 = vpop.f32.mrb[24].mxu1  ;;  %v9490_v53 = vpop.f32.mrb[236].mxu0 }
 0x8a9   : > { %v8736_v42 = vpop.f32.mrb[25].mxu1  ;;  %v9491_v18 = vpop.f32.mrb[237].mxu0 }
 0x8aa   : > { %v8737_v6 = vpop.f32.mrb[26].mxu1  ;;  %v9492_v59 = vpop.f32.mrb[238].mxu0 }
 0x8ab   : > { %v9493_v8 = vpop.f32.mrb[239].mxu0  ;;  %v12188_v48 = vpop.permute.xlu0 %12187 }
 0x8ac   : > { %v12190_v51 = vunpack.i.h.bf16 %v12188_v48  ;;  %v12189_v39 = vunpack.i.l.bf16 %v12188_v48  ;;  %v8738_v31 = vpop.f32.mrb[27].mxu1 }
 0x8ae   : > { %v9724_v50 = vsel %vm3282_vm2, %v17811_v1, %v12189_v39  ;;  %v9725_v24 = vsel %vm3282_vm2, %v17818_v13, %v12190_v51  ;;  %v12795_v1 = vld [vmem:[%s18092_s8 + $0x88] sm:$0xff]  }
 0x8af   : > { %v9737_v27 = vpack.c.bf16 %v9725_v24, %v9724_v50  ;;  %v12809_v24 = vld [vmem:[%s18092_s8 + $0x100] sm:$0xff]  }
 0x8b1   : > { %10195 = vmatprep.mubr.bf16.mxu1 %v9737_v27 }
 0x8b2   : > { %10196 = vmatmul.mubr.bf16.vlgmr.msra.gmra.mrb[28].mxu1 %v9736_v49 }
 0x8b3   : > { %v17920_v55 = vpop.permute.xlu1 %12192  ;;  %11283 = vmatpush3.bf16.msra.mxu1 %v12793_v40 }
 0x8b4   : > { %v12195_v13 = vunpack.i.h.bf16 %v17920_v55  ;;  %v12194_v12 = vunpack.i.l.bf16 %v17920_v55  ;;  %11284 = vmatprep.subr.bf16.mxu1 %v12794_v35  ;;  %v12810_v35 = vld [vmem:[%s18092_s8 + $0x148] sm:$0xff]   ;;  %v12812_v55 = vld [vmem:[%s18092_s8 + $0x150] sm:$0xff]  }
 0x8b6   : > { %v9726_v23 = vsel %vm3282_vm2, %v17824_v37, %v12194_v12  ;;  %v9727_v26 = vsel %vm3282_vm2, %v17828_v62, %v12195_v13  ;;  %v12799_v37 = vld [vmem:[%s18092_s8 + $0x98] sm:$0xff]   ;;  %v12800_v62 = vld [vmem:[%s18092_s8 + $0xe0] sm:$0xff]  }
 0x8b7   : > { %v9744_v49 = vpack.c.bf16 %v9727_v26, %v9726_v23  ;;  %11285 = vmatpush3.bf16.msra.mxu1 %v12795_v1 }
 0x8b8   : > { %11286 = vmatprep.subr.bf16.mxu1 %v12796_v3 }
 0x8b9   : > { %10203 = vmatprep.mubr.bf16.mxu1 %v9744_v49 }
 0x8ba   : > { %10204 = vmatmul.mubr.bf16.gmra.mrb[32].mxu1 %v9743_v47  ;;  %v12804_v47 = vld [vmem:[%s18092_s8 + $0xf0] sm:$0xff]  }
 0x8bb   : > { %11287 = vmatpush3.bf16.msra.mxu1 %v12797_v7 }
 0x8bc   : > { %11288 = vmatprep.subr.bf16.mxu1 %v12798_v19  ;;  %v12811_v19 = vld [vmem:[%s18092_s8 + $0x108] sm:$0xff]  }
 0x8bf   : > { %11289 = vmatpush3.bf16.msra.mxu1 %v12799_v37 }
 0x8c0   : > { %11290 = vmatprep.subr.bf16.mxu1 %v12800_v62 }
 0x8c3   : > { %11291 = vmatpush3.bf16.msra.mxu1 %v12801_v29 }
 0x8c4   : > { %11292 = vmatprep.subr.bf16.mxu1 %v12802_v32 }
 0x8c7   : > { %11293 = vmatpush3.bf16.msra.mxu1 %v12803_v45 }
 0x8c8   : > { %11294 = vmatprep.subr.bf16.mxu1 %v12804_v47 }
 0x8ca   : > { %v12198_v60 = vpop.permute.xlu0 %12197 }
 0x8cb   : > { %11295 = vmatpush3.bf16.msra.mxu1 %v12805_v21  ;;  %v12199_v22 = vunpack.i.l.bf16 %v12198_v60  ;;  %v12200_v52 = vunpack.i.h.bf16 %v12198_v60  ;;  %v12813_v21 = vld [vmem:[%s18092_s8 + $0x110] sm:$0xff]   ;;  %v12815_v60 = vld [vmem:[%s18092_s8 + $0x118] sm:$0xff]  }
 0x8cc   : > { %11296 = vmatprep.subr.bf16.mxu1 %v12806_v9  ;;  %v12208_v43 = vpop.permute.xlu1 %12207  ;;  %v12814_v9 = vld [vmem:[%s18092_s8 + $0x158] sm:$0xff]  }
 0x8cd   : > { %v12209_v4 = vunpack.i.l.bf16 %v12208_v43  ;;  %v12210_v34 = vunpack.i.h.bf16 %v12208_v43  ;;  %v9676_v6 = vsel %vm9675_vm6, %v12199_v22, %v12200_v52 }
 0x8ce   : > { %v12203_v61 = vpop.permute.xlu0 %12202 }
 0x8cf   : > { %v12205_v28 = vunpack.i.h.bf16 %v12203_v61  ;;  %v12204_v17 = vunpack.i.l.bf16 %v12203_v61  ;;  %11297 = vmatpush3.bf16.msra.mxu1 %v12807_v0  ;;  %v9677_v59 = vsel %vm9675_vm6, %v12209_v4, %v12210_v34  ;;  %v12816_v0 = vld [vmem:[%s18092_s8 + $0x160] sm:$0xff]   ;;  %v12821_v61 = vld [vmem:[%s18092_s8 + $0x130] sm:$0xff]  }
 0x8d0   : > { %11310 = vmatprep.subr.bf16.mxu1 %v12808_v15  ;;  %v12817_v15 = vld [vmem:[%s18092_s8 + $0x120] sm:$0xff]  }
 0x8d1   : > { %v9640_v16 = vsel %vm3282_vm2, %v12190_v51, %v12205_v28  ;;  %v9639_v57 = vsel %vm3282_vm2, %v12189_v39, %v12204_v17  ;;  %v12822_v28 = vld [vmem:[%s18092_s8 + $0x178] sm:$0xff]  }
 0x8d2   : > { %v9728_v11 = vsel %vm9675_vm6, %v9639_v57, %v12199_v22  ;;  %v9729_v2 = vsel %vm9675_vm6, %v9640_v16, %v12209_v4  ;;  %v12218_v63 = vpop.permute.xlu0 %12217  ;;  %v12823_v4 = vld [vmem:[%s18092_s8 + $0x138] sm:$0xff]   ;;  %v12824_v16 = vld [vmem:[%s18092_s8 + $0x180] sm:$0xff]  }
 0x8d3   : > { %v9738_v33 = vpack.c.bf16 %v9729_v2, %v9728_v11  ;;  %v12219_v27 = vunpack.i.l.bf16 %v12218_v63  ;;  %v12220_v1 = vunpack.i.h.bf16 %v12218_v63  ;;  %v12825_v63 = vld [vmem:[%s18092_s8 + $0x188] sm:$0xff]  }
 0x8d6   : > { %v12228_v14 = vpop.permute.xlu0 %12227 }
 0x8d7   : > { %v12229_v30 = vunpack.i.l.bf16 %v12228_v14  ;;  %v12230_v8 = vunpack.i.h.bf16 %v12228_v14 }
 0x8d9   : > { %v9641_v39 = vsel %vm3282_vm2, %v12194_v12, %v12229_v30  ;;  %v9642_v3 = vsel %vm3282_vm2, %v12195_v13, %v12230_v8  ;;  %v9678_v13 = vsel %vm9675_vm6, %v12219_v27, %v12220_v1 }
 0x8da   : > { %v9730_v12 = vsel %vm9675_vm6, %v9641_v39, %v12219_v27 }
 0x8eb   : > { %v17979_v53 = vpop.permute.xlu1 %12212 }
 0x8ec   : > { %v12215_v42 = vunpack.i.h.bf16 %v17979_v53  ;;  %v12214_v18 = vunpack.i.l.bf16 %v17979_v53  ;;  %v12238_v43 = vpop.permute.xlu0 %12237 }
 0x8ed   : > { %v12240_v17 = vunpack.i.h.bf16 %v12238_v43  ;;  %v12239_v22 = vunpack.i.l.bf16 %v12238_v43 }
 0x8ee   : > { %v9732_v48 = vsel %vm8183_vm5, %v9676_v6, %v12214_v18  ;;  %v9733_v51 = vsel %vm8183_vm5, %v9677_v59, %v12215_v42 }
 0x8ef   : > { %v12223_v31 = vpop.permute.xlu1 %12222  ;;  %v9739_v50 = vpack.c.bf16 %v9733_v51, %v9732_v48  ;;  %v9713_v57 = vsel %vm8183_vm5, %v12215_v42, %v12240_v17  ;;  %v9712_v11 = vsel %vm8183_vm5, %v12214_v18, %v12239_v22 }
 0x8f0   : > { %v12224_v40 = vunpack.i.l.bf16 %v12223_v31  ;;  %v12225_v23 = vunpack.i.h.bf16 %v12223_v31 }
 0x8f1   : > { %10244 = vmatprep.mubr.bf16.mxu1 %v9739_v50 }
 0x8f2   : > { %v9731_v26 = vsel %vm9675_vm6, %v9642_v3, %v12224_v40  ;;  %10245 = vmatmul.mubr.bf16.vlgmr.msra.gmra.mrb[36].mxu1 %v9738_v33  ;;  %v9679_v29 = vsel %vm9675_vm6, %v12224_v40, %v12225_v23  ;;  %v9740_v33 = vpack.c.bf16 %v9713_v57, %v9712_v11 }
 0x8f3   : > { %v9745_v49 = vpack.c.bf16 %v9731_v26, %v9730_v12  ;;  %11311 = vmatpush3.bf16.msra.mxu1 %v12809_v24  ;;  %v12233_v7 = vpop.permute.xlu1 %12232 }
 0x8f4   : > { %v12235_v37 = vunpack.i.h.bf16 %v12233_v7  ;;  %v12234_v62 = vunpack.i.l.bf16 %v12233_v7  ;;  %11312 = vmatprep.subr.bf16.mxu1 %v12810_v35 }
 0x8f6   : > { %v9734_v32 = vsel %vm8183_vm5, %v9678_v13, %v12234_v62  ;;  %v9735_v45 = vsel %vm8183_vm5, %v9679_v29, %v12235_v37 }
 0x8f7   : > { %11313 = vmatpush3.bf16.msra.mxu1 %v12811_v19  ;;  %v9746_v47 = vpack.c.bf16 %v9735_v45, %v9734_v32  ;;  %v12243_v2 = vpop.permute.xlu1 %12242 }
 0x8f8   : > { %11314 = vmatprep.subr.bf16.mxu1 %v12812_v55  ;;  %v12245_v14 = vunpack.i.h.bf16 %v12243_v2  ;;  %v12244_v52 = vunpack.i.l.bf16 %v12243_v2 }
 0x8f9   : > { %10252 = vmatprep.mubr.bf16.mxu1 %v9746_v47 }
 0x8fa   : > { %10253 = vmatmul.mubr.bf16.gmra.mrb[40].mxu1 %v9745_v49  ;;  %v9715_v34 = vsel %vm8183_vm5, %v12235_v37, %v12245_v14  ;;  %v9714_v30 = vsel %vm8183_vm5, %v12234_v62, %v12244_v52 }
 0x8fb   : > { %11315 = vmatpush3.bf16.msra.mxu1 %v12813_v21  ;;  %10293 = vmatprep.mubr.bf16.mxu1 %v9741_v25  ;;  %v12820_v25 = vld [vmem:[%s18092_s8 + $0x170] sm:$0xff]   ;;  %v9747_v53 = vpack.c.bf16 %v9715_v34, %v9714_v30 }
 0x8fc   : > { %11316 = vmatprep.subr.bf16.mxu1 %v12814_v9 }
 0x8ff   : > { %11317 = vmatpush3.bf16.msra.mxu1 %v12815_v60 }
 0x900   : > { %11318 = vmatprep.subr.bf16.mxu1 %v12816_v0 }
 0x903   : > { %11319 = vmatpush3.bf16.msra.mxu1 %v12817_v15 }
 0x904   : > { %11320 = vmatprep.subr.bf16.mxu1 %v12818_v54 }
 0x907   : > { %11321 = vmatpush3.bf16.msra.mxu1 %v12819_v38 }
 0x908   : > { %11322 = vmatprep.subr.bf16.mxu1 %v12820_v25 }
 0x90b   : > { %11323 = vmatpush3.bf16.msra.mxu1 %v12821_v61 }
 0x90c   : > { %11324 = vmatprep.subr.bf16.mxu1 %v12822_v28 }
 0x90f   : > { %11325 = vmatpush3.bf16.msra.mxu1 %v12823_v4 }
 0x910   : > { %11400 = vmatprep.subr.bf16.mxu1 %v12824_v16 }
 0x912   : > { %10294 = vmatmul.mubr.bf16.vlgmr.msra.gmra.mrb[44].mxu1 %v9740_v33 }
 0x913   : > { %10301 = vmatprep.mubr.bf16.mxu1 %v9748_v10  ;;  %11401 = vmatpush3.bf16.msra.mxu1 %v12824_v16 }
 0x914   : > { %11402 = vmatprep.subr.bf16.mxu1 %v12825_v63 }
 0x917   : > { %11403 = vmatpush3.bf16.msra.mxu1 %v12825_v63 }
 0x91a   : > { %10302 = vmatmul.mubr.bf16.gmra.mrb[48].mxu1 %v9747_v53 }
 0x91b   : > { %11404 = vmatprep.mubr.msk.bf16.mxu1 %vm3282_vm2, %v9742_v36 }
 0x922   : > { %11405 = vmatmul.mubr.msk.bf16.vlgmr.msra.gmra.mrb[52].mxu1 %vm3282_vm2, %v9749_v41 }
 0x985   : > { %v11270_v5 = vpop.f32.mrb[28].mxu1 }
 0x986   : > { %v11271_v56 = vpop.f32.mrb[29].mxu1 }
 0x987   : > { %v11272_v10 = vadd.f32 %v11271_v56, %v11270_v5  ;;  %v11273_v42 = vpop.f32.mrb[30].mxu1 }
 0x988   : > { %v11274_v18 = vpop.f32.mrb[31].mxu1 }
 0x989   : > { %v11275_v6 = vadd.f32 %v11274_v18, %v11273_v42  ;;  %v10198_v46 = vadd.f32 %v11272_v10, %v11170_v20 }
 0x98b   : > { %v10201_v24 = vadd.f32 %v11275_v6, %v11170_v20 }
 0x98d   : > { %v11276_v59 = vpop.f32.mrb[32].mxu1 }
 0x98e   : > { %v11277_v8 = vpop.f32.mrb[33].mxu1 }
 0x98f   : > { %v11278_v48 = vadd.f32 %v11277_v8, %v11276_v59  ;;  %v11279_v51 = vpop.f32.mrb[34].mxu1 }
 0x990   : > { %v11280_v39 = vpop.f32.mrb[35].mxu1 }
 0x991   : > { %v11281_v31 = vadd.f32 %v11280_v39, %v11279_v51  ;;  %v10206_v23 = vadd.f32 %v11278_v48, %v11170_v20 }
 0x993   : > { %v10209_v7 = vadd.f32 %v11281_v31, %v11170_v20 }
 0x9c5   : > { %v11298_v44 = vpop.f32.mrb[36].mxu1 }
 0x9c6   : > { %v11299_v36 = vpop.f32.mrb[37].mxu1 }
 0x9c7   : > { %v11300_v58 = vadd.f32 %v11299_v36, %v11298_v44  ;;  %v11301_v41 = vpop.f32.mrb[38].mxu1 }
 0x9c8   : > { %v11302_v50 = vpop.f32.mrb[39].mxu1 }
 0x9c9   : > { %v10247_v27 = vadd.f32 %v11300_v58, %v10198_v46  ;;  %v11303_v40 = vadd.f32 %v11302_v50, %v11301_v41 }
 0x9cb   : > { %v10250_v35 = vadd.f32 %v11303_v40, %v10201_v24 }
 0x9cd   : > { %v11304_v1 = vpop.f32.mrb[40].mxu1 }
 0x9ce   : > { %v11305_v3 = vpop.f32.mrb[41].mxu1 }
 0x9cf   : > { %v11306_v12 = vadd.f32 %v11305_v3, %v11304_v1  ;;  %v11307_v26 = vpop.f32.mrb[42].mxu1 }
 0x9d0   : > { %v11308_v49 = vpop.f32.mrb[43].mxu1 }
 0x9d1   : > { %v10255_v19 = vadd.f32 %v11306_v12, %v10206_v23  ;;  %v11309_v37 = vadd.f32 %v11308_v49, %v11307_v26 }
 0x9d3   : > { %v10258_v62 = vadd.f32 %v11309_v37, %v10209_v7 }
 0x9e5   : > { %v11326_v55 = vpop.f32.mrb[44].mxu1 }
 0x9e6   : > { %v11327_v13 = vpop.f32.mrb[45].mxu1 }
 0x9e7   : > { %v11328_v29 = vadd.f32 %v11327_v13, %v11326_v55  ;;  %v11329_v32 = vpop.f32.mrb[46].mxu1 }
 0x9e8   : > { %v11330_v45 = vpop.f32.mrb[47].mxu1 }
 0x9e9   : > { %v11331_v47 = vadd.f32 %v11330_v45, %v11329_v32  ;;  %v10296_v21 = vadd.f32 %v11328_v29, %v10247_v27 }
 0x9eb   : > { %v10299_v9 = vadd.f32 %v11331_v47, %v10250_v35 }
 0x9ed   : > { %v11332_v60 = vpop.f32.mrb[48].mxu1 }
 0x9ee   : > { %v11333_v0 = vpop.f32.mrb[49].mxu1 }
 0x9ef   : > { %v11334_v15 = vadd.f32 %v11333_v0, %v11332_v60  ;;  %v11335_v54 = vpop.f32.mrb[50].mxu1 }
 0x9f0   : > { %v11336_v38 = vpop.f32.mrb[51].mxu1 }
 0x9f1   : > { %v11337_v25 = vadd.f32 %v11336_v38, %v11335_v54  ;;  %v10304_v43 = vadd.f32 %v11334_v15, %v10255_v19 }
 0x9f3   : > { %v10307_v61 = vadd.f32 %v11337_v25, %v10258_v62 }
 0x9f5   : > { %v11406_v28 = vpop.f32.mrb[52].mxu1 }
 0x9f6   : > { %v10353_v17 = vadd.f32 %v11406_v28, %v10304_v43  ;;  %v10344_v22 = vpop.f32.mrb[53].mxu1 }
 0x9f7   : > { %v10345_v4 = vadd.f32 %v10344_v22, %v10296_v21  ;;  %v11407_v16 = vpop.f32.mrb[54].mxu1 }
 0x9f8   : > { %v10356_v57 = vadd.f32 %v11407_v16, %v10307_v61  ;;  %v10347_v11 = vpop.f32.mrb[55].mxu1  ;;  %10362 = vst.msk [vmem:[%s379_s14 + $0x10] sm:$0xff] %vm10359_vm7, %v10353_v17 }
 0x9f9   : > { %10360 = vst.msk [vmem:[%s379_s14] sm:$0xff] %vm10359_vm7, %v10345_v4  ;;  %v10348_v2 = vadd.f32 %v10347_v11, %v10299_v9 }
 0x9fa   : > { %10363 = vst.msk [vmem:[%s379_s14 + $0x18] sm:$0xff] %vm10359_vm7, %v10356_v57 }
 0x9fb   : > { %10361 = vst.msk [vmem:[%s379_s14 + $0x8] sm:$0xff] %vm10359_vm7, %v10348_v2 }
 0x9fc PF: > { %s20_s13 = sadd.s32 1, %s12833_s13  }
 0x9fd   : > { %p17_p5 = scmp.ge.s32.totalorder %s20_s13, 4  }
 0x9ff   :  { %19 = sbr.rel (!%p17_p5) target bundleno = 1 (0x1), region = 95 }

</bundles_post_ra>
